<compile_context>
chip_gen: v5e
topology: v5e:2x2
jax: 0.10.0
libtpu: 0.0.40
codegen_flags: <defaults>
</compile_context>

<pallas_src>
import functools

import jax
import jax.numpy as jnp
from jax.experimental import pallas as pl
from jax.experimental.pallas import tpu as pltpu

_EPS = 1e-5
_LANE = 128
_VMEM_LIMIT = 32 * 1024 * 1024       # <= scoped/physical VMEM on v5e/v6e/v7x
_TILE_BUDGET = 16 * 1024 * 1024      # target for double-buffered pipeline bufs


# ----------------------------- small helpers -------------------------------

def _round_up(x, m):
    return (x + m - 1) // m * m


def _pick_row_tile(h, est_bytes):
    """Largest row tile from (64,32,16,8) that tiles round_up(h,8) evenly and
    whose double-buffered pipeline footprint fits the VMEM budget."""
    h8 = _round_up(max(h, 1), 8)
    for cand in (64, 32, 16, 8):
        if cand <= h8 and h8 % cand == 0 and est_bytes(cand) <= _TILE_BUDGET:
            return cand
    return 8


def _pick_div(m, cands=(1024, 512, 256, 128, 64, 32, 16, 8)):
    for c in cands:
        if c <= m and m % c == 0:
            return c
    return m


def _pad_last(x, size):
    c = x.shape[-1]
    if c == size:
        return x
    return jnp.pad(x, [(0, 0)] * (x.ndim - 1) + [(0, size - c)])


def _pad_vec(v, size):
    return _pad_last(v.reshape(1, -1), size)


# ----------------------------- Pallas kernels ------------------------------

def _bn_stats_kernel(x_ref, g_ref, b_ref, scale_ref, shift_ref,
                     sum_ref, sq_ref, *, n_rows):
    """Tiled BatchNorm statistics -> folded per-channel (scale, shift).

    grid = (num_row_tiles,)  ["arbitrary"].  Sum / sum-of-squares accumulate in
    VMEM scratch; scale/shift are finalized in-kernel on the last step.
    """
    i = pl.program_id(0)

    @pl.when(i == 0)
    def _init():
        sum_ref[...] = jnp.zeros_like(sum_ref)
        sq_ref[...] = jnp.zeros_like(sq_ref)

    x = x_ref[...]
    sum_ref[...] += jnp.sum(x, axis=0, keepdims=True)
    sq_ref[...] += jnp.sum(x * x, axis=0, keepdims=True)

    @pl.when(i == pl.num_programs(0) - 1)
    def _finalize():
        inv_n = jnp.float32(1.0 / n_rows)
        mean = sum_ref[...] * inv_n
        # biased variance (PyTorch training-mode), clamped at 0 for stability.
        var = jnp.maximum(sq_ref[...] * inv_n - mean * mean, 0.0)
        scale = g_ref[...] * jax.lax.rsqrt(var + jnp.float32(_EPS))
        scale_ref[...] = scale
        shift_ref[...] = b_ref[...] - mean * scale


def _bn_relu_deconv2x2_kernel(x_ref, sc_ref, sh_ref, w_ref, b_ref, o_ref):
    """Fused BN affine + ReLU + ConvTranspose2d(k=2, s=2, bias=True).

    The weight is packed per output-row parity di as (Cin_p, 2*Cout_p) with
    column taps (di,0)|(di,1) side by side on the lane axis, so each output
    block is written directly in a layout memory-identical to the final
    interleaved (2H, 2W, Cout_p) image.
    """
    x = x_ref[0]                                        # (th, W, Cin_p)
    th, w, _ = x.shape
    z = jnp.maximum(x * sc_ref[...] + sh_ref[...], 0.0).reshape(th * w, -1)
    rows = []
    for di in range(2):
        y = jnp.dot(z, w_ref[di], preferred_element_type=jnp.float32)
        rows.append((y + b_ref[...]).reshape(th, w, -1))  # (th, W, 2*Cout_p)
    # interleave the two row parities in VMEM (leading-dim merge only).
    out = jnp.stack(rows, axis=1).reshape(2 * th, w, -1)  # (2*th, W, 2*Cout_p)
    o_ref[...] = out[None]


def _bn_relu_conv3x3_kernel(*refs, valid_h):
    """Fused BN affine + ReLU + 3x3 conv (stride 1, pad 1, no bias).

    refs = [main, halo, scale, shift, w9] * num_streams + [out].
    Each stream is one channel group of the (folded) channel concat; the conv
    is 9 shifted-window matmul taps accumulated over all streams.
    """
    o_ref = refs[-1]
    num_streams = (len(refs) - 1) // 5
    tile_h = o_ref.shape[1]
    w_out = o_ref.shape[2]
    row0 = pl.program_id(1) * tile_h

    # The raw input was zero-padded spatially; the affine would turn that halo
    # into relu(shift), so mask the conv's zero-padding positions back to 0.
    rows = row0 + jax.lax.broadcasted_iota(
        jnp.int32, (tile_h + 2, w_out + 2, 1), 0)
    cols = jax.lax.broadcasted_iota(jnp.int32, (tile_h + 2, w_out + 2, 1), 1)
    valid = (rows >= 1) & (rows <= valid_h) & (cols >= 1) & (cols <= w_out)

    acc = None
    for s in range(num_streams):
        main_ref, halo_ref, sc_ref, sh_ref, w_ref = refs[5 * s:5 * s + 5]
        xwin = jnp.concatenate([main_ref[0], halo_ref[0, 0:2]], axis=0)
        z = jnp.where(valid,
                      jnp.maximum(xwin * sc_ref[...] + sh_ref[...], 0.0),
                      0.0)                               # (tile_h+2, W+2, C)
        for dy in range(3):
            for dx in range(3):
                patch = z[dy:dy + tile_h, dx:dx + w_out, :]
                patch = patch.reshape(tile_h * w_out, -1)
                y = jnp.dot(patch, w_ref[dy * 3 + dx],
                            preferred_element_type=jnp.float32)
                acc = y if acc is None else acc + y
    o_ref[...] = acc.reshape(1, tile_h, w_out, -1)


# ----------------------------- kernel wrappers ------------------------------

def bn_scale_shift(x2d, gamma_p, beta_p):
    """Training-mode BatchNorm folded to (scale, shift), tiled reduction."""
    m, c = x2d.shape
    tile_m = _pick_div(m)
    return pl.pallas_call(
        functools.partial(_bn_stats_kernel, n_rows=float(m)),
        grid=(m // tile_m,),
        in_specs=[pl.BlockSpec((tile_m, c), lambda i: (i, 0)),
                  pl.BlockSpec((1, c), lambda i: (0, 0)),
                  pl.BlockSpec((1, c), lambda i: (0, 0))],
        out_specs=(pl.BlockSpec((1, c), lambda i: (0, 0)),
                   pl.BlockSpec((1, c), lambda i: (0, 0))),
        out_shape=(jax.ShapeDtypeStruct((1, c), jnp.float32),
                   jax.ShapeDtypeStruct((1, c), jnp.float32)),
        scratch_shapes=[pltpu.VMEM((1, c), jnp.float32),
                        pltpu.VMEM((1, c), jnp.float32)],
        compiler_params=pltpu.CompilerParams(
            dimension_semantics=("arbitrary",),
            vmem_limit_bytes=_VMEM_LIMIT),
    )(x2d, gamma_p, beta_p)


def bn_relu_deconv2x2(x_img, scale, shift, w2pack, bias2):
    """x_img (N,H,W,Cin_p) -> upsampled (N,2H,2W,Cout_p) in final layout."""
    n, h, w, cin_p = x_img.shape
    cout2 = w2pack.shape[-1]                    # 2 * Cout_p

    def est(th):
        return (2 * (th * w * cin_p + 2 * th * w * cout2) * 4
                + 2 * cin_p * cout2 * 4)

    th = _pick_row_tile(h, est)
    hc = _round_up(h, th)
    if hc != h:
        x_img = jnp.pad(x_img, ((0, 0), (0, hc - h), (0, 0), (0, 0)))
    num_t = hc // th

    flops = 2 * n * hc * w * cin_p * 2 * cout2
    bytes_accessed = 4 * (n * hc * w * cin_p + 2 * n * hc * w * cout2
                          + 2 * cin_p * cout2)

    out = pl.pallas_call(
        _bn_relu_deconv2x2_kernel,
        grid=(n, num_t),
        in_specs=[pl.BlockSpec((1, th, w, cin_p), lambda i, t: (i, t, 0, 0)),
                  pl.BlockSpec((1, cin_p), lambda i, t: (0, 0)),
                  pl.BlockSpec((1, cin_p), lambda i, t: (0, 0)),
                  pl.BlockSpec((2, cin_p, cout2), lambda i, t: (0, 0, 0)),
                  pl.BlockSpec((1, cout2), lambda i, t: (0, 0))],
        out_specs=pl.BlockSpec((1, 2 * th, w, cout2),
                               lambda i, t: (i, t, 0, 0)),
        out_shape=jax.ShapeDtypeStruct((n, 2 * hc, w, cout2), jnp.float32),
        compiler_params=pltpu.CompilerParams(
            dimension_semantics=("parallel", "parallel"),
            vmem_limit_bytes=_VMEM_LIMIT),
        cost_estimate=pl.CostEstimate(flops=flops, transcendentals=0,
                                      bytes_accessed=bytes_accessed),
    )(x_img, scale, shift, w2pack, bias2)

    # (N, 2H, W, 2*Cout_p) -> (N, 2H, 2W, Cout_p) is a contiguous (free) reshape.
    up = out.reshape(n, 2 * hc, 2 * w, cout2 // 2)
    return up[:, :2 * h] if hc != h else up


def bn_relu_conv3x3(streams, cout_p, h, w):
    """streams: list of (img (N,H,W,C), scale (1,C), shift (1,C), w9 (9,C,Cout_p))."""
    n = streams[0][0].shape[0]
    cs = [s[0].shape[-1] for s in streams]

    def est(th):
        return (2 * (sum((th + 8) * (w + 2) * c for c in cs)
                     + th * w * cout_p) * 4
                + sum(9 * c * cout_p for c in cs) * 4)

    tile_h = _pick_row_tile(h, est)
    hc = _round_up(h, tile_h)
    num_t = hc // tile_h

    args, in_specs = [], []
    for img, scale, shift, w9 in streams:
        c = img.shape[-1]
        # zero-pad: 1 halo row on top, 1 halo col each side, and enough extra
        # zero rows at the bottom that the 8-row halo block never goes OOB.
        xp = jnp.pad(img, ((0, 0), (1, hc + 8 - (h + 1)), (1, 1), (0, 0)))
        args += [xp, xp, scale, shift, w9]
        in_specs += [
            pl.BlockSpec((1, tile_h, w + 2, c), lambda i, t: (i, t, 0, 0)),
            pl.BlockSpec((1, 8, w + 2, c),
                         lambda i, t, _th=tile_h: (i, (t + 1) * (_th // 8), 0, 0)),
            pl.BlockSpec((1, c), lambda i, t: (0, 0)),
            pl.BlockSpec((1, c), lambda i, t: (0, 0)),
            pl.BlockSpec((9, c, cout_p), lambda i, t: (0, 0, 0)),
        ]

    flops = 2 * n * hc * w * 9 * sum(cs) * cout_p
    bytes_accessed = 4 * (sum(n * (hc + 8) * (w + 2) * c for c in cs)
                          + n * hc * w * cout_p + 9 * sum(cs) * cout_p)

    out = pl.pallas_call(
        functools.partial(_bn_relu_conv3x3_kernel, valid_h=h),
        grid=(n, num_t),
        in_specs=in_specs,
        out_specs=pl.BlockSpec((1, tile_h, w, cout_p),
                               lambda i, t: (i, t, 0, 0)),
        out_shape=jax.ShapeDtypeStruct((n, hc, w, cout_p), jnp.float32),
        compiler_params=pltpu.CompilerParams(
            dimension_semantics=("parallel", "parallel"),
            vmem_limit_bytes=_VMEM_LIMIT),
        cost_estimate=pl.CostEstimate(flops=flops, transcendentals=0,
                                      bytes_accessed=bytes_accessed),
    )(*args)
    return out[:, :h] if hc != h else out


# ------------------------------- module glue --------------------------------

def unet_up_forward(params, inputs1, inputs2):
    """unetUp(in_size, out_size, is_deconv=True).forward — NCHW in / NCHW out."""
    f32 = jnp.float32
    x1 = jnp.transpose(inputs1, (0, 2, 3, 1)).astype(f32)    # (N, H1, W1, C1)
    x2 = jnp.transpose(inputs2, (0, 2, 3, 1)).astype(f32)    # (N, H2, W2, Cin)
    n, h2, w2, cin = x2.shape
    c1 = x1.shape[-1]
    cout = params["deconv_b"].shape[0]

    cin_p = _round_up(cin, _LANE)
    c1_p = _round_up(c1, _LANE)
    cout_p = _round_up(cout, _LANE)

    x1p = _pad_last(x1, c1_p)
    x2p = _pad_last(x2, cin_p)

    # ---- up path: BN + ReLU + ConvTranspose2d(k=2, s=2, p=0, bias=True) ----
    sc_up, sh_up = bn_scale_shift(x2p.reshape(n * h2 * w2, cin_p),
                                  _pad_vec(params["bn_up_gamma"], cin_p),
                                  _pad_vec(params["bn_up_beta"], cin_p))
    # (Cin, Cout, 2, 2) -> per row-parity di: (Cin_p, 2*Cout_p), taps (di,0)|(di,1).
    wt = jnp.transpose(params["deconv_w"], (2, 3, 0, 1))      # (di, dj, Cin, Cout)
    wt = jnp.pad(wt, ((0, 0), (0, 0), (0, cin_p - cin), (0, cout_p - cout)))
    wd = jnp.transpose(wt, (0, 2, 1, 3)).reshape(2, cin_p, 2 * cout_p)
    bp = _pad_vec(params["deconv_b"], cout_p)
    bd = jnp.concatenate([bp, bp], axis=-1)                   # (1, 2*Cout_p)
    up = bn_relu_deconv2x2(x2p, sc_up, sh_up, wd, bd)         # (N, 2H2, 2W2, Cout_p)

    # ---- F.pad(outputs2, (0, -right, 0, buttom)) ----
    h1, w1_sz = x1.shape[1], x1.shape[2]
    buttom, right = h1 % 2, w1_sz % 2
    if right:
        up = up[:, :, :up.shape[2] - right, :]
    if buttom:
        up = jnp.pad(up, ((0, 0), (0, buttom), (0, 0), (0, 0)))
    h, w = up.shape[1], up.shape[2]
    assert (h, w) == (h1, w1_sz), ((h, w), (h1, w1_sz))

    # ---- first preconv2d: concat([x1, up], ch) folded into two conv streams ----
    g1, b1 = params["bn_c1_gamma"], params["bn_c1_beta"]
    sc1a, sh1a = bn_scale_shift(x1p.reshape(n * h * w, c1_p),
                                _pad_vec(g1[:c1], c1_p), _pad_vec(b1[:c1], c1_p))
    sc1b, sh1b = bn_scale_shift(up.reshape(n * h * w, cout_p),
                                _pad_vec(g1[c1:], cout_p), _pad_vec(b1[c1:], cout_p))
    # (Cout, Cin, 3, 3) -> (9, Cin, Cout); split Cin into the two streams.
    w1k = jnp.transpose(params["conv1_w"], (2, 3, 1, 0)).reshape(9, c1 + cout, cout)
    w1a = jnp.pad(w1k[:, :c1, :], ((0, 0), (0, c1_p - c1), (0, cout_p - cout)))
    w1b = jnp.pad(w1k[:, c1:, :], ((0, 0), (0, cout_p - cout), (0, cout_p - cout)))
    y1 = bn_relu_conv3x3([(x1p, sc1a, sh1a, w1a), (up, sc1b, sh1b, w1b)],
                         cout_p, h, w)

    # ---- second preconv2d ----
    sc2, sh2 = bn_scale_shift(y1.reshape(n * h * w, cout_p),
                              _pad_vec(params["bn_c2_gamma"], cout_p),
                              _pad_vec(params["bn_c2_beta"], cout_p))
    w2m = jnp.transpose(params["conv2_w"], (2, 3, 1, 0)).reshape(9, cout, cout)
    w2m = jnp.pad(w2m, ((0, 0), (0, cout_p - cout), (0, cout_p - cout)))
    y2 = bn_relu_conv3x3([(y1, sc2, sh2, w2m)], cout_p, h, w)

    return jnp.transpose(y2[..., :cout], (0, 3, 1, 2))        # back to NCHW


def init_params(key, in_size, out_size):
    ks = jax.random.split(key, 10)
    f32 = jnp.float32
    return {
        "bn_up_gamma": 1.0 + 0.1 * jax.random.normal(ks[0], (in_size,), f32),
        "bn_up_beta": 0.1 * jax.random.normal(ks[1], (in_size,), f32),
        "deconv_w": 0.2 * jax.random.normal(ks[2], (in_size, out_size, 2, 2), f32),
        "deconv_b": 0.1 * jax.random.normal(ks[3], (out_size,), f32),
        "bn_c1_gamma": 1.0 + 0.1 * jax.random.normal(ks[4], (in_size,), f32),
        "bn_c1_beta": 0.1 * jax.random.normal(ks[5], (in_size,), f32),
        "conv1_w": 0.2 * jax.random.normal(ks[6], (out_size, in_size, 3, 3), f32),
        "bn_c2_gamma": 1.0 + 0.1 * jax.random.normal(ks[7], (out_size,), f32),
        "bn_c2_beta": 0.1 * jax.random.normal(ks[8], (out_size,), f32),
        "conv2_w": 0.2 * jax.random.normal(ks[9], (out_size, out_size, 3, 3), f32),
    }


if __name__ == "__main__":
    in_size, out_size = 8, 4  # skip connection carries in_size - out_size channels
    key = jax.random.PRNGKey(0)
    k1, k2, kp = jax.random.split(key, 3)
    inputs1 = jax.random.normal(k1, (2, in_size - out_size, 16, 16), jnp.float32)
    inputs2 = jax.random.normal(k2, (2, in_size, 8, 8), jnp.float32)
    params = init_params(kp, in_size, out_size)

    fwd = jax.jit(functools.partial(unet_up_forward, params))
    out = fwd(inputs1, inputs2)
    jax.block_until_ready(out)
    assert out.shape == (2, out_size, 16, 16), out.shape
    assert out.dtype == jnp.float32
    print("KERNEL_OK")
</pallas_src>

<mosaic_0001>
module attributes {stable_mosaic.version = 11 : i64} {
  func.func @_bn_stats_kernel(%arg0: i32, %arg1: memref<128x128xf32, #tpu.memory_space<vmem>>, %arg2: memref<1x128xf32, #tpu.memory_space<vmem>>, %arg3: memref<1x128xf32, #tpu.memory_space<vmem>>, %arg4: memref<1x128xf32, #tpu.memory_space<vmem>>, %arg5: memref<1x128xf32, #tpu.memory_space<vmem>>, %arg6: memref<1x128xf32, #tpu.memory_space<vmem>>, %arg7: memref<1x128xf32, #tpu.memory_space<vmem>>) attributes {dimension_semantics = [#tpu.dimension_semantics<arbitrary>], iteration_bounds = array<i64: 1>, scalar_prefetch = 0 : i64, scratch_operands = 2 : i64, tpu.core_type = #tpu.core_type<tc>, window_params = [{transform_indices = @transform_0, window_bounds = array<i64: 128, 128>}, {pipeline_mode = #tpu.pipeline_mode<synchronous>, transform_indices = @transform_1, window_bounds = array<i64: 1, 128>}, {pipeline_mode = #tpu.pipeline_mode<synchronous>, transform_indices = @transform_2, window_bounds = array<i64: 1, 128>}, {pipeline_mode = #tpu.pipeline_mode<synchronous>, transform_indices = @transform_3, window_bounds = array<i64: 1, 128>}, {pipeline_mode = #tpu.pipeline_mode<synchronous>, transform_indices = @transform_4, window_bounds = array<i64: 1, 128>}]} {
    %c0_i32 = arith.constant 0 : i32
    %0 = arith.cmpi eq, %arg0, %c0_i32 : i32
    %1 = arith.extui %0 : i1 to i32
    %c0_i32_0 = arith.constant 0 : i32
    %2 = arith.cmpi ne, %1, %c0_i32_0 : i32
    scf.if %2 {
      %cst_13 = arith.constant 0.000000e+00 : f32
      %18 = vector.broadcast %cst_13 : f32 to vector<1x128xf32>
      %c0_14 = arith.constant 0 : index
      %c0_15 = arith.constant 0 : index
      %19 = vector.load %arg6[%c0_14, %c0_15] : memref<1x128xf32, #tpu.memory_space<vmem>>, vector<1x128xf32>
      tpu.vector_store %arg6[%c0_14, %c0_15], %18 {strides = array<i32>} : memref<1x128xf32, #tpu.memory_space<vmem>>, vector<1x128xf32>,
      %cst_16 = arith.constant 0.000000e+00 : f32
      %20 = vector.broadcast %cst_16 : f32 to vector<1x128xf32>
      %c0_17 = arith.constant 0 : index
      %c0_18 = arith.constant 0 : index
      %21 = vector.load %arg7[%c0_17, %c0_18] : memref<1x128xf32, #tpu.memory_space<vmem>>, vector<1x128xf32>
      tpu.vector_store %arg7[%c0_17, %c0_18], %20 {strides = array<i32>} : memref<1x128xf32, #tpu.memory_space<vmem>>, vector<1x128xf32>,
    } else {
    }
    %c0 = arith.constant 0 : index
    %c0_1 = arith.constant 0 : index
    %3 = vector.load %arg1[%c0, %c0_1] : memref<128x128xf32, #tpu.memory_space<vmem>>, vector<128x128xf32>
    %c0_2 = arith.constant 0 : index
    %c0_3 = arith.constant 0 : index
    %4 = vector.load %arg6[%c0_2, %c0_3] : memref<1x128xf32, #tpu.memory_space<vmem>>, vector<1x128xf32>
    %cst = arith.constant dense<0.000000e+00> : vector<128xf32>
    %5 = vector.multi_reduction <add>, %3, %cst [0] : vector<128x128xf32> to vector<128xf32>
    %6 = vector.shape_cast %5 : vector<128xf32> to vector<1x128xf32>
    %7 = arith.addf %4, %6 : vector<1x128xf32>
    %c0_4 = arith.constant 0 : index
    %c0_5 = arith.constant 0 : index
    %8 = vector.load %arg6[%c0_4, %c0_5] : memref<1x128xf32, #tpu.memory_space<vmem>>, vector<1x128xf32>
    tpu.vector_store %arg6[%c0_4, %c0_5], %7 {strides = array<i32>} : memref<1x128xf32, #tpu.memory_space<vmem>>, vector<1x128xf32>,
    %c0_6 = arith.constant 0 : index
    %c0_7 = arith.constant 0 : index
    %9 = vector.load %arg7[%c0_6, %c0_7] : memref<1x128xf32, #tpu.memory_space<vmem>>, vector<1x128xf32>
    %10 = arith.mulf %3, %3 : vector<128x128xf32>
    %cst_8 = arith.constant dense<0.000000e+00> : vector<128xf32>
    %11 = vector.multi_reduction <add>, %10, %cst_8 [0] : vector<128x128xf32> to vector<128xf32>
    %12 = vector.shape_cast %11 : vector<128xf32> to vector<1x128xf32>
    %13 = arith.addf %9, %12 : vector<1x128xf32>
    %c0_9 = arith.constant 0 : index
    %c0_10 = arith.constant 0 : index
    %14 = vector.load %arg7[%c0_9, %c0_10] : memref<1x128xf32, #tpu.memory_space<vmem>>, vector<1x128xf32>
    tpu.vector_store %arg7[%c0_9, %c0_10], %13 {strides = array<i32>} : memref<1x128xf32, #tpu.memory_space<vmem>>, vector<1x128xf32>,
    %c0_i32_11 = arith.constant 0 : i32
    %15 = arith.cmpi eq, %arg0, %c0_i32_11 : i32
    %16 = arith.extui %15 : i1 to i32
    %c0_i32_12 = arith.constant 0 : i32
    %17 = arith.cmpi ne, %16, %c0_i32_12 : i32
    scf.if %17 {
      %c0_13 = arith.constant 0 : index
      %c0_14 = arith.constant 0 : index
      %18 = vector.load %arg6[%c0_13, %c0_14] : memref<1x128xf32, #tpu.memory_space<vmem>>, vector<1x128xf32>
      %cst_15 = arith.constant 7.812500e-03 : f32
      %19 = vector.broadcast %cst_15 : f32 to vector<1x128xf32>
      %20 = arith.mulf %18, %19 : vector<1x128xf32>
      %c0_16 = arith.constant 0 : index
      %c0_17 = arith.constant 0 : index
      %21 = vector.load %arg7[%c0_16, %c0_17] : memref<1x128xf32, #tpu.memory_space<vmem>>, vector<1x128xf32>
      %cst_18 = arith.constant 7.812500e-03 : f32
      %22 = vector.broadcast %cst_18 : f32 to vector<1x128xf32>
      %23 = arith.mulf %21, %22 : vector<1x128xf32>
      %24 = arith.mulf %20, %20 : vector<1x128xf32>
      %25 = arith.subf %23, %24 : vector<1x128xf32>
      %cst_19 = arith.constant 0.000000e+00 : f32
      %26 = vector.broadcast %cst_19 : f32 to vector<1x128xf32>
      %27 = arith.maximumf %25, %26 : vector<1x128xf32>
      %c0_20 = arith.constant 0 : index
      %c0_21 = arith.constant 0 : index
      %28 = vector.load %arg2[%c0_20, %c0_21] : memref<1x128xf32, #tpu.memory_space<vmem>>, vector<1x128xf32>
      %cst_22 = arith.constant 9.99999974E-6 : f32
      %29 = vector.broadcast %cst_22 : f32 to vector<1x128xf32>
      %30 = arith.addf %27, %29 : vector<1x128xf32>
      %31 = math.rsqrt %30 : vector<1x128xf32>
      %32 = arith.mulf %28, %31 : vector<1x128xf32>
      %c0_23 = arith.constant 0 : index
      %c0_24 = arith.constant 0 : index
      %33 = vector.load %arg4[%c0_23, %c0_24] : memref<1x128xf32, #tpu.memory_space<vmem>>, vector<1x128xf32>
      tpu.vector_store %arg4[%c0_23, %c0_24], %32 {strides = array<i32>} : memref<1x128xf32, #tpu.memory_space<vmem>>, vector<1x128xf32>,
      %c0_25 = arith.constant 0 : index
      %c0_26 = arith.constant 0 : index
      %34 = vector.load %arg3[%c0_25, %c0_26] : memref<1x128xf32, #tpu.memory_space<vmem>>, vector<1x128xf32>
      %35 = arith.mulf %20, %32 : vector<1x128xf32>
      %36 = arith.subf %34, %35 : vector<1x128xf32>
      %c0_27 = arith.constant 0 : index
      %c0_28 = arith.constant 0 : index
      %37 = vector.load %arg5[%c0_27, %c0_28] : memref<1x128xf32, #tpu.memory_space<vmem>>, vector<1x128xf32>
      tpu.vector_store %arg5[%c0_27, %c0_28], %36 {strides = array<i32>} : memref<1x128xf32, #tpu.memory_space<vmem>>, vector<1x128xf32>,
    } else {
    }
    return
  }
  func.func @transform_0(%arg0: i32) -> (i32, i32) {
    %c0_i32 = arith.constant 0 : i32
    %c0_i32_0 = arith.constant 0 : i32
    return %arg0, %c0_i32 : i32, i32
  }
  func.func @transform_1(%arg0: i32) -> (i32, i32) {
    %c0_i32 = arith.constant 0 : i32
    %c0_i32_0 = arith.constant 0 : i32
    %c0_i32_1 = arith.constant 0 : i32
    return %c0_i32, %c0_i32_0 : i32, i32
  }
  func.func @transform_2(%arg0: i32) -> (i32, i32) {
    %c0_i32 = arith.constant 0 : i32
    %c0_i32_0 = arith.constant 0 : i32
    %c0_i32_1 = arith.constant 0 : i32
    return %c0_i32, %c0_i32_0 : i32, i32
  }
  func.func @transform_3(%arg0: i32) -> (i32, i32) {
    %c0_i32 = arith.constant 0 : i32
    %c0_i32_0 = arith.constant 0 : i32
    %c0_i32_1 = arith.constant 0 : i32
    return %c0_i32, %c0_i32_0 : i32, i32
  }
  func.func @transform_4(%arg0: i32) -> (i32, i32) {
    %c0_i32 = arith.constant 0 : i32
    %c0_i32_0 = arith.constant 0 : i32
    %c0_i32_1 = arith.constant 0 : i32
    return %c0_i32, %c0_i32_0 : i32, i32
  }
}

module attributes {stable_mosaic.version = 11 : i64} {
  func.func @_bn_relu_deconv2x2_kernel(%arg0: i32, %arg1: i32, %arg2: memref<1x8x8x128xf32, #tpu.memory_space<vmem>>, %arg3: memref<1x128xf32, #tpu.memory_space<vmem>>, %arg4: memref<1x128xf32, #tpu.memory_space<vmem>>, %arg5: memref<2x128x256xf32, #tpu.memory_space<vmem>>, %arg6: memref<1x256xf32, #tpu.memory_space<vmem>>, %arg7: memref<1x16x8x256xf32, #tpu.memory_space<vmem>>) attributes {dimension_semantics = [#tpu.dimension_semantics<parallel>, #tpu.dimension_semantics<parallel>], iteration_bounds = array<i64: 2, 1>, scalar_prefetch = 0 : i64, scratch_operands = 0 : i64, tpu.core_type = #tpu.core_type<tc>, window_params = [{transform_indices = @transform_0, window_bounds = array<i64: 1, 8, 8, 128>}, {pipeline_mode = #tpu.pipeline_mode<synchronous>, transform_indices = @transform_1, window_bounds = array<i64: 1, 128>}, {pipeline_mode = #tpu.pipeline_mode<synchronous>, transform_indices = @transform_2, window_bounds = array<i64: 1, 128>}, {pipeline_mode = #tpu.pipeline_mode<synchronous>, transform_indices = @transform_3, window_bounds = array<i64: 2, 128, 256>}, {pipeline_mode = #tpu.pipeline_mode<synchronous>, transform_indices = @transform_4, window_bounds = array<i64: 1, 256>}, {transform_indices = @transform_5, window_bounds = array<i64: 1, 16, 8, 256>}]} {
    %c0 = arith.constant 0 : index
    %c0_0 = arith.constant 0 : index
    %c0_1 = arith.constant 0 : index
    %c0_2 = arith.constant 0 : index
    %0 = vector.load %arg2[%c0, %c0_0, %c0_1, %c0_2] : memref<1x8x8x128xf32, #tpu.memory_space<vmem>>, vector<1x8x8x128xf32>
    %1 = vector.shape_cast %0 : vector<1x8x8x128xf32> to vector<8x8x128xf32>
    %c0_3 = arith.constant 0 : index
    %c0_4 = arith.constant 0 : index
    %2 = vector.load %arg3[%c0_3, %c0_4] : memref<1x128xf32, #tpu.memory_space<vmem>>, vector<1x128xf32>
    %3 = vector.shape_cast %2 : vector<1x128xf32> to vector<1x1x128xf32>
    %4 = vector.broadcast %3 : vector<1x1x128xf32> to vector<8x8x128xf32>
    %5 = arith.mulf %1, %4 : vector<8x8x128xf32>
    %c0_5 = arith.constant 0 : index
    %c0_6 = arith.constant 0 : index
    %6 = vector.load %arg4[%c0_5, %c0_6] : memref<1x128xf32, #tpu.memory_space<vmem>>, vector<1x128xf32>
    %7 = vector.shape_cast %6 : vector<1x128xf32> to vector<1x1x128xf32>
    %8 = vector.broadcast %7 : vector<1x1x128xf32> to vector<8x8x128xf32>
    %9 = arith.addf %5, %8 : vector<8x8x128xf32>
    %cst = arith.constant 0.000000e+00 : f32
    %10 = vector.broadcast %cst : f32 to vector<8x8x128xf32>
    %11 = arith.maximumf %9, %10 : vector<8x8x128xf32>
    %12 = vector.shape_cast %11 : vector<8x8x128xf32> to vector<64x128xf32>
    %c0_7 = arith.constant 0 : index
    %c0_8 = arith.constant 0 : index
    %c0_9 = arith.constant 0 : index
    %13 = vector.load %arg5[%c0_7, %c0_8, %c0_9] : memref<2x128x256xf32, #tpu.memory_space<vmem>>, vector<1x128x256xf32>
    %14 = vector.shape_cast %13 : vector<1x128x256xf32> to vector<128x256xf32>
    %cst_10 = arith.constant dense<0.000000e+00> : vector<64x256xf32>
    %15 = tpu.matmul %12, %14, %cst_10 {dimension_numbers = #tpu.dot_dimension_numbers<[1], [0], [0], [1], [0, 0, 1, 1], [], []>} : vector<64x128xf32>, vector<128x256xf32>, vector<64x256xf32> -> vector<64x256xf32>
    %c0_11 = arith.constant 0 : index
    %c0_12 = arith.constant 0 : index
    %16 = vector.load %arg6[%c0_11, %c0_12] : memref<1x256xf32, #tpu.memory_space<vmem>>, vector<1x256xf32>
    %17 = vector.broadcast %16 : vector<1x256xf32> to vector<64x256xf32>
    %18 = arith.addf %15, %17 : vector<64x256xf32>
    %19 = vector.shape_cast %18 : vector<64x256xf32> to vector<8x8x256xf32>
    %c1 = arith.constant 1 : index
    %c0_13 = arith.constant 0 : index
    %c0_14 = arith.constant 0 : index
    %20 = vector.load %arg5[%c1, %c0_13, %c0_14] : memref<2x128x256xf32, #tpu.memory_space<vmem>>, vector<1x128x256xf32>
    %21 = vector.shape_cast %20 : vector<1x128x256xf32> to vector<128x256xf32>
    %cst_15 = arith.constant dense<0.000000e+00> : vector<64x256xf32>
    %22 = tpu.matmul %12, %21, %cst_15 {dimension_numbers = #tpu.dot_dimension_numbers<[1], [0], [0], [1], [0, 0, 1, 1], [], []>} : vector<64x128xf32>, vector<128x256xf32>, vector<64x256xf32> -> vector<64x256xf32>
    %c0_16 = arith.constant 0 : index
    %c0_17 = arith.constant 0 : index
    %23 = vector.load %arg6[%c0_16, %c0_17] : memref<1x256xf32, #tpu.memory_space<vmem>>, vector<1x256xf32>
    %24 = vector.broadcast %23 : vector<1x256xf32> to vector<64x256xf32>
    %25 = arith.addf %22, %24 : vector<64x256xf32>
    %26 = vector.shape_cast %25 : vector<64x256xf32> to vector<8x8x256xf32>
    %27 = vector.shape_cast %19 : vector<8x8x256xf32> to vector<8x1x8x256xf32>
    %28 = vector.shape_cast %26 : vector<8x8x256xf32> to vector<8x1x8x256xf32>
    %29 = tpu.concatenate %27, %28 in 1 : vector<8x1x8x256xf32>, vector<8x1x8x256xf32> -> vector<8x2x8x256xf32>
    %30 = vector.shape_cast %29 : vector<8x2x8x256xf32> to vector<16x8x256xf32>
    %31 = vector.shape_cast %30 : vector<16x8x256xf32> to vector<1x16x8x256xf32>
    %c0_18 = arith.constant 0 : index
    %c0_19 = arith.constant 0 : index
    %c0_20 = arith.constant 0 : index
    %c0_21 = arith.constant 0 : index
    %32 = vector.load %arg7[%c0_18, %c0_19, %c0_20, %c0_21] : memref<1x16x8x256xf32, #tpu.memory_space<vmem>>, vector<1x16x8x256xf32>
    tpu.vector_store %arg7[%c0_18, %c0_19, %c0_20, %c0_21], %31 {strides = array<i32>} : memref<1x16x8x256xf32, #tpu.memory_space<vmem>>, vector<1x16x8x256xf32>,
    return
  }
  func.func @transform_0(%arg0: i32, %arg1: i32) -> (i32, i32, i32, i32) {
    %c0_i32 = arith.constant 0 : i32
    %c0_i32_0 = arith.constant 0 : i32
    %c0_i32_1 = arith.constant 0 : i32
    return %arg0, %arg1, %c0_i32, %c0_i32_0 : i32, i32, i32, i32
  }
  func.func @transform_1(%arg0: i32, %arg1: i32) -> (i32, i32) {
    %c0_i32 = arith.constant 0 : i32
    %c0_i32_0 = arith.constant 0 : i32
    %c0_i32_1 = arith.constant 0 : i32
    return %c0_i32, %c0_i32_0 : i32, i32
  }
  func.func @transform_2(%arg0: i32, %arg1: i32) -> (i32, i32) {
    %c0_i32 = arith.constant 0 : i32
    %c0_i32_0 = arith.constant 0 : i32
    %c0_i32_1 = arith.constant 0 : i32
    return %c0_i32, %c0_i32_0 : i32, i32
  }
  func.func @transform_3(%arg0: i32, %arg1: i32) -> (i32, i32, i32) {
    %c0_i32 = arith.constant 0 : i32
    %c0_i32_0 = arith.constant 0 : i32
    %c0_i32_1 = arith.constant 0 : i32
    %c0_i32_2 = arith.constant 0 : i32
    return %c0_i32, %c0_i32_0, %c0_i32_1 : i32, i32, i32
  }
  func.func @transform_4(%arg0: i32, %arg1: i32) -> (i32, i32) {
    %c0_i32 = arith.constant 0 : i32
    %c0_i32_0 = arith.constant 0 : i32
    %c0_i32_1 = arith.constant 0 : i32
    return %c0_i32, %c0_i32_0 : i32, i32
  }
  func.func @transform_5(%arg0: i32, %arg1: i32) -> (i32, i32, i32, i32) {
    %c0_i32 = arith.constant 0 : i32
    %c0_i32_0 = arith.constant 0 : i32
    %c0_i32_1 = arith.constant 0 : i32
    return %arg0, %arg1, %c0_i32, %c0_i32_0 : i32, i32, i32, i32
  }
}

module attributes {stable_mosaic.version = 11 : i64} {
  func.func @_bn_stats_kernel(%arg0: i32, %arg1: memref<512x128xf32, #tpu.memory_space<vmem>>, %arg2: memref<1x128xf32, #tpu.memory_space<vmem>>, %arg3: memref<1x128xf32, #tpu.memory_space<vmem>>, %arg4: memref<1x128xf32, #tpu.memory_space<vmem>>, %arg5: memref<1x128xf32, #tpu.memory_space<vmem>>, %arg6: memref<1x128xf32, #tpu.memory_space<vmem>>, %arg7: memref<1x128xf32, #tpu.memory_space<vmem>>) attributes {dimension_semantics = [#tpu.dimension_semantics<arbitrary>], iteration_bounds = array<i64: 1>, scalar_prefetch = 0 : i64, scratch_operands = 2 : i64, tpu.core_type = #tpu.core_type<tc>, window_params = [{transform_indices = @transform_0, window_bounds = array<i64: 512, 128>}, {pipeline_mode = #tpu.pipeline_mode<synchronous>, transform_indices = @transform_1, window_bounds = array<i64: 1, 128>}, {pipeline_mode = #tpu.pipeline_mode<synchronous>, transform_indices = @transform_2, window_bounds = array<i64: 1, 128>}, {pipeline_mode = #tpu.pipeline_mode<synchronous>, transform_indices = @transform_3, window_bounds = array<i64: 1, 128>}, {pipeline_mode = #tpu.pipeline_mode<synchronous>, transform_indices = @transform_4, window_bounds = array<i64: 1, 128>}]} {
    %c0_i32 = arith.constant 0 : i32
    %0 = arith.cmpi eq, %arg0, %c0_i32 : i32
    %1 = arith.extui %0 : i1 to i32
    %c0_i32_0 = arith.constant 0 : i32
    %2 = arith.cmpi ne, %1, %c0_i32_0 : i32
    scf.if %2 {
      %cst_13 = arith.constant 0.000000e+00 : f32
      %18 = vector.broadcast %cst_13 : f32 to vector<1x128xf32>
      %c0_14 = arith.constant 0 : index
      %c0_15 = arith.constant 0 : index
      %19 = vector.load %arg6[%c0_14, %c0_15] : memref<1x128xf32, #tpu.memory_space<vmem>>, vector<1x128xf32>
      tpu.vector_store %arg6[%c0_14, %c0_15], %18 {strides = array<i32>} : memref<1x128xf32, #tpu.memory_space<vmem>>, vector<1x128xf32>,
      %cst_16 = arith.constant 0.000000e+00 : f32
      %20 = vector.broadcast %cst_16 : f32 to vector<1x128xf32>
      %c0_17 = arith.constant 0 : index
      %c0_18 = arith.constant 0 : index
      %21 = vector.load %arg7[%c0_17, %c0_18] : memref<1x128xf32, #tpu.memory_space<vmem>>, vector<1x128xf32>
      tpu.vector_store %arg7[%c0_17, %c0_18], %20 {strides = array<i32>} : memref<1x128xf32, #tpu.memory_space<vmem>>, vector<1x128xf32>,
    } else {
    }
    %c0 = arith.constant 0 : index
    %c0_1 = arith.constant 0 : index
    %3 = vector.load %arg1[%c0, %c0_1] : memref<512x128xf32, #tpu.memory_space<vmem>>, vector<512x128xf32>
    %c0_2 = arith.constant 0 : index
    %c0_3 = arith.constant 0 : index
    %4 = vector.load %arg6[%c0_2, %c0_3] : memref<1x128xf32, #tpu.memory_space<vmem>>, vector<1x128xf32>
    %cst = arith.constant dense<0.000000e+00> : vector<128xf32>
    %5 = vector.multi_reduction <add>, %3, %cst [0] : vector<512x128xf32> to vector<128xf32>
    %6 = vector.shape_cast %5 : vector<128xf32> to vector<1x128xf32>
    %7 = arith.addf %4, %6 : vector<1x128xf32>
    %c0_4 = arith.constant 0 : index
    %c0_5 = arith.constant 0 : index
    %8 = vector.load %arg6[%c0_4, %c0_5] : memref<1x128xf32, #tpu.memory_space<vmem>>, vector<1x128xf32>
    tpu.vector_store %arg6[%c0_4, %c0_5], %7 {strides = array<i32>} : memref<1x128xf32, #tpu.memory_space<vmem>>, vector<1x128xf32>,
    %c0_6 = arith.constant 0 : index
    %c0_7 = arith.constant 0 : index
    %9 = vector.load %arg7[%c0_6, %c0_7] : memref<1x128xf32, #tpu.memory_space<vmem>>, vector<1x128xf32>
    %10 = arith.mulf %3, %3 : vector<512x128xf32>
    %cst_8 = arith.constant dense<0.000000e+00> : vector<128xf32>
    %11 = vector.multi_reduction <add>, %10, %cst_8 [0] : vector<512x128xf32> to vector<128xf32>
    %12 = vector.shape_cast %11 : vector<128xf32> to vector<1x128xf32>
    %13 = arith.addf %9, %12 : vector<1x128xf32>
    %c0_9 = arith.constant 0 : index
    %c0_10 = arith.constant 0 : index
    %14 = vector.load %arg7[%c0_9, %c0_10] : memref<1x128xf32, #tpu.memory_space<vmem>>, vector<1x128xf32>
    tpu.vector_store %arg7[%c0_9, %c0_10], %13 {strides = array<i32>} : memref<1x128xf32, #tpu.memory_space<vmem>>, vector<1x128xf32>,
    %c0_i32_11 = arith.constant 0 : i32
    %15 = arith.cmpi eq, %arg0, %c0_i32_11 : i32
    %16 = arith.extui %15 : i1 to i32
    %c0_i32_12 = arith.constant 0 : i32
    %17 = arith.cmpi ne, %16, %c0_i32_12 : i32
    scf.if %17 {
      %c0_13 = arith.constant 0 : index
      %c0_14 = arith.constant 0 : index
      %18 = vector.load %arg6[%c0_13, %c0_14] : memref<1x128xf32, #tpu.memory_space<vmem>>, vector<1x128xf32>
      %cst_15 = arith.constant 0.001953125 : f32
      %19 = vector.broadcast %cst_15 : f32 to vector<1x128xf32>
      %20 = arith.mulf %18, %19 : vector<1x128xf32>
      %c0_16 = arith.constant 0 : index
      %c0_17 = arith.constant 0 : index
      %21 = vector.load %arg7[%c0_16, %c0_17] : memref<1x128xf32, #tpu.memory_space<vmem>>, vector<1x128xf32>
      %cst_18 = arith.constant 0.001953125 : f32
      %22 = vector.broadcast %cst_18 : f32 to vector<1x128xf32>
      %23 = arith.mulf %21, %22 : vector<1x128xf32>
      %24 = arith.mulf %20, %20 : vector<1x128xf32>
      %25 = arith.subf %23, %24 : vector<1x128xf32>
      %cst_19 = arith.constant 0.000000e+00 : f32
      %26 = vector.broadcast %cst_19 : f32 to vector<1x128xf32>
      %27 = arith.maximumf %25, %26 : vector<1x128xf32>
      %c0_20 = arith.constant 0 : index
      %c0_21 = arith.constant 0 : index
      %28 = vector.load %arg2[%c0_20, %c0_21] : memref<1x128xf32, #tpu.memory_space<vmem>>, vector<1x128xf32>
      %cst_22 = arith.constant 9.99999974E-6 : f32
      %29 = vector.broadcast %cst_22 : f32 to vector<1x128xf32>
      %30 = arith.addf %27, %29 : vector<1x128xf32>
      %31 = math.rsqrt %30 : vector<1x128xf32>
      %32 = arith.mulf %28, %31 : vector<1x128xf32>
      %c0_23 = arith.constant 0 : index
      %c0_24 = arith.constant 0 : index
      %33 = vector.load %arg4[%c0_23, %c0_24] : memref<1x128xf32, #tpu.memory_space<vmem>>, vector<1x128xf32>
      tpu.vector_store %arg4[%c0_23, %c0_24], %32 {strides = array<i32>} : memref<1x128xf32, #tpu.memory_space<vmem>>, vector<1x128xf32>,
      %c0_25 = arith.constant 0 : index
      %c0_26 = arith.constant 0 : index
      %34 = vector.load %arg3[%c0_25, %c0_26] : memref<1x128xf32, #tpu.memory_space<vmem>>, vector<1x128xf32>
      %35 = arith.mulf %20, %32 : vector<1x128xf32>
      %36 = arith.subf %34, %35 : vector<1x128xf32>
      %c0_27 = arith.constant 0 : index
      %c0_28 = arith.constant 0 : index
      %37 = vector.load %arg5[%c0_27, %c0_28] : memref<1x128xf32, #tpu.memory_space<vmem>>, vector<1x128xf32>
      tpu.vector_store %arg5[%c0_27, %c0_28], %36 {strides = array<i32>} : memref<1x128xf32, #tpu.memory_space<vmem>>, vector<1x128xf32>,
    } else {
    }
    return
  }
  func.func @transform_0(%arg0: i32) -> (i32, i32) {
    %c0_i32 = arith.constant 0 : i32
    %c0_i32_0 = arith.constant 0 : i32
    return %arg0, %c0_i32 : i32, i32
  }
  func.func @transform_1(%arg0: i32) -> (i32, i32) {
    %c0_i32 = arith.constant 0 : i32
    %c0_i32_0 = arith.constant 0 : i32
    %c0_i32_1 = arith.constant 0 : i32
    return %c0_i32, %c0_i32_0 : i32, i32
  }
  func.func @transform_2(%arg0: i32) -> (i32, i32) {
    %c0_i32 = arith.constant 0 : i32
    %c0_i32_0 = arith.constant 0 : i32
    %c0_i32_1 = arith.constant 0 : i32
    return %c0_i32, %c0_i32_0 : i32, i32
  }
  func.func @transform_3(%arg0: i32) -> (i32, i32) {
    %c0_i32 = arith.constant 0 : i32
    %c0_i32_0 = arith.constant 0 : i32
    %c0_i32_1 = arith.constant 0 : i32
    return %c0_i32, %c0_i32_0 : i32, i32
  }
  func.func @transform_4(%arg0: i32) -> (i32, i32) {
    %c0_i32 = arith.constant 0 : i32
    %c0_i32_0 = arith.constant 0 : i32
    %c0_i32_1 = arith.constant 0 : i32
    return %c0_i32, %c0_i32_0 : i32, i32
  }
}

module attributes {stable_mosaic.version = 11 : i64} {
  func.func @_bn_relu_conv3x3_kernel(%arg0: i32, %arg1: i32, %arg2: memref<1x16x18x128xf32, #tpu.memory_space<vmem>>, %arg3: memref<1x8x18x128xf32, #tpu.memory_space<vmem>>, %arg4: memref<1x128xf32, #tpu.memory_space<vmem>>, %arg5: memref<1x128xf32, #tpu.memory_space<vmem>>, %arg6: memref<9x128x128xf32, #tpu.memory_space<vmem>>, %arg7: memref<1x16x18x128xf32, #tpu.memory_space<vmem>>, %arg8: memref<1x8x18x128xf32, #tpu.memory_space<vmem>>, %arg9: memref<1x128xf32, #tpu.memory_space<vmem>>, %arg10: memref<1x128xf32, #tpu.memory_space<vmem>>, %arg11: memref<9x128x128xf32, #tpu.memory_space<vmem>>, %arg12: memref<1x16x16x128xf32, #tpu.memory_space<vmem>>) attributes {dimension_semantics = [#tpu.dimension_semantics<parallel>, #tpu.dimension_semantics<parallel>], iteration_bounds = array<i64: 2, 1>, scalar_prefetch = 0 : i64, scratch_operands = 0 : i64, tpu.core_type = #tpu.core_type<tc>, window_params = [{transform_indices = @transform_0, window_bounds = array<i64: 1, 16, 18, 128>}, {transform_indices = @transform_1, window_bounds = array<i64: 1, 8, 18, 128>}, {pipeline_mode = #tpu.pipeline_mode<synchronous>, transform_indices = @transform_2, window_bounds = array<i64: 1, 128>}, {pipeline_mode = #tpu.pipeline_mode<synchronous>, transform_indices = @transform_3, window_bounds = array<i64: 1, 128>}, {pipeline_mode = #tpu.pipeline_mode<synchronous>, transform_indices = @transform_4, window_bounds = array<i64: 9, 128, 128>}, {transform_indices = @transform_5, window_bounds = array<i64: 1, 16, 18, 128>}, {transform_indices = @transform_6, window_bounds = array<i64: 1, 8, 18, 128>}, {pipeline_mode = #tpu.pipeline_mode<synchronous>, transform_indices = @transform_7, window_bounds = array<i64: 1, 128>}, {pipeline_mode = #tpu.pipeline_mode<synchronous>, transform_indices = @transform_8, window_bounds = array<i64: 1, 128>}, {pipeline_mode = #tpu.pipeline_mode<synchronous>, transform_indices = @transform_9, window_bounds = array<i64: 9, 128, 128>}, {transform_indices = @transform_10, window_bounds = array<i64: 1, 16, 16, 128>}]} {
    %c16_i32 = arith.constant 16 : i32
    %0 = arith.muli %arg1, %c16_i32 : i32
    %1 = tpu.iota {dimensions = array<i32: 0>} : vector<18x18x1xi32>
    %2 = vector.broadcast %0 : i32 to vector<18x18x1xi32>
    %3 = arith.addi %2, %1 : vector<18x18x1xi32>
    %4 = tpu.iota {dimensions = array<i32: 1>} : vector<18x18x1xi32>
    %c1_i32 = arith.constant 1 : i32
    %5 = vector.broadcast %c1_i32 : i32 to vector<18x18x1xi32>
    %6 = arith.cmpi sge, %3, %5 : vector<18x18x1xi32>
    %c16_i32_0 = arith.constant 16 : i32
    %7 = vector.broadcast %c16_i32_0 : i32 to vector<18x18x1xi32>
    %8 = arith.cmpi sle, %3, %7 : vector<18x18x1xi32>
    %9 = arith.andi %6, %8 : vector<18x18x1xi1>
    %c1_i32_1 = arith.constant 1 : i32
    %10 = vector.broadcast %c1_i32_1 : i32 to vector<18x18x1xi32>
    %11 = arith.cmpi sge, %4, %10 : vector<18x18x1xi32>
    %12 = arith.andi %9, %11 : vector<18x18x1xi1>
    %c16_i32_2 = arith.constant 16 : i32
    %13 = vector.broadcast %c16_i32_2 : i32 to vector<18x18x1xi32>
    %14 = arith.cmpi sle, %4, %13 : vector<18x18x1xi32>
    %15 = arith.andi %12, %14 : vector<18x18x1xi1>
    %c0 = arith.constant 0 : index
    %c0_3 = arith.constant 0 : index
    %c0_4 = arith.constant 0 : index
    %c0_5 = arith.constant 0 : index
    %16 = vector.load %arg2[%c0, %c0_3, %c0_4, %c0_5] : memref<1x16x18x128xf32, #tpu.memory_space<vmem>>, vector<1x16x18x128xf32>
    %17 = vector.shape_cast %16 : vector<1x16x18x128xf32> to vector<16x18x128xf32>
    %c0_6 = arith.constant 0 : index
    %c0_7 = arith.constant 0 : index
    %c0_8 = arith.constant 0 : index
    %c0_9 = arith.constant 0 : index
    %18 = vector.load %arg3[%c0_6, %c0_7, %c0_8, %c0_9] : memref<1x8x18x128xf32, #tpu.memory_space<vmem>>, vector<1x2x18x128xf32>
    %19 = vector.shape_cast %18 : vector<1x2x18x128xf32> to vector<2x18x128xf32>
    %20 = tpu.concatenate %17, %19 in 0 : vector<16x18x128xf32>, vector<2x18x128xf32> -> vector<18x18x128xf32>
    %c0_10 = arith.constant 0 : index
    %c0_11 = arith.constant 0 : index
    %21 = vector.load %arg4[%c0_10, %c0_11] : memref<1x128xf32, #tpu.memory_space<vmem>>, vector<1x128xf32>
    %22 = vector.shape_cast %21 : vector<1x128xf32> to vector<1x1x128xf32>
    %23 = vector.broadcast %22 : vector<1x1x128xf32> to vector<18x18x128xf32>
    %24 = arith.mulf %20, %23 : vector<18x18x128xf32>
    %c0_12 = arith.constant 0 : index
    %c0_13 = arith.constant 0 : index
    %25 = vector.load %arg5[%c0_12, %c0_13] : memref<1x128xf32, #tpu.memory_space<vmem>>, vector<1x128xf32>
    %26 = vector.shape_cast %25 : vector<1x128xf32> to vector<1x1x128xf32>
    %27 = vector.broadcast %26 : vector<1x1x128xf32> to vector<18x18x128xf32>
    %28 = arith.addf %24, %27 : vector<18x18x128xf32>
    %cst = arith.constant 0.000000e+00 : f32
    %29 = vector.broadcast %cst : f32 to vector<18x18x128xf32>
    %30 = arith.maximumf %28, %29 : vector<18x18x128xf32>
    %cst_14 = arith.constant 0.000000e+00 : f32
    %31 = vector.shape_cast %15 : vector<18x18x1xi1> to vector<18x18x1xi1>
    %32 = vector.broadcast %31 : vector<18x18x1xi1> to vector<18x18x128xi1>
    %33 = vector.broadcast %cst_14 : f32 to vector<18x18x128xf32>
    %34 = arith.select %32, %30, %33 : vector<18x18x128xi1>, vector<18x18x128xf32>
    %35 = vector.extract_strided_slice %34 {offsets = [0, 0, 0], sizes = [16, 16, 128], strides = [1, 1, 1]} : vector<18x18x128xf32> to vector<16x16x128xf32>
    %36 = vector.shape_cast %35 : vector<16x16x128xf32> to vector<256x128xf32>
    %c0_15 = arith.constant 0 : index
    %c0_16 = arith.constant 0 : index
    %c0_17 = arith.constant 0 : index
    %37 = vector.load %arg6[%c0_15, %c0_16, %c0_17] : memref<9x128x128xf32, #tpu.memory_space<vmem>>, vector<1x128x128xf32>
    %38 = vector.shape_cast %37 : vector<1x128x128xf32> to vector<128x128xf32>
    %cst_18 = arith.constant dense<0.000000e+00> : vector<256x128xf32>
    %39 = tpu.matmul %36, %38, %cst_18 {dimension_numbers = #tpu.dot_dimension_numbers<[1], [0], [0], [1], [0, 0, 1, 1], [], []>} : vector<256x128xf32>, vector<128x128xf32>, vector<256x128xf32> -> vector<256x128xf32>
    %40 = vector.extract_strided_slice %34 {offsets = [0, 1, 0], sizes = [16, 16, 128], strides = [1, 1, 1]} : vector<18x18x128xf32> to vector<16x16x128xf32>
    %41 = vector.shape_cast %40 : vector<16x16x128xf32> to vector<256x128xf32>
    %c1 = arith.constant 1 : index
    %c0_19 = arith.constant 0 : index
    %c0_20 = arith.constant 0 : index
    %42 = vector.load %arg6[%c1, %c0_19, %c0_20] : memref<9x128x128xf32, #tpu.memory_space<vmem>>, vector<1x128x128xf32>
    %43 = vector.shape_cast %42 : vector<1x128x128xf32> to vector<128x128xf32>
    %cst_21 = arith.constant dense<0.000000e+00> : vector<256x128xf32>
    %44 = tpu.matmul %41, %43, %cst_21 {dimension_numbers = #tpu.dot_dimension_numbers<[1], [0], [0], [1], [0, 0, 1, 1], [], []>} : vector<256x128xf32>, vector<128x128xf32>, vector<256x128xf32> -> vector<256x128xf32>
    %45 = arith.addf %39, %44 : vector<256x128xf32>
    %46 = vector.extract_strided_slice %34 {offsets = [0, 2, 0], sizes = [16, 16, 128], strides = [1, 1, 1]} : vector<18x18x128xf32> to vector<16x16x128xf32>
    %47 = vector.shape_cast %46 : vector<16x16x128xf32> to vector<256x128xf32>
    %c2 = arith.constant 2 : index
    %c0_22 = arith.constant 0 : index
    %c0_23 = arith.constant 0 : index
    %48 = vector.load %arg6[%c2, %c0_22, %c0_23] : memref<9x128x128xf32, #tpu.memory_space<vmem>>, vector<1x128x128xf32>
    %49 = vector.shape_cast %48 : vector<1x128x128xf32> to vector<128x128xf32>
    %cst_24 = arith.constant dense<0.000000e+00> : vector<256x128xf32>
    %50 = tpu.matmul %47, %49, %cst_24 {dimension_numbers = #tpu.dot_dimension_numbers<[1], [0], [0], [1], [0, 0, 1, 1], [], []>} : vector<256x128xf32>, vector<128x128xf32>, vector<256x128xf32> -> vector<256x128xf32>
    %51 = arith.addf %45, %50 : vector<256x128xf32>
    %52 = vector.extract_strided_slice %34 {offsets = [1, 0, 0], sizes = [16, 16, 128], strides = [1, 1, 1]} : vector<18x18x128xf32> to vector<16x16x128xf32>
    %53 = vector.shape_cast %52 : vector<16x16x128xf32> to vector<256x128xf32>
    %c3 = arith.constant 3 : index
    %c0_25 = arith.constant 0 : index
    %c0_26 = arith.constant 0 : index
    %54 = vector.load %arg6[%c3, %c0_25, %c0_26] : memref<9x128x128xf32, #tpu.memory_space<vmem>>, vector<1x128x128xf32>
    %55 = vector.shape_cast %54 : vector<1x128x128xf32> to vector<128x128xf32>
    %cst_27 = arith.constant dense<0.000000e+00> : vector<256x128xf32>
    %56 = tpu.matmul %53, %55, %cst_27 {dimension_numbers = #tpu.dot_dimension_numbers<[1], [0], [0], [1], [0, 0, 1, 1], [], []>} : vector<256x128xf32>, vector<128x128xf32>, vector<256x128xf32> -> vector<256x128xf32>
    %57 = arith.addf %51, %56 : vector<256x128xf32>
    %58 = vector.extract_strided_slice %34 {offsets = [1, 1, 0], sizes = [16, 16, 128], strides = [1, 1, 1]} : vector<18x18x128xf32> to vector<16x16x128xf32>
    %59 = vector.shape_cast %58 : vector<16x16x128xf32> to vector<256x128xf32>
    %c4 = arith.constant 4 : index
    %c0_28 = arith.constant 0 : index
    %c0_29 = arith.constant 0 : index
    %60 = vector.load %arg6[%c4, %c0_28, %c0_29] : memref<9x128x128xf32, #tpu.memory_space<vmem>>, vector<1x128x128xf32>
    %61 = vector.shape_cast %60 : vector<1x128x128xf32> to vector<128x128xf32>
    %cst_30 = arith.constant dense<0.000000e+00> : vector<256x128xf32>
    %62 = tpu.matmul %59, %61, %cst_30 {dimension_numbers = #tpu.dot_dimension_numbers<[1], [0], [0], [1], [0, 0, 1, 1], [], []>} : vector<256x128xf32>, vector<128x128xf32>, vector<256x128xf32> -> vector<256x128xf32>
    %63 = arith.addf %57, %62 : vector<256x128xf32>
    %64 = vector.extract_strided_slice %34 {offsets = [1, 2, 0], sizes = [16, 16, 128], strides = [1, 1, 1]} : vector<18x18x128xf32> to vector<16x16x128xf32>
    %65 = vector.shape_cast %64 : vector<16x16x128xf32> to vector<256x128xf32>
    %c5 = arith.constant 5 : index
    %c0_31 = arith.constant 0 : index
    %c0_32 = arith.constant 0 : index
    %66 = vector.load %arg6[%c5, %c0_31, %c0_32] : memref<9x128x128xf32, #tpu.memory_space<vmem>>, vector<1x128x128xf32>
    %67 = vector.shape_cast %66 : vector<1x128x128xf32> to vector<128x128xf32>
    %cst_33 = arith.constant dense<0.000000e+00> : vector<256x128xf32>
    %68 = tpu.matmul %65, %67, %cst_33 {dimension_numbers = #tpu.dot_dimension_numbers<[1], [0], [0], [1], [0, 0, 1, 1], [], []>} : vector<256x128xf32>, vector<128x128xf32>, vector<256x128xf32> -> vector<256x128xf32>
    %69 = arith.addf %63, %68 : vector<256x128xf32>
    %70 = vector.extract_strided_slice %34 {offsets = [2, 0, 0], sizes = [16, 16, 128], strides = [1, 1, 1]} : vector<18x18x128xf32> to vector<16x16x128xf32>
    %71 = vector.shape_cast %70 : vector<16x16x128xf32> to vector<256x128xf32>
    %c6 = arith.constant 6 : index
    %c0_34 = arith.constant 0 : index
    %c0_35 = arith.constant 0 : index
    %72 = vector.load %arg6[%c6, %c0_34, %c0_35] : memref<9x128x128xf32, #tpu.memory_space<vmem>>, vector<1x128x128xf32>
    %73 = vector.shape_cast %72 : vector<1x128x128xf32> to vector<128x128xf32>
    %cst_36 = arith.constant dense<0.000000e+00> : vector<256x128xf32>
    %74 = tpu.matmul %71, %73, %cst_36 {dimension_numbers = #tpu.dot_dimension_numbers<[1], [0], [0], [1], [0, 0, 1, 1], [], []>} : vector<256x128xf32>, vector<128x128xf32>, vector<256x128xf32> -> vector<256x128xf32>
    %75 = arith.addf %69, %74 : vector<256x128xf32>
    %76 = vector.extract_strided_slice %34 {offsets = [2, 1, 0], sizes = [16, 16, 128], strides = [1, 1, 1]} : vector<18x18x128xf32> to vector<16x16x128xf32>
    %77 = vector.shape_cast %76 : vector<16x16x128xf32> to vector<256x128xf32>
    %c7 = arith.constant 7 : index
    %c0_37 = arith.constant 0 : index
    %c0_38 = arith.constant 0 : index
    %78 = vector.load %arg6[%c7, %c0_37, %c0_38] : memref<9x128x128xf32, #tpu.memory_space<vmem>>, vector<1x128x128xf32>
    %79 = vector.shape_cast %78 : vector<1x128x128xf32> to vector<128x128xf32>
    %cst_39 = arith.constant dense<0.000000e+00> : vector<256x128xf32>
    %80 = tpu.matmul %77, %79, %cst_39 {dimension_numbers = #tpu.dot_dimension_numbers<[1], [0], [0], [1], [0, 0, 1, 1], [], []>} : vector<256x128xf32>, vector<128x128xf32>, vector<256x128xf32> -> vector<256x128xf32>
    %81 = arith.addf %75, %80 : vector<256x128xf32>
    %82 = vector.extract_strided_slice %34 {offsets = [2, 2, 0], sizes = [16, 16, 128], strides = [1, 1, 1]} : vector<18x18x128xf32> to vector<16x16x128xf32>
    %83 = vector.shape_cast %82 : vector<16x16x128xf32> to vector<256x128xf32>
    %c8 = arith.constant 8 : index
    %c0_40 = arith.constant 0 : index
    %c0_41 = arith.constant 0 : index
    %84 = vector.load %arg6[%c8, %c0_40, %c0_41] : memref<9x128x128xf32, #tpu.memory_space<vmem>>, vector<1x128x128xf32>
    %85 = vector.shape_cast %84 : vector<1x128x128xf32> to vector<128x128xf32>
    %cst_42 = arith.constant dense<0.000000e+00> : vector<256x128xf32>
    %86 = tpu.matmul %83, %85, %cst_42 {dimension_numbers = #tpu.dot_dimension_numbers<[1], [0], [0], [1], [0, 0, 1, 1], [], []>} : vector<256x128xf32>, vector<128x128xf32>, vector<256x128xf32> -> vector<256x128xf32>
    %87 = arith.addf %81, %86 : vector<256x128xf32>
    %c0_43 = arith.constant 0 : index
    %c0_44 = arith.constant 0 : index
    %c0_45 = arith.constant 0 : index
    %c0_46 = arith.constant 0 : index
    %88 = vector.load %arg7[%c0_43, %c0_44, %c0_45, %c0_46] : memref<1x16x18x128xf32, #tpu.memory_space<vmem>>, vector<1x16x18x128xf32>
    %89 = vector.shape_cast %88 : vector<1x16x18x128xf32> to vector<16x18x128xf32>
    %c0_47 = arith.constant 0 : index
    %c0_48 = arith.constant 0 : index
    %c0_49 = arith.constant 0 : index
    %c0_50 = arith.constant 0 : index
    %90 = vector.load %arg8[%c0_47, %c0_48, %c0_49, %c0_50] : memref<1x8x18x128xf32, #tpu.memory_space<vmem>>, vector<1x2x18x128xf32>
    %91 = vector.shape_cast %90 : vector<1x2x18x128xf32> to vector<2x18x128xf32>
    %92 = tpu.concatenate %89, %91 in 0 : vector<16x18x128xf32>, vector<2x18x128xf32> -> vector<18x18x128xf32>
    %c0_51 = arith.constant 0 : index
    %c0_52 = arith.constant 0 : index
    %93 = vector.load %arg9[%c0_51, %c0_52] : memref<1x128xf32, #tpu.memory_space<vmem>>, vector<1x128xf32>
    %94 = vector.shape_cast %93 : vector<1x128xf32> to vector<1x1x128xf32>
    %95 = vector.broadcast %94 : vector<1x1x128xf32> to vector<18x18x128xf32>
    %96 = arith.mulf %92, %95 : vector<18x18x128xf32>
    %c0_53 = arith.constant 0 : index
    %c0_54 = arith.constant 0 : index
    %97 = vector.load %arg10[%c0_53, %c0_54] : memref<1x128xf32, #tpu.memory_space<vmem>>, vector<1x128xf32>
    %98 = vector.shape_cast %97 : vector<1x128xf32> to vector<1x1x128xf32>
    %99 = vector.broadcast %98 : vector<1x1x128xf32> to vector<18x18x128xf32>
    %100 = arith.addf %96, %99 : vector<18x18x128xf32>
    %cst_55 = arith.constant 0.000000e+00 : f32
    %101 = vector.broadcast %cst_55 : f32 to vector<18x18x128xf32>
    %102 = arith.maximumf %100, %101 : vector<18x18x128xf32>
    %cst_56 = arith.constant 0.000000e+00 : f32
    %103 = vector.shape_cast %15 : vector<18x18x1xi1> to vector<18x18x1xi1>
    %104 = vector.broadcast %103 : vector<18x18x1xi1> to vector<18x18x128xi1>
    %105 = vector.broadcast %cst_56 : f32 to vector<18x18x128xf32>
    %106 = arith.select %104, %102, %105 : vector<18x18x128xi1>, vector<18x18x128xf32>
    %107 = vector.extract_strided_slice %106 {offsets = [0, 0, 0], sizes = [16, 16, 128], strides = [1, 1, 1]} : vector<18x18x128xf32> to vector<16x16x128xf32>
    %108 = vector.shape_cast %107 : vector<16x16x128xf32> to vector<256x128xf32>
    %c0_57 = arith.constant 0 : index
    %c0_58 = arith.constant 0 : index
    %c0_59 = arith.constant 0 : index
    %109 = vector.load %arg11[%c0_57, %c0_58, %c0_59] : memref<9x128x128xf32, #tpu.memory_space<vmem>>, vector<1x128x128xf32>
    %110 = vector.shape_cast %109 : vector<1x128x128xf32> to vector<128x128xf32>
    %cst_60 = arith.constant dense<0.000000e+00> : vector<256x128xf32>
    %111 = tpu.matmul %108, %110, %cst_60 {dimension_numbers = #tpu.dot_dimension_numbers<[1], [0], [0], [1], [0, 0, 1, 1], [], []>} : vector<256x128xf32>, vector<128x128xf32>, vector<256x128xf32> -> vector<256x128xf32>
    %112 = arith.addf %87, %111 : vector<256x128xf32>
    %113 = vector.extract_strided_slice %106 {offsets = [0, 1, 0], sizes = [16, 16, 128], strides = [1, 1, 1]} : vector<18x18x128xf32> to vector<16x16x128xf32>
    %114 = vector.shape_cast %113 : vector<16x16x128xf32> to vector<256x128xf32>
    %c1_61 = arith.constant 1 : index
    %c0_62 = arith.constant 0 : index
    %c0_63 = arith.constant 0 : index
    %115 = vector.load %arg11[%c1_61, %c0_62, %c0_63] : memref<9x128x128xf32, #tpu.memory_space<vmem>>, vector<1x128x128xf32>
    %116 = vector.shape_cast %115 : vector<1x128x128xf32> to vector<128x128xf32>
    %cst_64 = arith.constant dense<0.000000e+00> : vector<256x128xf32>
    %117 = tpu.matmul %114, %116, %cst_64 {dimension_numbers = #tpu.dot_dimension_numbers<[1], [0], [0], [1], [0, 0, 1, 1], [], []>} : vector<256x128xf32>, vector<128x128xf32>, vector<256x128xf32> -> vector<256x128xf32>
    %118 = arith.addf %112, %117 : vector<256x128xf32>
    %119 = vector.extract_strided_slice %106 {offsets = [0, 2, 0], sizes = [16, 16, 128], strides = [1, 1, 1]} : vector<18x18x128xf32> to vector<16x16x128xf32>
    %120 = vector.shape_cast %119 : vector<16x16x128xf32> to vector<256x128xf32>
    %c2_65 = arith.constant 2 : index
    %c0_66 = arith.constant 0 : index
    %c0_67 = arith.constant 0 : index
    %121 = vector.load %arg11[%c2_65, %c0_66, %c0_67] : memref<9x128x128xf32, #tpu.memory_space<vmem>>, vector<1x128x128xf32>
    %122 = vector.shape_cast %121 : vector<1x128x128xf32> to vector<128x128xf32>
    %cst_68 = arith.constant dense<0.000000e+00> : vector<256x128xf32>
    %123 = tpu.matmul %120, %122, %cst_68 {dimension_numbers = #tpu.dot_dimension_numbers<[1], [0], [0], [1], [0, 0, 1, 1], [], []>} : vector<256x128xf32>, vector<128x128xf32>, vector<256x128xf32> -> vector<256x128xf32>
    %124 = arith.addf %118, %123 : vector<256x128xf32>
    %125 = vector.extract_strided_slice %106 {offsets = [1, 0, 0], sizes = [16, 16, 128], strides = [1, 1, 1]} : vector<18x18x128xf32> to vector<16x16x128xf32>
    %126 = vector.shape_cast %125 : vector<16x16x128xf32> to vector<256x128xf32>
    %c3_69 = arith.constant 3 : index
    %c0_70 = arith.constant 0 : index
    %c0_71 = arith.constant 0 : index
    %127 = vector.load %arg11[%c3_69, %c0_70, %c0_71] : memref<9x128x128xf32, #tpu.memory_space<vmem>>, vector<1x128x128xf32>
    %128 = vector.shape_cast %127 : vector<1x128x128xf32> to vector<128x128xf32>
    %cst_72 = arith.constant dense<0.000000e+00> : vector<256x128xf32>
    %129 = tpu.matmul %126, %128, %cst_72 {dimension_numbers = #tpu.dot_dimension_numbers<[1], [0], [0], [1], [0, 0, 1, 1], [], []>} : vector<256x128xf32>, vector<128x128xf32>, vector<256x128xf32> -> vector<256x128xf32>
    %130 = arith.addf %124, %129 : vector<256x128xf32>
    %131 = vector.extract_strided_slice %106 {offsets = [1, 1, 0], sizes = [16, 16, 128], strides = [1, 1, 1]} : vector<18x18x128xf32> to vector<16x16x128xf32>
    %132 = vector.shape_cast %131 : vector<16x16x128xf32> to vector<256x128xf32>
    %c4_73 = arith.constant 4 : index
    %c0_74 = arith.constant 0 : index
    %c0_75 = arith.constant 0 : index
    %133 = vector.load %arg11[%c4_73, %c0_74, %c0_75] : memref<9x128x128xf32, #tpu.memory_space<vmem>>, vector<1x128x128xf32>
    %134 = vector.shape_cast %133 : vector<1x128x128xf32> to vector<128x128xf32>
    %cst_76 = arith.constant dense<0.000000e+00> : vector<256x128xf32>
    %135 = tpu.matmul %132, %134, %cst_76 {dimension_numbers = #tpu.dot_dimension_numbers<[1], [0], [0], [1], [0, 0, 1, 1], [], []>} : vector<256x128xf32>, vector<128x128xf32>, vector<256x128xf32> -> vector<256x128xf32>
    %136 = arith.addf %130, %135 : vector<256x128xf32>
    %137 = vector.extract_strided_slice %106 {offsets = [1, 2, 0], sizes = [16, 16, 128], strides = [1, 1, 1]} : vector<18x18x128xf32> to vector<16x16x128xf32>
    %138 = vector.shape_cast %137 : vector<16x16x128xf32> to vector<256x128xf32>
    %c5_77 = arith.constant 5 : index
    %c0_78 = arith.constant 0 : index
    %c0_79 = arith.constant 0 : index
    %139 = vector.load %arg11[%c5_77, %c0_78, %c0_79] : memref<9x128x128xf32, #tpu.memory_space<vmem>>, vector<1x128x128xf32>
    %140 = vector.shape_cast %139 : vector<1x128x128xf32> to vector<128x128xf32>
    %cst_80 = arith.constant dense<0.000000e+00> : vector<256x128xf32>
    %141 = tpu.matmul %138, %140, %cst_80 {dimension_numbers = #tpu.dot_dimension_numbers<[1], [0], [0], [1], [0, 0, 1, 1], [], []>} : vector<256x128xf32>, vector<128x128xf32>, vector<256x128xf32> -> vector<256x128xf32>
    %142 = arith.addf %136, %141 : vector<256x128xf32>
    %143 = vector.extract_strided_slice %106 {offsets = [2, 0, 0], sizes = [16, 16, 128], strides = [1, 1, 1]} : vector<18x18x128xf32> to vector<16x16x128xf32>
    %144 = vector.shape_cast %143 : vector<16x16x128xf32> to vector<256x128xf32>
    %c6_81 = arith.constant 6 : index
    %c0_82 = arith.constant 0 : index
    %c0_83 = arith.constant 0 : index
    %145 = vector.load %arg11[%c6_81, %c0_82, %c0_83] : memref<9x128x128xf32, #tpu.memory_space<vmem>>, vector<1x128x128xf32>
    %146 = vector.shape_cast %145 : vector<1x128x128xf32> to vector<128x128xf32>
    %cst_84 = arith.constant dense<0.000000e+00> : vector<256x128xf32>
    %147 = tpu.matmul %144, %146, %cst_84 {dimension_numbers = #tpu.dot_dimension_numbers<[1], [0], [0], [1], [0, 0, 1, 1], [], []>} : vector<256x128xf32>, vector<128x128xf32>, vector<256x128xf32> -> vector<256x128xf32>
    %148 = arith.addf %142, %147 : vector<256x128xf32>
    %149 = vector.extract_strided_slice %106 {offsets = [2, 1, 0], sizes = [16, 16, 128], strides = [1, 1, 1]} : vector<18x18x128xf32> to vector<16x16x128xf32>
    %150 = vector.shape_cast %149 : vector<16x16x128xf32> to vector<256x128xf32>
    %c7_85 = arith.constant 7 : index
    %c0_86 = arith.constant 0 : index
    %c0_87 = arith.constant 0 : index
    %151 = vector.load %arg11[%c7_85, %c0_86, %c0_87] : memref<9x128x128xf32, #tpu.memory_space<vmem>>, vector<1x128x128xf32>
    %152 = vector.shape_cast %151 : vector<1x128x128xf32> to vector<128x128xf32>
    %cst_88 = arith.constant dense<0.000000e+00> : vector<256x128xf32>
    %153 = tpu.matmul %150, %152, %cst_88 {dimension_numbers = #tpu.dot_dimension_numbers<[1], [0], [0], [1], [0, 0, 1, 1], [], []>} : vector<256x128xf32>, vector<128x128xf32>, vector<256x128xf32> -> vector<256x128xf32>
    %154 = arith.addf %148, %153 : vector<256x128xf32>
    %155 = vector.extract_strided_slice %106 {offsets = [2, 2, 0], sizes = [16, 16, 128], strides = [1, 1, 1]} : vector<18x18x128xf32> to vector<16x16x128xf32>
    %156 = vector.shape_cast %155 : vector<16x16x128xf32> to vector<256x128xf32>
    %c8_89 = arith.constant 8 : index
    %c0_90 = arith.constant 0 : index
    %c0_91 = arith.constant 0 : index
    %157 = vector.load %arg11[%c8_89, %c0_90, %c0_91] : memref<9x128x128xf32, #tpu.memory_space<vmem>>, vector<1x128x128xf32>
    %158 = vector.shape_cast %157 : vector<1x128x128xf32> to vector<128x128xf32>
    %cst_92 = arith.constant dense<0.000000e+00> : vector<256x128xf32>
    %159 = tpu.matmul %156, %158, %cst_92 {dimension_numbers = #tpu.dot_dimension_numbers<[1], [0], [0], [1], [0, 0, 1, 1], [], []>} : vector<256x128xf32>, vector<128x128xf32>, vector<256x128xf32> -> vector<256x128xf32>
    %160 = arith.addf %154, %159 : vector<256x128xf32>
    %161 = vector.shape_cast %160 : vector<256x128xf32> to vector<1x16x16x128xf32>
    %c0_93 = arith.constant 0 : index
    %c0_94 = arith.constant 0 : index
    %c0_95 = arith.constant 0 : index
    %c0_96 = arith.constant 0 : index
    %162 = vector.load %arg12[%c0_93, %c0_94, %c0_95, %c0_96] : memref<1x16x16x128xf32, #tpu.memory_space<vmem>>, vector<1x16x16x128xf32>
    tpu.vector_store %arg12[%c0_93, %c0_94, %c0_95, %c0_96], %161 {strides = array<i32>} : memref<1x16x16x128xf32, #tpu.memory_space<vmem>>, vector<1x16x16x128xf32>,
    return
  }
  func.func @transform_0(%arg0: i32, %arg1: i32) -> (i32, i32, i32, i32) {
    %c0_i32 = arith.constant 0 : i32
    %c0_i32_0 = arith.constant 0 : i32
    %c0_i32_1 = arith.constant 0 : i32
    return %arg0, %arg1, %c0_i32, %c0_i32_0 : i32, i32, i32, i32
  }
  func.func @transform_1(%arg0: i32, %arg1: i32) -> (i32, i32, i32, i32) {
    %c1_i32 = arith.constant 1 : i32
    %0 = arith.addi %arg1, %c1_i32 : i32
    %c2_i32 = arith.constant 2 : i32
    %1 = arith.muli %0, %c2_i32 : i32
    %c0_i32 = arith.constant 0 : i32
    %c0_i32_0 = arith.constant 0 : i32
    %c0_i32_1 = arith.constant 0 : i32
    return %arg0, %1, %c0_i32, %c0_i32_0 : i32, i32, i32, i32
  }
  func.func @transform_2(%arg0: i32, %arg1: i32) -> (i32, i32) {
    %c0_i32 = arith.constant 0 : i32
    %c0_i32_0 = arith.constant 0 : i32
    %c0_i32_1 = arith.constant 0 : i32
    return %c0_i32, %c0_i32_0 : i32, i32
  }
  func.func @transform_3(%arg0: i32, %arg1: i32) -> (i32, i32) {
    %c0_i32 = arith.constant 0 : i32
    %c0_i32_0 = arith.constant 0 : i32
    %c0_i32_1 = arith.constant 0 : i32
    return %c0_i32, %c0_i32_0 : i32, i32
  }
  func.func @transform_4(%arg0: i32, %arg1: i32) -> (i32, i32, i32) {
    %c0_i32 = arith.constant 0 : i32
    %c0_i32_0 = arith.constant 0 : i32
    %c0_i32_1 = arith.constant 0 : i32
    %c0_i32_2 = arith.constant 0 : i32
    return %c0_i32, %c0_i32_0, %c0_i32_1 : i32, i32, i32
  }
  func.func @transform_5(%arg0: i32, %arg1: i32) -> (i32, i32, i32, i32) {
    %c0_i32 = arith.constant 0 : i32
    %c0_i32_0 = arith.constant 0 : i32
    %c0_i32_1 = arith.constant 0 : i32
    return %arg0, %arg1, %c0_i32, %c0_i32_0 : i32, i32, i32, i32
  }
  func.func @transform_6(%arg0: i32, %arg1: i32) -> (i32, i32, i32, i32) {
    %c1_i32 = arith.constant 1 : i32
    %0 = arith.addi %arg1, %c1_i32 : i32
    %c2_i32 = arith.constant 2 : i32
    %1 = arith.muli %0, %c2_i32 : i32
    %c0_i32 = arith.constant 0 : i32
    %c0_i32_0 = arith.constant 0 : i32
    %c0_i32_1 = arith.constant 0 : i32
    return %arg0, %1, %c0_i32, %c0_i32_0 : i32, i32, i32, i32
  }
  func.func @transform_7(%arg0: i32, %arg1: i32) -> (i32, i32) {
    %c0_i32 = arith.constant 0 : i32
    %c0_i32_0 = arith.constant 0 : i32
    %c0_i32_1 = arith.constant 0 : i32
    return %c0_i32, %c0_i32_0 : i32, i32
  }
  func.func @transform_8(%arg0: i32, %arg1: i32) -> (i32, i32) {
    %c0_i32 = arith.constant 0 : i32
    %c0_i32_0 = arith.constant 0 : i32
    %c0_i32_1 = arith.constant 0 : i32
    return %c0_i32, %c0_i32_0 : i32, i32
  }
  func.func @transform_9(%arg0: i32, %arg1: i32) -> (i32, i32, i32) {
    %c0_i32 = arith.constant 0 : i32
    %c0_i32_0 = arith.constant 0 : i32
    %c0_i32_1 = arith.constant 0 : i32
    %c0_i32_2 = arith.constant 0 : i32
    return %c0_i32, %c0_i32_0, %c0_i32_1 : i32, i32, i32
  }
  func.func @transform_10(%arg0: i32, %arg1: i32) -> (i32, i32, i32, i32) {
    %c0_i32 = arith.constant 0 : i32
    %c0_i32_0 = arith.constant 0 : i32
    %c0_i32_1 = arith.constant 0 : i32
    return %arg0, %arg1, %c0_i32, %c0_i32_0 : i32, i32, i32, i32
  }
}

module attributes {stable_mosaic.version = 11 : i64} {
  func.func @_bn_relu_conv3x3_kernel(%arg0: i32, %arg1: i32, %arg2: memref<1x16x18x128xf32, #tpu.memory_space<vmem>>, %arg3: memref<1x8x18x128xf32, #tpu.memory_space<vmem>>, %arg4: memref<1x128xf32, #tpu.memory_space<vmem>>, %arg5: memref<1x128xf32, #tpu.memory_space<vmem>>, %arg6: memref<9x128x128xf32, #tpu.memory_space<vmem>>, %arg7: memref<1x16x16x128xf32, #tpu.memory_space<vmem>>) attributes {dimension_semantics = [#tpu.dimension_semantics<parallel>, #tpu.dimension_semantics<parallel>], iteration_bounds = array<i64: 2, 1>, scalar_prefetch = 0 : i64, scratch_operands = 0 : i64, tpu.core_type = #tpu.core_type<tc>, window_params = [{transform_indices = @transform_0, window_bounds = array<i64: 1, 16, 18, 128>}, {transform_indices = @transform_1, window_bounds = array<i64: 1, 8, 18, 128>}, {pipeline_mode = #tpu.pipeline_mode<synchronous>, transform_indices = @transform_2, window_bounds = array<i64: 1, 128>}, {pipeline_mode = #tpu.pipeline_mode<synchronous>, transform_indices = @transform_3, window_bounds = array<i64: 1, 128>}, {pipeline_mode = #tpu.pipeline_mode<synchronous>, transform_indices = @transform_4, window_bounds = array<i64: 9, 128, 128>}, {transform_indices = @transform_5, window_bounds = array<i64: 1, 16, 16, 128>}]} {
    %c16_i32 = arith.constant 16 : i32
    %0 = arith.muli %arg1, %c16_i32 : i32
    %1 = tpu.iota {dimensions = array<i32: 0>} : vector<18x18x1xi32>
    %2 = vector.broadcast %0 : i32 to vector<18x18x1xi32>
    %3 = arith.addi %2, %1 : vector<18x18x1xi32>
    %4 = tpu.iota {dimensions = array<i32: 1>} : vector<18x18x1xi32>
    %c1_i32 = arith.constant 1 : i32
    %5 = vector.broadcast %c1_i32 : i32 to vector<18x18x1xi32>
    %6 = arith.cmpi sge, %3, %5 : vector<18x18x1xi32>
    %c16_i32_0 = arith.constant 16 : i32
    %7 = vector.broadcast %c16_i32_0 : i32 to vector<18x18x1xi32>
    %8 = arith.cmpi sle, %3, %7 : vector<18x18x1xi32>
    %9 = arith.andi %6, %8 : vector<18x18x1xi1>
    %c1_i32_1 = arith.constant 1 : i32
    %10 = vector.broadcast %c1_i32_1 : i32 to vector<18x18x1xi32>
    %11 = arith.cmpi sge, %4, %10 : vector<18x18x1xi32>
    %12 = arith.andi %9, %11 : vector<18x18x1xi1>
    %c16_i32_2 = arith.constant 16 : i32
    %13 = vector.broadcast %c16_i32_2 : i32 to vector<18x18x1xi32>
    %14 = arith.cmpi sle, %4, %13 : vector<18x18x1xi32>
    %15 = arith.andi %12, %14 : vector<18x18x1xi1>
    %c0 = arith.constant 0 : index
    %c0_3 = arith.constant 0 : index
    %c0_4 = arith.constant 0 : index
    %c0_5 = arith.constant 0 : index
    %16 = vector.load %arg2[%c0, %c0_3, %c0_4, %c0_5] : memref<1x16x18x128xf32, #tpu.memory_space<vmem>>, vector<1x16x18x128xf32>
    %17 = vector.shape_cast %16 : vector<1x16x18x128xf32> to vector<16x18x128xf32>
    %c0_6 = arith.constant 0 : index
    %c0_7 = arith.constant 0 : index
    %c0_8 = arith.constant 0 : index
    %c0_9 = arith.constant 0 : index
    %18 = vector.load %arg3[%c0_6, %c0_7, %c0_8, %c0_9] : memref<1x8x18x128xf32, #tpu.memory_space<vmem>>, vector<1x2x18x128xf32>
    %19 = vector.shape_cast %18 : vector<1x2x18x128xf32> to vector<2x18x128xf32>
    %20 = tpu.concatenate %17, %19 in 0 : vector<16x18x128xf32>, vector<2x18x128xf32> -> vector<18x18x128xf32>
    %c0_10 = arith.constant 0 : index
    %c0_11 = arith.constant 0 : index
    %21 = vector.load %arg4[%c0_10, %c0_11] : memref<1x128xf32, #tpu.memory_space<vmem>>, vector<1x128xf32>
    %22 = vector.shape_cast %21 : vector<1x128xf32> to vector<1x1x128xf32>
    %23 = vector.broadcast %22 : vector<1x1x128xf32> to vector<18x18x128xf32>
    %24 = arith.mulf %20, %23 : vector<18x18x128xf32>
    %c0_12 = arith.constant 0 : index
    %c0_13 = arith.constant 0 : index
    %25 = vector.load %arg5[%c0_12, %c0_13] : memref<1x128xf32, #tpu.memory_space<vmem>>, vector<1x128xf32>
    %26 = vector.shape_cast %25 : vector<1x128xf32> to vector<1x1x128xf32>
    %27 = vector.broadcast %26 : vector<1x1x128xf32> to vector<18x18x128xf32>
    %28 = arith.addf %24, %27 : vector<18x18x128xf32>
    %cst = arith.constant 0.000000e+00 : f32
    %29 = vector.broadcast %cst : f32 to vector<18x18x128xf32>
    %30 = arith.maximumf %28, %29 : vector<18x18x128xf32>
    %cst_14 = arith.constant 0.000000e+00 : f32
    %31 = vector.shape_cast %15 : vector<18x18x1xi1> to vector<18x18x1xi1>
    %32 = vector.broadcast %31 : vector<18x18x1xi1> to vector<18x18x128xi1>
    %33 = vector.broadcast %cst_14 : f32 to vector<18x18x128xf32>
    %34 = arith.select %32, %30, %33 : vector<18x18x128xi1>, vector<18x18x128xf32>
    %35 = vector.extract_strided_slice %34 {offsets = [0, 0, 0], sizes = [16, 16, 128], strides = [1, 1, 1]} : vector<18x18x128xf32> to vector<16x16x128xf32>
    %36 = vector.shape_cast %35 : vector<16x16x128xf32> to vector<256x128xf32>
    %c0_15 = arith.constant 0 : index
    %c0_16 = arith.constant 0 : index
    %c0_17 = arith.constant 0 : index
    %37 = vector.load %arg6[%c0_15, %c0_16, %c0_17] : memref<9x128x128xf32, #tpu.memory_space<vmem>>, vector<1x128x128xf32>
    %38 = vector.shape_cast %37 : vector<1x128x128xf32> to vector<128x128xf32>
    %cst_18 = arith.constant dense<0.000000e+00> : vector<256x128xf32>
    %39 = tpu.matmul %36, %38, %cst_18 {dimension_numbers = #tpu.dot_dimension_numbers<[1], [0], [0], [1], [0, 0, 1, 1], [], []>} : vector<256x128xf32>, vector<128x128xf32>, vector<256x128xf32> -> vector<256x128xf32>
    %40 = vector.extract_strided_slice %34 {offsets = [0, 1, 0], sizes = [16, 16, 128], strides = [1, 1, 1]} : vector<18x18x128xf32> to vector<16x16x128xf32>
    %41 = vector.shape_cast %40 : vector<16x16x128xf32> to vector<256x128xf32>
    %c1 = arith.constant 1 : index
    %c0_19 = arith.constant 0 : index
    %c0_20 = arith.constant 0 : index
    %42 = vector.load %arg6[%c1, %c0_19, %c0_20] : memref<9x128x128xf32, #tpu.memory_space<vmem>>, vector<1x128x128xf32>
    %43 = vector.shape_cast %42 : vector<1x128x128xf32> to vector<128x128xf32>
    %cst_21 = arith.constant dense<0.000000e+00> : vector<256x128xf32>
    %44 = tpu.matmul %41, %43, %cst_21 {dimension_numbers = #tpu.dot_dimension_numbers<[1], [0], [0], [1], [0, 0, 1, 1], [], []>} : vector<256x128xf32>, vector<128x128xf32>, vector<256x128xf32> -> vector<256x128xf32>
    %45 = arith.addf %39, %44 : vector<256x128xf32>
    %46 = vector.extract_strided_slice %34 {offsets = [0, 2, 0], sizes = [16, 16, 128], strides = [1, 1, 1]} : vector<18x18x128xf32> to vector<16x16x128xf32>
    %47 = vector.shape_cast %46 : vector<16x16x128xf32> to vector<256x128xf32>
    %c2 = arith.constant 2 : index
    %c0_22 = arith.constant 0 : index
    %c0_23 = arith.constant 0 : index
    %48 = vector.load %arg6[%c2, %c0_22, %c0_23] : memref<9x128x128xf32, #tpu.memory_space<vmem>>, vector<1x128x128xf32>
    %49 = vector.shape_cast %48 : vector<1x128x128xf32> to vector<128x128xf32>
    %cst_24 = arith.constant dense<0.000000e+00> : vector<256x128xf32>
    %50 = tpu.matmul %47, %49, %cst_24 {dimension_numbers = #tpu.dot_dimension_numbers<[1], [0], [0], [1], [0, 0, 1, 1], [], []>} : vector<256x128xf32>, vector<128x128xf32>, vector<256x128xf32> -> vector<256x128xf32>
    %51 = arith.addf %45, %50 : vector<256x128xf32>
    %52 = vector.extract_strided_slice %34 {offsets = [1, 0, 0], sizes = [16, 16, 128], strides = [1, 1, 1]} : vector<18x18x128xf32> to vector<16x16x128xf32>
    %53 = vector.shape_cast %52 : vector<16x16x128xf32> to vector<256x128xf32>
    %c3 = arith.constant 3 : index
    %c0_25 = arith.constant 0 : index
    %c0_26 = arith.constant 0 : index
    %54 = vector.load %arg6[%c3, %c0_25, %c0_26] : memref<9x128x128xf32, #tpu.memory_space<vmem>>, vector<1x128x128xf32>
    %55 = vector.shape_cast %54 : vector<1x128x128xf32> to vector<128x128xf32>
    %cst_27 = arith.constant dense<0.000000e+00> : vector<256x128xf32>
    %56 = tpu.matmul %53, %55, %cst_27 {dimension_numbers = #tpu.dot_dimension_numbers<[1], [0], [0], [1], [0, 0, 1, 1], [], []>} : vector<256x128xf32>, vector<128x128xf32>, vector<256x128xf32> -> vector<256x128xf32>
    %57 = arith.addf %51, %56 : vector<256x128xf32>
    %58 = vector.extract_strided_slice %34 {offsets = [1, 1, 0], sizes = [16, 16, 128], strides = [1, 1, 1]} : vector<18x18x128xf32> to vector<16x16x128xf32>
    %59 = vector.shape_cast %58 : vector<16x16x128xf32> to vector<256x128xf32>
    %c4 = arith.constant 4 : index
    %c0_28 = arith.constant 0 : index
    %c0_29 = arith.constant 0 : index
    %60 = vector.load %arg6[%c4, %c0_28, %c0_29] : memref<9x128x128xf32, #tpu.memory_space<vmem>>, vector<1x128x128xf32>
    %61 = vector.shape_cast %60 : vector<1x128x128xf32> to vector<128x128xf32>
    %cst_30 = arith.constant dense<0.000000e+00> : vector<256x128xf32>
    %62 = tpu.matmul %59, %61, %cst_30 {dimension_numbers = #tpu.dot_dimension_numbers<[1], [0], [0], [1], [0, 0, 1, 1], [], []>} : vector<256x128xf32>, vector<128x128xf32>, vector<256x128xf32> -> vector<256x128xf32>
    %63 = arith.addf %57, %62 : vector<256x128xf32>
    %64 = vector.extract_strided_slice %34 {offsets = [1, 2, 0], sizes = [16, 16, 128], strides = [1, 1, 1]} : vector<18x18x128xf32> to vector<16x16x128xf32>
    %65 = vector.shape_cast %64 : vector<16x16x128xf32> to vector<256x128xf32>
    %c5 = arith.constant 5 : index
    %c0_31 = arith.constant 0 : index
    %c0_32 = arith.constant 0 : index
    %66 = vector.load %arg6[%c5, %c0_31, %c0_32] : memref<9x128x128xf32, #tpu.memory_space<vmem>>, vector<1x128x128xf32>
    %67 = vector.shape_cast %66 : vector<1x128x128xf32> to vector<128x128xf32>
    %cst_33 = arith.constant dense<0.000000e+00> : vector<256x128xf32>
    %68 = tpu.matmul %65, %67, %cst_33 {dimension_numbers = #tpu.dot_dimension_numbers<[1], [0], [0], [1], [0, 0, 1, 1], [], []>} : vector<256x128xf32>, vector<128x128xf32>, vector<256x128xf32> -> vector<256x128xf32>
    %69 = arith.addf %63, %68 : vector<256x128xf32>
    %70 = vector.extract_strided_slice %34 {offsets = [2, 0, 0], sizes = [16, 16, 128], strides = [1, 1, 1]} : vector<18x18x128xf32> to vector<16x16x128xf32>
    %71 = vector.shape_cast %70 : vector<16x16x128xf32> to vector<256x128xf32>
    %c6 = arith.constant 6 : index
    %c0_34 = arith.constant 0 : index
    %c0_35 = arith.constant 0 : index
    %72 = vector.load %arg6[%c6, %c0_34, %c0_35] : memref<9x128x128xf32, #tpu.memory_space<vmem>>, vector<1x128x128xf32>
    %73 = vector.shape_cast %72 : vector<1x128x128xf32> to vector<128x128xf32>
    %cst_36 = arith.constant dense<0.000000e+00> : vector<256x128xf32>
    %74 = tpu.matmul %71, %73, %cst_36 {dimension_numbers = #tpu.dot_dimension_numbers<[1], [0], [0], [1], [0, 0, 1, 1], [], []>} : vector<256x128xf32>, vector<128x128xf32>, vector<256x128xf32> -> vector<256x128xf32>
    %75 = arith.addf %69, %74 : vector<256x128xf32>
    %76 = vector.extract_strided_slice %34 {offsets = [2, 1, 0], sizes = [16, 16, 128], strides = [1, 1, 1]} : vector<18x18x128xf32> to vector<16x16x128xf32>
    %77 = vector.shape_cast %76 : vector<16x16x128xf32> to vector<256x128xf32>
    %c7 = arith.constant 7 : index
    %c0_37 = arith.constant 0 : index
    %c0_38 = arith.constant 0 : index
    %78 = vector.load %arg6[%c7, %c0_37, %c0_38] : memref<9x128x128xf32, #tpu.memory_space<vmem>>, vector<1x128x128xf32>
    %79 = vector.shape_cast %78 : vector<1x128x128xf32> to vector<128x128xf32>
    %cst_39 = arith.constant dense<0.000000e+00> : vector<256x128xf32>
    %80 = tpu.matmul %77, %79, %cst_39 {dimension_numbers = #tpu.dot_dimension_numbers<[1], [0], [0], [1], [0, 0, 1, 1], [], []>} : vector<256x128xf32>, vector<128x128xf32>, vector<256x128xf32> -> vector<256x128xf32>
    %81 = arith.addf %75, %80 : vector<256x128xf32>
    %82 = vector.extract_strided_slice %34 {offsets = [2, 2, 0], sizes = [16, 16, 128], strides = [1, 1, 1]} : vector<18x18x128xf32> to vector<16x16x128xf32>
    %83 = vector.shape_cast %82 : vector<16x16x128xf32> to vector<256x128xf32>
    %c8 = arith.constant 8 : index
    %c0_40 = arith.constant 0 : index
    %c0_41 = arith.constant 0 : index
    %84 = vector.load %arg6[%c8, %c0_40, %c0_41] : memref<9x128x128xf32, #tpu.memory_space<vmem>>, vector<1x128x128xf32>
    %85 = vector.shape_cast %84 : vector<1x128x128xf32> to vector<128x128xf32>
    %cst_42 = arith.constant dense<0.000000e+00> : vector<256x128xf32>
    %86 = tpu.matmul %83, %85, %cst_42 {dimension_numbers = #tpu.dot_dimension_numbers<[1], [0], [0], [1], [0, 0, 1, 1], [], []>} : vector<256x128xf32>, vector<128x128xf32>, vector<256x128xf32> -> vector<256x128xf32>
    %87 = arith.addf %81, %86 : vector<256x128xf32>
    %88 = vector.shape_cast %87 : vector<256x128xf32> to vector<1x16x16x128xf32>
    %c0_43 = arith.constant 0 : index
    %c0_44 = arith.constant 0 : index
    %c0_45 = arith.constant 0 : index
    %c0_46 = arith.constant 0 : index
    %89 = vector.load %arg7[%c0_43, %c0_44, %c0_45, %c0_46] : memref<1x16x16x128xf32, #tpu.memory_space<vmem>>, vector<1x16x16x128xf32>
    tpu.vector_store %arg7[%c0_43, %c0_44, %c0_45, %c0_46], %88 {strides = array<i32>} : memref<1x16x16x128xf32, #tpu.memory_space<vmem>>, vector<1x16x16x128xf32>,
    return
  }
  func.func @transform_0(%arg0: i32, %arg1: i32) -> (i32, i32, i32, i32) {
    %c0_i32 = arith.constant 0 : i32
    %c0_i32_0 = arith.constant 0 : i32
    %c0_i32_1 = arith.constant 0 : i32
    return %arg0, %arg1, %c0_i32, %c0_i32_0 : i32, i32, i32, i32
  }
  func.func @transform_1(%arg0: i32, %arg1: i32) -> (i32, i32, i32, i32) {
    %c1_i32 = arith.constant 1 : i32
    %0 = arith.addi %arg1, %c1_i32 : i32
    %c2_i32 = arith.constant 2 : i32
    %1 = arith.muli %0, %c2_i32 : i32
    %c0_i32 = arith.constant 0 : i32
    %c0_i32_0 = arith.constant 0 : i32
    %c0_i32_1 = arith.constant 0 : i32
    return %arg0, %1, %c0_i32, %c0_i32_0 : i32, i32, i32, i32
  }
  func.func @transform_2(%arg0: i32, %arg1: i32) -> (i32, i32) {
    %c0_i32 = arith.constant 0 : i32
    %c0_i32_0 = arith.constant 0 : i32
    %c0_i32_1 = arith.constant 0 : i32
    return %c0_i32, %c0_i32_0 : i32, i32
  }
  func.func @transform_3(%arg0: i32, %arg1: i32) -> (i32, i32) {
    %c0_i32 = arith.constant 0 : i32
    %c0_i32_0 = arith.constant 0 : i32
    %c0_i32_1 = arith.constant 0 : i32
    return %c0_i32, %c0_i32_0 : i32, i32
  }
  func.func @transform_4(%arg0: i32, %arg1: i32) -> (i32, i32, i32) {
    %c0_i32 = arith.constant 0 : i32
    %c0_i32_0 = arith.constant 0 : i32
    %c0_i32_1 = arith.constant 0 : i32
    %c0_i32_2 = arith.constant 0 : i32
    return %c0_i32, %c0_i32_0, %c0_i32_1 : i32, i32, i32
  }
  func.func @transform_5(%arg0: i32, %arg1: i32) -> (i32, i32, i32, i32) {
    %c0_i32 = arith.constant 0 : i32
    %c0_i32_0 = arith.constant 0 : i32
    %c0_i32_1 = arith.constant 0 : i32
    return %arg0, %arg1, %c0_i32, %c0_i32_0 : i32, i32, i32, i32
  }
}

</mosaic_0001>

<bundles_post_ra>
// kernel: unet_up_forward.7
= control target key start
LH: loop header
LB: loop body
LE: loop exit
PB: predicated region body
PF: predicated region fallthrough
CT: control target
= control target key end

     0   :  { %v141_v0 = vmov 0.0   ;;  %s227_s0 = inlined_call_operand.vmem [shape: f32[128,128], index: 0, kind: input, shape index: {}]   ;;  %s228_s1 = inlined_call_operand.vmem [shape: f32[1,128], index: 1, kind: input, shape index: {}]   ;;  %s229_s2 = inlined_call_operand.vmem [shape: f32[1,128], index: 2, kind: input, shape index: {}]   ;;  %s230_s3 = inlined_call_operand.vmem [shape: f32[1,128], index: 3, kind: output, shape index: {0}]   ;;  %s231_s4 = inlined_call_operand.vmem [shape: f32[1,128], index: 4, kind: output, shape index: {1}]  }
   0x1   :  { %20 = vst [vmem:[#allocation2] sm:$0x1] %v141_v0  ;;  %v22_v1 = vld [vmem:[%s227_s0] sm:$0xff]  ;;  %v23_v2 = vld [vmem:[%s227_s0 + $0x8] sm:$0xff]  ;;  %v24_v3 = vld [vmem:[%s227_s0 + $0x10] sm:$0xff] }
   0x2   :  { %21 = vst [vmem:[#allocation3] sm:$0x1] %v141_v0  ;;  %v25_v4 = vld [vmem:[%s227_s0 + $0x18] sm:$0xff]  ;;  %v39_v5 = vadd.f32 %v23_v2, %v22_v1  ;;  %v63_v6 = vmul.f32 %v22_v1, %v22_v1  ;;  %v64_v7 = vmul.f32 %v23_v2, %v23_v2  ;;  %v65_v8 = vmul.f32 %v24_v3, %v24_v3  ;;  %v26_v9 = vld [vmem:[%s227_s0 + $0x20] sm:$0xff]  ;;  %v27_v13 = vld [vmem:[%s227_s0 + $0x28] sm:$0xff] }
   0x3   :  { %v66_v11 = vmul.f32 %v25_v4, %v25_v4  ;;  %v67_v15 = vmul.f32 %v26_v9, %v26_v9  ;;  %v28_v17 = vld [vmem:[%s227_s0 + $0x30] sm:$0xff]  ;;  %v68_v19 = vmul.f32 %v27_v13, %v27_v13  ;;  %v29_v21 = vld [vmem:[%s227_s0 + $0x38] sm:$0xff]  ;;  %v30_v25 = vld [vmem:[%s227_s0 + $0x40] sm:$0xff] }
   0x4   :  { %v40_v10 = vadd.f32 %v39_v5, %v24_v3  ;;  %v79_v12 = vadd.f32 %v64_v7, %v63_v6  ;;  %v69_v23 = vmul.f32 %v28_v17, %v28_v17  ;;  %v70_v27 = vmul.f32 %v29_v21, %v29_v21  ;;  %v31_v29 = vld [vmem:[%s227_s0 + $0x48] sm:$0xff]  ;;  %v32_v33 = vld [vmem:[%s227_s0 + $0x50] sm:$0xff]  ;;  %v33_v37 = vld [vmem:[%s227_s0 + $0x58] sm:$0xff] }
   0x5   :  { %v71_v31 = vmul.f32 %v30_v25, %v30_v25  ;;  %v72_v35 = vmul.f32 %v31_v29, %v31_v29  ;;  %v73_v39 = vmul.f32 %v32_v33, %v32_v33  ;;  %v34_v41 = vld [vmem:[%s227_s0 + $0x60] sm:$0xff]  ;;  %v74_v43 = vmul.f32 %v33_v37, %v33_v37  ;;  %v35_v45 = vld [vmem:[%s227_s0 + $0x68] sm:$0xff]  ;;  %v36_v49 = vld [vmem:[%s227_s0 + $0x70] sm:$0xff] }
   0x6   :  { %v41_v14 = vadd.f32 %v40_v10, %v25_v4  ;;  %v80_v16 = vadd.f32 %v79_v12, %v65_v8  ;;  %v75_v47 = vmul.f32 %v34_v41, %v34_v41  ;;  %v76_v51 = vmul.f32 %v35_v45, %v35_v45  ;;  %v37_v53 = vld [vmem:[%s227_s0 + $0x78] sm:$0xff] }
   0x7   :  { %v77_v55 = vmul.f32 %v36_v49, %v36_v49  ;;  %v78_v58 = vmul.f32 %v37_v53, %v37_v53 }
   0x8   :  { %v42_v18 = vadd.f32 %v41_v14, %v26_v9  ;;  %v81_v20 = vadd.f32 %v80_v16, %v66_v11  ;;  %v38_v7 = vld [vmem:[#allocation2] sm:$0x1] }
   0x9   :  { %v62_v12 = vld [vmem:[#allocation3] sm:$0x1] }
   0xa   :  { %v43_v22 = vadd.f32 %v42_v18, %v27_v13  ;;  %v82_v24 = vadd.f32 %v81_v20, %v67_v15 }
   0xc   :  { %v44_v26 = vadd.f32 %v43_v22, %v28_v17  ;;  %v83_v28 = vadd.f32 %v82_v24, %v68_v19 }
   0xe   :  { %v45_v30 = vadd.f32 %v44_v26, %v29_v21  ;;  %v84_v32 = vadd.f32 %v83_v28, %v69_v23  ;;  %v112_v28 = vld [vmem:[%s228_s1] sm:$0x1] }
  0x10   :  { %v46_v34 = vadd.f32 %v45_v30, %v30_v25  ;;  %v85_v36 = vadd.f32 %v84_v32, %v70_v27  ;;  %v126_v32 = vld [vmem:[%s229_s2] sm:$0x1] }
  0x12   :  { %v47_v38 = vadd.f32 %v46_v34, %v31_v29  ;;  %v86_v40 = vadd.f32 %v85_v36, %v71_v31 }
  0x14   :  { %v48_v42 = vadd.f32 %v47_v38, %v32_v33  ;;  %v87_v44 = vadd.f32 %v86_v40, %v72_v35 }
  0x16   :  { %v49_v46 = vadd.f32 %v48_v42, %v33_v37  ;;  %v88_v48 = vadd.f32 %v87_v44, %v73_v39 }
  0x18   :  { %v50_v50 = vadd.f32 %v49_v46, %v34_v41  ;;  %v89_v52 = vadd.f32 %v88_v48, %v74_v43 }
  0x1a   :  { %v51_v54 = vadd.f32 %v50_v50, %v35_v45  ;;  %v90_v56 = vadd.f32 %v89_v52, %v75_v47 }
  0x1c   :  { %v52_v57 = vadd.f32 %v51_v54, %v36_v49  ;;  %v91_v59 = vadd.f32 %v90_v56, %v76_v51 }
  0x1e   :  { %v53_v60 = vadd.f32 %v52_v57, %v37_v53  ;;  %v92_v61 = vadd.f32 %v91_v59, %v77_v55 }
  0x20   :  { %v54_v62 = vrot.slane %v53_v60, 4  ;;  %v93_v63 = vadd.f32 %v92_v61, %v78_v58 }
  0x22   :  { %v55_v0 = vadd.f32 %v54_v62, %v53_v60  ;;  %v94_v1 = vrot.slane %v93_v63, 4 }
  0x24   :  { %v56_v2 = vrot.slane %v55_v0, 2  ;;  %v95_v3 = vadd.f32 %v94_v1, %v93_v63 }
  0x26   :  { %v57_v4 = vadd.f32 %v56_v2, %v55_v0  ;;  %v96_v5 = vrot.slane %v95_v3, 2 }
  0x28   :  { %v58_v6 = vrot.slane %v57_v4, 1  ;;  %v97_v8 = vadd.f32 %v96_v5, %v95_v3 }
  0x2a   :  { %v59_v9 = vadd.f32 %v58_v6, %v57_v4  ;;  %v98_v10 = vrot.slane %v97_v8, 1 }
  0x2c   :  { %v60_v11 = vadd.f32 %v59_v9, %v38_v7  ;;  %v99_v13 = vadd.f32 %v98_v10, %v97_v8 }
  0x2e   :  { %61 = vst [vmem:[#allocation2] sm:$0x1] %v60_v11  ;;  %v100_v14 = vadd.f32 %v99_v13, %v62_v12 }
  0x30   :  { %101 = vst [vmem:[#allocation3] sm:$0x1] %v100_v14 }
  0x35   :  { %v105_v15 = vld [vmem:[#allocation2] sm:$0x1] }
  0x36   :  { %v106_v16 = vmul.f32 0.0078125, %v105_v15 }
  0x37   :  { %v107_v17 = vld [vmem:[#allocation3] sm:$0x1] }
  0x38   :  { %v109_v18 = vmul.f32 %v106_v16, %v106_v16  ;;  %v108_v19 = vmul.f32 0.0078125, %v107_v17 }
  0x3a   :  { %v110_v20 = vsub.f32 %v108_v19, %v109_v18 }
  0x3c   :  { %v111_v21 = vmax.f32 %v110_v20, 0.0 }
  0x3e   :  { %v113_v22 = vadd.f32 1e-05, %v111_v21 }
  0x40   :  { %139 = vrsqrt.f32 %v113_v22  ;;  %vm120_vm1 = vweird.f32 %v113_v22 }
  0x46   :  { %v140_v23 = vpop.eup %139 }
  0x47   :  { %v115_v24 = vmul.f32 %v140_v23, %v113_v22  ;;  %vm121_vm0 = vweird.f32 %v140_v23 }
  0x48   :  { %vm122_vm2 = vmor %vm120_vm1, %vm121_vm0 }
  0x49   :  { %v116_v25 = vmul.f32 %v140_v23, %v115_v24 }
  0x4b   :  { %v117_v26 = vmul.f32 0.5, %v116_v25 }
  0x4d   :  { %v118_v27 = vsub.f32 1.5, %v117_v26 }
  0x4f   :  { %v119_v29 = vmul.f32 %v140_v23, %v118_v27 }
  0x51   :  { %v123_v30 = vsel %vm122_vm2, %v140_v23, %v119_v29 }
  0x52   :  { %v124_v31 = vmul.f32 %v123_v30, %v112_v28 }
  0x54   :  { %125 = vst [vmem:[%s230_s3] sm:$0x1] %v124_v31  ;;  %v127_v33 = vmul.f32 %v124_v31, %v106_v16 }
  0x56   :  { %v128_v34 = vsub.f32 %v126_v32, %v127_v33 }
  0x58   :  { %129 = vst [vmem:[%s231_s4] sm:$0x1] %v128_v34 }

// kernel: unet_up_forward.8
= control target key start
LH: loop header
LB: loop body
LE: loop exit
PB: predicated region body
PF: predicated region fallthrough
CT: control target
= control target key end

     0   :  { %s791_s18 = smov 0   ;;  %s793_s19 = smov 0   ;;  %s1135_s0 = inlined_call_operand.vmem [shape: f32[2,8,8,128], index: 0, kind: input, shape index: {}]   ;;  %s1136_s1 = inlined_call_operand.vmem [shape: f32[1,128], index: 1, kind: input, shape index: {}]   ;;  %s1137_s2 = inlined_call_operand.vmem [shape: f32[1,128], index: 2, kind: input, shape index: {}]   ;;  %s1138_s3 = inlined_call_operand.vmem [shape: f32[2,128,256], index: 3, kind: input, shape index: {}]   ;;  %s1139_s4 = inlined_call_operand.vmem [shape: f32[1,256], index: 4, kind: input, shape index: {}]   ;;  %s1140_s5 = inlined_call_operand.vmem [shape: f32[2,16,8,256], index: 5, kind: output, shape index: {}]  }
   0x1   :  { %s795_s20 = smov 0  }
   0x2 LB: > { %s27_s21 = sadd.s32 1, %s755_s19  ;;  %p670_p0 = scmp.ge.s32.totalorder %s759_s20, 1  ;;  %s759_s20 = sphi %s795_s20, %s15_s20   ;;  %s755_s19 = sphi %s793_s19, %s1142_s19   ;;  %s751_s18 = sphi %s791_s18, %s1141_s18  }
   0x3   : > { %p29_p1 = scmp.ge.s32.totalorder %s27_s21, 2  ;;  %p208_p2 = scmp.lt.s32.totalorder %s759_s20, 3 }
   0x5   : > { %s1144_s21 = smov (%p29_p1, %s27_s21), 0  ;;  %p209_p3 = pnand %p670_p0, %p208_p2 }
   0x6   : > { %p246_p4 = scmp.lt.s32.totalorder (!%p209_p3), %s751_s18, 1 }
   0x7   : > { %212 = sbr.rel (%p209_p3) target bundleno = 236 (0xec), region = 40 }
   0xc   : > { %v705_v0 = vld [vmem:[%s1138_s3 + $0x1f0] sm:$0xff]  ;;  %v706_v1 = vld [vmem:[%s1138_s3 + $0x1f8] sm:$0xff]  ;;  %v703_v2 = vld [vmem:[%s1138_s3 + $0x1e0] sm:$0xff]  ;;  %s1146_s18 = smov (!%p246_p4, %s751_s18), 1 }
   0xd   : > { %459 = vmatpush.msra.mxu2 %v705_v0  ;;  %500 = vmatpush.msra.mxu3 %v706_v1  ;;  %v704_v3 = vld [vmem:[%s1138_s3 + $0x1e8] sm:$0xff]  ;;  %v701_v4 = vld [vmem:[%s1138_s3 + $0x1d0] sm:$0xff]  ;;  %v702_v5 = vld [vmem:[%s1138_s3 + $0x1d8] sm:$0xff]  ;;  %s709_s15 = sshll.u32 %s1146_s18, 6 }
   0xe   : > { %v336_v6 = vld [vmem:[%s1138_s3 + $0xf0] sm:$0xff]  ;;  %v337_v7 = vld [vmem:[%s1138_s3 + $0xf8] sm:$0xff]  ;;  %v334_v8 = vld [vmem:[%s1138_s3 + $0xe0] sm:$0xff]  ;;  %s932_s11 = scalar_lea.vmem %s1135_s0, %s709_s15 }
   0xf   : > { %460 = vmatpush.msra.mxu2 %v703_v2  ;;  %501 = vmatpush.msra.mxu3 %v704_v3  ;;  %v335_v9 = vld [vmem:[%s1138_s3 + $0xe8] sm:$0xff]  ;;  %v699_v10 = vld [vmem:[%s1138_s3 + $0x1c0] sm:$0xff]  ;;  %v332_v12 = vld [vmem:[%s1138_s3 + $0xd0] sm:$0xff] }
  0x10   : > { %344 = vmatpush.msra.mxu0 %v336_v6  ;;  %385 = vmatpush.msra.mxu1 %v337_v7  ;;  %v700_v11 = vld [vmem:[%s1138_s3 + $0x1c8] sm:$0xff]  ;;  %v333_v13 = vld [vmem:[%s1138_s3 + $0xd8] sm:$0xff]  ;;  %v697_v14 = vld [vmem:[%s1138_s3 + $0x1b0] sm:$0xff] }
  0x11   : > { %461 = vmatpush.msra.mxu2 %v701_v4  ;;  %502 = vmatpush.msra.mxu3 %v702_v5  ;;  %v698_v15 = vld [vmem:[%s1138_s3 + $0x1b8] sm:$0xff]  ;;  %v330_v16 = vld [vmem:[%s1138_s3 + $0xc0] sm:$0xff]  ;;  %v331_v17 = vld [vmem:[%s1138_s3 + $0xc8] sm:$0xff] }
  0x12   : > { %345 = vmatpush.msra.mxu0 %v334_v8  ;;  %386 = vmatpush.msra.mxu1 %v335_v9  ;;  %v695_v18 = vld [vmem:[%s1138_s3 + $0x1a0] sm:$0xff]  ;;  %v696_v19 = vld [vmem:[%s1138_s3 + $0x1a8] sm:$0xff]  ;;  %v328_v20 = vld [vmem:[%s1138_s3 + $0xb0] sm:$0xff] }
  0x13   : > { %462 = vmatpush.msra.mxu2 %v699_v10  ;;  %503 = vmatpush.msra.mxu3 %v700_v11  ;;  %v329_v21 = vld [vmem:[%s1138_s3 + $0xb8] sm:$0xff]  ;;  %v693_v22 = vld [vmem:[%s1138_s3 + $0x190] sm:$0xff]  ;;  %v326_v24 = vld [vmem:[%s1138_s3 + $0xa0] sm:$0xff] }
  0x14   : > { %346 = vmatpush.msra.mxu0 %v332_v12  ;;  %387 = vmatpush.msra.mxu1 %v333_v13  ;;  %v694_v23 = vld [vmem:[%s1138_s3 + $0x198] sm:$0xff]  ;;  %v327_v25 = vld [vmem:[%s1138_s3 + $0xa8] sm:$0xff]  ;;  %v691_v26 = vld [vmem:[%s1138_s3 + $0x180] sm:$0xff] }
  0x15   : > { %463 = vmatpush.msra.mxu2 %v697_v14  ;;  %504 = vmatpush.msra.mxu3 %v698_v15  ;;  %v692_v27 = vld [vmem:[%s1138_s3 + $0x188] sm:$0xff]  ;;  %v324_v28 = vld [vmem:[%s1138_s3 + $0x90] sm:$0xff]  ;;  %v325_v29 = vld [vmem:[%s1138_s3 + $0x98] sm:$0xff] }
  0x16   : > { %347 = vmatpush.msra.mxu0 %v330_v16  ;;  %388 = vmatpush.msra.mxu1 %v331_v17  ;;  %v689_v30 = vld [vmem:[%s1138_s3 + $0x170] sm:$0xff]  ;;  %v690_v31 = vld [vmem:[%s1138_s3 + $0x178] sm:$0xff]  ;;  %v322_v32 = vld [vmem:[%s1138_s3 + $0x80] sm:$0xff] }
  0x17   : > { %464 = vmatpush.msra.mxu2 %v695_v18  ;;  %505 = vmatpush.msra.mxu3 %v696_v19  ;;  %v323_v33 = vld [vmem:[%s1138_s3 + $0x88] sm:$0xff]  ;;  %v687_v34 = vld [vmem:[%s1138_s3 + $0x160] sm:$0xff]  ;;  %v685_v36 = vld [vmem:[%s1138_s3 + $0x150] sm:$0xff] }
  0x18   : > { %348 = vmatpush.msra.mxu0 %v328_v20  ;;  %389 = vmatpush.msra.mxu1 %v329_v21  ;;  %v688_v35 = vld [vmem:[%s1138_s3 + $0x168] sm:$0xff]  ;;  %v686_v37 = vld [vmem:[%s1138_s3 + $0x158] sm:$0xff]  ;;  %v320_v38 = vld [vmem:[%s1138_s3 + $0x70] sm:$0xff] }
  0x19   : > { %465 = vmatpush.msra.mxu2 %v693_v22  ;;  %506 = vmatpush.msra.mxu3 %v694_v23  ;;  %v321_v39 = vld [vmem:[%s1138_s3 + $0x78] sm:$0xff]  ;;  %v683_v40 = vld [vmem:[%s1138_s3 + $0x140] sm:$0xff]  ;;  %v684_v41 = vld [vmem:[%s1138_s3 + $0x148] sm:$0xff] }
  0x1a   : > { %349 = vmatpush.msra.mxu0 %v326_v24  ;;  %390 = vmatpush.msra.mxu1 %v327_v25  ;;  %v318_v42 = vld [vmem:[%s1138_s3 + $0x60] sm:$0xff]  ;;  %v319_v43 = vld [vmem:[%s1138_s3 + $0x68] sm:$0xff]  ;;  %v316_v47 = vld [vmem:[%s1138_s3 + $0x50] sm:$0xff] }
  0x1b   : > { %466 = vmatpush.msra.mxu2 %v691_v26  ;;  %507 = vmatpush.msra.mxu3 %v692_v27  ;;  %v266_v44 = vld [vmem:[%s932_s11] sm:$0xff]  ;;  %v317_v48 = vld [vmem:[%s1138_s3 + $0x58] sm:$0xff]  ;;  %v681_v49 = vld [vmem:[%s1138_s3 + $0x130] sm:$0xff] }
  0x1c   : > { %350 = vmatpush.msra.mxu0 %v324_v28  ;;  %391 = vmatpush.msra.mxu1 %v325_v29  ;;  %v959_v45 = vld [vmem:[%s1136_s1] ss:$0 sm:$0xff]  ;;  %v682_v50 = vld [vmem:[%s1138_s3 + $0x138] sm:$0xff]  ;;  %v315_v53 = vld [vmem:[%s1138_s3 + $0x48] sm:$0xff] }
  0x1d   : > { %467 = vmatpush.msra.mxu2 %v689_v30  ;;  %508 = vmatpush.msra.mxu3 %v690_v31  ;;  %v964_v46 = vld [vmem:[%s1137_s2] ss:$0 sm:$0xff]  ;;  %v278_v51 = vmul.f32 %v959_v45, %v266_v44  ;;  %v680_v55 = vld [vmem:[%s1138_s3 + $0x128] sm:$0xff]  ;;  %v312_v57 = vld [vmem:[%s1138_s3 + $0x30] sm:$0xff] }
  0x1e   : > { %351 = vmatpush.msra.mxu0 %v322_v32  ;;  %392 = vmatpush.msra.mxu1 %v323_v33  ;;  %v314_v52 = vld [vmem:[%s1138_s3 + $0x40] sm:$0xff]  ;;  %v313_v58 = vld [vmem:[%s1138_s3 + $0x38] sm:$0xff]  ;;  %v267_v59 = vld [vmem:[%s932_s11 + $0x8] sm:$0xff] }
  0x1f   : > { %468 = vmatpush.msra.mxu2 %v687_v34  ;;  %509 = vmatpush.msra.mxu3 %v688_v35  ;;  %v679_v54 = vld [vmem:[%s1138_s3 + $0x120] sm:$0xff]  ;;  %v290_v56 = vadd.f32 %v964_v46, %v278_v51  ;;  %v677_v60 = vld [vmem:[%s1138_s3 + $0x110] sm:$0xff]  ;;  %v678_v61 = vld [vmem:[%s1138_s3 + $0x118] sm:$0xff]  ;;  %v279_v3 = vmul.f32 %v959_v45, %v267_v59 }
  0x20   : > { %352 = vmatpush.msra.mxu0 %v320_v38  ;;  %393 = vmatpush.msra.mxu1 %v321_v39  ;;  %v310_v62 = vld [vmem:[%s1138_s3 + $0x20] sm:$0xff]  ;;  %v311_v63 = vld [vmem:[%s1138_s3 + $0x28] sm:$0xff]  ;;  %v308_v4 = vld [vmem:[%s1138_s3 + $0x10] sm:$0xff] }
  0x21   : > { %469 = vmatpush.msra.mxu2 %v685_v36  ;;  %510 = vmatpush.msra.mxu3 %v686_v37  ;;  %v675_v0 = vld [vmem:[%s1138_s3 + $0x100] sm:$0xff]  ;;  %v676_v1 = vld [vmem:[%s1138_s3 + $0x108] sm:$0xff]  ;;  %v298_v2 = vmax.f32 %v290_v56, 0.0  ;;  %v309_v5 = vld [vmem:[%s1138_s3 + $0x18] sm:$0xff]  ;;  %v291_v8 = vadd.f32 %v964_v46, %v279_v3 }
  0x22   : > { %353 = vmatpush.msra.mxu0 %v318_v42  ;;  %394 = vmatpush.msra.mxu1 %v319_v43  ;;  %v306_v6 = vld [vmem:[%s1138_s3] sm:$0xff]  ;;  %v307_v7 = vld [vmem:[%s1138_s3 + $0x8] sm:$0xff]  ;;  %v268_v9 = vld [vmem:[%s932_s11 + $0x10] sm:$0xff] }
  0x23   : > { %470 = vmatpush.msra.mxu2 %v683_v40  ;;  %511 = vmatpush.msra.mxu3 %v684_v41  ;;  %v299_v10 = vmax.f32 %v291_v8, 0.0  ;;  %v280_v11 = vmul.f32 %v959_v45, %v268_v9  ;;  %v269_v13 = vld [vmem:[%s932_s11 + $0x18] sm:$0xff]  ;;  %v270_v17 = vld [vmem:[%s932_s11 + $0x20] sm:$0xff]  ;;  %v271_v21 = vld [vmem:[%s932_s11 + $0x28] sm:$0xff] }
  0x24   : > { %354 = vmatpush.msra.mxu0 %v316_v47  ;;  %395 = vmatpush.msra.mxu1 %v317_v48  ;;  %v281_v15 = vmul.f32 %v959_v45, %v269_v13  ;;  %v282_v19 = vmul.f32 %v959_v45, %v270_v17  ;;  %v283_v23 = vmul.f32 %v959_v45, %v271_v21  ;;  %v272_v25 = vld [vmem:[%s932_s11 + $0x30] sm:$0xff]  ;;  %v273_v29 = vld [vmem:[%s932_s11 + $0x38] sm:$0xff]  ;;  %v338_v34 = vld [vmem:[%s1139_s4] sm:$0x3]  ;;  %s710_s11 = sshll.u32 %s1146_s18, 8 }
  0x25   : > { %471 = vmatpush.msra.mxu2 %v681_v49  ;;  %512 = vmatpush.msra.mxu3 %v682_v50  ;;  %v292_v12 = vadd.f32 %v964_v46, %v280_v11  ;;  %v284_v27 = vmul.f32 %v959_v45, %v272_v25  ;;  %v285_v31 = vmul.f32 %v959_v45, %v273_v29  ;;  %v1053_v35 = vperm.slane %v338_v34, 0  ;;  %s1060_s14 = scalar_lea.vmem %s1140_s5, %s710_s11 }
  0x26   : > { %355 = vmatpush.msra.mxu0 %v314_v52  ;;  %396 = vmatpush.msra.mxu1 %v315_v53  ;;  %v293_v16 = vadd.f32 %v964_v46, %v281_v15  ;;  %v294_v20 = vadd.f32 %v964_v46, %v282_v19  ;;  %v295_v24 = vadd.f32 %v964_v46, %v283_v23  ;;  %v1055_v36 = vperm.slane %v338_v34, 1 }
  0x27   : > { %472 = vmatpush.msra.mxu2 %v679_v54  ;;  %513 = vmatpush.msra.mxu3 %v680_v55  ;;  %v300_v14 = vmax.f32 %v292_v12, 0.0  ;;  %v296_v28 = vadd.f32 %v964_v46, %v284_v27  ;;  %v297_v32 = vadd.f32 %v964_v46, %v285_v31 }
  0x28   : > { %356 = vmatpush.msra.mxu0 %v312_v57  ;;  %397 = vmatpush.msra.mxu1 %v313_v58  ;;  %v301_v18 = vmax.f32 %v293_v16, 0.0  ;;  %v302_v22 = vmax.f32 %v294_v20, 0.0  ;;  %v303_v26 = vmax.f32 %v295_v24, 0.0 }
  0x29   : > { %473 = vmatpush.msra.mxu2 %v677_v60  ;;  %514 = vmatpush.msra.mxu3 %v678_v61  ;;  %v304_v30 = vmax.f32 %v296_v28, 0.0  ;;  %v305_v33 = vmax.f32 %v297_v32, 0.0 }
  0x2a   : > { %357 = vmatpush.msra.mxu0 %v310_v62  ;;  %398 = vmatpush.msra.mxu1 %v311_v63 }
  0x2b   : > { %474 = vmatpush.msra.mxu2 %v675_v0  ;;  %515 = vmatpush.msra.mxu3 %v676_v1 }
  0x2c   : > { %475 = vmatmul.f32.vlgmr.msra.gmra.mxu2 %v298_v2  ;;  %516 = vmatmul.f32.vlgmr.msra.gmra.mxu3 %v298_v2 }
  0x2d   : > { %358 = vmatpush.msra.mxu0 %v308_v4  ;;  %399 = vmatpush.msra.mxu1 %v309_v5 }
  0x2f   : > { %359 = vmatpush.msra.mxu0 %v306_v6  ;;  %400 = vmatpush.msra.mxu1 %v307_v7 }
  0x30   : > { %360 = vmatmul.f32.vlgmr.msra.gmra.mxu0 %v298_v2  ;;  %401 = vmatmul.f32.vlgmr.msra.gmra.mxu1 %v298_v2 }
  0x34   : > { %478 = vmatmul.f32.gmra.mxu2 %v299_v10  ;;  %519 = vmatmul.f32.gmra.mxu3 %v299_v10 }
  0x38   : > { %363 = vmatmul.f32.gmra.mxu0 %v299_v10  ;;  %404 = vmatmul.f32.gmra.mxu1 %v299_v10 }
  0x3c   : > { %481 = vmatmul.f32.gmra.mxu2 %v300_v14  ;;  %522 = vmatmul.f32.gmra.mxu3 %v300_v14 }
  0x40   : > { %366 = vmatmul.f32.gmra.mxu0 %v300_v14  ;;  %407 = vmatmul.f32.gmra.mxu1 %v300_v14 }
  0x44   : > { %484 = vmatmul.f32.gmra.mxu2 %v301_v18  ;;  %525 = vmatmul.f32.gmra.mxu3 %v301_v18 }
  0x48   : > { %369 = vmatmul.f32.gmra.mxu0 %v301_v18  ;;  %410 = vmatmul.f32.gmra.mxu1 %v301_v18 }
  0x4c   : > { %487 = vmatmul.f32.gmra.mxu2 %v302_v22  ;;  %528 = vmatmul.f32.gmra.mxu3 %v302_v22 }
  0x50   : > { %372 = vmatmul.f32.gmra.mxu0 %v302_v22  ;;  %413 = vmatmul.f32.gmra.mxu1 %v302_v22 }
  0x54   : > { %490 = vmatmul.f32.gmra.mxu2 %v303_v26  ;;  %531 = vmatmul.f32.gmra.mxu3 %v303_v26 }
  0x58   : > { %375 = vmatmul.f32.gmra.mxu0 %v303_v26  ;;  %416 = vmatmul.f32.gmra.mxu1 %v303_v26 }
  0x5c   : > { %493 = vmatmul.f32.gmra.mxu2 %v304_v30  ;;  %534 = vmatmul.f32.gmra.mxu3 %v304_v30 }
  0x60   : > { %378 = vmatmul.f32.gmra.mxu0 %v304_v30  ;;  %419 = vmatmul.f32.gmra.mxu1 %v304_v30 }
  0x64   : > { %496 = vmatmul.f32.gmra.mxu2 %v305_v33  ;;  %537 = vmatmul.f32.gmra.mxu3 %v305_v33 }
  0x68   : > { %381 = vmatmul.f32.gmra.mxu0 %v305_v33  ;;  %422 = vmatmul.f32.gmra.mxu1 %v305_v33 }
  0xad   : > { %v361_v37 = vpop.f32.mrf.mxu0  ;;  %v402_v38 = vpop.f32.mrf.mxu1 }
  0xae   : > { %v362_v39 = vadd.f32 %v361_v37, %v1053_v35  ;;  %v403_v40 = vadd.f32 %v402_v38, %v1055_v36 }
  0xaf   : > { %v476_v41 = vpop.f32.mrf.mxu2  ;;  %v517_v42 = vpop.f32.mrf.mxu3 }
  0xb0   : > { %541 = vst [vmem:[%s1060_s14] sm:$0xff] %v362_v39  ;;  %v477_v43 = vadd.f32 %v476_v41, %v1053_v35  ;;  %v518_v44 = vadd.f32 %v517_v42, %v1055_v36 }
  0xb1   : > { %542 = vst [vmem:[%s1060_s14 + $0x8] sm:$0xff] %v403_v40 }
  0xb2   : > { %543 = vst [vmem:[%s1060_s14 + $0x10] sm:$0xff] %v477_v43 }
  0xb3   : > { %544 = vst [vmem:[%s1060_s14 + $0x18] sm:$0xff] %v518_v44 }
  0xb5   : > { %v364_v45 = vpop.f32.mrf.mxu0  ;;  %v405_v46 = vpop.f32.mrf.mxu1 }
  0xb6   : > { %v365_v47 = vadd.f32 %v364_v45, %v1053_v35  ;;  %v406_v48 = vadd.f32 %v405_v46, %v1055_v36 }
  0xb7   : > { %v479_v49 = vpop.f32.mrf.mxu2  ;;  %v520_v50 = vpop.f32.mrf.mxu3 }
  0xb8   : > { %545 = vst [vmem:[%s1060_s14 + $0x20] sm:$0xff] %v365_v47  ;;  %v480_v51 = vadd.f32 %v479_v49, %v1053_v35  ;;  %v521_v52 = vadd.f32 %v520_v50, %v1055_v36 }
  0xb9   : > { %546 = vst [vmem:[%s1060_s14 + $0x28] sm:$0xff] %v406_v48 }
  0xba   : > { %547 = vst [vmem:[%s1060_s14 + $0x30] sm:$0xff] %v480_v51 }
  0xbb   : > { %548 = vst [vmem:[%s1060_s14 + $0x38] sm:$0xff] %v521_v52 }
  0xbd   : > { %v367_v53 = vpop.f32.mrf.mxu0  ;;  %v408_v54 = vpop.f32.mrf.mxu1 }
  0xbe   : > { %v368_v55 = vadd.f32 %v367_v53, %v1053_v35  ;;  %v409_v56 = vadd.f32 %v408_v54, %v1055_v36 }
  0xbf   : > { %v482_v57 = vpop.f32.mrf.mxu2  ;;  %v523_v58 = vpop.f32.mrf.mxu3 }
  0xc0   : > { %549 = vst [vmem:[%s1060_s14 + $0x40] sm:$0xff] %v368_v55  ;;  %v483_v59 = vadd.f32 %v482_v57, %v1053_v35  ;;  %v524_v60 = vadd.f32 %v523_v58, %v1055_v36 }
  0xc1   : > { %550 = vst [vmem:[%s1060_s14 + $0x48] sm:$0xff] %v409_v56 }
  0xc2   : > { %551 = vst [vmem:[%s1060_s14 + $0x50] sm:$0xff] %v483_v59 }
  0xc3   : > { %552 = vst [vmem:[%s1060_s14 + $0x58] sm:$0xff] %v524_v60 }
  0xc5   : > { %v370_v61 = vpop.f32.mrf.mxu0  ;;  %v411_v62 = vpop.f32.mrf.mxu1 }
  0xc6   : > { %v371_v63 = vadd.f32 %v370_v61, %v1053_v35  ;;  %v412_v0 = vadd.f32 %v411_v62, %v1055_v36 }
  0xc7   : > { %v485_v1 = vpop.f32.mrf.mxu2  ;;  %v526_v2 = vpop.f32.mrf.mxu3 }
  0xc8   : > { %553 = vst [vmem:[%s1060_s14 + $0x60] sm:$0xff] %v371_v63  ;;  %v486_v3 = vadd.f32 %v485_v1, %v1053_v35  ;;  %v527_v4 = vadd.f32 %v526_v2, %v1055_v36 }
  0xc9   : > { %554 = vst [vmem:[%s1060_s14 + $0x68] sm:$0xff] %v412_v0 }
  0xca   : > { %555 = vst [vmem:[%s1060_s14 + $0x70] sm:$0xff] %v486_v3 }
  0xcb   : > { %556 = vst [vmem:[%s1060_s14 + $0x78] sm:$0xff] %v527_v4 }
  0xcd   : > { %v373_v5 = vpop.f32.mrf.mxu0  ;;  %v414_v6 = vpop.f32.mrf.mxu1 }
  0xce   : > { %v374_v7 = vadd.f32 %v373_v5, %v1053_v35  ;;  %v415_v8 = vadd.f32 %v414_v6, %v1055_v36 }
  0xcf   : > { %v488_v9 = vpop.f32.mrf.mxu2  ;;  %v529_v10 = vpop.f32.mrf.mxu3 }
  0xd0   : > { %557 = vst [vmem:[%s1060_s14 + $0x80] sm:$0xff] %v374_v7  ;;  %v489_v11 = vadd.f32 %v488_v9, %v1053_v35  ;;  %v530_v12 = vadd.f32 %v529_v10, %v1055_v36 }
  0xd1   : > { %558 = vst [vmem:[%s1060_s14 + $0x88] sm:$0xff] %v415_v8 }
  0xd2   : > { %559 = vst [vmem:[%s1060_s14 + $0x90] sm:$0xff] %v489_v11 }
  0xd3   : > { %560 = vst [vmem:[%s1060_s14 + $0x98] sm:$0xff] %v530_v12 }
  0xd5   : > { %v376_v13 = vpop.f32.mrf.mxu0  ;;  %v417_v14 = vpop.f32.mrf.mxu1 }
  0xd6   : > { %v377_v15 = vadd.f32 %v376_v13, %v1053_v35  ;;  %v418_v16 = vadd.f32 %v417_v14, %v1055_v36 }
  0xd7   : > { %v491_v17 = vpop.f32.mrf.mxu2  ;;  %v532_v18 = vpop.f32.mrf.mxu3 }
  0xd8   : > { %561 = vst [vmem:[%s1060_s14 + $0xa0] sm:$0xff] %v377_v15  ;;  %v492_v19 = vadd.f32 %v491_v17, %v1053_v35  ;;  %v533_v20 = vadd.f32 %v532_v18, %v1055_v36 }
  0xd9   : > { %562 = vst [vmem:[%s1060_s14 + $0xa8] sm:$0xff] %v418_v16 }
  0xda   : > { %563 = vst [vmem:[%s1060_s14 + $0xb0] sm:$0xff] %v492_v19 }
  0xdb   : > { %564 = vst [vmem:[%s1060_s14 + $0xb8] sm:$0xff] %v533_v20 }
  0xdd   : > { %v379_v21 = vpop.f32.mrf.mxu0  ;;  %v420_v22 = vpop.f32.mrf.mxu1 }
  0xde   : > { %v380_v23 = vadd.f32 %v379_v21, %v1053_v35  ;;  %v421_v24 = vadd.f32 %v420_v22, %v1055_v36 }
  0xdf   : > { %v494_v25 = vpop.f32.mrf.mxu2  ;;  %v535_v26 = vpop.f32.mrf.mxu3 }
  0xe0   : > { %565 = vst [vmem:[%s1060_s14 + $0xc0] sm:$0xff] %v380_v23  ;;  %v495_v27 = vadd.f32 %v494_v25, %v1053_v35  ;;  %v536_v28 = vadd.f32 %v535_v26, %v1055_v36 }
  0xe1   : > { %566 = vst [vmem:[%s1060_s14 + $0xc8] sm:$0xff] %v421_v24 }
  0xe2   : > { %567 = vst [vmem:[%s1060_s14 + $0xd0] sm:$0xff] %v495_v27 }
  0xe3   : > { %568 = vst [vmem:[%s1060_s14 + $0xd8] sm:$0xff] %v536_v28 }
  0xe5   : > { %v382_v29 = vpop.f32.mrf.mxu0  ;;  %v423_v30 = vpop.f32.mrf.mxu1 }
  0xe6   : > { %v383_v31 = vadd.f32 %v382_v29, %v1053_v35  ;;  %v424_v32 = vadd.f32 %v423_v30, %v1055_v36 }
  0xe7   : > { %v497_v33 = vpop.f32.mrf.mxu2  ;;  %v538_v34 = vpop.f32.mrf.mxu3 }
  0xe8   : > { %569 = vst [vmem:[%s1060_s14 + $0xe0] sm:$0xff] %v383_v31  ;;  %v498_v37 = vadd.f32 %v497_v33, %v1053_v35  ;;  %v539_v38 = vadd.f32 %v538_v34, %v1055_v36 }
  0xe9   : > { %570 = vst [vmem:[%s1060_s14 + $0xe8] sm:$0xff] %v424_v32 }
  0xea   : > { %571 = vst [vmem:[%s1060_s14 + $0xf0] sm:$0xff] %v498_v37 }
  0xeb   : > { %572 = vst [vmem:[%s1060_s14 + $0xf8] sm:$0xff] %v539_v38 }
  0xec PF: > { %s15_s20 = sadd.s32 1, %s759_s20   ;;  %s1141_s18 = smov %s755_s19 }
  0xed   : > { %p12_p5 = scmp.ge.s32.totalorder %s15_s20, 4   ;;  %s1142_s19 = smov %s1144_s21 }
  0xef   :  { %14 = sbr.rel (!%p12_p5) target bundleno = 2 (0x2), region = 71 }

// kernel: unet_up_forward.10
= control target key start
LH: loop header
LB: loop body
LE: loop exit
PB: predicated region body
PF: predicated region fallthrough
CT: control target
= control target key end

     0   :  { %v333_v0 = vmov 0.0   ;;  %s563_s0 = inlined_call_operand.vmem [shape: f32[512,128], index: 0, kind: input, shape index: {}]   ;;  %s564_s1 = inlined_call_operand.vmem [shape: f32[1,128], index: 1, kind: input, shape index: {}]   ;;  %s565_s2 = inlined_call_operand.vmem [shape: f32[1,128], index: 2, kind: input, shape index: {}]   ;;  %s566_s3 = inlined_call_operand.vmem [shape: f32[1,128], index: 3, kind: output, shape index: {0}]   ;;  %s567_s4 = inlined_call_operand.vmem [shape: f32[1,128], index: 4, kind: output, shape index: {1}]  }
   0x1   :  { %20 = vst [vmem:[#allocation2] sm:$0x1] %v333_v0  ;;  %v22_v1 = vld [vmem:[%s563_s0] sm:$0xff]  ;;  %v23_v2 = vld [vmem:[%s563_s0 + $0x8] sm:$0xff]  ;;  %v24_v3 = vld [vmem:[%s563_s0 + $0x10] sm:$0xff] }
   0x2   :  { %21 = vst [vmem:[#allocation3] sm:$0x1] %v333_v0  ;;  %v25_v4 = vld [vmem:[%s563_s0 + $0x18] sm:$0xff]  ;;  %v87_v5 = vadd.f32 %v23_v2, %v22_v1  ;;  %v159_v6 = vmul.f32 %v22_v1, %v22_v1  ;;  %v160_v7 = vmul.f32 %v23_v2, %v23_v2  ;;  %v161_v8 = vmul.f32 %v24_v3, %v24_v3  ;;  %v26_v9 = vld [vmem:[%s563_s0 + $0x20] sm:$0xff]  ;;  %v27_v13 = vld [vmem:[%s563_s0 + $0x28] sm:$0xff] }
   0x3   :  { %v162_v11 = vmul.f32 %v25_v4, %v25_v4  ;;  %v163_v15 = vmul.f32 %v26_v9, %v26_v9  ;;  %v28_v17 = vld [vmem:[%s563_s0 + $0x30] sm:$0xff]  ;;  %v164_v19 = vmul.f32 %v27_v13, %v27_v13  ;;  %v29_v21 = vld [vmem:[%s563_s0 + $0x38] sm:$0xff]  ;;  %v30_v25 = vld [vmem:[%s563_s0 + $0x40] sm:$0xff] }
   0x4   :  { %v88_v10 = vadd.f32 %v87_v5, %v24_v3  ;;  %v223_v12 = vadd.f32 %v160_v7, %v159_v6  ;;  %v165_v23 = vmul.f32 %v28_v17, %v28_v17  ;;  %v166_v27 = vmul.f32 %v29_v21, %v29_v21  ;;  %v31_v29 = vld [vmem:[%s563_s0 + $0x48] sm:$0xff]  ;;  %v32_v33 = vld [vmem:[%s563_s0 + $0x50] sm:$0xff]  ;;  %v33_v37 = vld [vmem:[%s563_s0 + $0x58] sm:$0xff] }
   0x5   :  { %v167_v31 = vmul.f32 %v30_v25, %v30_v25  ;;  %v168_v35 = vmul.f32 %v31_v29, %v31_v29  ;;  %v169_v39 = vmul.f32 %v32_v33, %v32_v33  ;;  %v34_v41 = vld [vmem:[%s563_s0 + $0x60] sm:$0xff]  ;;  %v170_v43 = vmul.f32 %v33_v37, %v33_v37  ;;  %v35_v45 = vld [vmem:[%s563_s0 + $0x68] sm:$0xff]  ;;  %v36_v49 = vld [vmem:[%s563_s0 + $0x70] sm:$0xff] }
   0x6   :  { %v89_v14 = vadd.f32 %v88_v10, %v25_v4  ;;  %v224_v16 = vadd.f32 %v223_v12, %v161_v8  ;;  %v171_v47 = vmul.f32 %v34_v41, %v34_v41  ;;  %v172_v51 = vmul.f32 %v35_v45, %v35_v45  ;;  %v37_v53 = vld [vmem:[%s563_s0 + $0x78] sm:$0xff]  ;;  %v38_v57 = vld [vmem:[%s563_s0 + $0x80] sm:$0xff]  ;;  %v39_v61 = vld [vmem:[%s563_s0 + $0x88] sm:$0xff] }
   0x7   :  { %v173_v55 = vmul.f32 %v36_v49, %v36_v49  ;;  %v174_v59 = vmul.f32 %v37_v53, %v37_v53  ;;  %v175_v63 = vmul.f32 %v38_v57, %v38_v57  ;;  %v40_v1 = vld [vmem:[%s563_s0 + $0x90] sm:$0xff]  ;;  %v176_v3 = vmul.f32 %v39_v61, %v39_v61  ;;  %v41_v5 = vld [vmem:[%s563_s0 + $0x98] sm:$0xff] }
   0x8   :  { %v90_v18 = vadd.f32 %v89_v14, %v26_v9  ;;  %v225_v20 = vadd.f32 %v224_v16, %v162_v11  ;;  %v177_v7 = vmul.f32 %v40_v1, %v40_v1  ;;  %v42_v9 = vld [vmem:[%s563_s0 + $0xa0] sm:$0xff]  ;;  %v178_v11 = vmul.f32 %v41_v5, %v41_v5 }
   0xa   :  { %v91_v22 = vadd.f32 %v90_v18, %v27_v13  ;;  %v226_v24 = vadd.f32 %v225_v20, %v163_v15  ;;  %v43_v13 = vld [vmem:[%s563_s0 + $0xa8] sm:$0xff]  ;;  %v179_v15 = vmul.f32 %v42_v9, %v42_v9 }
   0xc   :  { %v92_v26 = vadd.f32 %v91_v22, %v28_v17  ;;  %v227_v28 = vadd.f32 %v226_v24, %v164_v19  ;;  %v44_v17 = vld [vmem:[%s563_s0 + $0xb0] sm:$0xff]  ;;  %v180_v19 = vmul.f32 %v43_v13, %v43_v13 }
   0xe   :  { %v93_v30 = vadd.f32 %v92_v26, %v29_v21  ;;  %v228_v32 = vadd.f32 %v227_v28, %v165_v23  ;;  %v45_v21 = vld [vmem:[%s563_s0 + $0xb8] sm:$0xff]  ;;  %v181_v23 = vmul.f32 %v44_v17, %v44_v17 }
  0x10   :  { %v94_v34 = vadd.f32 %v93_v30, %v30_v25  ;;  %v229_v36 = vadd.f32 %v228_v32, %v166_v27  ;;  %v46_v25 = vld [vmem:[%s563_s0 + $0xc0] sm:$0xff]  ;;  %v182_v27 = vmul.f32 %v45_v21, %v45_v21 }
  0x12   :  { %v95_v38 = vadd.f32 %v94_v34, %v31_v29  ;;  %v230_v40 = vadd.f32 %v229_v36, %v167_v31  ;;  %v47_v29 = vld [vmem:[%s563_s0 + $0xc8] sm:$0xff]  ;;  %v183_v31 = vmul.f32 %v46_v25, %v46_v25 }
  0x14   :  { %v96_v42 = vadd.f32 %v95_v38, %v32_v33  ;;  %v231_v44 = vadd.f32 %v230_v40, %v168_v35  ;;  %v48_v33 = vld [vmem:[%s563_s0 + $0xd0] sm:$0xff]  ;;  %v184_v35 = vmul.f32 %v47_v29, %v47_v29 }
  0x16   :  { %v97_v46 = vadd.f32 %v96_v42, %v33_v37  ;;  %v232_v48 = vadd.f32 %v231_v44, %v169_v39  ;;  %v49_v37 = vld [vmem:[%s563_s0 + $0xd8] sm:$0xff]  ;;  %v185_v39 = vmul.f32 %v48_v33, %v48_v33 }
  0x18   :  { %v98_v50 = vadd.f32 %v97_v46, %v34_v41  ;;  %v233_v52 = vadd.f32 %v232_v48, %v170_v43  ;;  %v50_v41 = vld [vmem:[%s563_s0 + $0xe0] sm:$0xff]  ;;  %v186_v43 = vmul.f32 %v49_v37, %v49_v37 }
  0x1a   :  { %v99_v54 = vadd.f32 %v98_v50, %v35_v45  ;;  %v234_v56 = vadd.f32 %v233_v52, %v171_v47  ;;  %v51_v45 = vld [vmem:[%s563_s0 + $0xe8] sm:$0xff]  ;;  %v187_v47 = vmul.f32 %v50_v41, %v50_v41 }
  0x1c   :  { %v100_v58 = vadd.f32 %v99_v54, %v36_v49  ;;  %v235_v60 = vadd.f32 %v234_v56, %v172_v51  ;;  %v52_v49 = vld [vmem:[%s563_s0 + $0xf0] sm:$0xff]  ;;  %v188_v51 = vmul.f32 %v51_v45, %v51_v45 }
  0x1e   :  { %v101_v62 = vadd.f32 %v100_v58, %v37_v53  ;;  %v236_v0 = vadd.f32 %v235_v60, %v173_v55  ;;  %v53_v53 = vld [vmem:[%s563_s0 + $0xf8] sm:$0xff]  ;;  %v189_v55 = vmul.f32 %v52_v49, %v52_v49 }
  0x20   :  { %v102_v2 = vadd.f32 %v101_v62, %v38_v57  ;;  %v237_v4 = vadd.f32 %v236_v0, %v174_v59  ;;  %v54_v57 = vld [vmem:[%s563_s0 + $0x100] sm:$0xff]  ;;  %v190_v59 = vmul.f32 %v53_v53, %v53_v53 }
  0x22   :  { %v103_v6 = vadd.f32 %v102_v2, %v39_v61  ;;  %v238_v8 = vadd.f32 %v237_v4, %v175_v63  ;;  %v55_v61 = vld [vmem:[%s563_s0 + $0x108] sm:$0xff]  ;;  %v191_v63 = vmul.f32 %v54_v57, %v54_v57 }
  0x24   :  { %v104_v10 = vadd.f32 %v103_v6, %v40_v1  ;;  %v239_v12 = vadd.f32 %v238_v8, %v176_v3  ;;  %v56_v1 = vld [vmem:[%s563_s0 + $0x110] sm:$0xff]  ;;  %v192_v3 = vmul.f32 %v55_v61, %v55_v61 }
  0x26   :  { %v105_v14 = vadd.f32 %v104_v10, %v41_v5  ;;  %v240_v16 = vadd.f32 %v239_v12, %v177_v7  ;;  %v57_v5 = vld [vmem:[%s563_s0 + $0x118] sm:$0xff]  ;;  %v193_v7 = vmul.f32 %v56_v1, %v56_v1 }
  0x28   :  { %v106_v18 = vadd.f32 %v105_v14, %v42_v9  ;;  %v241_v20 = vadd.f32 %v240_v16, %v178_v11  ;;  %v58_v9 = vld [vmem:[%s563_s0 + $0x120] sm:$0xff]  ;;  %v194_v11 = vmul.f32 %v57_v5, %v57_v5 }
  0x2a   :  { %v107_v22 = vadd.f32 %v106_v18, %v43_v13  ;;  %v242_v24 = vadd.f32 %v241_v20, %v179_v15  ;;  %v59_v13 = vld [vmem:[%s563_s0 + $0x128] sm:$0xff]  ;;  %v195_v15 = vmul.f32 %v58_v9, %v58_v9 }
  0x2c   :  { %v108_v26 = vadd.f32 %v107_v22, %v44_v17  ;;  %v243_v28 = vadd.f32 %v242_v24, %v180_v19  ;;  %v60_v17 = vld [vmem:[%s563_s0 + $0x130] sm:$0xff]  ;;  %v196_v19 = vmul.f32 %v59_v13, %v59_v13 }
  0x2e   :  { %v109_v30 = vadd.f32 %v108_v26, %v45_v21  ;;  %v244_v32 = vadd.f32 %v243_v28, %v181_v23  ;;  %v61_v21 = vld [vmem:[%s563_s0 + $0x138] sm:$0xff]  ;;  %v197_v23 = vmul.f32 %v60_v17, %v60_v17 }
  0x30   :  { %v110_v34 = vadd.f32 %v109_v30, %v46_v25  ;;  %v245_v36 = vadd.f32 %v244_v32, %v182_v27  ;;  %v62_v25 = vld [vmem:[%s563_s0 + $0x140] sm:$0xff]  ;;  %v198_v27 = vmul.f32 %v61_v21, %v61_v21 }
  0x32   :  { %v111_v38 = vadd.f32 %v110_v34, %v47_v29  ;;  %v246_v40 = vadd.f32 %v245_v36, %v183_v31  ;;  %v63_v29 = vld [vmem:[%s563_s0 + $0x148] sm:$0xff]  ;;  %v199_v31 = vmul.f32 %v62_v25, %v62_v25 }
  0x34   :  { %v112_v42 = vadd.f32 %v111_v38, %v48_v33  ;;  %v247_v44 = vadd.f32 %v246_v40, %v184_v35  ;;  %v64_v33 = vld [vmem:[%s563_s0 + $0x150] sm:$0xff]  ;;  %v200_v35 = vmul.f32 %v63_v29, %v63_v29 }
  0x36   :  { %v113_v46 = vadd.f32 %v112_v42, %v49_v37  ;;  %v248_v48 = vadd.f32 %v247_v44, %v185_v39  ;;  %v65_v37 = vld [vmem:[%s563_s0 + $0x158] sm:$0xff]  ;;  %v201_v39 = vmul.f32 %v64_v33, %v64_v33 }
  0x38   :  { %v114_v50 = vadd.f32 %v113_v46, %v50_v41  ;;  %v249_v52 = vadd.f32 %v248_v48, %v186_v43  ;;  %v66_v41 = vld [vmem:[%s563_s0 + $0x160] sm:$0xff]  ;;  %v202_v43 = vmul.f32 %v65_v37, %v65_v37 }
  0x3a   :  { %v115_v54 = vadd.f32 %v114_v50, %v51_v45  ;;  %v250_v56 = vadd.f32 %v249_v52, %v187_v47  ;;  %v67_v45 = vld [vmem:[%s563_s0 + $0x168] sm:$0xff]  ;;  %v203_v47 = vmul.f32 %v66_v41, %v66_v41 }
  0x3c   :  { %v116_v58 = vadd.f32 %v115_v54, %v52_v49  ;;  %v251_v60 = vadd.f32 %v250_v56, %v188_v51  ;;  %v68_v49 = vld [vmem:[%s563_s0 + $0x170] sm:$0xff]  ;;  %v204_v51 = vmul.f32 %v67_v45, %v67_v45 }
  0x3e   :  { %v117_v62 = vadd.f32 %v116_v58, %v53_v53  ;;  %v252_v0 = vadd.f32 %v251_v60, %v189_v55  ;;  %v69_v53 = vld [vmem:[%s563_s0 + $0x178] sm:$0xff]  ;;  %v205_v55 = vmul.f32 %v68_v49, %v68_v49 }
  0x40   :  { %v118_v2 = vadd.f32 %v117_v62, %v54_v57  ;;  %v253_v4 = vadd.f32 %v252_v0, %v190_v59  ;;  %v70_v57 = vld [vmem:[%s563_s0 + $0x180] sm:$0xff]  ;;  %v206_v59 = vmul.f32 %v69_v53, %v69_v53 }
  0x42   :  { %v119_v6 = vadd.f32 %v118_v2, %v55_v61  ;;  %v254_v8 = vadd.f32 %v253_v4, %v191_v63  ;;  %v71_v61 = vld [vmem:[%s563_s0 + $0x188] sm:$0xff]  ;;  %v207_v63 = vmul.f32 %v70_v57, %v70_v57 }
  0x44   :  { %v120_v10 = vadd.f32 %v119_v6, %v56_v1  ;;  %v255_v12 = vadd.f32 %v254_v8, %v192_v3  ;;  %v72_v1 = vld [vmem:[%s563_s0 + $0x190] sm:$0xff]  ;;  %v208_v3 = vmul.f32 %v71_v61, %v71_v61 }
  0x46   :  { %v121_v14 = vadd.f32 %v120_v10, %v57_v5  ;;  %v256_v16 = vadd.f32 %v255_v12, %v193_v7  ;;  %v73_v5 = vld [vmem:[%s563_s0 + $0x198] sm:$0xff]  ;;  %v209_v7 = vmul.f32 %v72_v1, %v72_v1 }
  0x48   :  { %v122_v18 = vadd.f32 %v121_v14, %v58_v9  ;;  %v257_v20 = vadd.f32 %v256_v16, %v194_v11  ;;  %v74_v9 = vld [vmem:[%s563_s0 + $0x1a0] sm:$0xff]  ;;  %v210_v11 = vmul.f32 %v73_v5, %v73_v5 }
  0x4a   :  { %v123_v22 = vadd.f32 %v122_v18, %v59_v13  ;;  %v258_v24 = vadd.f32 %v257_v20, %v195_v15  ;;  %v75_v13 = vld [vmem:[%s563_s0 + $0x1a8] sm:$0xff]  ;;  %v211_v15 = vmul.f32 %v74_v9, %v74_v9 }
  0x4c   :  { %v124_v26 = vadd.f32 %v123_v22, %v60_v17  ;;  %v259_v28 = vadd.f32 %v258_v24, %v196_v19  ;;  %v76_v17 = vld [vmem:[%s563_s0 + $0x1b0] sm:$0xff]  ;;  %v212_v19 = vmul.f32 %v75_v13, %v75_v13 }
  0x4e   :  { %v125_v30 = vadd.f32 %v124_v26, %v61_v21  ;;  %v260_v32 = vadd.f32 %v259_v28, %v197_v23  ;;  %v77_v21 = vld [vmem:[%s563_s0 + $0x1b8] sm:$0xff]  ;;  %v213_v23 = vmul.f32 %v76_v17, %v76_v17 }
  0x50   :  { %v126_v34 = vadd.f32 %v125_v30, %v62_v25  ;;  %v261_v36 = vadd.f32 %v260_v32, %v198_v27  ;;  %v78_v25 = vld [vmem:[%s563_s0 + $0x1c0] sm:$0xff]  ;;  %v214_v27 = vmul.f32 %v77_v21, %v77_v21 }
  0x52   :  { %v127_v38 = vadd.f32 %v126_v34, %v63_v29  ;;  %v262_v40 = vadd.f32 %v261_v36, %v199_v31  ;;  %v79_v29 = vld [vmem:[%s563_s0 + $0x1c8] sm:$0xff]  ;;  %v215_v31 = vmul.f32 %v78_v25, %v78_v25 }
  0x54   :  { %v128_v42 = vadd.f32 %v127_v38, %v64_v33  ;;  %v263_v44 = vadd.f32 %v262_v40, %v200_v35  ;;  %v80_v33 = vld [vmem:[%s563_s0 + $0x1d0] sm:$0xff]  ;;  %v216_v35 = vmul.f32 %v79_v29, %v79_v29 }
  0x56   :  { %v129_v46 = vadd.f32 %v128_v42, %v65_v37  ;;  %v264_v48 = vadd.f32 %v263_v44, %v201_v39  ;;  %v81_v37 = vld [vmem:[%s563_s0 + $0x1d8] sm:$0xff]  ;;  %v217_v39 = vmul.f32 %v80_v33, %v80_v33 }
  0x58   :  { %v130_v50 = vadd.f32 %v129_v46, %v66_v41  ;;  %v265_v52 = vadd.f32 %v264_v48, %v202_v43  ;;  %v82_v41 = vld [vmem:[%s563_s0 + $0x1e0] sm:$0xff]  ;;  %v218_v43 = vmul.f32 %v81_v37, %v81_v37 }
  0x5a   :  { %v131_v54 = vadd.f32 %v130_v50, %v67_v45  ;;  %v266_v56 = vadd.f32 %v265_v52, %v203_v47  ;;  %v83_v45 = vld [vmem:[%s563_s0 + $0x1e8] sm:$0xff]  ;;  %v219_v47 = vmul.f32 %v82_v41, %v82_v41 }
  0x5c   :  { %v132_v58 = vadd.f32 %v131_v54, %v68_v49  ;;  %v267_v60 = vadd.f32 %v266_v56, %v204_v51  ;;  %v84_v49 = vld [vmem:[%s563_s0 + $0x1f0] sm:$0xff]  ;;  %v220_v51 = vmul.f32 %v83_v45, %v83_v45 }
  0x5e   :  { %v133_v62 = vadd.f32 %v132_v58, %v69_v53  ;;  %v268_v0 = vadd.f32 %v267_v60, %v205_v55  ;;  %v85_v53 = vld [vmem:[%s563_s0 + $0x1f8] sm:$0xff]  ;;  %v221_v55 = vmul.f32 %v84_v49, %v84_v49 }
  0x5f   :  { %v222_v58 = vmul.f32 %v85_v53, %v85_v53 }
  0x60   :  { %v134_v2 = vadd.f32 %v133_v62, %v70_v57  ;;  %v269_v4 = vadd.f32 %v268_v0, %v206_v59 }
  0x62   :  { %v135_v6 = vadd.f32 %v134_v2, %v71_v61  ;;  %v270_v8 = vadd.f32 %v269_v4, %v207_v63 }
  0x64   :  { %v136_v10 = vadd.f32 %v135_v6, %v72_v1  ;;  %v271_v12 = vadd.f32 %v270_v8, %v208_v3 }
  0x66   :  { %v137_v14 = vadd.f32 %v136_v10, %v73_v5  ;;  %v272_v16 = vadd.f32 %v271_v12, %v209_v7  ;;  %v86_v7 = vld [vmem:[#allocation2] sm:$0x1]  ;;  %v158_v12 = vld [vmem:[#allocation3] sm:$0x1] }
  0x68   :  { %v138_v18 = vadd.f32 %v137_v14, %v74_v9  ;;  %v273_v20 = vadd.f32 %v272_v16, %v210_v11 }
  0x6a   :  { %v139_v22 = vadd.f32 %v138_v18, %v75_v13  ;;  %v274_v24 = vadd.f32 %v273_v20, %v211_v15 }
  0x6c   :  { %v140_v26 = vadd.f32 %v139_v22, %v76_v17  ;;  %v275_v28 = vadd.f32 %v274_v24, %v212_v19 }
  0x6e   :  { %v141_v30 = vadd.f32 %v140_v26, %v77_v21  ;;  %v276_v32 = vadd.f32 %v275_v28, %v213_v23  ;;  %v304_v28 = vld [vmem:[%s564_s1] sm:$0x1] }
  0x70   :  { %v142_v34 = vadd.f32 %v141_v30, %v78_v25  ;;  %v277_v36 = vadd.f32 %v276_v32, %v214_v27  ;;  %v318_v32 = vld [vmem:[%s565_s2] sm:$0x1] }
  0x72   :  { %v143_v38 = vadd.f32 %v142_v34, %v79_v29  ;;  %v278_v40 = vadd.f32 %v277_v36, %v215_v31 }
  0x74   :  { %v144_v42 = vadd.f32 %v143_v38, %v80_v33  ;;  %v279_v44 = vadd.f32 %v278_v40, %v216_v35 }
  0x76   :  { %v145_v46 = vadd.f32 %v144_v42, %v81_v37  ;;  %v280_v48 = vadd.f32 %v279_v44, %v217_v39 }
  0x78   :  { %v146_v50 = vadd.f32 %v145_v46, %v82_v41  ;;  %v281_v52 = vadd.f32 %v280_v48, %v218_v43 }
  0x7a   :  { %v147_v54 = vadd.f32 %v146_v50, %v83_v45  ;;  %v282_v56 = vadd.f32 %v281_v52, %v219_v47 }
  0x7c   :  { %v148_v57 = vadd.f32 %v147_v54, %v84_v49  ;;  %v283_v59 = vadd.f32 %v282_v56, %v220_v51 }
  0x7e   :  { %v149_v60 = vadd.f32 %v148_v57, %v85_v53  ;;  %v284_v61 = vadd.f32 %v283_v59, %v221_v55 }
  0x80   :  { %v150_v62 = vrot.slane %v149_v60, 4  ;;  %v285_v63 = vadd.f32 %v284_v61, %v222_v58 }
  0x82   :  { %v151_v0 = vadd.f32 %v150_v62, %v149_v60  ;;  %v286_v1 = vrot.slane %v285_v63, 4 }
  0x84   :  { %v152_v2 = vrot.slane %v151_v0, 2  ;;  %v287_v3 = vadd.f32 %v286_v1, %v285_v63 }
  0x86   :  { %v153_v4 = vadd.f32 %v152_v2, %v151_v0  ;;  %v288_v5 = vrot.slane %v287_v3, 2 }
  0x88   :  { %v154_v6 = vrot.slane %v153_v4, 1  ;;  %v289_v8 = vadd.f32 %v288_v5, %v287_v3 }
  0x8a   :  { %v155_v9 = vadd.f32 %v154_v6, %v153_v4  ;;  %v290_v10 = vrot.slane %v289_v8, 1 }
  0x8c   :  { %v156_v11 = vadd.f32 %v155_v9, %v86_v7  ;;  %v291_v13 = vadd.f32 %v290_v10, %v289_v8 }
  0x8e   :  { %157 = vst [vmem:[#allocation2] sm:$0x1] %v156_v11  ;;  %v292_v14 = vadd.f32 %v291_v13, %v158_v12 }
  0x90   :  { %293 = vst [vmem:[#allocation3] sm:$0x1] %v292_v14 }
  0x95   :  { %v297_v15 = vld [vmem:[#allocation2] sm:$0x1] }
  0x96   :  { %v298_v16 = vmul.f32 0.001953125, %v297_v15 }
  0x97   :  { %v299_v17 = vld [vmem:[#allocation3] sm:$0x1] }
  0x98   :  { %v301_v18 = vmul.f32 %v298_v16, %v298_v16  ;;  %v300_v19 = vmul.f32 0.001953125, %v299_v17 }
  0x9a   :  { %v302_v20 = vsub.f32 %v300_v19, %v301_v18 }
  0x9c   :  { %v303_v21 = vmax.f32 %v302_v20, 0.0 }
  0x9e   :  { %v305_v22 = vadd.f32 1e-05, %v303_v21 }
  0xa0   :  { %331 = vrsqrt.f32 %v305_v22  ;;  %vm312_vm1 = vweird.f32 %v305_v22 }
  0xa6   :  { %v332_v23 = vpop.eup %331 }
  0xa7   :  { %v307_v24 = vmul.f32 %v332_v23, %v305_v22  ;;  %vm313_vm0 = vweird.f32 %v332_v23 }
  0xa8   :  { %vm314_vm2 = vmor %vm312_vm1, %vm313_vm0 }
  0xa9   :  { %v308_v25 = vmul.f32 %v332_v23, %v307_v24 }
  0xab   :  { %v309_v26 = vmul.f32 0.5, %v308_v25 }
  0xad   :  { %v310_v27 = vsub.f32 1.5, %v309_v26 }
  0xaf   :  { %v311_v29 = vmul.f32 %v332_v23, %v310_v27 }
  0xb1   :  { %v315_v30 = vsel %vm314_vm2, %v332_v23, %v311_v29 }
  0xb2   :  { %v316_v31 = vmul.f32 %v315_v30, %v304_v28 }
  0xb4   :  { %317 = vst [vmem:[%s566_s3] sm:$0x1] %v316_v31  ;;  %v319_v33 = vmul.f32 %v316_v31, %v298_v16 }
  0xb6   :  { %v320_v34 = vsub.f32 %v318_v32, %v319_v33 }
  0xb8   :  { %321 = vst [vmem:[%s567_s4] sm:$0x1] %v320_v34 }

// kernel: unet_up_forward.13
= control target key start
LH: loop header
LB: loop body
LE: loop exit
PB: predicated region body
PF: predicated region fallthrough
CT: control target
= control target key end

     0   :  { %s3097_s18 = smov 0   ;;  %s3099_s19 = smov 0   ;;  %s4877_s0 = inlined_call_operand.vmem [shape: f32[2,24,18,128], index: 0, kind: input, shape index: {}, may-alias: {0,1}]   ;;  %s4878_s1 = inlined_call_operand.vmem [shape: f32[2,24,18,128], index: 1, kind: input, shape index: {}, may-alias: {0,1}]   ;;  %s4879_s2 = inlined_call_operand.vmem [shape: f32[1,128], index: 2, kind: input, shape index: {}]   ;;  %s4880_s3 = inlined_call_operand.vmem [shape: f32[1,128], index: 3, kind: input, shape index: {}]   ;;  %s4881_s4 = inlined_call_operand.vmem [shape: f32[9,128,128], index: 4, kind: input, shape index: {}]   ;;  %s4882_s5 = inlined_call_operand.vmem [shape: f32[2,16,16,128], index: 5, kind: output, shape index: {}]  }
   0x1   :  { %s3101_s20 = smov 0  }
   0x2 LB: > { %s27_s21 = sadd.s32 1, %s3060_s19  ;;  %p2778_p0 = scmp.ge.s32.totalorder %s3064_s20, 1  ;;  %s3064_s20 = sphi %s3101_s20, %s15_s20   ;;  %s3060_s19 = sphi %s3099_s19, %s5240_s19   ;;  %s3056_s18 = sphi %s3097_s18, %s5239_s18  }
   0x3   : > { %p29_p1 = scmp.ge.s32.totalorder %s27_s21, 2  ;;  %p245_p2 = scmp.lt.s32.totalorder %s3064_s20, 3 }
   0x5   : > { %s5242_s21 = smov (%p29_p1, %s27_s21), 0  ;;  %p246_p3 = pnand %p2778_p0, %p245_p2 }
   0x7   : > { %249 = sbr.rel (%p246_p3) target bundleno = 751 (0x2ef), region = 40 }
   0xc   : > { %v2798_v0 = vld [vmem:[%s4881_s4 + $0xf8] sm:$0xff]  ;;  %v2797_v1 = vld [vmem:[%s4881_s4 + $0xf0] sm:$0xff]  ;;  %p306_p4 = scmp.lt.s32.totalorder %s3056_s18, 1  ;;  %v2796_v2 = vld [vmem:[%s4881_s4 + $0xe8] sm:$0xff]  ;;  %v366_v16 = vlaneseq  ;;  %vm988_vm1 = vcmask 1046528   ;;  %vm1344_vm3 = vcmask 1045504  }
   0xd   : > { %2962 = vmatpush.msra.mxu1 %v2798_v0  ;;  %2963 = vmatpush.msra.mxu2 %v2798_v0  ;;  %v2795_v3 = vld [vmem:[%s4881_s4 + $0xe0] sm:$0xff]  ;;  %v2794_v4 = vld [vmem:[%s4881_s4 + $0xd8] sm:$0xff]  ;;  %v2793_v8 = vld [vmem:[%s4881_s4 + $0xd0] sm:$0xff] }
   0xe   : > { %2964 = vmatpush.msra.mxu3 %v2798_v0  ;;  %1118 = vmatpush.msra.mxu0 %v2798_v0  ;;  %s5244_s18 = smov (!%p306_p4, %s3056_s18), 1  ;;  %v3143_v5 = vld [vmem:[%s4879_s2] ss:$0 sm:$0xff]  ;;  %v2792_v11 = vld [vmem:[%s4881_s4 + $0xc8] sm:$0xff]  ;;  %v2790_v22 = vld [vmem:[%s4881_s4 + $0xb8] sm:$0xff]  ;;  %v3176_v26 = vshrl.u32 %v366_v16, 7 }
   0xf   : > { %2965 = vmatpush.msra.mxu1 %v2797_v1  ;;  %2966 = vmatpush.msra.mxu2 %v2797_v1  ;;  %s3010_s30 = smul.u32 576, %s5244_s18  ;;  %v3159_v13 = vld [vmem:[%s4880_s3] ss:$0 sm:$0xff]  ;;  %v2789_v29 = vld [vmem:[%s4881_s4 + $0xb0] sm:$0xff]  ;;  %v2788_v35 = vld [vmem:[%s4881_s4 + $0xa8] sm:$0xff]  ;;  %s2961_s6 = sshll.u32 %s5244_s18, 8 }
  0x10   : > { %2967 = vmatpush.msra.mxu3 %v2797_v1  ;;  %1119 = vmatpush.msra.mxu0 %v2797_v1  ;;  %v2791_v17 = vld [vmem:[%s4881_s4 + $0xc0] sm:$0xff]  ;;  %vm424_vm0 = vcmp.ge.s32.totalorder %v3176_v26, 1  ;;  %v3210_v46 = vadd.s32 16, %v3176_v26  ;;  %v2786_v48 = vld [vmem:[%s4881_s4 + $0x98] sm:$0xff]  ;;  %v2785_v55 = vld [vmem:[%s4881_s4 + $0x90] sm:$0xff]  ;;  %s4730_s9 = scalar_lea.vmem %s4882_s5, %s2961_s6 }
  0x11   : > { %2968 = vmatpush.msra.mxu1 %v2796_v2  ;;  %2969 = vmatpush.msra.mxu2 %v2796_v2  ;;  %s3138_s10 = scalar_lea.vmem %s4877_s0, %s3010_s30  ;;  %v2787_v41 = vld [vmem:[%s4881_s4 + $0xa0] sm:$0xff]  ;;  %v2784_v1 = vld [vmem:[%s4881_s4 + $0x88] sm:$0xff]  ;;  %s2960_s22 = sadd.s32 384, %s3010_s30 }
  0x12   : > { %2970 = vmatpush.msra.mxu3 %v2796_v2  ;;  %1120 = vmatpush.msra.mxu0 %v2796_v2  ;;  %v550_v6 = vld [vmem:[%s3138_s10 + $0x60] sm:$0xff]  ;;  %v551_v9 = vld [vmem:[%s3138_s10 + $0x68] sm:$0xff]  ;;  %v552_v25 = vld [vmem:[%s3138_s10 + $0x70] sm:$0x3]  ;;  %vm483_vm2 = vcmp.le.s32.totalorder %v3210_v46, 16  ;;  %s332_s26 = scalar_lea.vmem %s4878_s1, %s2960_s22 }
  0x13   : > { %2971 = vmatpush.msra.mxu1 %v2795_v3  ;;  %2972 = vmatpush.msra.mxu2 %v2795_v3  ;;  %v562_v7 = vld [vmem:[%s3138_s10 + $0xc0] sm:$0xff]  ;;  %v608_v12 = vmul.f32 %v3143_v5, %v550_v6  ;;  %v563_v14 = vld [vmem:[%s3138_s10 + $0xc8] sm:$0xff]  ;;  %v609_v18 = vmul.f32 %v3143_v5, %v551_v9  ;;  %v564_v28 = vld [vmem:[%s3138_s10 + $0xd0] sm:$0x3]  ;;  %v610_v33 = vmul.f32 %v3143_v5, %v552_v25 }
  0x14   : > { %2973 = vmatpush.msra.mxu3 %v2795_v3  ;;  %1121 = vmatpush.msra.mxu0 %v2795_v3  ;;  %v574_v10 = vld [vmem:[%s3138_s10 + $0x120] sm:$0xff]  ;;  %v620_v15 = vmul.f32 %v3143_v5, %v562_v7  ;;  %v575_v19 = vld [vmem:[%s3138_s10 + $0x128] sm:$0xff]  ;;  %v621_v21 = vmul.f32 %v3143_v5, %v563_v14  ;;  %v576_v34 = vld [vmem:[%s3138_s10 + $0x130] sm:$0x3]  ;;  %v622_v38 = vmul.f32 %v3143_v5, %v564_v28 }
  0x15   : > { %2974 = vmatpush.msra.mxu1 %v2794_v4  ;;  %2975 = vmatpush.msra.mxu2 %v2794_v4  ;;  %v632_v20 = vmul.f32 %v3143_v5, %v574_v10  ;;  %v666_v23 = vadd.f32 %v3159_v13, %v608_v12  ;;  %v633_v27 = vmul.f32 %v3143_v5, %v575_v19  ;;  %v553_v40 = vld [vmem:[%s3138_s10 + $0x78] sm:$0xff]  ;;  %v554_v59 = vld [vmem:[%s3138_s10 + $0x80] sm:$0xff]  ;;  %v555_v10 = vld [vmem:[%s3138_s10 + $0x88] sm:$0x3] }
  0x16   : > { %2976 = vmatpush.msra.mxu3 %v2794_v4  ;;  %1122 = vmatpush.msra.mxu0 %v2794_v4  ;;  %v678_v24 = vadd.f32 %v3159_v13, %v620_v15  ;;  %v667_v30 = vadd.f32 %v3159_v13, %v609_v18  ;;  %v679_v32 = vadd.f32 %v3159_v13, %v621_v21  ;;  %v565_v54 = vld [vmem:[%s3138_s10 + $0xd8] sm:$0xff]  ;;  %v566_v4 = vld [vmem:[%s3138_s10 + $0xe0] sm:$0xff] }
  0x17   : > { %2977 = vmatpush.msra.mxu1 %v2793_v8  ;;  %2978 = vmatpush.msra.mxu2 %v2793_v8  ;;  %v690_v31 = vadd.f32 %v3159_v13, %v632_v20  ;;  %v3191_v36 = vmax.f32 %v666_v23, 0.0  ;;  %v691_v39 = vadd.f32 %v3159_v13, %v633_v27  ;;  %v634_v44 = vmul.f32 %v3143_v5, %v576_v34  ;;  %v577_v0 = vld [vmem:[%s3138_s10 + $0x138] sm:$0xff]  ;;  %v578_v14 = vld [vmem:[%s3138_s10 + $0x140] sm:$0xff] }
  0x18   : > { %2979 = vmatpush.msra.mxu3 %v2793_v8  ;;  %1123 = vmatpush.msra.mxu0 %v2793_v8  ;;  %v3193_v37 = vmax.f32 %v678_v24, 0.0  ;;  %v3202_v42 = vmax.f32 %v667_v30, 0.0  ;;  %v3207_v45 = vmax.f32 %v679_v32, 0.0  ;;  %v668_v47 = vadd.f32 %v3159_v13, %v610_v33  ;;  %v541_v20 = vld [vmem:[%s3138_s10 + $0x18] sm:$0xff]  ;;  %v2828_v33 = vld [vmem:[%s4881_s4 + $0x170] sm:$0xff] }
  0x19   : > { %2980 = vmatpush.msra.mxu1 %v2792_v11  ;;  %2981 = vmatpush.msra.mxu2 %v2792_v11  ;;  %v3204_v43 = vmax.f32 %v690_v31, 0.0  ;;  %v3219_v49 = vsel %vm424_vm0, %v3191_v36, 0.0  ;;  %v680_v51 = vadd.f32 %v3159_v13, %v622_v38  ;;  %v611_v52 = vmul.f32 %v3143_v5, %v553_v40  ;;  %v2829_v21 = vld [vmem:[%s4881_s4 + $0x178] sm:$0xff]  ;;  %v567_v31 = vld [vmem:[%s3138_s10 + $0xe8] sm:$0x3]  ;;  %v542_v38 = vld [vmem:[%s3138_s10 + $0x20] sm:$0xff] }
  0x1a   : > { %2982 = vmatpush.msra.mxu3 %v2792_v11  ;;  %1124 = vmatpush.msra.mxu0 %v2792_v11  ;;  %5011 = vst [vmem:[#allocation2_spill] sm:$0xff] %v3193_v37  ;;  %v3224_v50 = vsel %vm424_vm0, %v3193_v37, 0.0  ;;  %v3228_v53 = vmax.f32 %v691_v39, 0.0  ;;  %v1010_v56 = vrot.slane %v3202_v42, 1  ;;  %v692_v58 = vadd.f32 %v3159_v13, %v634_v44  ;;  %v2783_v11 = vld [vmem:[%s4881_s4 + $0x80] sm:$0xff]  ;;  %v939_v28 = vld [vmem:[%s4881_s4 + $0x78] sm:$0xff] }
  0x1b   : > { %2983 = vmatpush.msra.mxu1 %v2791_v17  ;;  %2984 = vmatpush.msra.mxu2 %v2791_v17  ;;  %5012 = vst [vmem:[#allocation3_spill] sm:$0xff] %v3202_v42  ;;  %v3238_v57 = vsel %vm424_vm0, %v3204_v43, 0.0  ;;  %v1009_v60 = vrot.slane %v3219_v49, 1  ;;  %v1029_v61 = vrot.slane %v3224_v50, 1  ;;  %v1030_v62 = vrot.slane %v3207_v45, 1  ;;  %v2845_v32 = vld [vmem:[%s4881_s4 + $0x1f8] sm:$0xff] }
  0x1c   : > { %2985 = vmatpush.msra.mxu3 %v2791_v17  ;;  %1125 = vmatpush.msra.mxu0 %v2791_v17  ;;  %5013 = vst [vmem:[#allocation4_spill] sm:$0xff] %v3204_v43  ;;  %v722_v63 = vmax.f32 %v668_v47, 0.0  ;;  %v734_v2 = vmax.f32 %v680_v51, 0.0  ;;  %v669_v3 = vadd.f32 %v3159_v13, %v611_v52  ;;  %v623_v6 = vmul.f32 %v3143_v5, %v565_v54  ;;  %v938_v44 = vld [vmem:[%s4881_s4 + $0x70] sm:$0xff]  ;;  %v579_v52 = vld [vmem:[%s3138_s10 + $0x148] sm:$0x3] }
  0x1d   : > { %2986 = vmatpush.msra.mxu1 %v2790_v22  ;;  %2987 = vmatpush.msra.mxu2 %v2790_v22  ;;  %5014 = vst [vmem:[#allocation5_spill] sm:$0xff] %v3207_v45  ;;  %v1049_v7 = vrot.slane %v3238_v57, 1  ;;  %v1050_v8 = vrot.slane %v3228_v53, 1  ;;  %v612_v9 = vmul.f32 %v3143_v5, %v554_v59  ;;  %v746_v12 = vmax.f32 %v692_v58, 0.0  ;;  %v2844_v54 = vld [vmem:[%s4881_s4 + $0x1f0] sm:$0xff] }
  0x1e   : > { %2988 = vmatpush.msra.mxu3 %v2790_v22  ;;  %1126 = vmatpush.msra.mxu0 %v2790_v22  ;;  %5015 = vst [vmem:[#allocation6_spill] sm:$0xff] %v3224_v50  ;;  %v635_v15 = vmul.f32 %v3143_v5, %v577_v0  ;;  %v3265_v16 = vsel %vm988_vm1, %v1009_v60, %v1010_v56  ;;  %v3274_v18 = vsel %vm483_vm2, %v722_v63, 0.0  ;;  %v3283_v22 = vsel %vm483_vm2, %v734_v2, 0.0  ;;  %v937_v0 = vld [vmem:[%s4881_s4 + $0x68] sm:$0xff] }
  0x1f   : > { %2989 = vmatpush.msra.mxu1 %v2789_v29  ;;  %2990 = vmatpush.msra.mxu2 %v2789_v29  ;;  %5016 = vst [vmem:[#allocation7_spill] sm:$0xff] %v3228_v53  ;;  %v3270_v17 = vsel %vm988_vm1, %v1029_v61, %v1030_v62  ;;  %v624_v19 = vmul.f32 %v3143_v5, %v566_v4  ;;  %v3285_v23 = vmax.f32 %v669_v3, 0.0  ;;  %v3310_v34 = vsel %vm483_vm2, %v746_v12, 0.0  ;;  %v556_v4 = vld [vmem:[%s3138_s10 + $0x90] sm:$0xff]  ;;  %v2870_v53 = vld [vmem:[%s4881_s4 + $0x240] sm:$0xff] }
  0x20   : > { %2991 = vmatpush.msra.mxu3 %v2789_v29  ;;  %1127 = vmatpush.msra.mxu0 %v2789_v29  ;;  %5017 = vst [vmem:[#allocation8_spill] sm:$0xff] %v3238_v57  ;;  %v681_v24 = vadd.f32 %v3159_v13, %v623_v6  ;;  %v613_v25 = vmul.f32 %v3143_v5, %v555_v10  ;;  %v1012_v40 = vrot.slane %v3274_v18, 1  ;;  %v4883_v47 = vmov 0.0   ;;  %v2843_v6 = vld [vmem:[%s4881_s4 + $0x1e8] sm:$0xff] }
  0x21   : > { %2992 = vmatpush.msra.mxu1 %v2788_v35  ;;  %2993 = vmatpush.msra.mxu2 %v2788_v35  ;;  %5018 = vst [vmem:[#allocation9_spill] sm:$0xff] %v3270_v17  ;;  %v3292_v27 = vsel %vm988_vm1, %v1049_v7, %v1050_v8  ;;  %v670_v29 = vadd.f32 %v3159_v13, %v612_v9  ;;  %v3335_v58 = vsel %vm424_vm0, %v3285_v23, 0.0  ;;  %v1052_v63 = vrot.slane %v3310_v34, 1  ;;  %v2877_v7 = vld [vmem:[%s4881_s4 + $0x278] sm:$0xff]  ;;  %v559_v57 = vld [vmem:[%s3138_s10 + $0xa8] sm:$0xff] }
  0x22   : > { %2994 = vmatpush.msra.mxu3 %v2788_v35  ;;  %1128 = vmatpush.msra.mxu0 %v2788_v35  ;;  %5019 = vst [vmem:[#allocation10_spill] sm:$0xff] %v3283_v22  ;;  %v636_v30 = vmul.f32 %v3143_v5, %v578_v14  ;;  %v693_v35 = vadd.f32 %v3159_v13, %v635_v15  ;;  %v3337_v59 = vmax.f32 %v681_v24, 0.0  ;;  %v1014_v15 = vrot.slane %v3335_v58, 1 }
  0x23   : > { %2995 = vmatpush.msra.mxu1 %v2787_v41  ;;  %2996 = vmatpush.msra.mxu2 %v2787_v41  ;;  %5020 = vst [vmem:[#allocation11_spill] sm:$0xff] %v3285_v23  ;;  %v599_v39 = vmul.f32 %v3143_v5, %v541_v20  ;;  %v682_v51 = vadd.f32 %v3159_v13, %v624_v19  ;;  %v543_v20 = vld [vmem:[%s3138_s10 + $0x28] sm:$0x3] }
  0x24   : > { %2997 = vmatpush.msra.mxu3 %v2787_v41  ;;  %1129 = vmatpush.msra.mxu0 %v2787_v41  ;;  %5021 = vst [vmem:[#allocation12_spill] sm:$0xff] %v3292_v27  ;;  %v1032_v41 = vrot.slane %v3283_v22, 1  ;;  %v671_v60 = vadd.f32 %v3159_v13, %v613_v25  ;;  %v625_v61 = vmul.f32 %v3143_v5, %v567_v31  ;;  %v3356_v9 = vmax.f32 %v693_v35, 0.0  ;;  %v2876_v31 = vld [vmem:[%s4881_s4 + $0x270] sm:$0xff]  ;;  %v2866_v22 = vld [vmem:[%s4881_s4 + $0x220] sm:$0xff] }
  0x25   : > { %2998 = vmatpush.msra.mxu1 %v2786_v48  ;;  %2999 = vmatpush.msra.mxu2 %v2786_v48  ;;  %5022 = vst [vmem:[#allocation13_spill] sm:$0xff] %v3310_v34  ;;  %v694_v2 = vadd.f32 %v3159_v13, %v636_v30  ;;  %v600_v3 = vmul.f32 %v3143_v5, %v542_v38  ;;  %v3371_v19 = vmax.f32 %v682_v51, 0.0  ;;  %v568_v38 = vld [vmem:[%s3138_s10 + $0xf0] sm:$0xff] }
  0x26   : > { %3000 = vmatpush.msra.mxu3 %v2786_v48  ;;  %1130 = vmatpush.msra.mxu0 %v2786_v48  ;;  %v3321_v48 = vrot.slane %v4883_v47, 1  ;;  %5024 = vst [vmem:[#allocation15_spill] sm:$0xff] %v3337_v59  ;;  %v657_v10 = vadd.f32 %v3159_v13, %v599_v39  ;;  %v637_v12 = vmul.f32 %v3143_v5, %v579_v52  ;;  %v725_v24 = vmax.f32 %v671_v60, 0.0  ;;  %v2825_v39 = vld [vmem:[%s4881_s4 + $0x158] sm:$0xff]  ;;  %v2875_v60 = vld [vmem:[%s4881_s4 + $0x268] sm:$0xff] }
  0x27   : > { %3001 = vmatpush.msra.mxu1 %v2785_v55  ;;  %3002 = vmatpush.msra.mxu2 %v2785_v55  ;;  %5026 = vst [vmem:[#allocation17_spill] sm:$0xff] %v3356_v9  ;;  %v3368_v14 = vsel %vm988_vm1, %v1030_v62, %v1032_v41  ;;  %v3384_v62 = vsel %vm424_vm0, %v3337_v59, 0.0  ;;  %v683_v25 = vadd.f32 %v3159_v13, %v625_v61 }
  0x28   : > { %3003 = vmatpush.msra.mxu3 %v2785_v55  ;;  %1131 = vmatpush.msra.mxu0 %v2785_v55  ;;  %5023 = vst [vmem:[#allocation14_spill] sm:$0xff] %v3321_v48  ;;  %v2827_v55 = vld [vmem:[%s4881_s4 + $0x168] sm:$0xff]  ;;  %v3392_v30 = vsel %vm988_vm1, %v1050_v8, %v1052_v63  ;;  %v658_v35 = vadd.f32 %v3159_v13, %v600_v3  ;;  %v936_v8 = vld [vmem:[%s4881_s4 + $0x60] sm:$0xff]  ;;  %v3415_v41 = vmax.f32 %v657_v10, 0.0  ;;  %v1034_v52 = vrot.slane %v3384_v62, 1  ;;  %v580_v63 = vld [vmem:[%s3138_s10 + $0x150] sm:$0xff] }
  0x29   : > { %3004 = vmatpush.msra.mxu1 %v2784_v1  ;;  %3005 = vmatpush.msra.mxu2 %v2784_v1  ;;  %5028 = vst [vmem:[#allocation19_spill] sm:$0xff] %v3368_v14  ;;  %v601_v51 = vmul.f32 %v3143_v5, %v543_v20  ;;  %v3438_v3 = vsel %vm483_vm2, %v725_v24, 0.0  ;;  %v626_v10 = vmul.f32 %v3143_v5, %v568_v38 }
  0x2a   : > { %3006 = vmatpush.msra.mxu3 %v2784_v1  ;;  %1132 = vmatpush.msra.mxu0 %v2784_v1  ;;  %v3345_v1 = vmax.f32 %v670_v29, 0.0  ;;  %5029 = vst [vmem:[#allocation20_spill] sm:$0xff] %v3371_v19  ;;  %v614_v29 = vmul.f32 %v3143_v5, %v556_v4  ;;  %v737_v4 = vmax.f32 %v683_v25, 0.0  ;;  %v3453_v24 = vmax.f32 %v658_v35, 0.0  ;;  %v934_v25 = vld [vmem:[%s4881_s4 + $0x50] sm:$0xff]  ;;  %v581_v35 = vld [vmem:[%s3138_s10 + $0x158] sm:$0xff] }
  0x2b   : > { %3007 = vmatpush.msra.mxu1 %v2783_v11  ;;  %3008 = vmatpush.msra.mxu2 %v2783_v11  ;;  %5030 = vst [vmem:[#allocation21_spill] sm:$0xff] %v3384_v62  ;;  %v638_v38 = vmul.f32 %v3143_v5, %v580_v63  ;;  %v2873_v63 = vld [vmem:[%s4881_s4 + $0x258] sm:$0xff]  ;;  %v639_v47 = vmul.f32 %v3143_v5, %v581_v35 }
  0x2c   : > { %1158 = vmatmul.f32.vlgmr.msra.gmra.mxu1 %v3265_v16  ;;  %1182 = vmatmul.f32.vlgmr.msra.gmra.mxu2 %v3270_v17  ;;  %5025 = vst [vmem:[#allocation16_spill] sm:$0xff] %v3345_v1  ;;  %v545_v35 = vld [vmem:[%s3138_s10 + $0x38] sm:$0xff] }
  0x2d   : > { %1474 = vmatpush.msrb.mxu2 %v2829_v21  ;;  %3009 = vmatpush.msra.mxu3 %v2783_v11  ;;  %v2842_v21 = vld [vmem:[%s4881_s4 + $0x1e0] sm:$0xff]  ;;  %5031 = vst [vmem:[#allocation22_spill] sm:$0xff] %v3392_v30  ;;  %v697_v34 = vadd.f32 %v3159_v13, %v639_v47  ;;  %v931_v47 = vld [vmem:[%s4881_s4 + $0x38] sm:$0xff] }
  0x2e   : > { %1206 = vmatmul.f32.vlgmr.msra.gmra.mxu3 %v3292_v27  ;;  %1231 = vmatpush.msrb.mxu1 %v939_v28  ;;  %v557_v28 = vld [vmem:[%s3138_s10 + $0x98] sm:$0xff] }
  0x2f   : > { %1636 = vmatpush.msrb.mxu3 %v2845_v32  ;;  %1475 = vmatpush.msrb.mxu2 %v2828_v33  ;;  %v4886_v32 = vrot.slane %v3345_v1, 1  ;;  %v3398_v33 = vmax.f32 %v694_v2, 0.0  ;;  %v615_v61 = vmul.f32 %v3143_v5, %v557_v28  ;;  %v2824_v2 = vld [vmem:[%s4881_s4 + $0x150] sm:$0xff]  ;;  %v3464_v28 = vsel %vm424_vm0, %v3415_v41, 0.0  ;;  %v573_v62 = vld [vmem:[%s3138_s10 + $0x118] sm:$0x3] }
  0x30   : > { %1232 = vmatpush.msrb.mxu1 %v938_v44  ;;  %1133 = vmatpush.msra.mxu0 %v2783_v11  ;;  %v3363_v11 = vsel %vm988_vm1, %v1010_v56, %v1012_v40  ;;  %v2826_v56 = vld [vmem:[%s4881_s4 + $0x160] sm:$0xff]  ;;  %v3413_v40 = vsel %vm424_vm0, %v3356_v9, 0.0  ;;  %v695_v44 = vadd.f32 %v3159_v13, %v637_v12 }
  0x31   : > { %1637 = vmatpush.msrb.mxu3 %v2844_v54  ;;  %5027 = vst [vmem:[#allocation18_spill] sm:$0xff] %v3363_v11  ;;  %1476 = vmatpush.msrb.mxu2 %v2827_v55  ;;  %v4885_v54 = vrot.slane %v3371_v19, 1  ;;  %v2841_v55 = vld [vmem:[%s4881_s4 + $0x1d8] sm:$0xff]  ;;  %v3446_v12 = vsel %vm988_vm1, %v1014_v15, %v4886_v32  ;;  %v1054_v20 = vrot.slane %v3413_v40, 1  ;;  %v2874_v15 = vld [vmem:[%s4881_s4 + $0x260] sm:$0xff] }
  0x32   : > { %1134 = vmatmul.f32.vlgmr.msra.gmra.mxu0 %v3321_v48  ;;  %1233 = vmatpush.msrb.mxu1 %v937_v0  ;;  %5032 = vst [vmem:[#allocation23_spill] sm:$0xff] %v3398_v33  ;;  %v935_v0 = vld [vmem:[%s4881_s4 + $0x58] sm:$0xff]  ;;  %v570_v32 = vld [vmem:[%s3138_s10 + $0x100] sm:$0x3] }
  0x33   : > { %1638 = vmatpush.msrb.mxu3 %v2843_v6  ;;  %1808 = vmatpush.msrb.mxu0 %v2877_v7  ;;  %5033 = vst [vmem:[#allocation24_spill] sm:$0xff] %v3413_v40  ;;  %v672_v6 = vadd.f32 %v3159_v13, %v614_v29  ;;  %v569_v7 = vld [vmem:[%s3138_s10 + $0xf8] sm:$0xff]  ;;  %v749_v29 = vmax.f32 %v695_v44, 0.0  ;;  %v544_v44 = vld [vmem:[%s3138_s10 + $0x30] sm:$0xff]  ;;  %v2838_v40 = vld [vmem:[%s4881_s4 + $0x1c0] sm:$0xff] }
  0x34   : > { %1161 = vmatmul.f32.gmra.mxu1 %v3363_v11  ;;  %1185 = vmatmul.f32.gmra.mxu2 %v3368_v14  ;;  %5034 = vst [vmem:[#allocation25_spill] sm:$0xff] %v3446_v12  ;;  %v582_v9 = vld [vmem:[%s3138_s10 + $0x160] sm:$0x3]  ;;  %v585_v14 = vld [vmem:[%s3138_s10 + $0x178] sm:$0x3] }
  0x35   : > { %1477 = vmatpush.msrb.mxu2 %v2826_v56  ;;  %1639 = vmatpush.msrb.mxu3 %v2842_v21  ;;  %v4887_v56 = vrot.slane %v3398_v33, 1  ;;  %v2840_v21 = vld [vmem:[%s4881_s4 + $0x1d0] sm:$0xff] }
  0x36   : > { %1209 = vmatmul.f32.gmra.mxu3 %v3392_v30  ;;  %1809 = vmatpush.msrb.mxu0 %v2876_v31  ;;  %v659_v31 = vadd.f32 %v3159_v13, %v601_v51  ;;  %v3481_v51 = vsel %vm483_vm2, %v737_v4, 0.0  ;;  %v2837_v30 = vld [vmem:[%s4881_s4 + $0x1b8] sm:$0xff] }
  0x37   : > { %1234 = vmatpush.msrb.mxu1 %v936_v8  ;;  %1478 = vmatpush.msrb.mxu2 %v2825_v39  ;;  %v3472_v8 = vsel %vm988_vm1, %v1034_v52, %v4885_v54  ;;  %v1017_v39 = vrot.slane %v3438_v3, 1  ;;  %5036 = vst [vmem:[#allocation27_spill] sm:$0xff] %v3481_v51  ;;  %v2823_v52 = vld [vmem:[%s4881_s4 + $0x148] sm:$0xff]  ;;  %v3498_v4 = vsel %vm988_vm1, %v1054_v20, %v4887_v56  ;;  %v558_v54 = vld [vmem:[%s3138_s10 + $0xa0] sm:$0x3] }
  0x38   : > { %1640 = vmatpush.msrb.mxu3 %v2841_v55  ;;  %1810 = vmatpush.msrb.mxu0 %v2875_v60  ;;  %5035 = vst [vmem:[#allocation26_spill] sm:$0xff] %v3472_v8  ;;  %v673_v55 = vadd.f32 %v3159_v13, %v615_v61  ;;  %v627_v60 = vmul.f32 %v3143_v5, %v569_v7  ;;  %v2839_v61 = vld [vmem:[%s4881_s4 + $0x1c8] sm:$0xff]  ;;  %v994_v7 = vrot.slane %v3464_v28, 1  ;;  %v2822_v20 = vld [vmem:[%s4881_s4 + $0x140] sm:$0xff] }
  0x39   : > { %1235 = vmatpush.msrb.mxu1 %v935_v0  ;;  %1479 = vmatpush.msrb.mxu2 %v2824_v2  ;;  %v3492_v0 = vmax.f32 %v672_v6, 0.0  ;;  %v684_v2 = vadd.f32 %v3159_v13, %v626_v10  ;;  %5038 = vst [vmem:[#allocation29_spill] sm:$0xff] %v3498_v4  ;;  %v3509_v6 = vsel %vm483_vm2, %v749_v29, 0.0  ;;  %v933_v10 = vld [vmem:[%s4881_s4 + $0x48] sm:$0xff]  ;;  %v602_v56 = vmul.f32 %v3143_v5, %v544_v44 }
  0x3a   : > { %1137 = vmatmul.f32.gmra.mxu0 %v3321_v48  ;;  %1641 = vmatpush.msrb.mxu3 %v2840_v21  ;;  %5039 = vst [vmem:[#allocation30_spill] sm:$0xff] %v3509_v6  ;;  %v5040_v21 = vrot.slane %v3345_v1, 1  ;;  %v1037_v29 = vrot.slane %v3481_v51, 1  ;;  %v685_v44 = vadd.f32 %v3159_v13, %v627_v60  ;;  %v616_v60 = vmul.f32 %v3143_v5, %v558_v54 }
  0x3b   : > { %5037 = vst [vmem:[#allocation28_spill] sm:$0xff] %v3492_v0  ;;  %1811 = vmatpush.msrb.mxu0 %v2874_v15  ;;  %1236 = vmatpush.msrb.mxu1 %v934_v25  ;;  %v713_v15 = vmax.f32 %v659_v31, 0.0  ;;  %v696_v25 = vadd.f32 %v3159_v13, %v638_v38  ;;  %v2872_v31 = vld [vmem:[%s4881_s4 + $0x250] sm:$0xff]  ;;  %v3532_v38 = vmax.f32 %v673_v55, 0.0  ;;  %v2821_v55 = vld [vmem:[%s4881_s4 + $0x138] sm:$0xff]  ;;  %v603_v54 = vmul.f32 %v3143_v5, %v545_v35 }
  0x3c   : > { %1164 = vmatmul.f32.gmra.mxu1 %v3446_v12  ;;  %1188 = vmatmul.f32.gmra.mxu2 %v3472_v8  ;;  %v3523_v48 = vsel %vm988_vm1, %v5040_v21, %v1017_v39  ;;  %v3540_v39 = vsel %vm424_vm0, %v3492_v0, 0.0  ;;  %v628_v21 = vmul.f32 %v3143_v5, %v570_v32  ;;  %v640_v35 = vmul.f32 %v3143_v5, %v582_v9 }
  0x3d   : > { %5041 = vst [vmem:[#allocation31_spill] sm:$0xff] %v3523_v48  ;;  %1480 = vmatpush.msrb.mxu2 %v2823_v52  ;;  %1642 = vmatpush.msrb.mxu3 %v2839_v61  ;;  %v3542_v52 = vmax.f32 %v684_v2, 0.0  ;;  %v932_v61 = vld [vmem:[%s4881_s4 + $0x40] sm:$0xff]  ;;  %v1057_v2 = vrot.slane %v3509_v6, 1  ;;  %v3565_v32 = vsel %vm483_vm2, %v713_v15, 0.0  ;;  %v1019_v15 = vrot.slane %v3540_v39, 1 }
  0x3e   : > { %5042 = vst [vmem:[#allocation32_spill] sm:$0xff] %v3532_v38  ;;  %1212 = vmatmul.f32.gmra.mxu3 %v3498_v4  ;;  %1812 = vmatpush.msrb.mxu0 %v2873_v63  ;;  %v5044_v63 = vrot.slane %v3453_v24, 1  ;;  %v546_v6 = vld [vmem:[%s3138_s10 + $0x40] sm:$0x3]  ;;  %v5054_v27 = vrot.slane %v3532_v38, 1 }
  0x3f   : > { %5043 = vst [vmem:[#allocation33_spill] sm:$0xff] %v3542_v52  ;;  %1237 = vmatpush.msrb.mxu1 %v933_v10  ;;  %1481 = vmatpush.msrb.mxu2 %v2822_v20  ;;  %v2871_v10 = vld [vmem:[%s4881_s4 + $0x248] sm:$0xff]  ;;  %v660_v20 = vadd.f32 %v3159_v13, %v602_v56  ;;  %v3591_v9 = vsel %vm424_vm0, %v3542_v52, 0.0  ;;  %v2820_v56 = vld [vmem:[%s4881_s4 + $0x130] sm:$0xff] }
  0x40   : > { %v3555_v4 = vsel %vm988_vm1, %v994_v7, %v5044_v63  ;;  %1643 = vmatpush.msrb.mxu3 %v2838_v40  ;;  %1813 = vmatpush.msrb.mxu0 %v2872_v31  ;;  %v3567_v7 = vmax.f32 %v696_v25, 0.0  ;;  %v5046_v40 = vrot.slane %v3371_v19, 1  ;;  %v3584_v63 = vmax.f32 %v685_v44, 0.0  ;;  %5049 = vst [vmem:[#allocation37_spill] sm:$0xff] %v3591_v9  ;;  %v929_v52 = vld [vmem:[%s4881_s4 + $0x28] sm:$0xff] }
  0x41   : > { %1238 = vmatpush.msrb.mxu1 %v932_v61  ;;  %1482 = vmatpush.msrb.mxu2 %v2821_v55  ;;  %v674_v44 = vadd.f32 %v3159_v13, %v616_v60  ;;  %v686_v61 = vadd.f32 %v3159_v13, %v628_v21  ;;  %v5050_v55 = vrot.slane %v3398_v33, 1  ;;  %v3607_v25 = vmax.f32 %v697_v34, 0.0  ;;  %v571_v21 = vld [vmem:[%s3138_s10 + $0x108] sm:$0xff] }
  0x42   : > { %5045 = vst [vmem:[#allocation34_spill] sm:$0xff] %v3567_v7  ;;  %v3580_v31 = vsel %vm988_vm1, %v5046_v40, %v1037_v29  ;;  %1140 = vmatmul.f32.gmra.mxu0 %v3555_v4  ;;  %1644 = vmatpush.msrb.mxu3 %v2837_v30  ;;  %v2836_v29 = vld [vmem:[%s4881_s4 + $0x1b0] sm:$0xff]  ;;  %v997_v30 = vrot.slane %v3565_v32, 1  ;;  %v661_v60 = vadd.f32 %v3159_v13, %v603_v54  ;;  %v3620_v34 = vsel %vm424_vm0, %v3567_v7, 0.0  ;;  %v2819_v54 = vld [vmem:[%s4881_s4 + $0x128] sm:$0xff] }
  0x43   : > { %5047 = vst [vmem:[#allocation35_spill] sm:$0xff] %v3580_v31  ;;  %v3604_v40 = vsel %vm988_vm1, %v5050_v55, %v1057_v2  ;;  %1814 = vmatpush.msrb.mxu0 %v2871_v10  ;;  %1239 = vmatpush.msrb.mxu1 %v931_v47  ;;  %v930_v2 = vld [vmem:[%s4881_s4 + $0x30] sm:$0xff]  ;;  %v3628_v10 = vmax.f32 %v660_v20, 0.0  ;;  %v698_v47 = vadd.f32 %v3159_v13, %v640_v35  ;;  %v1039_v43 = vrot.slane %v3591_v9, 1  ;;  %v2835_v20 = vld [vmem:[%s4881_s4 + $0x1a8] sm:$0xff] }
  0x44   : > { %5048 = vst [vmem:[#allocation36_spill] sm:$0xff] %v3584_v63  ;;  %1167 = vmatmul.f32.gmra.mxu1 %v3523_v48  ;;  %1191 = vmatmul.f32.gmra.mxu2 %v3580_v31  ;;  %v560_v55 = vld [vmem:[%s3138_s10 + $0xb0] sm:$0xff]  ;;  %v604_v33 = vmul.f32 %v3143_v5, %v546_v6  ;;  %v3636_v7 = vsel %vm988_vm1, %v1019_v15, %v5054_v27  ;;  %v2869_v6 = vld [vmem:[%s4881_s4 + $0x238] sm:$0xff]  ;;  %v583_v35 = vld [vmem:[%s3138_s10 + $0x168] sm:$0xff]  ;;  %v728_v27 = vmax.f32 %v674_v44, 0.0  ;;  %v740_v15 = vmax.f32 %v686_v61, 0.0 }
  0x45   : > { %5051 = vst [vmem:[#allocation38_spill] sm:$0xff] %v3604_v40  ;;  %1483 = vmatpush.msrb.mxu2 %v2820_v56  ;;  %1645 = vmatpush.msrb.mxu3 %v2836_v29  ;;  %v2818_v56 = vld [vmem:[%s4881_s4 + $0x120] sm:$0xff]  ;;  %v617_v29 = vmul.f32 %v3143_v5, %v559_v57  ;;  %v572_v9 = vld [vmem:[%s3138_s10 + $0x110] sm:$0xff]  ;;  %v629_v51 = vmul.f32 %v3143_v5, %v571_v21  ;;  %v5056_v31 = vrot.slane %v3453_v24, 1  ;;  %v1059_v44 = vrot.slane %v3620_v34, 1  ;;  %v547_v19 = vld [vmem:[%s3138_s10 + $0x48] sm:$0xff] }
  0x46   : > { %5052 = vst [vmem:[#allocation39_spill] sm:$0xff] %v3607_v25  ;;  %1215 = vmatmul.f32.gmra.mxu3 %v3604_v40  ;;  %1815 = vmatpush.msrb.mxu0 %v2870_v53  ;;  %v3664_v40 = vmax.f32 %v661_v60, 0.0  ;;  %v2834_v57 = vld [vmem:[%s4881_s4 + $0x1a0] sm:$0xff]  ;;  %v3672_v21 = vsel %vm424_vm0, %v3628_v10, 0.0  ;;  %v641_v61 = vmul.f32 %v3143_v5, %v583_v35  ;;  %v3698_v35 = vsel %vm483_vm2, %v740_v15, 0.0 }
  0x47   : > { %5053 = vst [vmem:[#allocation40_spill] sm:$0xff] %v3620_v34  ;;  %v3660_v53 = vsel %vm988_vm1, %v5056_v31, %v997_v30  ;;  %1240 = vmatpush.msrb.mxu1 %v930_v2  ;;  %1484 = vmatpush.msrb.mxu2 %v2819_v54  ;;  %v752_v31 = vmax.f32 %v698_v47, 0.0  ;;  %v2868_v30 = vld [vmem:[%s4881_s4 + $0x230] sm:$0xff]  ;;  %v928_v60 = vld [vmem:[%s4881_s4 + $0x20] sm:$0xff]  ;;  %v662_v2 = vadd.f32 %v3159_v13, %v604_v33  ;;  %v5057_v34 = vrot.slane %v3584_v63, 1 }
  0x48   : > { %5055 = vst [vmem:[#allocation41_spill] sm:$0xff] %v3636_v7  ;;  %1646 = vmatpush.msrb.mxu3 %v2835_v20  ;;  %1816 = vmatpush.msrb.mxu0 %v2869_v6  ;;  %v584_v54 = vld [vmem:[%s3138_s10 + $0x170] sm:$0xff]  ;;  %v618_v20 = vmul.f32 %v3143_v5, %v560_v55  ;;  %v630_v6 = vmul.f32 %v3143_v5, %v572_v9  ;;  %v3694_v33 = vsel %vm483_vm2, %v728_v27, 0.0  ;;  %v2817_v9 = vld [vmem:[%s4881_s4 + $0x118] sm:$0xff]  ;;  %v5060_v27 = vrot.slane %v3607_v25, 1 }
  0x49   : > { %v3686_v47 = vsel %vm988_vm1, %v1039_v43, %v5057_v34  ;;  %1241 = vmatpush.msrb.mxu1 %v929_v52  ;;  %1485 = vmatpush.msrb.mxu2 %v2818_v56  ;;  %5059 = vst [vmem:[#allocation43_spill] sm:$0xff] %v3698_v35  ;;  %v675_v43 = vadd.f32 %v3159_v13, %v617_v29  ;;  %v2833_v34 = vld [vmem:[%s4881_s4 + $0x198] sm:$0xff]  ;;  %v999_v56 = vrot.slane %v3672_v21, 1  ;;  %v548_v29 = vld [vmem:[%s3138_s10 + $0x50] sm:$0xff]  ;;  %v1042_v59 = vrot.slane %v3698_v35, 1 }
  0x4a   : > { %5058 = vst [vmem:[#allocation42_spill] sm:$0xff] %v3686_v47  ;;  %1143 = vmatmul.f32.gmra.mxu0 %v3660_v53  ;;  %1647 = vmatpush.msrb.mxu3 %v2834_v57  ;;  %v687_v52 = vadd.f32 %v3159_v13, %v629_v51  ;;  %v561_v55 = vld [vmem:[%s3138_s10 + $0xb8] sm:$0x3]  ;;  %v3712_v15 = vsel %vm988_vm1, %v1059_v44, %v5060_v27  ;;  %v2867_v57 = vld [vmem:[%s4881_s4 + $0x228] sm:$0xff]  ;;  %v3725_v44 = vsel %vm483_vm2, %v752_v31, 0.0  ;;  %v716_v27 = vmax.f32 %v662_v2, 0.0 }
  0x4b   : > { %5061 = vst [vmem:[#allocation44_spill] sm:$0xff] %v3712_v15  ;;  %1817 = vmatpush.msrb.mxu0 %v2868_v30  ;;  %1242 = vmatpush.msrb.mxu1 %v928_v60  ;;  %v642_v51 = vmul.f32 %v3143_v5, %v584_v54  ;;  %v699_v30 = vadd.f32 %v3159_v13, %v641_v61  ;;  %v927_v60 = vld [vmem:[%s4881_s4 + $0x18] sm:$0xff]  ;;  %v2816_v54 = vld [vmem:[%s4881_s4 + $0x110] sm:$0xff]  ;;  %v5065_v45 = vrot.slane %v3664_v40, 1 }
  0x4c   : > { %1170 = vmatmul.f32.gmra.mxu1 %v3636_v7  ;;  %1194 = vmatmul.f32.gmra.mxu2 %v3686_v47  ;;  %5062 = vst [vmem:[#allocation45_spill] sm:$0xff] %v3725_v44  ;;  %v605_v8 = vmul.f32 %v3143_v5, %v547_v19  ;;  %v1022_v47 = vrot.slane %v3694_v33, 1  ;;  %v676_v31 = vadd.f32 %v3159_v13, %v618_v20  ;;  %v2832_v61 = vld [vmem:[%s4881_s4 + $0x190] sm:$0xff]  ;;  %v3748_v19 = vmax.f32 %v675_v43, 0.0 }
  0x4d   : > { %v688_v2 = vadd.f32 %v3159_v13, %v630_v6  ;;  %1486 = vmatpush.msrb.mxu2 %v2817_v9  ;;  %1648 = vmatpush.msrb.mxu3 %v2833_v34  ;;  %v3750_v35 = vmax.f32 %v687_v52, 0.0  ;;  %v619_v20 = vmul.f32 %v3143_v5, %v561_v55  ;;  %v631_v6 = vmul.f32 %v3143_v5, %v573_v62  ;;  %v926_v9 = vld [vmem:[%s4881_s4 + $0x10] sm:$0xff]  ;;  %v2815_v34 = vld [vmem:[%s4881_s4 + $0x108] sm:$0xff] }
  0x4e   : > { %1218 = vmatmul.f32.gmra.mxu3 %v3712_v15  ;;  %5063 = vst [vmem:[#allocation46_spill] sm:$0xff] %v3748_v19  ;;  %1818 = vmatpush.msrb.mxu0 %v2867_v57  ;;  %v3763_v43 = vsel %vm988_vm1, %v999_v56, %v5065_v45  ;;  %v1062_v52 = vrot.slane %v3725_v44, 1  ;;  %v700_v57 = vadd.f32 %v3159_v13, %v642_v51  ;;  %v2831_v55 = vld [vmem:[%s4881_s4 + $0x188] sm:$0xff]  ;;  %v3773_v15 = vsel %vm483_vm2, %v716_v27, 0.0 }
  0x4f   : > { %5064 = vst [vmem:[#allocation47_spill] sm:$0xff] %v3750_v35  ;;  %1243 = vmatpush.msrb.mxu1 %v927_v60  ;;  %1487 = vmatpush.msrb.mxu2 %v2816_v54  ;;  %v606_v62 = vmul.f32 %v3143_v5, %v548_v29  ;;  %v3775_v50 = vmax.f32 %v699_v30, 0.0  ;;  %v663_v45 = vadd.f32 %v3159_v13, %v605_v8  ;;  %v2865_v29 = vld [vmem:[%s4881_s4 + $0x218] sm:$0xff]  ;;  %v925_v51 = vld [vmem:[%s4881_s4 + $0x8] sm:$0xff]  ;;  %v5067_v60 = vrot.slane %v3532_v38, 1 }
  0x50   : > { %1649 = vmatpush.msrb.mxu3 %v2832_v61  ;;  %1819 = vmatpush.msrb.mxu0 %v2866_v22  ;;  %v643_v56 = vmul.f32 %v3143_v5, %v585_v14  ;;  %v5069_v30 = vrot.slane %v3584_v63, 1  ;;  %v3795_v8 = vmax.f32 %v676_v31, 0.0  ;;  %v3797_v14 = vmax.f32 %v688_v2, 0.0  ;;  %v549_v54 = vld [vmem:[%s3138_s10 + $0x58] sm:$0x3]  ;;  %v2814_v2 = vld [vmem:[%s4881_s4 + $0x100] sm:$0xff] }
  0x51   : > { %5066 = vst [vmem:[#allocation48_spill] sm:$0xff] %v3775_v50  ;;  %v3788_v27 = vsel %vm988_vm1, %v5067_v60, %v1022_v47  ;;  %1244 = vmatpush.msrb.mxu1 %v926_v9  ;;  %1488 = vmatpush.msrb.mxu2 %v2815_v34  ;;  %v3804_v61 = vsel %vm424_vm0, %v3748_v19, 0.0  ;;  %v3809_v47 = vsel %vm424_vm0, %v3750_v35, 0.0  ;;  %v689_v31 = vadd.f32 %v3159_v13, %v631_v6  ;;  %v2830_v9 = vld [vmem:[%s4881_s4 + $0x180] sm:$0xff]  ;;  %v2864_v6 = vld [vmem:[%s4881_s4 + $0x210] sm:$0xff]  ;;  %v2940_v35 = vld [vmem:[%s4881_s4 + $0x3f8] sm:$0xff] }
  0x52   : > { %5068 = vst [vmem:[#allocation49_spill] sm:$0xff] %v3788_v27  ;;  %v3793_v22 = vsel %vm988_vm1, %v5069_v30, %v1042_v59  ;;  %1146 = vmatmul.f32.gmra.mxu0 %v3763_v43  ;;  %v677_v59 = vadd.f32 %v3159_v13, %v619_v20  ;;  %1650 = vmatpush.msrb.mxu3 %v2831_v55  ;;  %v5074_v34 = vrot.slane %v3607_v25, 1  ;;  %v1002_v30 = vrot.slane %v3773_v15, 1 }
  0x53   : > { %5070 = vst [vmem:[#allocation50_spill] sm:$0xff] %v3793_v22  ;;  %v3825_v44 = vmax.f32 %v700_v57, 0.0  ;;  %v664_v20 = vadd.f32 %v3159_v13, %v606_v62  ;;  %1820 = vmatpush.msrb.mxu0 %v2865_v29  ;;  %1245 = vmatpush.msrb.mxu1 %v925_v51  ;;  %v3838_v55 = vmax.f32 %v663_v45, 0.0  ;;  %v701_v57 = vadd.f32 %v3159_v13, %v643_v56  ;;  %v924_v62 = vld [vmem:[%s4881_s4] sm:$0xff]  ;;  %v2909_v29 = vld [vmem:[%s4881_s4 + $0x378] sm:$0xff]  ;;  %v2863_v56 = vld [vmem:[%s4881_s4 + $0x208] sm:$0xff] }
  0x54   : > { %5071 = vst [vmem:[#allocation51_spill] sm:$0xff] %v3795_v8  ;;  %v3822_v60 = vsel %vm988_vm1, %v5074_v34, %v1062_v52  ;;  %1173 = vmatmul.f32.gmra.mxu1 %v3788_v27  ;;  %1197 = vmatmul.f32.gmra.mxu2 %v3793_v22  ;;  %v3836_v52 = vsel %vm424_vm0, %v3775_v50, 0.0  ;;  %v607_v51 = vmul.f32 %v3143_v5, %v549_v54  ;;  %v1024_v34 = vrot.slane %v3804_v61, 1 }
  0x55   : > { %5072 = vst [vmem:[#allocation52_spill] sm:$0xff] %v3797_v14  ;;  %v1025_v25 = vrot.slane %v3795_v8, 1  ;;  %v1044_v50 = vrot.slane %v3809_v47, 1  ;;  %v1045_v45 = vrot.slane %v3797_v14, 1  ;;  %1489 = vmatpush.msrb.mxu2 %v2814_v2  ;;  %1651 = vmatpush.msrb.mxu3 %v2830_v9  ;;  %v731_v5 = vmax.f32 %v677_v59, 0.0 }
  0x56   : > { %5073 = vst [vmem:[#allocation53_spill] sm:$0xff] %v3809_v47  ;;  %1221 = vmatmul.f32.gmra.mxu3 %v3822_v60  ;;  %v743_v54 = vmax.f32 %v689_v31, 0.0  ;;  %1821 = vmatpush.msrb.mxu0 %v2864_v6  ;;  %v2893_v47 = vld [vmem:[%s4881_s4 + $0x2f8] sm:$0xff]  ;;  %v5077_v2 = vrot.slane %v3664_v40, 1  ;;  %v1064_v14 = vrot.slane %v3836_v52, 1  ;;  %v1065_v22 = vrot.slane %v3825_v44, 1 }
  0x57   : > { %5075 = vst [vmem:[#allocation54_spill] sm:$0xff] %v3822_v60  ;;  %v3869_v63 = vmax.f32 %v664_v20, 0.0  ;;  %1246 = vmatpush.msrb.mxu1 %v924_v62  ;;  %2139 = vmatpush.msra.mxu2 %v2909_v29  ;;  %v3874_v59 = vsel %vm424_vm0, %v3838_v55, 0.0  ;;  %v755_v31 = vmax.f32 %v701_v57, 0.0  ;;  %v665_v6 = vadd.f32 %v3159_v13, %v607_v51 }
  0x58   : > { %5076 = vst [vmem:[#allocation55_spill] sm:$0xff] %v3825_v44  ;;  %v3865_v9 = vsel %vm988_vm1, %v5077_v2, %v1002_v30  ;;  %1822 = vmatpush.msrb.mxu0 %v2863_v56  ;;  %2311 = vmatpush.msra.mxu3 %v2940_v35  ;;  %v2862_v30 = vld [vmem:[%s4881_s4 + $0x200] sm:$0xff]  ;;  %v3881_v2 = vsel %vm988_vm1, %v1024_v34, %v1025_v25  ;;  %v3889_v57 = vsel %vm483_vm2, %v731_v5, 0.0  ;;  %v3893_v13 = vsel %vm483_vm2, %v743_v54, 0.0  ;;  %v2956_v35 = vld [vmem:[%s4881_s4 + $0x478] sm:$0xff]  ;;  %v2908_v34 = vld [vmem:[%s4881_s4 + $0x370] sm:$0xff] }
  0x59   : > { %5078 = vst [vmem:[#allocation56_spill] sm:$0xff] %v3881_v2  ;;  %v3884_v20 = vsel %vm988_vm1, %v1044_v50, %v1045_v45  ;;  %1977 = vmatpush.msra.mxu1 %v2893_v47  ;;  %v3899_v62 = vsel %vm988_vm1, %v1064_v14, %v1065_v22  ;;  %v1004_v50 = vrot.slane %v3874_v59, 1  ;;  %v1005_v47 = vrot.slane %v3869_v63, 1  ;;  %2140 = vmatpush.msra.mxu2 %v2908_v34  ;;  %v2939_v5 = vld [vmem:[%s4881_s4 + $0x3f0] sm:$0xff] }
  0x5a   : > { %1149 = vmatmul.f32.gmra.mxu0 %v3865_v9  ;;  %v3907_v29 = vsel %vm483_vm2, %v755_v31, 0.0  ;;  %v719_v51 = vmax.f32 %v665_v6, 0.0  ;;  %v1027_v14 = vrot.slane %v3889_v57, 1  ;;  %v1047_v56 = vrot.slane %v3893_v13, 1  ;;  %v2892_v54 = vld [vmem:[%s4881_s4 + $0x2f0] sm:$0xff]  ;;  %2312 = vmatpush.msra.mxu3 %v2939_v5 }
  0x5b   : > { %1823 = vmatpush.msrb.mxu0 %v2862_v30  ;;  %v3922_v31 = vsel %vm988_vm1, %v1004_v50, %v1005_v47  ;;  %v1067_v6 = vrot.slane %v3907_v29, 1  ;;  %1978 = vmatpush.msra.mxu1 %v2892_v54  ;;  %v1350_v5 = vrot.slane %v3464_v28, 2  ;;  %v1351_v54 = vrot.slane %v3453_v24, 2  ;;  %v2906_v28 = vld [vmem:[%s4881_s4 + $0x360] sm:$0xff] }
  0x5c   : > { %1176 = vmatmul.f32.gmra.mxu1 %v3881_v2  ;;  %1200 = vmatmul.f32.gmra.mxu2 %v3884_v20  ;;  %v3927_v30 = vsel %vm483_vm2, %v719_v51, 0.0  ;;  %v3933_v34 = vsel %vm988_vm1, %v1045_v45, %v1047_v56  ;;  %v5081_v51 = vmov 0.0   ;;  %v2891_v56 = vld [vmem:[%s4881_s4 + $0x2e8] sm:$0xff] }
  0x5d   : > { %2480 = vmatpush.msra.mxu0 %v2956_v35  ;;  %v3930_v35 = vsel %vm988_vm1, %v1025_v25, %v1027_v14  ;;  %5080 = vst [vmem:[#allocation58_spill] sm:$0xff] %v3933_v34  ;;  %v3937_v44 = vsel %vm988_vm1, %v1065_v22, %v1067_v6  ;;  %v1007_v50 = vrot.slane %v3927_v30, 1  ;;  %v2955_v25 = vld [vmem:[%s4881_s4 + $0x470] sm:$0xff]  ;;  %v3950_v14 = vrot.slane %v5081_v51, 2  ;;  %v2907_v22 = vld [vmem:[%s4881_s4 + $0x368] sm:$0xff]  ;;  %1979 = vmatpush.msra.mxu1 %v2891_v56 }
  0x5e   : > { %1224 = vmatmul.f32.gmra.mxu3 %v3899_v62  ;;  %5079 = vst [vmem:[#allocation57_spill] sm:$0xff] %v3930_v35  ;;  %2141 = vmatpush.msra.mxu2 %v2907_v22  ;;  %v2954_v6 = vld [vmem:[%s4881_s4 + $0x468] sm:$0xff]  ;;  %v1356_v22 = vrot.slane %v3664_v40, 2 }
  0x5f   : > { %v3947_v45 = vsel %vm988_vm1, %v1005_v47, %v1007_v50  ;;  %2481 = vmatpush.msra.mxu0 %v2955_v25  ;;  %5082 = vst [vmem:[#allocation59_spill] sm:$0xff] %v3950_v14  ;;  %v2938_v47 = vld [vmem:[%s4881_s4 + $0x3e8] sm:$0xff]  ;;  %v3977_v50 = vsel %vm1344_vm3, %v1350_v5, %v1351_v54  ;;  %v2936_v5 = vld [vmem:[%s4881_s4 + $0x3d8] sm:$0xff] }
  0x60   : > { %2313 = vmatpush.msra.mxu3 %v2938_v47  ;;  %2142 = vmatpush.msra.mxu2 %v2906_v28  ;;  %v2953_v47 = vld [vmem:[%s4881_s4 + $0x460] sm:$0xff]  ;;  %v1361_v28 = vrot.slane %v3869_v63, 2 }
  0x61   : > { %2482 = vmatpush.msra.mxu0 %v2954_v6 }
  0x62   : > { %1152 = vmatmul.f32.gmra.mxu0 %v3922_v31 }
  0x63   : > { %2483 = vmatpush.msra.mxu0 %v2953_v47 }
  0x64   : > { %1179 = vmatmul.f32.gmra.mxu1 %v3930_v35  ;;  %1203 = vmatmul.f32.gmra.mxu2 %v3933_v34 }
  0x66   : > { %1227 = vmatmul.f32.gmra.mxu3 %v3937_v44 }
  0x6a   : > { %1155 = vmatmul.f32.gmra.mxu0 %v3947_v45 }
  0x6c   : > { %1247 = vmatmul.f32.vlgmr.msrb.gmra.mxu1 %v5081_v51  ;;  %1490 = vmatmul.f32.vlgmr.msrb.gmra.mxu2 %v3950_v14 }
  0x6e   : > { %2846 = vmatmul.msk.f32.vlgmr.msrb.gmra.mxu3 %vm424_vm0, %v3415_v41 }
  0x72   : > { %1824 = vmatmul.f32.vlgmr.msrb.gmra.mxu0 %v3555_v4  ;;  %v1353_v4 = vrot.slane %v3565_v32, 2  ;;  %v1355_v32 = vrot.slane %v3672_v21, 2  ;;  %v1358_v21 = vrot.slane %v3773_v15, 2  ;;  %v1360_v15 = vrot.slane %v3874_v59, 2  ;;  %v2904_v59 = vld [vmem:[%s4881_s4 + $0x350] sm:$0xff] }
  0x74   : > { %1250 = vmatmul.f32.gmra.mxu1 %v5081_v51  ;;  %1493 = vmatmul.f32.gmra.mxu2 %v3950_v14  ;;  %v3998_v25 = vsel %vm1344_vm3, %v1351_v54, %v1353_v4  ;;  %v4010_v56 = vsel %vm1344_vm3, %v1355_v32, %v1356_v22  ;;  %v2889_v54 = vld [vmem:[%s4881_s4 + $0x2d8] sm:$0xff]  ;;  %v4031_v6 = vsel %vm1344_vm3, %v1356_v22, %v1358_v21  ;;  %v2935_v32 = vld [vmem:[%s4881_s4 + $0x3d0] sm:$0xff] }
  0x75   : > { %v2952_v4 = vld [vmem:[%s4881_s4 + $0x458] sm:$0xff]  ;;  %v2888_v22 = vld [vmem:[%s4881_s4 + $0x2d0] sm:$0xff] }
  0x76   : > { %1655 = vmatmul.f32.gmra.mxu3 %v3453_v24  ;;  %2484 = vmatpush.msra.mxu0 %v2952_v4  ;;  %v2951_v21 = vld [vmem:[%s4881_s4 + $0x450] sm:$0xff] }
  0x78   : > { %2485 = vmatpush.msra.mxu0 %v2951_v21  ;;  %v1371_v21 = vrot.slane %v3345_v1, 2 }
  0x7a   : > { %1827 = vmatmul.f32.gmra.mxu0 %v3660_v53  ;;  %v2937_v53 = vld [vmem:[%s4881_s4 + $0x3e0] sm:$0xff] }
  0x7b   : > { %2314 = vmatpush.msra.mxu3 %v2937_v53  ;;  %v4043_v53 = vsel %vm1344_vm3, %v1360_v15, %v1361_v28  ;;  %v1368_v15 = vrot.slane %v3274_v18, 2 }
  0x7c   : > { %2799 = vmatmul.msk.f32.gmra.mxu1 %vm424_vm0, %v3415_v41  ;;  %1496 = vmatmul.f32.gmra.mxu2 %v3977_v50  ;;  %v2890_v41 = vld [vmem:[%s4881_s4 + $0x2e0] sm:$0xff] }
  0x7d   : > { %1980 = vmatpush.msra.mxu1 %v2890_v41  ;;  %2315 = vmatpush.msra.mxu3 %v2936_v5  ;;  %v1363_v41 = vrot.slane %v3927_v30, 2  ;;  %v1365_v30 = vrot.slane %v3219_v49, 2  ;;  %v2903_v49 = vld [vmem:[%s4881_s4 + $0x348] sm:$0xff] }
  0x7e   : > { %2847 = vmatmul.msk.f32.gmra.mxu3 %vm424_vm0, %v3628_v10 }
  0x7f   : > { %1981 = vmatpush.msra.mxu1 %v2889_v54  ;;  %2316 = vmatpush.msra.mxu3 %v2935_v32  ;;  %v4064_v47 = vsel %vm1344_vm3, %v1361_v28, %v1363_v41  ;;  %v2934_v28 = vld [vmem:[%s4881_s4 + $0x3c8] sm:$0xff] }
  0x80   : > { %v2887_v41 = vld [vmem:[%s4881_s4 + $0x2c8] sm:$0xff] }
  0x81   : > { %1982 = vmatpush.msra.mxu1 %v2888_v22  ;;  %2317 = vmatpush.msra.mxu3 %v2934_v28 }
  0x82   : > { %1830 = vmatmul.f32.gmra.mxu0 %v3763_v43 }
  0x83   : > { %1983 = vmatpush.msra.mxu1 %v2887_v41 }
  0x84   : > { %1256 = vmatmul.f32.gmra.mxu1 %v3453_v24  ;;  %1499 = vmatmul.f32.gmra.mxu2 %v3998_v25  ;;  %v2905_v24 = vld [vmem:[%s4881_s4 + $0x358] sm:$0xff] }
  0x85   : > { %2143 = vmatpush.msra.mxu2 %v2905_v24  ;;  %v1366_v24 = vrot.slane %v3202_v42, 2 }
  0x86   : > { %1661 = vmatmul.f32.gmra.mxu3 %v3664_v40 }
  0x87   : > { %2144 = vmatpush.msra.mxu2 %v2904_v59  ;;  %v4078_v54 = vsel %vm1344_vm3, %v1365_v30, %v1366_v24  ;;  %v4107_v22 = vsel %vm1344_vm3, %v1366_v24, %v1368_v15  ;;  %v1370_v30 = vrot.slane %v3335_v58, 2  ;;  %v2902_v58 = vld [vmem:[%s4881_s4 + $0x340] sm:$0xff] }
  0x88   : > { %5083 = vst [vmem:[#allocation60_spill] sm:$0xff] %v4078_v54 }
  0x89   : > { %2145 = vmatpush.msra.mxu2 %v2903_v49  ;;  %5085 = vst [vmem:[#allocation62_spill] sm:$0xff] %v4107_v22  ;;  %v2950_v49 = vld [vmem:[%s4881_s4 + $0x448] sm:$0xff]  ;;  %v4127_v14 = vsel %vm1344_vm3, %v1370_v30, %v1371_v21  ;;  %v2933_v30 = vld [vmem:[%s4881_s4 + $0x3c0] sm:$0xff] }
  0x8a   : > { %1833 = vmatmul.f32.gmra.mxu0 %v3865_v9  ;;  %5087 = vst [vmem:[#allocation64_spill] sm:$0xff] %v4127_v14  ;;  %2318 = vmatpush.msra.mxu3 %v2933_v30  ;;  %v1375_v30 = vrot.slane %v3540_v39, 2  ;;  %v2901_v39 = vld [vmem:[%s4881_s4 + $0x338] sm:$0xff] }
  0x8b   : > { %2486 = vmatpush.msra.mxu0 %v2950_v49  ;;  %v1373_v49 = vrot.slane %v3438_v3, 2  ;;  %2146 = vmatpush.msra.mxu2 %v2902_v58 }
  0x8c   : > { %2800 = vmatmul.msk.f32.gmra.mxu1 %vm424_vm0, %v3628_v10  ;;  %1502 = vmatmul.f32.gmra.mxu2 %v4010_v56 }
  0x8d   : > { %2147 = vmatpush.msra.mxu2 %v2901_v39 }
  0x8e   : > { %2848 = vmatmul.msk.f32.gmra.mxu3 %vm424_vm0, %v3838_v55 }
  0x92   : > { %1836 = vmatmul.f32.gmra.mxu0 %v3922_v31 }
  0x94   : > { %1262 = vmatmul.f32.gmra.mxu1 %v3664_v40  ;;  %1505 = vmatmul.f32.gmra.mxu2 %v4031_v6 }
  0x96   : > { %1667 = vmatmul.f32.gmra.mxu3 %v3869_v63 }
  0x9a   : > { %1839 = vmatmul.f32.gmra.mxu0 %v3947_v45 }
  0x9c   : > { %2801 = vmatmul.msk.f32.gmra.mxu1 %vm424_vm0, %v3838_v55  ;;  %1508 = vmatmul.f32.gmra.mxu2 %v4043_v53 }
  0x9e   : > { %2849 = vmatmul.msk.f32.gmra.mxu3 %vm424_vm0, %v3191_v36 }
  0xa2   : > { %1842 = vmatmul.f32.gmra.mxu0 %v3265_v16 }
  0xa4   : > { %1268 = vmatmul.f32.gmra.mxu1 %v3869_v63  ;;  %1511 = vmatmul.f32.gmra.mxu2 %v4064_v47 }
  0xa6   : > { %1673 = vmatmul.f32.gmra.mxu3 %v3202_v42 }
  0xa9   : > { %v4075_v5 = vpop.f32.mrf.mxu1 }
  0xaa   : > { %1845 = vmatmul.f32.gmra.mxu0 %v3363_v11  ;;  %v5108_v11 = vld [vmem:[#allocation26_spill] sm:$0xff] }
  0xac   : > { %2802 = vmatmul.msk.f32.gmra.mxu1 %vm424_vm0, %v3191_v36  ;;  %1514 = vmatmul.f32.gmra.mxu2 %v4078_v54 }
  0xae   : > { %2850 = vmatmul.msk.f32.gmra.mxu3 %vm424_vm0, %v3285_v23 }
  0xaf   : > { %v4095_v4 = vpop.f32.mrf.mxu2  ;;  %v4097_v59 = vpop.f32.mrf.mxu0 }
  0xb1   : > { %v4102_v18 = vpop.f32.mrf.mxu1  ;;  %v4104_v32 = vpop.f32.mrf.mxu3 }
  0xb2   : > { %5084 = vst [vmem:[#allocation61_spill] sm:$0xff] %v4104_v32  ;;  %1848 = vmatmul.f32.gmra.mxu0 %v3446_v12  ;;  %v2886_v32 = vld [vmem:[%s4881_s4 + $0x2c0] sm:$0xff] }
  0xb3   : > { %1984 = vmatpush.msra.mxu1 %v2886_v32  ;;  %v2949_v32 = vld [vmem:[%s4881_s4 + $0x440] sm:$0xff] }
  0xb4   : > { %1274 = vmatmul.f32.gmra.mxu1 %v3202_v42  ;;  %1517 = vmatmul.f32.gmra.mxu2 %v4107_v22  ;;  %v2883_v22 = vld [vmem:[%s4881_s4 + $0x2a8] sm:$0xff] }
  0xb5   : > { %2487 = vmatpush.msra.mxu0 %v2949_v32  ;;  %v1378_v32 = vrot.slane %v3694_v33, 2 }
  0xb6   : > { %1679 = vmatmul.f32.gmra.mxu3 %v3345_v1 }
  0xb7   : > { %v4118_v28 = vpop.f32.mrf.mxu2  ;;  %v4120_v24 = vpop.f32.mrf.mxu0 }
  0xb9   : > { %v4122_v15 = vpop.f32.mrf.mxu1  ;;  %v4124_v41 = vpop.f32.mrf.mxu3 }
  0xba   : > { %5086 = vst [vmem:[#allocation63_spill] sm:$0xff] %v4124_v41  ;;  %1851 = vmatmul.f32.gmra.mxu0 %v3523_v48  ;;  %v4156_v48 = vsel %vm1344_vm3, %v1371_v21, %v1373_v49 }
  0xbb   : > { %5089 = vst [vmem:[#allocation66_spill] sm:$0xff] %v4156_v48 }
  0xbc   : > { %2803 = vmatmul.msk.f32.gmra.mxu1 %vm424_vm0, %v3285_v23  ;;  %1520 = vmatmul.f32.gmra.mxu2 %v4127_v14  ;;  %v1376_v14 = vrot.slane %v3532_v38, 2 }
  0xbe   : > { %2851 = vmatmul.msk.f32.gmra.mxu3 %vm424_vm0, %v3492_v0  ;;  %v4205_v39 = vsel %vm1344_vm3, %v1376_v14, %v1378_v32 }
  0xbf   : > { %v4144_v51 = vpop.f32.mrf.mxu2  ;;  %v4146_v41 = vpop.f32.mrf.mxu0  ;;  %5093 = vst [vmem:[#allocation70_spill] sm:$0xff] %v4205_v39 }
  0xc1   : > { %v4151_v3 = vpop.f32.mrf.mxu1  ;;  %v4153_v58 = vpop.f32.mrf.mxu3 }
  0xc2   : > { %5088 = vst [vmem:[#allocation65_spill] sm:$0xff] %v4153_v58  ;;  %1854 = vmatmul.f32.gmra.mxu0 %v3636_v7 }
  0xc4   : > { %1280 = vmatmul.f32.gmra.mxu1 %v3345_v1  ;;  %1523 = vmatmul.f32.gmra.mxu2 %v4156_v48  ;;  %v4176_v48 = vsel %vm1344_vm3, %v1375_v30, %v1376_v14  ;;  %v2932_v30 = vld [vmem:[%s4881_s4 + $0x3b8] sm:$0xff]  ;;  %v1381_v1 = vrot.slane %v3795_v8, 2 }
  0xc5   : > { %5091 = vst [vmem:[#allocation68_spill] sm:$0xff] %v4176_v48  ;;  %2319 = vmatpush.msra.mxu3 %v2932_v30  ;;  %v1380_v30 = vrot.slane %v3804_v61, 2  ;;  %v2900_v61 = vld [vmem:[%s4881_s4 + $0x330] sm:$0xff] }
  0xc6   : > { %1685 = vmatmul.f32.gmra.mxu3 %v3532_v38  ;;  %2148 = vmatpush.msra.mxu2 %v2900_v61 }
  0xc7   : > { %v4167_v58 = vpop.f32.mrf.mxu2  ;;  %v4169_v21 = vpop.f32.mrf.mxu0 }
  0xc9   : > { %v4171_v49 = vpop.f32.mrf.mxu1  ;;  %v4173_v7 = vpop.f32.mrf.mxu3 }
  0xca   : > { %5090 = vst [vmem:[#allocation67_spill] sm:$0xff] %v4173_v7  ;;  %1857 = vmatmul.f32.gmra.mxu0 %v3788_v27 }
  0xcc   : > { %2804 = vmatmul.msk.f32.gmra.mxu1 %vm424_vm0, %v3492_v0  ;;  %1526 = vmatmul.f32.gmra.mxu2 %v4176_v48  ;;  %v2885_v48 = vld [vmem:[%s4881_s4 + $0x2b8] sm:$0xff] }
  0xcd   : > { %1985 = vmatpush.msra.mxu1 %v2885_v48 }
  0xce   : > { %2852 = vmatmul.msk.f32.gmra.mxu3 %vm424_vm0, %v3748_v19 }
  0xcf   : > { %v4193_v7 = vpop.f32.mrf.mxu2  ;;  %v4195_v27 = vpop.f32.mrf.mxu0 }
  0xd1   : > { %v4200_v0 = vpop.f32.mrf.mxu1  ;;  %v4202_v33 = vpop.f32.mrf.mxu3 }
  0xd2   : > { %5092 = vst [vmem:[#allocation69_spill] sm:$0xff] %v4202_v33  ;;  %1860 = vmatmul.f32.gmra.mxu0 %v3881_v2  ;;  %v2948_v33 = vld [vmem:[%s4881_s4 + $0x438] sm:$0xff]  ;;  %v4225_v2 = vsel %vm1344_vm3, %v1380_v30, %v1381_v1  ;;  %v2931_v30 = vld [vmem:[%s4881_s4 + $0x3b0] sm:$0xff] }
  0xd3   : > { %2488 = vmatpush.msra.mxu0 %v2948_v33  ;;  %5096 = vst [vmem:[#allocation73_spill] sm:$0xff] %v4225_v2  ;;  %v1383_v33 = vrot.slane %v3889_v57, 2  ;;  %2320 = vmatpush.msra.mxu3 %v2931_v30 }
  0xd4   : > { %1286 = vmatmul.f32.gmra.mxu1 %v3532_v38  ;;  %1529 = vmatmul.f32.gmra.mxu2 %v4205_v39  ;;  %v5100_v39 = vld [vmem:[#allocation6_spill] sm:$0xff]  ;;  %v5101_v38 = vld [vmem:[#allocation5_spill] sm:$0xff] }
  0xd5   : > { %v4254_v61 = vsel %vm1344_vm3, %v1381_v1, %v1383_v33  ;;  %v1385_v30 = vrot.slane %v5100_v39, 2  ;;  %v5105_v39 = vld [vmem:[#allocation19_spill] sm:$0xff] }
  0xd6   : > { %1691 = vmatmul.f32.gmra.mxu3 %v3795_v8  ;;  %5099 = vst [vmem:[#allocation76_spill] sm:$0xff] %v4254_v61 }
  0xd7   : > { %v4216_v12 = vpop.f32.mrf.mxu2  ;;  %v4218_v14 = vpop.f32.mrf.mxu0 }
  0xd8   : > { %5094 = vst [vmem:[#allocation71_spill] sm:$0xff] %v4216_v12 }
  0xd9   : > { %v4220_v48 = vpop.f32.mrf.mxu1  ;;  %v4222_v32 = vpop.f32.mrf.mxu3 }
  0xda   : > { %5095 = vst [vmem:[#allocation72_spill] sm:$0xff] %v4222_v32  ;;  %1863 = vmatmul.f32.gmra.mxu0 %v3930_v35 }
  0xdc   : > { %2805 = vmatmul.msk.f32.gmra.mxu1 %vm424_vm0, %v3748_v19  ;;  %1532 = vmatmul.f32.gmra.mxu2 %v4225_v2  ;;  %v2884_v2 = vld [vmem:[%s4881_s4 + $0x2b0] sm:$0xff] }
  0xdd   : > { %1986 = vmatpush.msra.mxu1 %v2884_v2 }
  0xde   : > { %2853 = vmatmul.msk.f32.gmra.mxu3 %vm424_vm0, %v3193_v37 }
  0xdf   : > { %v4242_v32 = vpop.f32.mrf.mxu2  ;;  %v4244_v35 = vpop.f32.mrf.mxu0  ;;  %1987 = vmatpush.msra.mxu1 %v2883_v22 }
  0xe0   : > { %5097 = vst [vmem:[#allocation74_spill] sm:$0xff] %v4242_v32  ;;  %v1386_v32 = vrot.slane %v5101_v38, 2 }
  0xe1   : > { %v4249_v19 = vpop.f32.mrf.mxu1  ;;  %v4251_v57 = vpop.f32.mrf.mxu3 }
  0xe2   : > { %5098 = vst [vmem:[#allocation75_spill] sm:$0xff] %v4251_v57  ;;  %1866 = vmatmul.f32.gmra.mxu0 %v3270_v17  ;;  %v2947_v57 = vld [vmem:[%s4881_s4 + $0x430] sm:$0xff]  ;;  %v4272_v17 = vsel %vm1344_vm3, %v1385_v30, %v1386_v32  ;;  %v2930_v30 = vld [vmem:[%s4881_s4 + $0x3a8] sm:$0xff] }
  0xe3   : > { %2489 = vmatpush.msra.mxu0 %v2947_v57  ;;  %5104 = vst [vmem:[#allocation77_spill] sm:$0xff] %v4272_v17  ;;  %2321 = vmatpush.msra.mxu3 %v2930_v30  ;;  %v5111_v30 = vld [vmem:[#allocation20_spill] sm:$0xff] }
  0xe4   : > { %1292 = vmatmul.f32.gmra.mxu1 %v3795_v8  ;;  %1535 = vmatmul.f32.gmra.mxu2 %v4254_v61  ;;  %v2899_v61 = vld [vmem:[%s4881_s4 + $0x328] sm:$0xff]  ;;  %v5106_v8 = vld [vmem:[#allocation10_spill] sm:$0xff]  ;;  %v1391_v42 = vrot.slane %v5111_v30, 2 }
  0xe5   : > { %v1388_v57 = vrot.slane %v5106_v8, 2  ;;  %2149 = vmatpush.msra.mxu2 %v2899_v61 }
  0xe6   : > { %1697 = vmatmul.f32.gmra.mxu3 %v5101_v38 }
  0xe7   : > { %v4265_v23 = vpop.f32.mrf.mxu2  ;;  %v4267_v1 = vpop.f32.mrf.mxu0 }
  0xe8   : > { %5102 = vst [vmem:[#allocation6_spill] sm:$0xff] %v4265_v23  ;;  %v5107_v23 = vld [vmem:[#allocation15_spill] sm:$0xff] }
  0xe9   : > { %v4269_v2 = vpop.f32.mrf.mxu3  ;;  %v1248_v33 = vpop.f32.mrf.mxu1 }
  0xea   : > { %5103 = vst [vmem:[#allocation5_spill] sm:$0xff] %v4269_v2  ;;  %1869 = vmatmul.f32.gmra.mxu0 %v5105_v39  ;;  %v1249_v2 = vadd.f32 %v1248_v33, %v4097_v59  ;;  %v4294_v59 = vsel %vm1344_vm3, %v1386_v32, %v1388_v57 }
  0xec   : > { %2806 = vmatmul.msk.f32.gmra.mxu1 %vm424_vm0, %v3193_v37  ;;  %1538 = vmatmul.f32.gmra.mxu2 %v4272_v17 }
  0xee   : > { %2854 = vmatmul.msk.f32.gmra.mxu3 %vm424_vm0, %v5107_v23 }
  0xef   : > { %v1491_v39 = vpop.f32.mrf.mxu2  ;;  %v1825_v37 = vpop.f32.mrf.mxu0 }
  0xf0   : > { %v1587_v17 = vadd.f32 %v1491_v39, %v1249_v2  ;;  %v5110_v2 = vld [vmem:[#allocation21_spill] sm:$0xff] }
  0xf1   : > { %v1251_v8 = vpop.f32.mrf.mxu1  ;;  %v1653_v61 = vpop.f32.mrf.mxu3  ;;  %v1390_v39 = vrot.slane %v5110_v2, 2 }
  0xf2   : > { %v1749_v33 = vadd.f32 %v1653_v61, %v1587_v17  ;;  %1872 = vmatmul.f32.gmra.mxu0 %v5108_v11  ;;  %v1252_v54 = vadd.f32 %v1251_v8, %v4120_v24  ;;  %v2946_v17 = vld [vmem:[%s4881_s4 + $0x428] sm:$0xff] }
  0xf3   : > { %2490 = vmatpush.msra.mxu0 %v2946_v17  ;;  %v5115_v24 = vld [vmem:[#allocation27_spill] sm:$0xff]  ;;  %v5116_v17 = vld [vmem:[#allocation33_spill] sm:$0xff] }
  0xf4   : > { %v4297_v12 = vadd.f32 %v1825_v37, %v1749_v33  ;;  %1298 = vmatmul.f32.gmra.mxu1 %v5101_v38  ;;  %1541 = vmatmul.f32.gmra.mxu2 %v4294_v59  ;;  %v4309_v33 = vsel %vm1344_vm3, %v1390_v39, %v1391_v42  ;;  %v1393_v8 = vrot.slane %v5115_v24, 2 }
  0xf5   : > { %5112 = vst [vmem:[#allocation21_spill] sm:$0xff] %v4309_v33 }
  0xf6   : > { %5109 = vst [vmem:[#allocation10_spill] sm:$0xff] %v4297_v12  ;;  %1703 = vmatmul.f32.gmra.mxu3 %v5111_v30  ;;  %v5113_v12 = vld [vmem:[#allocation35_spill] sm:$0xff] }
  0xf7   : > { %v1494_v22 = vpop.f32.mrf.mxu2  ;;  %v1828_v32 = vpop.f32.mrf.mxu0 }
  0xf8   : > { %v1588_v37 = vadd.f32 %v1494_v22, %v1252_v54  ;;  %v2898_v54 = vld [vmem:[%s4881_s4 + $0x320] sm:$0xff] }
  0xf9   : > { %v1254_v57 = vpop.f32.mrf.mxu1  ;;  %v1656_v61 = vpop.f32.mrf.mxu3  ;;  %2150 = vmatpush.msra.mxu2 %v2898_v54  ;;  %v2929_v22 = vld [vmem:[%s4881_s4 + $0x3a0] sm:$0xff] }
  0xfa   : > { %v1750_v2 = vadd.f32 %v1656_v61, %v1588_v37  ;;  %1875 = vmatmul.f32.gmra.mxu0 %v5113_v12  ;;  %v1255_v39 = vadd.f32 %v1254_v57, %v4146_v41  ;;  %2322 = vmatpush.msra.mxu3 %v2929_v22  ;;  %v4333_v41 = vsel %vm1344_vm3, %v1391_v42, %v1393_v8  ;;  %v2945_v42 = vld [vmem:[%s4881_s4 + $0x420] sm:$0xff] }
  0xfb   : > { %2491 = vmatpush.msra.mxu0 %v2945_v42  ;;  %v5125_v42 = vld [vmem:[#allocation47_spill] sm:$0xff] }
  0xfc   : > { %v4312_v11 = vadd.f32 %v1828_v32, %v1750_v2  ;;  %2807 = vmatmul.msk.f32.gmra.mxu1 %vm424_vm0, %v5107_v23  ;;  %1544 = vmatmul.f32.gmra.mxu2 %v4309_v33  ;;  %v2882_v2 = vld [vmem:[%s4881_s4 + $0x2a0] sm:$0xff] }
  0xfd   : > { %1988 = vmatpush.msra.mxu1 %v2882_v2 }
  0xfe   : > { %5114 = vst [vmem:[#allocation20_spill] sm:$0xff] %v4312_v11  ;;  %2855 = vmatmul.msk.f32.gmra.mxu3 %vm424_vm0, %v5116_v17  ;;  %v5117_v11 = vld [vmem:[#allocation42_spill] sm:$0xff] }
  0xff   : > { %v1497_v32 = vpop.f32.mrf.mxu2  ;;  %v1831_v37 = vpop.f32.mrf.mxu0 }
 0x100   : > { %v1589_v61 = vadd.f32 %v1497_v32, %v1255_v39  ;;  %v5119_v39 = vld [vmem:[#allocation37_spill] sm:$0xff]  ;;  %v5120_v32 = vld [vmem:[#allocation36_spill] sm:$0xff] }
 0x101   : > { %v1257_v24 = vpop.f32.mrf.mxu1  ;;  %v1659_v54 = vpop.f32.mrf.mxu3  ;;  %v1395_v22 = vrot.slane %v5119_v39, 2  ;;  %v1396_v33 = vrot.slane %v5120_v32, 2 }
 0x102   : > { %v1751_v57 = vadd.f32 %v1659_v54, %v1589_v61  ;;  %1878 = vmatmul.f32.gmra.mxu0 %v5117_v11  ;;  %v1258_v23 = vadd.f32 %v1257_v24, %v4169_v21  ;;  %v5124_v21 = vld [vmem:[#allocation43_spill] sm:$0xff] }
 0x103   : > { %v1398_v24 = vrot.slane %v5124_v21, 2 }
 0x104   : > { %v4336_v12 = vadd.f32 %v1831_v37, %v1751_v57  ;;  %1304 = vmatmul.f32.gmra.mxu1 %v5111_v30  ;;  %1547 = vmatmul.f32.gmra.mxu2 %v4333_v41  ;;  %v4348_v57 = vsel %vm1344_vm3, %v1395_v22, %v1396_v33 }
 0x105   : > { %5121 = vst [vmem:[#allocation33_spill] sm:$0xff] %v4348_v57 }
 0x106   : > { %5118 = vst [vmem:[#allocation27_spill] sm:$0xff] %v4336_v12  ;;  %1709 = vmatmul.f32.gmra.mxu3 %v5120_v32  ;;  %v5122_v12 = vld [vmem:[#allocation50_spill] sm:$0xff] }
 0x107   : > { %v1500_v8 = vpop.f32.mrf.mxu2  ;;  %v1834_v61 = vpop.f32.mrf.mxu0 }
 0x108   : > { %v1590_v37 = vadd.f32 %v1500_v8, %v1258_v23  ;;  %v2897_v23 = vld [vmem:[%s4881_s4 + $0x318] sm:$0xff] }
 0x109   : > { %v1260_v2 = vpop.f32.mrf.mxu1  ;;  %v1662_v54 = vpop.f32.mrf.mxu3  ;;  %2151 = vmatpush.msra.mxu2 %v2897_v23  ;;  %v2928_v8 = vld [vmem:[%s4881_s4 + $0x398] sm:$0xff] }
 0x10a   : > { %v1752_v39 = vadd.f32 %v1662_v54, %v1590_v37  ;;  %1881 = vmatmul.f32.gmra.mxu0 %v5122_v12  ;;  %v1261_v22 = vadd.f32 %v1260_v2, %v4195_v27  ;;  %2323 = vmatpush.msra.mxu3 %v2928_v8  ;;  %v4372_v27 = vsel %vm1344_vm3, %v1396_v33, %v1398_v24  ;;  %v2944_v33 = vld [vmem:[%s4881_s4 + $0x418] sm:$0xff] }
 0x10b   : > { %2492 = vmatpush.msra.mxu0 %v2944_v33  ;;  %v2927_v33 = vld [vmem:[%s4881_s4 + $0x390] sm:$0xff] }
 0x10c   : > { %v4351_v11 = vadd.f32 %v1834_v61, %v1752_v39  ;;  %2808 = vmatmul.msk.f32.gmra.mxu1 %vm424_vm0, %v5116_v17  ;;  %1550 = vmatmul.f32.gmra.mxu2 %v4348_v57  ;;  %v2881_v39 = vld [vmem:[%s4881_s4 + $0x298] sm:$0xff] }
 0x10d   : > { %1989 = vmatpush.msra.mxu1 %v2881_v39  ;;  %2324 = vmatpush.msra.mxu3 %v2927_v33 }
 0x10e   : > { %5123 = vst [vmem:[#allocation37_spill] sm:$0xff] %v4351_v11  ;;  %2856 = vmatmul.msk.f32.gmra.mxu3 %vm424_vm0, %v5125_v42 }
 0x10f   : > { %v1503_v61 = vpop.f32.mrf.mxu2  ;;  %v1837_v37 = vpop.f32.mrf.mxu0 }
 0x110   : > { %v1591_v54 = vadd.f32 %v1503_v61, %v1261_v22  ;;  %v5127_v22 = vld [vmem:[#allocation53_spill] sm:$0xff]  ;;  %v5128_v61 = vld [vmem:[#allocation52_spill] sm:$0xff] }
 0x111   : > { %v1263_v21 = vpop.f32.mrf.mxu1  ;;  %v1665_v23 = vpop.f32.mrf.mxu3  ;;  %v1400_v8 = vrot.slane %v5127_v22, 2  ;;  %v1401_v12 = vrot.slane %v5128_v61, 2 }
 0x112   : > { %v1753_v2 = vadd.f32 %v1665_v23, %v1591_v54  ;;  %1884 = vmatmul.f32.gmra.mxu0 %v3884_v20  ;;  %v1264_v57 = vadd.f32 %v1263_v21, %v4218_v14  ;;  %v2896_v14 = vld [vmem:[%s4881_s4 + $0x310] sm:$0xff] }
 0x113   : > { %2152 = vmatpush.msra.mxu2 %v2896_v14  ;;  %v5132_v14 = vld [vmem:[#allocation12_spill] sm:$0xff] }
 0x114   : > { %v4375_v11 = vadd.f32 %v1837_v37, %v1753_v2  ;;  %1310 = vmatmul.f32.gmra.mxu1 %v5120_v32  ;;  %1553 = vmatmul.f32.gmra.mxu2 %v4372_v27  ;;  %v4387_v2 = vsel %vm1344_vm3, %v1400_v8, %v1401_v12  ;;  %v5131_v8 = vld [vmem:[#allocation4_spill] sm:$0xff] }
 0x115   : > { %5129 = vst [vmem:[#allocation43_spill] sm:$0xff] %v4387_v2 }
 0x116   : > { %5126 = vst [vmem:[#allocation36_spill] sm:$0xff] %v4375_v11  ;;  %1715 = vmatmul.f32.gmra.mxu3 %v5128_v61 }
 0x117   : > { %v1506_v24 = vpop.f32.mrf.mxu2  ;;  %v1840_v54 = vpop.f32.mrf.mxu0 }
 0x118   : > { %v1592_v37 = vadd.f32 %v1506_v24, %v1264_v57  ;;  %v1403_v57 = vrot.slane %v3893_v13, 2 }
 0x119   : > { %v1266_v39 = vpop.f32.mrf.mxu1  ;;  %v1668_v23 = vpop.f32.mrf.mxu3 }
 0x11a   : > { %v1754_v22 = vadd.f32 %v1668_v23, %v1592_v37  ;;  %1887 = vmatmul.f32.gmra.mxu0 %v3933_v34  ;;  %v1267_v21 = vadd.f32 %v1266_v39, %v4244_v35  ;;  %v2880_v23 = vld [vmem:[%s4881_s4 + $0x290] sm:$0xff]  ;;  %v4411_v35 = vsel %vm1344_vm3, %v1401_v12, %v1403_v57 }
 0x11b   : > { %1990 = vmatpush.msra.mxu1 %v2880_v23  ;;  %v2943_v12 = vld [vmem:[%s4881_s4 + $0x410] sm:$0xff] }
 0x11c   : > { %v4390_v11 = vadd.f32 %v1840_v54, %v1754_v22  ;;  %2809 = vmatmul.msk.f32.gmra.mxu1 %vm424_vm0, %v5125_v42  ;;  %1556 = vmatmul.f32.gmra.mxu2 %v4387_v2 }
 0x11d   : > { %2493 = vmatpush.msra.mxu0 %v2943_v12  ;;  %v5140_v12 = vld [vmem:[#allocation17_spill] sm:$0xff] }
 0x11e   : > { %5130 = vst [vmem:[#allocation47_spill] sm:$0xff] %v4390_v11  ;;  %2857 = vmatmul.msk.f32.gmra.mxu3 %vm424_vm0, %v5131_v8 }
 0x11f   : > { %v1509_v24 = vpop.f32.mrf.mxu2  ;;  %v1843_v54 = vpop.f32.mrf.mxu0 }
 0x120   : > { %v1593_v37 = vadd.f32 %v1509_v24, %v1267_v21  ;;  %v5134_v21 = vld [vmem:[#allocation8_spill] sm:$0xff]  ;;  %v5135_v24 = vld [vmem:[#allocation7_spill] sm:$0xff] }
 0x121   : > { %v1269_v13 = vpop.f32.mrf.mxu1  ;;  %v1671_v22 = vpop.f32.mrf.mxu3  ;;  %v1405_v33 = vrot.slane %v5134_v21, 2  ;;  %v1406_v34 = vrot.slane %v5135_v24, 2 }
 0x122   : > { %v1755_v39 = vadd.f32 %v1671_v22, %v1593_v37  ;;  %1890 = vmatmul.f32.gmra.mxu0 %v5132_v14  ;;  %v1270_v2 = vadd.f32 %v1269_v13, %v4267_v1  ;;  %v2895_v1 = vld [vmem:[%s4881_s4 + $0x308] sm:$0xff] }
 0x123   : > { %2153 = vmatpush.msra.mxu2 %v2895_v1 }
 0x124   : > { %v4414_v11 = vadd.f32 %v1843_v54, %v1755_v39  ;;  %1316 = vmatmul.f32.gmra.mxu1 %v5128_v61  ;;  %1559 = vmatmul.f32.gmra.mxu2 %v4411_v35  ;;  %v4426_v39 = vsel %vm1344_vm3, %v1405_v33, %v1406_v34 }
 0x125   : > { %5136 = vst [vmem:[#allocation52_spill] sm:$0xff] %v4426_v39 }
 0x126   : > { %5133 = vst [vmem:[#allocation53_spill] sm:$0xff] %v4414_v11  ;;  %1721 = vmatmul.f32.gmra.mxu3 %v5135_v24  ;;  %v5137_v11 = vld [vmem:[#allocation22_spill] sm:$0xff] }
 0x127   : > { %v1512_v57 = vpop.f32.mrf.mxu2  ;;  %v1846_v37 = vpop.f32.mrf.mxu0 }
 0x128   : > { %v1594_v54 = vadd.f32 %v1512_v57, %v1270_v2  ;;  %v5139_v2 = vld [vmem:[#allocation13_spill] sm:$0xff]  ;;  %v2926_v57 = vld [vmem:[%s4881_s4 + $0x388] sm:$0xff] }
 0x129   : > { %v1272_v23 = vpop.f32.mrf.mxu1  ;;  %v1674_v22 = vpop.f32.mrf.mxu3  ;;  %v1408_v13 = vrot.slane %v5139_v2, 2  ;;  %2325 = vmatpush.msra.mxu3 %v2926_v57 }
 0x12a   : > { %v1756_v21 = vadd.f32 %v1674_v22, %v1594_v54  ;;  %1893 = vmatmul.f32.gmra.mxu0 %v5137_v11  ;;  %v1273_v33 = vadd.f32 %v1272_v23, %v4075_v5 }
 0x12b   : > { %v4450_v5 = vsel %vm1344_vm3, %v1406_v34, %v1408_v13  ;;  %v2942_v34 = vld [vmem:[%s4881_s4 + $0x408] sm:$0xff] }
 0x12c   : > { %v4429_v14 = vadd.f32 %v1846_v37, %v1756_v21  ;;  %2810 = vmatmul.msk.f32.gmra.mxu1 %vm424_vm0, %v5131_v8  ;;  %1562 = vmatmul.f32.gmra.mxu2 %v4426_v39  ;;  %v2879_v21 = vld [vmem:[%s4881_s4 + $0x288] sm:$0xff] }
 0x12d   : > { %1991 = vmatpush.msra.mxu1 %v2879_v21  ;;  %2494 = vmatpush.msra.mxu0 %v2942_v34  ;;  %v5149_v34 = vld [vmem:[#allocation34_spill] sm:$0xff] }
 0x12e   : > { %5138 = vst [vmem:[#allocation8_spill] sm:$0xff] %v4429_v14  ;;  %2858 = vmatmul.msk.f32.gmra.mxu3 %vm424_vm0, %v5140_v12  ;;  %v5141_v14 = vld [vmem:[#allocation29_spill] sm:$0xff] }
 0x12f   : > { %v1515_v37 = vpop.f32.mrf.mxu2  ;;  %v1849_v54 = vpop.f32.mrf.mxu0 }
 0x130   : > { %v1595_v22 = vadd.f32 %v1515_v37, %v1273_v33  ;;  %v5143_v33 = vld [vmem:[#allocation24_spill] sm:$0xff]  ;;  %v5144_v37 = vld [vmem:[#allocation23_spill] sm:$0xff] }
 0x131   : > { %v1275_v2 = vpop.f32.mrf.mxu1  ;;  %v1677_v1 = vpop.f32.mrf.mxu3  ;;  %v1410_v57 = vrot.slane %v5143_v33, 2  ;;  %v1411_v39 = vrot.slane %v5144_v37, 2 }
 0x132   : > { %v1757_v23 = vadd.f32 %v1677_v1, %v1595_v22  ;;  %1896 = vmatmul.f32.gmra.mxu0 %v5141_v14  ;;  %v1276_v8 = vadd.f32 %v1275_v2, %v4102_v18  ;;  %v2894_v18 = vld [vmem:[%s4881_s4 + $0x300] sm:$0xff] }
 0x133   : > { %2154 = vmatpush.msra.mxu2 %v2894_v18 }
 0x134   : > { %v4453_v11 = vadd.f32 %v1849_v54, %v1757_v23  ;;  %1322 = vmatmul.f32.gmra.mxu1 %v5135_v24  ;;  %1565 = vmatmul.f32.gmra.mxu2 %v4450_v5  ;;  %v4465_v23 = vsel %vm1344_vm3, %v1410_v57, %v1411_v39 }
 0x135   : > { %5145 = vst [vmem:[#allocation13_spill] sm:$0xff] %v4465_v23 }
 0x136   : > { %5142 = vst [vmem:[#allocation7_spill] sm:$0xff] %v4453_v11  ;;  %1727 = vmatmul.f32.gmra.mxu3 %v5144_v37  ;;  %v5146_v11 = vld [vmem:[#allocation38_spill] sm:$0xff] }
 0x137   : > { %v1518_v13 = vpop.f32.mrf.mxu2  ;;  %v1852_v22 = vpop.f32.mrf.mxu0 }
 0x138   : > { %v1596_v54 = vadd.f32 %v1518_v13, %v1276_v8  ;;  %v5148_v8 = vld [vmem:[#allocation30_spill] sm:$0xff] }
 0x139   : > { %v1278_v21 = vpop.f32.mrf.mxu1  ;;  %v1680_v1 = vpop.f32.mrf.mxu3  ;;  %v1413_v2 = vrot.slane %v5148_v8, 2  ;;  %v2925_v13 = vld [vmem:[%s4881_s4 + $0x380] sm:$0xff] }
 0x13a   : > { %v1758_v33 = vadd.f32 %v1680_v1, %v1596_v54  ;;  %1899 = vmatmul.f32.gmra.mxu0 %v5146_v11  ;;  %v1279_v57 = vadd.f32 %v1278_v21, %v4122_v15  ;;  %2326 = vmatpush.msra.mxu3 %v2925_v13 }
 0x13b   : > { %v4489_v15 = vsel %vm1344_vm3, %v1411_v39, %v1413_v2  ;;  %v2941_v39 = vld [vmem:[%s4881_s4 + $0x400] sm:$0xff] }
 0x13c   : > { %v4468_v14 = vadd.f32 %v1852_v22, %v1758_v33  ;;  %2811 = vmatmul.msk.f32.gmra.mxu1 %vm424_vm0, %v5140_v12  ;;  %1568 = vmatmul.f32.gmra.mxu2 %v4465_v23  ;;  %v2878_v33 = vld [vmem:[%s4881_s4 + $0x280] sm:$0xff]  ;;  %5150 = vst [vmem:[#allocation30_spill] sm:$0xff] %v4489_v15 }
 0x13d   : > { %1992 = vmatpush.msra.mxu1 %v2878_v33  ;;  %2495 = vmatpush.msra.mxu0 %v2941_v39  ;;  %v5157_v39 = vld [vmem:[#allocation45_spill] sm:$0xff] }
 0x13e   : > { %5147 = vst [vmem:[#allocation24_spill] sm:$0xff] %v4468_v14  ;;  %2859 = vmatmul.msk.f32.gmra.mxu3 %vm424_vm0, %v5149_v34  ;;  %v5151_v14 = vld [vmem:[#allocation44_spill] sm:$0xff] }
 0x13f   : > { %v1521_v22 = vpop.f32.mrf.mxu2  ;;  %v1855_v54 = vpop.f32.mrf.mxu0 }
 0x140   : > { %v1597_v1 = vadd.f32 %v1521_v22, %v1279_v57  ;;  %v5153_v57 = vld [vmem:[#allocation40_spill] sm:$0xff]  ;;  %v5154_v22 = vld [vmem:[#allocation39_spill] sm:$0xff] }
 0x141   : > { %v1281_v18 = vpop.f32.mrf.mxu1  ;;  %v1683_v8 = vpop.f32.mrf.mxu3  ;;  %v1415_v13 = vrot.slane %v5153_v57, 2  ;;  %v1416_v23 = vrot.slane %v5154_v22, 2 }
 0x142   : > { %v1759_v21 = vadd.f32 %v1683_v8, %v1597_v1  ;;  %1902 = vmatmul.f32.gmra.mxu0 %v5151_v14  ;;  %v1282_v12 = vadd.f32 %v1281_v18, %v4151_v3  ;;  %v586_v18 = vld [vmem:[%s332_s26] sm:$0xff]  ;;  %v5158_v14 = vld [vmem:[#allocation48_spill] sm:$0xff] }
 0x144   : > { %v4492_v11 = vadd.f32 %v1855_v54, %v1759_v21  ;;  %1328 = vmatmul.f32.gmra.mxu1 %v5144_v37  ;;  %1571 = vmatmul.f32.gmra.mxu2 %v4489_v15  ;;  %v4509_v21 = vsel %vm1344_vm3, %v1415_v13, %v1416_v23  ;;  %v3040_v13 = vld [vmem:[%s4879_s2] ss:$0 sm:$0xff] }
 0x145   : > { %5155 = vst [vmem:[#allocation40_spill] sm:$0xff] %v4509_v21 }
 0x146   : > { %5152 = vst [vmem:[#allocation78_spill] sm:$0xff] %v4492_v11  ;;  %1733 = vmatmul.f32.gmra.mxu3 %v5154_v22 }
 0x147   : > { %v1524_v2 = vpop.f32.mrf.mxu2  ;;  %v1858_v54 = vpop.f32.mrf.mxu0 }
 0x148   : > { %v1598_v1 = vadd.f32 %v1524_v2, %v1282_v12  ;;  %v587_v12 = vld [vmem:[%s332_s26 + $0x8] sm:$0xff]  ;;  %v1418_v2 = vrot.slane %v5157_v39, 2  ;;  %v588_v39 = vld [vmem:[%s332_s26 + $0x10] sm:$0x3] }
 0x149   : > { %v1284_v33 = vpop.f32.mrf.mxu1  ;;  %v1686_v8 = vpop.f32.mrf.mxu3 }
 0x14a   : > { %v1760_v3 = vadd.f32 %v1686_v8, %v1598_v1  ;;  %1905 = vmatmul.f32.gmra.mxu0 %v3822_v60  ;;  %v1285_v11 = vadd.f32 %v1284_v33, %v4171_v49  ;;  %v3041_v33 = vld [vmem:[%s4880_s3] ss:$0 sm:$0xff] }
 0x14c   : > { %v4512_v57 = vadd.f32 %v1858_v54, %v1760_v3  ;;  %2812 = vmatmul.msk.f32.gmra.mxu1 %vm424_vm0, %v5149_v34  ;;  %1574 = vmatmul.f32.gmra.mxu2 %v4509_v21  ;;  %v644_v54 = vmul.f32 %v3040_v13, %v586_v18  ;;  %v645_v3 = vmul.f32 %v3040_v13, %v587_v12  ;;  %v5160_v12 = vld [vmem:[#allocation55_spill] sm:$0xff] }
 0x14d   : > { %v4527_v34 = vsel %vm1344_vm3, %v1416_v23, %v1418_v2  ;;  %v1420_v23 = vrot.slane %v3836_v52, 2  ;;  %v1421_v2 = vrot.slane %v5160_v12, 2 }
 0x14e   : > { %5156 = vst [vmem:[#allocation39_spill] sm:$0xff] %v4512_v57  ;;  %2860 = vmatmul.msk.f32.gmra.mxu3 %vm424_vm0, %v5158_v14  ;;  %v702_v15 = vadd.f32 %v3041_v33, %v644_v54  ;;  %v703_v37 = vadd.f32 %v3041_v33, %v645_v3 }
 0x14f   : > { %v1527_v1 = vpop.f32.mrf.mxu2  ;;  %v1861_v8 = vpop.f32.mrf.mxu0 }
 0x150   : > { %v1599_v57 = vadd.f32 %v1527_v1, %v1285_v11  ;;  %v646_v11 = vmul.f32 %v3040_v13, %v588_v39  ;;  %v4543_v3 = vmax.f32 %v703_v37, 0.0 }
 0x151   : > { %v1287_v60 = vpop.f32.mrf.mxu1  ;;  %v1689_v21 = vpop.f32.mrf.mxu3 }
 0x152   : > { %v1761_v49 = vadd.f32 %v1689_v21, %v1599_v57  ;;  %1908 = vmatmul.f32.gmra.mxu0 %v3899_v62  ;;  %v1288_v21 = vadd.f32 %v1287_v60, %v4200_v0  ;;  %v4541_v57 = vmax.f32 %v702_v15, 0.0  ;;  %v704_v13 = vadd.f32 %v3041_v33, %v646_v11 }
 0x153   : > { %v1785_v37 = vrot.slane %v4543_v3, 1  ;;  %v1423_v11 = vrot.slane %v3907_v29, 2 }
 0x154   : > { %v4533_v18 = vadd.f32 %v1861_v8, %v1761_v49  ;;  %1334 = vmatmul.f32.gmra.mxu1 %v5154_v22  ;;  %1577 = vmatmul.f32.gmra.mxu2 %v4527_v34  ;;  %v4548_v49 = vsel %vm424_vm0, %v4541_v57, 0.0  ;;  %v758_v33 = vmax.f32 %v704_v13, 0.0 }
 0x155   : > { %v1784_v60 = vrot.slane %v4548_v49, 1  ;;  %v4575_v29 = vsel %vm1344_vm3, %v1421_v2, %v1423_v11 }
 0x156   : > { %5159 = vst [vmem:[#allocation45_spill] sm:$0xff] %v4533_v18  ;;  %1739 = vmatmul.f32.gmra.mxu3 %v5160_v12  ;;  %v4551_v18 = vsel %vm1344_vm3, %v1420_v23, %v1421_v2 }
 0x157   : > { %v1530_v1 = vpop.f32.mrf.mxu2  ;;  %v1864_v54 = vpop.f32.mrf.mxu0 }
 0x158   : > { %v1600_v8 = vadd.f32 %v1530_v1, %v1288_v21 }
 0x159   : > { %v1290_v52 = vpop.f32.mrf.mxu1  ;;  %v1692_v39 = vpop.f32.mrf.mxu3 }
 0x15a   : > { %v1762_v0 = vadd.f32 %v1692_v39, %v1600_v8  ;;  %1911 = vmatmul.f32.gmra.mxu0 %v3937_v44  ;;  %v1291_v23 = vadd.f32 %v1290_v52, %v4220_v48  ;;  %v4572_v39 = vsel %vm483_vm2, %v758_v33, 0.0 }
 0x15b   : > { %v1787_v52 = vrot.slane %v4572_v39, 1 }
 0x15c   : > { %v4556_v15 = vadd.f32 %v1864_v54, %v1762_v0  ;;  %2813 = vmatmul.msk.f32.gmra.mxu1 %vm424_vm0, %v5158_v14  ;;  %1580 = vmatmul.f32.gmra.mxu2 %v4551_v18  ;;  %v4568_v54 = vsel %vm988_vm1, %v1784_v60, %v1785_v37 }
 0x15d   : > { %v4586_v2 = vsel %vm988_vm1, %v1785_v37, %v1787_v52 }
 0x15e   : > { %5161 = vst [vmem:[#allocation48_spill] sm:$0xff] %v4556_v15  ;;  %2861 = vmatmul.msk.f32.gmra.mxu3 %vm424_vm0, %v4541_v57 }
 0x15f   : > { %v1533_v21 = vpop.f32.mrf.mxu2  ;;  %v1867_v1 = vpop.f32.mrf.mxu0 }
 0x160   : > { %v1601_v8 = vadd.f32 %v1533_v21, %v1291_v23 }
 0x161   : > { %v1293_v0 = vpop.f32.mrf.mxu1  ;;  %v1695_v13 = vpop.f32.mrf.mxu3 }
 0x162   : > { %v1763_v48 = vadd.f32 %v1695_v13, %v1601_v8  ;;  %1914 = vmatmul.f32.gmra.mxu0 %v4568_v54  ;;  %v1294_v46 = vadd.f32 %v1293_v0, %v4249_v19 }
 0x164   : > { %v4579_v15 = vadd.f32 %v1867_v1, %v1763_v48  ;;  %1340 = vmatmul.f32.gmra.mxu1 %v5160_v12  ;;  %1583 = vmatmul.f32.gmra.mxu2 %v4575_v29 }
 0x165   : > { %v5235_v26 = vld [vmem:[#allocation48_spill] sm:$0xff] }
 0x166   : > { %1745 = vmatmul.f32.gmra.mxu3 %v4543_v3 }
 0x167   : > { %v1536_v60 = vpop.f32.mrf.mxu2  ;;  %v1870_v33 = vpop.f32.mrf.mxu0 }
 0x168   : > { %v1602_v11 = vadd.f32 %v1536_v60, %v1294_v46 }
 0x169   : > { %v1296_v23 = vpop.f32.mrf.mxu1  ;;  %v1698_v21 = vpop.f32.mrf.mxu3 }
 0x16a   : > { %v1764_v8 = vadd.f32 %v1698_v21, %v1602_v11  ;;  %1917 = vmatmul.f32.gmra.mxu0 %v4586_v2  ;;  %v1297_v19 = vadd.f32 %v1296_v23, %v4095_v4 }
 0x16c   : > { %v4589_v1 = vadd.f32 %v1870_v33, %v1764_v8  ;;  %1993 = vmatmul.f32.vlgmr.msra.gmra.mxu1 %v3977_v50  ;;  %2910 = vmatmul.msk.f32.vlgmr.msra.gmra.mxu2 %vm424_vm0, %v3628_v10 }
 0x16e   : > { %2327 = vmatmul.f32.vlgmr.msra.gmra.mxu3 %v3763_v43 }
 0x16f   : > { %v1539_v37 = vpop.f32.mrf.mxu2  ;;  %v1873_v0 = vpop.f32.mrf.mxu0 }
 0x170   : > { %v1603_v13 = vadd.f32 %v1539_v37, %v1297_v19 }
 0x171   : > { %v1299_v48 = vpop.f32.mrf.mxu1  ;;  %v1701_v52 = vpop.f32.mrf.mxu3 }
 0x172   : > { %v1765_v46 = vadd.f32 %v1701_v52, %v1603_v13  ;;  %2496 = vmatmul.f32.vlgmr.msra.gmra.mxu0 %v4010_v56  ;;  %v1300_v10 = vadd.f32 %v1299_v48, %v4118_v28 }
 0x174   : > { %v4598_v60 = vadd.f32 %v1873_v0, %v1765_v46  ;;  %1996 = vmatmul.f32.gmra.mxu1 %v3998_v25  ;;  %2158 = vmatmul.f32.gmra.mxu2 %v3664_v40 }
 0x176   : > { %2330 = vmatmul.f32.gmra.mxu3 %v3865_v9 }
 0x177   : > { %v1542_v50 = vpop.f32.mrf.mxu2  ;;  %v1876_v43 = vpop.f32.mrf.mxu0 }
 0x178   : > { %v1604_v4 = vadd.f32 %v1542_v50, %v1300_v10 }
 0x179   : > { %v1302_v33 = vpop.f32.mrf.mxu1  ;;  %v1704_v11 = vpop.f32.mrf.mxu3 }
 0x17a   : > { %v1766_v23 = vadd.f32 %v1704_v11, %v1604_v4  ;;  %2499 = vmatmul.f32.gmra.mxu0 %v4031_v6  ;;  %v1303_v40 = vadd.f32 %v1302_v33, %v4144_v51  ;;  %v5162_v4 = vld [vmem:[#allocation60_spill] sm:$0xff]  ;;  %v5164_v11 = vld [vmem:[#allocation71_spill] sm:$0xff] }
 0x17c   : > { %v4605_v21 = vadd.f32 %v1876_v43, %v1766_v23  ;;  %1999 = vmatmul.f32.gmra.mxu1 %v4010_v56  ;;  %2911 = vmatmul.msk.f32.gmra.mxu2 %vm424_vm0, %v3838_v55  ;;  %v5165_v23 = vld [vmem:[#allocation18_spill] sm:$0xff] }
 0x17e   : > { %2333 = vmatmul.f32.gmra.mxu3 %v3922_v31 }
 0x17f   : > { %v1545_v9 = vpop.f32.mrf.mxu2  ;;  %v1879_v25 = vpop.f32.mrf.mxu0 }
 0x180   : > { %v1605_v28 = vadd.f32 %v1545_v9, %v1303_v40 }
 0x181   : > { %v1305_v8 = vpop.f32.mrf.mxu1  ;;  %v1707_v19 = vpop.f32.mrf.mxu3 }
 0x182   : > { %v1767_v37 = vadd.f32 %v1707_v19, %v1605_v28  ;;  %2502 = vmatmul.f32.gmra.mxu0 %v4043_v53  ;;  %v1306_v55 = vadd.f32 %v1305_v8, %v4167_v58  ;;  %v5166_v8 = vld [vmem:[#allocation62_spill] sm:$0xff] }
 0x184   : > { %v4614_v0 = vadd.f32 %v1879_v25, %v1767_v37  ;;  %2002 = vmatmul.f32.gmra.mxu1 %v4031_v6  ;;  %2164 = vmatmul.f32.gmra.mxu2 %v3869_v63  ;;  %v5167_v37 = vld [vmem:[#allocation11_spill] sm:$0xff] }
 0x186   : > { %2336 = vmatmul.f32.gmra.mxu3 %v3947_v45 }
 0x187   : > { %v1548_v51 = vpop.f32.mrf.mxu2  ;;  %v1882_v31 = vpop.f32.mrf.mxu0 }
 0x188   : > { %v1606_v56 = vadd.f32 %v1548_v51, %v1306_v55  ;;  %v5169_v51 = vld [vmem:[#allocation25_spill] sm:$0xff] }
 0x189   : > { %v1308_v13 = vpop.f32.mrf.mxu1  ;;  %v1710_v48 = vpop.f32.mrf.mxu3 }
 0x18a   : > { %v1768_v52 = vadd.f32 %v1710_v48, %v1606_v56  ;;  %2505 = vmatmul.f32.gmra.mxu0 %v4064_v47  ;;  %v1309_v63 = vadd.f32 %v1308_v13, %v4193_v7 }
 0x18c   : > { %v4621_v46 = vadd.f32 %v1882_v31, %v1768_v52  ;;  %2005 = vmatmul.f32.gmra.mxu1 %v4043_v53  ;;  %2912 = vmatmul.msk.f32.gmra.mxu2 %vm424_vm0, %v3191_v36  ;;  %v5163_v53 = vld [vmem:[#allocation3_spill] sm:$0xff] }
 0x18e   : > { %2339 = vmatmul.f32.gmra.mxu3 %v3265_v16 }
 0x18f   : > { %v1551_v45 = vpop.f32.mrf.mxu2  ;;  %v1885_v6 = vpop.f32.mrf.mxu0 }
 0x190   : > { %v1607_v58 = vadd.f32 %v1551_v45, %v1309_v63  ;;  %v5170_v45 = vld [vmem:[#allocation64_spill] sm:$0xff] }
 0x191   : > { %v1311_v10 = vpop.f32.mrf.mxu1  ;;  %v1713_v50 = vpop.f32.mrf.mxu3 }
 0x192   : > { %v1769_v43 = vadd.f32 %v1713_v50, %v1607_v58  ;;  %2508 = vmatmul.f32.gmra.mxu0 %v5162_v4  ;;  %v1312_v36 = vadd.f32 %v1311_v10, %v5164_v11  ;;  %v5171_v58 = vld [vmem:[#allocation16_spill] sm:$0xff]  ;;  %v5172_v10 = vld [vmem:[#allocation6_spill] sm:$0xff] }
 0x194   : > { %v4630_v33 = vadd.f32 %v1885_v6, %v1769_v43  ;;  %2008 = vmatmul.f32.gmra.mxu1 %v4064_v47  ;;  %2170 = vmatmul.f32.gmra.mxu2 %v5163_v53  ;;  %v5168_v47 = vld [vmem:[#allocation74_spill] sm:$0xff]  ;;  %v5173_v43 = vld [vmem:[#allocation31_spill] sm:$0xff] }
 0x196   : > { %2342 = vmatmul.f32.gmra.mxu3 %v5165_v23 }
 0x197   : > { %v1554_v7 = vpop.f32.mrf.mxu2  ;;  %v1888_v16 = vpop.f32.mrf.mxu0 }
 0x198   : > { %v1608_v40 = vadd.f32 %v1554_v7, %v1312_v36 }
 0x199   : > { %v1314_v9 = vpop.f32.mrf.mxu1  ;;  %v1716_v25 = vpop.f32.mrf.mxu3 }
 0x19a   : > { %v1770_v28 = vadd.f32 %v1716_v25, %v1608_v40  ;;  %2511 = vmatmul.f32.gmra.mxu0 %v5166_v8  ;;  %v1315_v55 = vadd.f32 %v1314_v9, %v5168_v47  ;;  %v5175_v9 = vld [vmem:[#allocation28_spill] sm:$0xff]  ;;  %v5176_v25 = vld [vmem:[#allocation61_spill] sm:$0xff] }
 0x19c   : > { %v4637_v19 = vadd.f32 %v1888_v16, %v1770_v28  ;;  %2011 = vmatmul.f32.gmra.mxu1 %v5162_v4  ;;  %2913 = vmatmul.msk.f32.gmra.mxu2 %vm424_vm0, %v5167_v37  ;;  %v5174_v16 = vld [vmem:[#allocation66_spill] sm:$0xff] }
 0x19e   : > { %2345 = vmatmul.f32.gmra.mxu3 %v5169_v51 }
 0x19f   : > { %v1557_v31 = vpop.f32.mrf.mxu2  ;;  %v1891_v56 = vpop.f32.mrf.mxu0 }
 0x1a0   : > { %v1609_v13 = vadd.f32 %v1557_v31, %v1315_v55 }
 0x1a1   : > { %v1317_v48 = vpop.f32.mrf.mxu1  ;;  %v1719_v52 = vpop.f32.mrf.mxu3 }
 0x1a2   : > { %v1771_v63 = vadd.f32 %v1719_v52, %v1609_v13  ;;  %2514 = vmatmul.f32.gmra.mxu0 %v5170_v45  ;;  %v1318_v50 = vadd.f32 %v1317_v48, %v5172_v10  ;;  %v5178_v13 = vld [vmem:[#allocation68_spill] sm:$0xff] }
 0x1a3   : > { %v5179_v52 = vld [vmem:[#allocation32_spill] sm:$0xff] }
 0x1a4   : > { %v4646_v6 = vadd.f32 %v1891_v56, %v1771_v63  ;;  %2014 = vmatmul.f32.gmra.mxu1 %v5166_v8  ;;  %2176 = vmatmul.f32.gmra.mxu2 %v5171_v58  ;;  %v5177_v8 = vld [vmem:[#allocation41_spill] sm:$0xff]  ;;  %v5180_v63 = vld [vmem:[#allocation63_spill] sm:$0xff] }
 0x1a5   : > { %v5181_v58 = vld [vmem:[#allocation49_spill] sm:$0xff] }
 0x1a6   : > { %2348 = vmatmul.f32.gmra.mxu3 %v5173_v43 }
 0x1a7   : > { %v1560_v4 = vpop.f32.mrf.mxu2  ;;  %v1894_v53 = vpop.f32.mrf.mxu0 }
 0x1a8   : > { %v1610_v11 = vadd.f32 %v1560_v4, %v1318_v50 }
 0x1a9   : > { %v1320_v36 = vpop.f32.mrf.mxu1  ;;  %v1722_v23 = vpop.f32.mrf.mxu3 }
 0x1aa   : > { %v1772_v7 = vadd.f32 %v1722_v23, %v1610_v11  ;;  %2517 = vmatmul.f32.gmra.mxu0 %v5174_v16  ;;  %v1321_v28 = vadd.f32 %v1320_v36, %v5176_v25  ;;  %v5182_v36 = vld [vmem:[#allocation70_spill] sm:$0xff]  ;;  %v5185_v25 = vld [vmem:[#allocation56_spill] sm:$0xff] }
 0x1ac   : > { %v4653_v40 = vadd.f32 %v1894_v53, %v1772_v7  ;;  %2017 = vmatmul.f32.gmra.mxu1 %v5170_v45  ;;  %2914 = vmatmul.msk.f32.gmra.mxu2 %vm424_vm0, %v5175_v9  ;;  %v5183_v7 = vld [vmem:[#allocation46_spill] sm:$0xff] }
 0x1ae   : > { %2351 = vmatmul.f32.gmra.mxu3 %v5177_v8 }
 0x1af   : > { %v1563_v37 = vpop.f32.mrf.mxu2  ;;  %v1897_v47 = vpop.f32.mrf.mxu0 }
 0x1b0   : > { %v1611_v55 = vadd.f32 %v1563_v37, %v1321_v28 }
 0x1b1   : > { %v1323_v51 = vpop.f32.mrf.mxu1  ;;  %v1725_v31 = vpop.f32.mrf.mxu3 }
 0x1b2   : > { %v1773_v56 = vadd.f32 %v1725_v31, %v1611_v55  ;;  %2520 = vmatmul.f32.gmra.mxu0 %v5178_v13  ;;  %v1324_v45 = vadd.f32 %v1323_v51, %v5180_v63  ;;  %v5186_v31 = vld [vmem:[#allocation73_spill] sm:$0xff] }
 0x1b4   : > { %v4662_v48 = vadd.f32 %v1897_v47, %v1773_v56  ;;  %2020 = vmatmul.f32.gmra.mxu1 %v5174_v16  ;;  %2182 = vmatmul.f32.gmra.mxu2 %v5179_v52  ;;  %v5184_v16 = vld [vmem:[#allocation65_spill] sm:$0xff]  ;;  %v5188_v52 = vld [vmem:[#allocation67_spill] sm:$0xff] }
 0x1b6   : > { %2354 = vmatmul.f32.gmra.mxu3 %v5181_v58 }
 0x1b7   : > { %v1566_v10 = vpop.f32.mrf.mxu2  ;;  %v1900_v50 = vpop.f32.mrf.mxu0 }
 0x1b8   : > { %v1612_v43 = vadd.f32 %v1566_v10, %v1324_v45  ;;  %v5189_v45 = vld [vmem:[#allocation57_spill] sm:$0xff] }
 0x1b9   : > { %v1326_v4 = vpop.f32.mrf.mxu1  ;;  %v1728_v53 = vpop.f32.mrf.mxu3 }
 0x1ba   : > { %v1774_v11 = vadd.f32 %v1728_v53, %v1612_v43  ;;  %2523 = vmatmul.f32.gmra.mxu0 %v5182_v36  ;;  %v1327_v9 = vadd.f32 %v1326_v4, %v5184_v16  ;;  %v5191_v16 = vld [vmem:[#allocation2_spill] sm:$0xff] }
 0x1bc   : > { %v4669_v23 = vadd.f32 %v1900_v50, %v1774_v11  ;;  %2023 = vmatmul.f32.gmra.mxu1 %v5178_v13  ;;  %2915 = vmatmul.msk.f32.gmra.mxu2 %vm424_vm0, %v5183_v7  ;;  %v5187_v13 = vld [vmem:[#allocation51_spill] sm:$0xff]  ;;  %v5190_v11 = vld [vmem:[#allocation76_spill] sm:$0xff] }
 0x1be   : > { %2357 = vmatmul.f32.gmra.mxu3 %v5185_v25  ;;  %v5193_v25 = vld [vmem:[#allocation9_spill] sm:$0xff] }
 0x1bf   : > { %v1569_v28 = vpop.f32.mrf.mxu2  ;;  %v1903_v8 = vpop.f32.mrf.mxu0 }
 0x1c0   : > { %v1613_v37 = vadd.f32 %v1569_v28, %v1327_v9 }
 0x1c1   : > { %v1329_v47 = vpop.f32.mrf.mxu1  ;;  %v1731_v55 = vpop.f32.mrf.mxu3 }
 0x1c2   : > { %v1775_v51 = vadd.f32 %v1731_v55, %v1613_v37  ;;  %2526 = vmatmul.f32.gmra.mxu0 %v5186_v31  ;;  %v1330_v63 = vadd.f32 %v1329_v47, %v5188_v52 }
 0x1c4   : > { %v4678_v56 = vadd.f32 %v1903_v8, %v1775_v51  ;;  %2026 = vmatmul.f32.gmra.mxu1 %v5182_v36  ;;  %2188 = vmatmul.f32.gmra.mxu2 %v5187_v13  ;;  %v5192_v36 = vld [vmem:[#allocation69_spill] sm:$0xff] }
 0x1c5   : > { %v5194_v13 = vld [vmem:[#allocation77_spill] sm:$0xff] }
 0x1c6   : > { %2360 = vmatmul.f32.gmra.mxu3 %v5189_v45  ;;  %v5196_v45 = vld [vmem:[#allocation19_spill] sm:$0xff] }
 0x1c7   : > { %v1572_v58 = vpop.f32.mrf.mxu2  ;;  %v1906_v10 = vpop.f32.mrf.mxu0 }
 0x1c8   : > { %v1614_v50 = vadd.f32 %v1572_v58, %v1330_v63 }
 0x1c9   : > { %v1332_v43 = vpop.f32.mrf.mxu1  ;;  %v1734_v4 = vpop.f32.mrf.mxu3 }
 0x1ca   : > { %v1776_v53 = vadd.f32 %v1734_v4, %v1614_v50  ;;  %2529 = vmatmul.f32.gmra.mxu0 %v5190_v11  ;;  %v1333_v9 = vadd.f32 %v1332_v43, %v5192_v36  ;;  %v5197_v36 = vld [vmem:[#allocation15_spill] sm:$0xff] }
 0x1cc   : > { %v4685_v7 = vadd.f32 %v1906_v10, %v1776_v53  ;;  %2029 = vmatmul.f32.gmra.mxu1 %v5186_v31  ;;  %2916 = vmatmul.msk.f32.gmra.mxu2 %vm424_vm0, %v5191_v16  ;;  %v5195_v31 = vld [vmem:[#allocation72_spill] sm:$0xff] }
 0x1ce   : > { %2363 = vmatmul.f32.gmra.mxu3 %v5193_v25 }
 0x1cf   : > { %v1575_v28 = vpop.f32.mrf.mxu2  ;;  %v1909_v8 = vpop.f32.mrf.mxu0 }
 0x1d0   : > { %v1615_v37 = vadd.f32 %v1575_v28, %v1333_v9  ;;  %v5199_v9 = vld [vmem:[#allocation26_spill] sm:$0xff] }
 0x1d1   : > { %v1335_v47 = vpop.f32.mrf.mxu1  ;;  %v1737_v55 = vpop.f32.mrf.mxu3 }
 0x1d2   : > { %v1777_v51 = vadd.f32 %v1737_v55, %v1615_v37  ;;  %2532 = vmatmul.f32.gmra.mxu0 %v5194_v13  ;;  %v1336_v63 = vadd.f32 %v1335_v47, %v5195_v31 }
 0x1d4   : > { %v4694_v52 = vadd.f32 %v1909_v8, %v1777_v51  ;;  %2032 = vmatmul.f32.gmra.mxu1 %v5190_v11  ;;  %2194 = vmatmul.f32.gmra.mxu2 %v5101_v38  ;;  %v5198_v38 = vld [vmem:[#allocation75_spill] sm:$0xff]  ;;  %v5200_v51 = vld [vmem:[#allocation21_spill] sm:$0xff] }
 0x1d6   : > { %2366 = vmatmul.f32.gmra.mxu3 %v5196_v45  ;;  %v5202_v45 = vld [vmem:[#allocation35_spill] sm:$0xff] }
 0x1d7   : > { %v1578_v58 = vpop.f32.mrf.mxu2  ;;  %v1912_v10 = vpop.f32.mrf.mxu0 }
 0x1d8   : > { %v1616_v50 = vadd.f32 %v1578_v58, %v1336_v63 }
 0x1d9   : > { %v1338_v43 = vpop.f32.mrf.mxu1  ;;  %v1740_v4 = vpop.f32.mrf.mxu3 }
 0x1da   : > { %v1778_v53 = vadd.f32 %v1740_v4, %v1616_v50  ;;  %2535 = vmatmul.f32.gmra.mxu0 %v4294_v59  ;;  %v1339_v11 = vadd.f32 %v1338_v43, %v5198_v38  ;;  %v5204_v38 = vld [vmem:[#allocation42_spill] sm:$0xff] }
 0x1dc   : > { %v4701_v16 = vadd.f32 %v1912_v10, %v1778_v53  ;;  %2035 = vmatmul.f32.gmra.mxu1 %v5194_v13  ;;  %2917 = vmatmul.msk.f32.gmra.mxu2 %vm424_vm0, %v5197_v36  ;;  %v5201_v13 = vld [vmem:[#allocation5_spill] sm:$0xff] }
 0x1de   : > { %2369 = vmatmul.f32.gmra.mxu3 %v5199_v9 }
 0x1df   : > { %v1581_v25 = vpop.f32.mrf.mxu2  ;;  %v1915_v28 = vpop.f32.mrf.mxu0 }
 0x1e0   : > { %v1617_v8 = vadd.f32 %v1581_v25, %v1339_v11 }
 0x1e1   : > { %v1341_v37 = vpop.f32.mrf.mxu1  ;;  %v1743_v47 = vpop.f32.mrf.mxu3 }
 0x1e2   : > { %v1779_v55 = vadd.f32 %v1743_v47, %v1617_v8  ;;  %2538 = vmatmul.f32.gmra.mxu0 %v5200_v51  ;;  %v1342_v63 = vadd.f32 %v1341_v37, %v5201_v13  ;;  %v5205_v47 = vld [vmem:[#allocation33_spill] sm:$0xff]  ;;  %v5207_v13 = vld [vmem:[#allocation50_spill] sm:$0xff] }
 0x1e4   : > { %v4710_v31 = vadd.f32 %v1915_v28, %v1779_v55  ;;  %2038 = vmatmul.f32.gmra.mxu1 %v4294_v59  ;;  %2200 = vmatmul.f32.gmra.mxu2 %v5111_v30  ;;  %v5203_v59 = vld [vmem:[#allocation10_spill] sm:$0xff]  ;;  %v5206_v55 = vld [vmem:[#allocation20_spill] sm:$0xff] }
 0x1e6   : > { %2372 = vmatmul.f32.gmra.mxu3 %v5202_v45 }
 0x1e7   : > { %v1584_v58 = vpop.f32.mrf.mxu2  ;;  %v1918_v10 = vpop.f32.mrf.mxu0 }
 0x1e8   : > { %v1618_v50 = vadd.f32 %v1584_v58, %v1342_v63 }
 0x1e9   : > { %v1746_v43 = vpop.f32.mrf.mxu3  ;;  %v1994_v4 = vpop.f32.mrf.mxu1 }
 0x1ea   : > { %v1780_v53 = vadd.f32 %v1746_v43, %v1618_v50  ;;  %2541 = vmatmul.f32.gmra.mxu0 %v4333_v41  ;;  %v2090_v30 = vadd.f32 %v1994_v4, %v5203_v59 }
 0x1ec   : > { %v4717_v36 = vadd.f32 %v1918_v10, %v1780_v53  ;;  %2041 = vmatmul.f32.gmra.mxu1 %v5200_v51  ;;  %2918 = vmatmul.msk.f32.gmra.mxu2 %vm424_vm0, %v5116_v17 }
 0x1ee   : > { %2375 = vmatmul.f32.gmra.mxu3 %v5204_v38 }
 0x1ef   : > { %v2156_v11 = vpop.f32.mrf.mxu2  ;;  %v2497_v9 = vpop.f32.mrf.mxu0 }
 0x1f0   : > { %v2252_v25 = vadd.f32 %v2156_v11, %v2090_v30 }
 0x1f1   : > { %v1997_v28 = vpop.f32.mrf.mxu1  ;;  %v2328_v8 = vpop.f32.mrf.mxu3 }
 0x1f2   : > { %v2424_v37 = vadd.f32 %v2328_v8, %v2252_v25  ;;  %2544 = vmatmul.f32.gmra.mxu0 %v5205_v47  ;;  %v2091_v51 = vadd.f32 %v1997_v28, %v5206_v55  ;;  %v5209_v25 = vld [vmem:[#allocation43_spill] sm:$0xff] }
 0x1f4   : > { %v2593_v17 = vadd.f32 %v2497_v9, %v2424_v37  ;;  %2044 = vmatmul.f32.gmra.mxu1 %v4333_v41  ;;  %2206 = vmatmul.f32.gmra.mxu2 %v5120_v32  ;;  %v5208_v41 = vld [vmem:[#allocation27_spill] sm:$0xff]  ;;  %v5211_v37 = vld [vmem:[#allocation58_spill] sm:$0xff] }
 0x1f6   : > { %2625 = vst [vmem:[%s4730_s9] sm:$0xff] %v2593_v17  ;;  %2378 = vmatmul.f32.gmra.mxu3 %v5207_v13 }
 0x1f7   : > { %v2159_v63 = vpop.f32.mrf.mxu2  ;;  %v2500_v45 = vpop.f32.mrf.mxu0 }
 0x1f8   : > { %v2253_v58 = vadd.f32 %v2159_v63, %v2091_v51 }
 0x1f9   : > { %v2000_v10 = vpop.f32.mrf.mxu1  ;;  %v2331_v50 = vpop.f32.mrf.mxu3 }
 0x1fa   : > { %v2425_v43 = vadd.f32 %v2331_v50, %v2253_v58  ;;  %2547 = vmatmul.f32.gmra.mxu0 %v4372_v27  ;;  %v2092_v32 = vadd.f32 %v2000_v10, %v5208_v41  ;;  %v5214_v58 = vld [vmem:[#allocation12_spill] sm:$0xff] }
 0x1fc   : > { %v2594_v4 = vadd.f32 %v2500_v45, %v2425_v43  ;;  %2047 = vmatmul.f32.gmra.mxu1 %v5205_v47  ;;  %2919 = vmatmul.msk.f32.gmra.mxu2 %vm424_vm0, %v5125_v42  ;;  %v5210_v42 = vld [vmem:[#allocation37_spill] sm:$0xff] }
 0x1fe   : > { %2626 = vst [vmem:[%s4730_s9 + $0x8] sm:$0xff] %v2594_v4  ;;  %2381 = vmatmul.f32.gmra.mxu3 %v3884_v20 }
 0x1ff   : > { %v2162_v53 = vpop.f32.mrf.mxu2  ;;  %v2503_v59 = vpop.f32.mrf.mxu0 }
 0x200   : > { %v2254_v30 = vadd.f32 %v2162_v53, %v2092_v32  ;;  %v5215_v53 = vld [vmem:[#allocation52_spill] sm:$0xff] }
 0x201   : > { %v2003_v38 = vpop.f32.mrf.mxu1  ;;  %v2334_v11 = vpop.f32.mrf.mxu3 }
 0x202   : > { %v2426_v9 = vadd.f32 %v2334_v11, %v2254_v30  ;;  %2550 = vmatmul.f32.gmra.mxu0 %v5209_v25  ;;  %v2093_v8 = vadd.f32 %v2003_v38, %v5210_v42  ;;  %v5216_v30 = vld [vmem:[#allocation47_spill] sm:$0xff]  ;;  %v5217_v11 = vld [vmem:[#allocation22_spill] sm:$0xff] }
 0x204   : > { %v2595_v28 = vadd.f32 %v2503_v59, %v2426_v9  ;;  %2050 = vmatmul.f32.gmra.mxu1 %v4372_v27  ;;  %2212 = vmatmul.f32.gmra.mxu2 %v5128_v61  ;;  %v5212_v27 = vld [vmem:[#allocation4_spill] sm:$0xff] }
 0x205   : > { %v5213_v61 = vld [vmem:[#allocation36_spill] sm:$0xff] }
 0x206   : > { %2627 = vst [vmem:[%s4730_s9 + $0x10] sm:$0xff] %v2595_v28  ;;  %2384 = vmatmul.f32.gmra.mxu3 %v5211_v37 }
 0x207   : > { %v2165_v20 = vpop.f32.mrf.mxu2  ;;  %v2506_v47 = vpop.f32.mrf.mxu0 }
 0x208   : > { %v2255_v17 = vadd.f32 %v2165_v20, %v2093_v8 }
 0x209   : > { %v2006_v55 = vpop.f32.mrf.mxu1  ;;  %v2337_v51 = vpop.f32.mrf.mxu3 }
 0x20a   : > { %v2427_v13 = vadd.f32 %v2337_v51, %v2255_v17  ;;  %2553 = vmatmul.f32.gmra.mxu0 %v4411_v35  ;;  %v2094_v45 = vadd.f32 %v2006_v55, %v5213_v61  ;;  %v5220_v17 = vld [vmem:[#allocation29_spill] sm:$0xff] }
 0x20c   : > { %v2596_v63 = vadd.f32 %v2506_v47, %v2427_v13  ;;  %2053 = vmatmul.f32.gmra.mxu1 %v5209_v25  ;;  %2920 = vmatmul.msk.f32.gmra.mxu2 %vm424_vm0, %v5212_v27 }
 0x20e   : > { %2628 = vst [vmem:[%s4730_s9 + $0x18] sm:$0xff] %v2596_v63  ;;  %2387 = vmatmul.f32.gmra.mxu3 %v5214_v58 }
 0x20f   : > { %v2168_v10 = vpop.f32.mrf.mxu2  ;;  %v2509_v50 = vpop.f32.mrf.mxu0 }
 0x210   : > { %v2256_v43 = vadd.f32 %v2168_v10, %v2094_v45  ;;  %v5221_v45 = vld [vmem:[#allocation13_spill] sm:$0xff]  ;;  %v5222_v10 = vld [vmem:[#allocation23_spill] sm:$0xff] }
 0x211   : > { %v2009_v4 = vpop.f32.mrf.mxu1  ;;  %v2340_v41 = vpop.f32.mrf.mxu3 }
 0x212   : > { %v2428_v32 = vadd.f32 %v2340_v41, %v2256_v43  ;;  %2556 = vmatmul.f32.gmra.mxu0 %v5215_v53  ;;  %v2095_v38 = vadd.f32 %v2009_v4, %v5216_v30  ;;  %v5224_v4 = vld [vmem:[#allocation38_spill] sm:$0xff] }
 0x214   : > { %v2597_v59 = vadd.f32 %v2509_v50, %v2428_v32  ;;  %2056 = vmatmul.f32.gmra.mxu1 %v4411_v35  ;;  %2218 = vmatmul.f32.gmra.mxu2 %v5135_v24  ;;  %v5218_v35 = vld [vmem:[#allocation17_spill] sm:$0xff]  ;;  %v5223_v50 = vld [vmem:[#allocation8_spill] sm:$0xff] }
 0x215   : > { %v5219_v24 = vld [vmem:[#allocation53_spill] sm:$0xff] }
 0x216   : > { %2629 = vst [vmem:[%s4730_s9 + $0x20] sm:$0xff] %v2597_v59  ;;  %2390 = vmatmul.f32.gmra.mxu3 %v5217_v11  ;;  %v5225_v11 = vld [vmem:[#allocation30_spill] sm:$0xff] }
 0x217   : > { %v2171_v9 = vpop.f32.mrf.mxu2  ;;  %v2512_v25 = vpop.f32.mrf.mxu0 }
 0x218   : > { %v2257_v28 = vadd.f32 %v2171_v9, %v2095_v38 }
 0x219   : > { %v2012_v42 = vpop.f32.mrf.mxu1  ;;  %v2343_v8 = vpop.f32.mrf.mxu3 }
 0x21a   : > { %v2429_v37 = vadd.f32 %v2343_v8, %v2257_v28  ;;  %2559 = vmatmul.f32.gmra.mxu0 %v4450_v5  ;;  %v2096_v47 = vadd.f32 %v2012_v42, %v5219_v24  ;;  %v5228_v42 = vld [vmem:[#allocation44_spill] sm:$0xff] }
 0x21c   : > { %v2598_v20 = vadd.f32 %v2512_v25, %v2429_v37  ;;  %2059 = vmatmul.f32.gmra.mxu1 %v5215_v53  ;;  %2921 = vmatmul.msk.f32.gmra.mxu2 %vm424_vm0, %v5218_v35  ;;  %v5227_v25 = vld [vmem:[#allocation7_spill] sm:$0xff] }
 0x21e   : > { %2630 = vst [vmem:[%s4730_s9 + $0x28] sm:$0xff] %v2598_v20  ;;  %2393 = vmatmul.f32.gmra.mxu3 %v5220_v17  ;;  %v5229_v17 = vld [vmem:[#allocation40_spill] sm:$0xff] }
 0x21f   : > { %v2174_v55 = vpop.f32.mrf.mxu2  ;;  %v2515_v51 = vpop.f32.mrf.mxu0 }
 0x220   : > { %v2258_v13 = vadd.f32 %v2174_v55, %v2096_v47 }
 0x221   : > { %v2015_v63 = vpop.f32.mrf.mxu1  ;;  %v2346_v27 = vpop.f32.mrf.mxu3 }
 0x222   : > { %v2430_v61 = vadd.f32 %v2346_v27, %v2258_v13  ;;  %2562 = vmatmul.f32.gmra.mxu0 %v5221_v45  ;;  %v2097_v43 = vadd.f32 %v2015_v63, %v5223_v50  ;;  %v5231_v63 = vld [vmem:[#allocation54_spill] sm:$0xff] }
 0x224   : > { %v2599_v58 = vadd.f32 %v2515_v51, %v2430_v61  ;;  %2062 = vmatmul.f32.gmra.mxu1 %v4450_v5  ;;  %2224 = vmatmul.f32.gmra.mxu2 %v5222_v10  ;;  %v5226_v5 = vld [vmem:[#allocation34_spill] sm:$0xff]  ;;  %v5230_v51 = vld [vmem:[#allocation24_spill] sm:$0xff] }
 0x226   : > { %2631 = vst [vmem:[%s4730_s9 + $0x30] sm:$0xff] %v2599_v58  ;;  %2396 = vmatmul.f32.gmra.mxu3 %v5224_v4 }
 0x227   : > { %v2177_v41 = vpop.f32.mrf.mxu2  ;;  %v2518_v32 = vpop.f32.mrf.mxu0 }
 0x228   : > { %v2259_v53 = vadd.f32 %v2177_v41, %v2097_v43 }
 0x229   : > { %v2018_v59 = vpop.f32.mrf.mxu1  ;;  %v2349_v30 = vpop.f32.mrf.mxu3 }
 0x22a   : > { %v2431_v38 = vadd.f32 %v2349_v30, %v2259_v53  ;;  %2565 = vmatmul.f32.gmra.mxu0 %v5225_v11  ;;  %v2098_v28 = vadd.f32 %v2018_v59, %v5227_v25 }
 0x22c   : > { %v2600_v9 = vadd.f32 %v2518_v32, %v2431_v38  ;;  %2065 = vmatmul.f32.gmra.mxu1 %v5221_v45  ;;  %2922 = vmatmul.msk.f32.gmra.mxu2 %vm424_vm0, %v5226_v5 }
 0x22e   : > { %2632 = vst [vmem:[%s4730_s9 + $0x38] sm:$0xff] %v2600_v9  ;;  %2399 = vmatmul.f32.gmra.mxu3 %v5228_v42  ;;  %v5233_v9 = vld [vmem:[#allocation39_spill] sm:$0xff] }
 0x22f   : > { %v2180_v8 = vpop.f32.mrf.mxu2  ;;  %v2521_v37 = vpop.f32.mrf.mxu0 }
 0x230   : > { %v2260_v20 = vadd.f32 %v2180_v8, %v2098_v28 }
 0x231   : > { %v2021_v35 = vpop.f32.mrf.mxu1  ;;  %v2352_v24 = vpop.f32.mrf.mxu3 }
 0x232   : > { %v2432_v47 = vadd.f32 %v2352_v24, %v2260_v20  ;;  %2568 = vmatmul.f32.gmra.mxu0 %v5229_v17  ;;  %v2099_v13 = vadd.f32 %v2021_v35, %v5230_v51 }
 0x234   : > { %v2601_v55 = vadd.f32 %v2521_v37, %v2432_v47  ;;  %2068 = vmatmul.f32.gmra.mxu1 %v5225_v11  ;;  %2230 = vmatmul.f32.gmra.mxu2 %v5154_v22  ;;  %v5232_v22 = vld [vmem:[#allocation78_spill] sm:$0xff]  ;;  %v1953_v37 = vrot.slane %v4548_v49, 2 }
 0x236   : > { %2633 = vst [vmem:[%s4730_s9 + $0x40] sm:$0xff] %v2601_v55  ;;  %2402 = vmatmul.f32.gmra.mxu3 %v5231_v63 }
 0x237   : > { %v2183_v27 = vpop.f32.mrf.mxu2  ;;  %v2524_v61 = vpop.f32.mrf.mxu0 }
 0x238   : > { %v2261_v45 = vadd.f32 %v2183_v27, %v2099_v13 }
 0x239   : > { %v2024_v58 = vpop.f32.mrf.mxu1  ;;  %v2355_v10 = vpop.f32.mrf.mxu3 }
 0x23a   : > { %v2433_v50 = vadd.f32 %v2355_v10, %v2261_v45  ;;  %2571 = vmatmul.f32.gmra.mxu0 %v4527_v34  ;;  %v2100_v4 = vadd.f32 %v2024_v58, %v5232_v22 }
 0x23c   : > { %v2602_v43 = vadd.f32 %v2524_v61, %v2433_v50  ;;  %2071 = vmatmul.f32.gmra.mxu1 %v5229_v17  ;;  %2923 = vmatmul.msk.f32.gmra.mxu2 %vm424_vm0, %v5158_v14  ;;  %v5237_v50 = vld [vmem:[#allocation14_spill] sm:$0xff] }
 0x23e   : > { %2634 = vst [vmem:[%s4730_s9 + $0x48] sm:$0xff] %v2602_v43  ;;  %2405 = vmatmul.f32.gmra.mxu3 %v3899_v62 }
 0x23f   : > { %v2186_v41 = vpop.f32.mrf.mxu2  ;;  %v2527_v32 = vpop.f32.mrf.mxu0 }
 0x240   : > { %v2262_v53 = vadd.f32 %v2186_v41, %v2100_v4 }
 0x241   : > { %v2027_v59 = vpop.f32.mrf.mxu1  ;;  %v2358_v30 = vpop.f32.mrf.mxu3 }
 0x242   : > { %v2434_v38 = vadd.f32 %v2358_v30, %v2262_v53  ;;  %2574 = vmatmul.f32.gmra.mxu0 %v4551_v18  ;;  %v2101_v14 = vadd.f32 %v2027_v59, %v5233_v9  ;;  %v5238_v53 = vld [vmem:[#allocation59_spill] sm:$0xff] }
 0x244   : > { %v2603_v11 = vadd.f32 %v2527_v32, %v2434_v38  ;;  %2074 = vmatmul.f32.gmra.mxu1 %v4527_v34  ;;  %2236 = vmatmul.f32.gmra.mxu2 %v5160_v12  ;;  %v1954_v34 = vrot.slane %v4543_v3, 2 }
 0x246   : > { %2635 = vst [vmem:[%s4730_s9 + $0x50] sm:$0xff] %v2603_v11  ;;  %2408 = vmatmul.f32.gmra.mxu3 %v3937_v44  ;;  %v5234_v44 = vld [vmem:[#allocation45_spill] sm:$0xff]  ;;  %v1955_v47 = vsel %vm1344_vm3, %v1953_v37, %v1954_v34 }
 0x247   : > { %v2189_v62 = vpop.f32.mrf.mxu2  ;;  %v2530_v5 = vpop.f32.mrf.mxu0 }
 0x248   : > { %v2263_v25 = vadd.f32 %v2189_v62, %v2101_v14 }
 0x249   : > { %v2030_v28 = vpop.f32.mrf.mxu1  ;;  %v2361_v42 = vpop.f32.mrf.mxu3 }
 0x24a   : > { %v2435_v8 = vadd.f32 %v2361_v42, %v2263_v25  ;;  %2577 = vmatmul.f32.gmra.mxu0 %v4575_v29  ;;  %v2102_v12 = vadd.f32 %v2030_v28, %v5234_v44 }
 0x24c   : > { %v2604_v20 = vadd.f32 %v2530_v5, %v2435_v8  ;;  %2077 = vmatmul.f32.gmra.mxu1 %v4551_v18  ;;  %2924 = vmatmul.msk.f32.gmra.mxu2 %vm424_vm0, %v4541_v57  ;;  %v1956_v18 = vrot.slane %v4572_v39, 2 }
 0x24e   : > { %2636 = vst [vmem:[%s4730_s9 + $0x58] sm:$0xff] %v2604_v20  ;;  %2411 = vmatmul.f32.gmra.mxu3 %v4568_v54  ;;  %v1957_v27 = vsel %vm1344_vm3, %v1954_v34, %v1956_v18 }
 0x24f   : > { %v2192_v35 = vpop.f32.mrf.mxu2  ;;  %v2533_v24 = vpop.f32.mrf.mxu0 }
 0x250   : > { %v2264_v49 = vadd.f32 %v2192_v35, %v2102_v12 }
 0x251   : > { %v2033_v17 = vpop.f32.mrf.mxu1  ;;  %v2364_v55 = vpop.f32.mrf.mxu3 }
 0x252   : > { %v2436_v51 = vadd.f32 %v2364_v55, %v2264_v49  ;;  %2580 = vmatmul.f32.gmra.mxu0 %v1955_v47  ;;  %v2103_v57 = vadd.f32 %v2033_v17, %v5235_v26 }
 0x254   : > { %v2605_v13 = vadd.f32 %v2533_v24, %v2436_v51  ;;  %2080 = vmatmul.f32.gmra.mxu1 %v4575_v29  ;;  %2242 = vmatmul.f32.gmra.mxu2 %v4543_v3  ;;  %v5236_v29 = vmov 0.0  }
 0x256   : > { %2637 = vst [vmem:[%s4730_s9 + $0x60] sm:$0xff] %v2605_v13  ;;  %2414 = vmatmul.f32.gmra.mxu3 %v4586_v2 }
 0x257   : > { %v2195_v54 = vpop.f32.mrf.mxu2  ;;  %v2536_v63 = vpop.f32.mrf.mxu0 }
 0x258   : > { %v2265_v61 = vadd.f32 %v2195_v54, %v2103_v57 }
 0x259   : > { %v2036_v45 = vpop.f32.mrf.mxu1  ;;  %v2367_v58 = vpop.f32.mrf.mxu3 }
 0x25a   : > { %v2437_v10 = vadd.f32 %v2367_v58, %v2265_v61  ;;  %2583 = vmatmul.f32.gmra.mxu0 %v1957_v27  ;;  %v2104_v3 = vadd.f32 %v2036_v45, %v4579_v15 }
 0x25c   : > { %v2606_v39 = vadd.f32 %v2536_v63, %v2437_v10  ;;  %2083 = vmatmul.f32.gmra.mxu1 %v1955_v47  ;;  %2245 = vmatmul.f32.gmra.mxu2 %v5236_v29 }
 0x25e   : > { %2638 = vst [vmem:[%s4730_s9 + $0x68] sm:$0xff] %v2606_v39  ;;  %2417 = vmatmul.f32.gmra.mxu3 %v5237_v50 }
 0x25f   : > { %v2198_v2 = vpop.f32.mrf.mxu2  ;;  %v2539_v43 = vpop.f32.mrf.mxu0 }
 0x260   : > { %v2266_v22 = vadd.f32 %v2198_v2, %v2104_v3 }
 0x261   : > { %v2039_v4 = vpop.f32.mrf.mxu1  ;;  %v2370_v41 = vpop.f32.mrf.mxu3 }
 0x262   : > { %v2438_v32 = vadd.f32 %v2370_v41, %v2266_v22  ;;  %2586 = vmatmul.f32.gmra.mxu0 %v5238_v53  ;;  %v2105_v30 = vadd.f32 %v2039_v4, %v4589_v1 }
 0x264   : > { %v2607_v59 = vadd.f32 %v2539_v43, %v2438_v32  ;;  %2086 = vmatmul.f32.gmra.mxu1 %v1957_v27  ;;  %2248 = vmatmul.f32.gmra.mxu2 %v5236_v29 }
 0x266   : > { %2639 = vst [vmem:[%s4730_s9 + $0x70] sm:$0xff] %v2607_v59  ;;  %2420 = vmatmul.f32.gmra.mxu3 %v5237_v50 }
 0x267   : > { %v2201_v15 = vpop.f32.mrf.mxu2  ;;  %v2542_v38 = vpop.f32.mrf.mxu0 }
 0x268   : > { %v2267_v11 = vadd.f32 %v2201_v15, %v2105_v30 }
 0x269   : > { %v2042_v9 = vpop.f32.mrf.mxu1  ;;  %v2373_v14 = vpop.f32.mrf.mxu3 }
 0x26a   : > { %v2439_v62 = vadd.f32 %v2373_v14, %v2267_v11  ;;  %2589 = vmatmul.f32.gmra.mxu0 %v5238_v53  ;;  %v2106_v25 = vadd.f32 %v2042_v9, %v4598_v60 }
 0x26c   : > { %v2608_v5 = vadd.f32 %v2542_v38, %v2439_v62 }
 0x26e   : > { %2640 = vst [vmem:[%s4730_s9 + $0x78] sm:$0xff] %v2608_v5 }
 0x26f   : > { %v2204_v28 = vpop.f32.mrf.mxu2  ;;  %v2545_v42 = vpop.f32.mrf.mxu0 }
 0x270   : > { %v2268_v1 = vadd.f32 %v2204_v28, %v2106_v25 }
 0x271   : > { %v2045_v8 = vpop.f32.mrf.mxu1  ;;  %v2376_v37 = vpop.f32.mrf.mxu3 }
 0x272   : > { %v2440_v34 = vadd.f32 %v2376_v37, %v2268_v1  ;;  %v2107_v44 = vadd.f32 %v2045_v8, %v4605_v21 }
 0x274   : > { %v2609_v20 = vadd.f32 %v2545_v42, %v2440_v34 }
 0x276   : > { %2641 = vst [vmem:[%s4730_s9 + $0x80] sm:$0xff] %v2609_v20 }
 0x277   : > { %v2207_v12 = vpop.f32.mrf.mxu2  ;;  %v2548_v35 = vpop.f32.mrf.mxu0 }
 0x278   : > { %v2269_v24 = vadd.f32 %v2207_v12, %v2107_v44 }
 0x279   : > { %v2048_v47 = vpop.f32.mrf.mxu1  ;;  %v2379_v49 = vpop.f32.mrf.mxu3 }
 0x27a   : > { %v2441_v17 = vadd.f32 %v2379_v49, %v2269_v24  ;;  %v2108_v55 = vadd.f32 %v2048_v47, %v4614_v0 }
 0x27c   : > { %v2610_v60 = vadd.f32 %v2548_v35, %v2441_v17 }
 0x27e   : > { %2642 = vst [vmem:[%s4730_s9 + $0x88] sm:$0xff] %v2610_v60 }
 0x27f   : > { %v2210_v51 = vpop.f32.mrf.mxu2  ;;  %v2551_v18 = vpop.f32.mrf.mxu0 }
 0x280   : > { %v2270_v13 = vadd.f32 %v2210_v51, %v2108_v55 }
 0x281   : > { %v2051_v26 = vpop.f32.mrf.mxu1  ;;  %v2382_v57 = vpop.f32.mrf.mxu3 }
 0x282   : > { %v2442_v54 = vadd.f32 %v2382_v57, %v2270_v13  ;;  %v2109_v63 = vadd.f32 %v2051_v26, %v4621_v46 }
 0x284   : > { %v2611_v21 = vadd.f32 %v2551_v18, %v2442_v54 }
 0x286   : > { %2643 = vst [vmem:[%s4730_s9 + $0x90] sm:$0xff] %v2611_v21 }
 0x287   : > { %v2213_v27 = vpop.f32.mrf.mxu2  ;;  %v2554_v61 = vpop.f32.mrf.mxu0 }
 0x288   : > { %v2271_v45 = vadd.f32 %v2213_v27, %v2109_v63 }
 0x289   : > { %v2054_v58 = vpop.f32.mrf.mxu1  ;;  %v2385_v10 = vpop.f32.mrf.mxu3 }
 0x28a   : > { %v2443_v39 = vadd.f32 %v2385_v10, %v2271_v45  ;;  %v2110_v29 = vadd.f32 %v2054_v58, %v4630_v33 }
 0x28c   : > { %v2612_v0 = vadd.f32 %v2554_v61, %v2443_v39 }
 0x28e   : > { %2644 = vst [vmem:[%s4730_s9 + $0x98] sm:$0xff] %v2612_v0 }
 0x28f   : > { %v2216_v3 = vpop.f32.mrf.mxu2  ;;  %v2557_v50 = vpop.f32.mrf.mxu0 }
 0x290   : > { %v2272_v2 = vadd.f32 %v2216_v3, %v2110_v29 }
 0x291   : > { %v2057_v43 = vpop.f32.mrf.mxu1  ;;  %v2388_v22 = vpop.f32.mrf.mxu3 }
 0x292   : > { %v2444_v4 = vadd.f32 %v2388_v22, %v2272_v2  ;;  %v2111_v41 = vadd.f32 %v2057_v43, %v4637_v19 }
 0x294   : > { %v2613_v46 = vadd.f32 %v2557_v50, %v2444_v4 }
 0x296   : > { %2645 = vst [vmem:[%s4730_s9 + $0xa0] sm:$0xff] %v2613_v46 }
 0x297   : > { %v2219_v32 = vpop.f32.mrf.mxu2  ;;  %v2560_v53 = vpop.f32.mrf.mxu0 }
 0x298   : > { %v2273_v59 = vadd.f32 %v2219_v32, %v2111_v41 }
 0x299   : > { %v2060_v30 = vpop.f32.mrf.mxu1  ;;  %v2391_v15 = vpop.f32.mrf.mxu3 }
 0x29a   : > { %v2445_v38 = vadd.f32 %v2391_v15, %v2273_v59  ;;  %v2112_v11 = vadd.f32 %v2060_v30, %v4646_v6 }
 0x29c   : > { %v2614_v33 = vadd.f32 %v2560_v53, %v2445_v38 }
 0x29e   : > { %2646 = vst [vmem:[%s4730_s9 + $0xa8] sm:$0xff] %v2614_v33 }
 0x29f   : > { %v2222_v9 = vpop.f32.mrf.mxu2  ;;  %v2563_v14 = vpop.f32.mrf.mxu0 }
 0x2a0   : > { %v2274_v62 = vadd.f32 %v2222_v9, %v2112_v11 }
 0x2a1   : > { %v2063_v5 = vpop.f32.mrf.mxu1  ;;  %v2394_v25 = vpop.f32.mrf.mxu3 }
 0x2a2   : > { %v2446_v28 = vadd.f32 %v2394_v25, %v2274_v62  ;;  %v2113_v42 = vadd.f32 %v2063_v5, %v4653_v40 }
 0x2a4   : > { %v2615_v19 = vadd.f32 %v2563_v14, %v2446_v28 }
 0x2a6   : > { %2647 = vst [vmem:[%s4730_s9 + $0xb0] sm:$0xff] %v2615_v19 }
 0x2a7   : > { %v2225_v1 = vpop.f32.mrf.mxu2  ;;  %v2566_v8 = vpop.f32.mrf.mxu0 }
 0x2a8   : > { %v2275_v37 = vadd.f32 %v2225_v1, %v2113_v42 }
 0x2a9   : > { %v2066_v34 = vpop.f32.mrf.mxu1  ;;  %v2397_v20 = vpop.f32.mrf.mxu3 }
 0x2aa   : > { %v2447_v44 = vadd.f32 %v2397_v20, %v2275_v37  ;;  %v2114_v12 = vadd.f32 %v2066_v34, %v4662_v48 }
 0x2ac   : > { %v2616_v6 = vadd.f32 %v2566_v8, %v2447_v44 }
 0x2ae   : > { %2648 = vst [vmem:[%s4730_s9 + $0xb8] sm:$0xff] %v2616_v6 }
 0x2af   : > { %v2228_v35 = vpop.f32.mrf.mxu2  ;;  %v2569_v24 = vpop.f32.mrf.mxu0 }
 0x2b0   : > { %v2276_v47 = vadd.f32 %v2228_v35, %v2114_v12 }
 0x2b1   : > { %v2069_v49 = vpop.f32.mrf.mxu1  ;;  %v2400_v17 = vpop.f32.mrf.mxu3 }
 0x2b2   : > { %v2448_v60 = vadd.f32 %v2400_v17, %v2276_v47  ;;  %v2115_v55 = vadd.f32 %v2069_v49, %v4669_v23 }
 0x2b4   : > { %v2617_v40 = vadd.f32 %v2569_v24, %v2448_v60 }
 0x2b6   : > { %2649 = vst [vmem:[%s4730_s9 + $0xc0] sm:$0xff] %v2617_v40 }
 0x2b7   : > { %v2231_v51 = vpop.f32.mrf.mxu2  ;;  %v2572_v18 = vpop.f32.mrf.mxu0 }
 0x2b8   : > { %v2277_v13 = vadd.f32 %v2231_v51, %v2115_v55 }
 0x2b9   : > { %v2072_v26 = vpop.f32.mrf.mxu1  ;;  %v2403_v57 = vpop.f32.mrf.mxu3 }
 0x2ba   : > { %v2449_v54 = vadd.f32 %v2403_v57, %v2277_v13  ;;  %v2116_v21 = vadd.f32 %v2072_v26, %v4678_v56 }
 0x2bc   : > { %v2618_v48 = vadd.f32 %v2572_v18, %v2449_v54 }
 0x2be   : > { %2650 = vst [vmem:[%s4730_s9 + $0xc8] sm:$0xff] %v2618_v48 }
 0x2bf   : > { %v2234_v63 = vpop.f32.mrf.mxu2  ;;  %v2575_v27 = vpop.f32.mrf.mxu0 }
 0x2c0   : > { %v2278_v61 = vadd.f32 %v2234_v63, %v2116_v21 }
 0x2c1   : > { %v2075_v45 = vpop.f32.mrf.mxu1  ;;  %v2406_v58 = vpop.f32.mrf.mxu3 }
 0x2c2   : > { %v2450_v10 = vadd.f32 %v2406_v58, %v2278_v61  ;;  %v2117_v39 = vadd.f32 %v2075_v45, %v4685_v7 }
 0x2c4   : > { %v2619_v23 = vadd.f32 %v2575_v27, %v2450_v10 }
 0x2c6   : > { %2651 = vst [vmem:[%s4730_s9 + $0xd0] sm:$0xff] %v2619_v23 }
 0x2c7   : > { %v2237_v0 = vpop.f32.mrf.mxu2  ;;  %v2578_v29 = vpop.f32.mrf.mxu0 }
 0x2c8   : > { %v2279_v3 = vadd.f32 %v2237_v0, %v2117_v39 }
 0x2c9   : > { %v2078_v50 = vpop.f32.mrf.mxu1  ;;  %v2409_v2 = vpop.f32.mrf.mxu3 }
 0x2ca   : > { %v2451_v43 = vadd.f32 %v2409_v2, %v2279_v3  ;;  %v2118_v22 = vadd.f32 %v2078_v50, %v4694_v52 }
 0x2cc   : > { %v2620_v56 = vadd.f32 %v2578_v29, %v2451_v43 }
 0x2ce   : > { %2652 = vst [vmem:[%s4730_s9 + $0xd8] sm:$0xff] %v2620_v56 }
 0x2cf   : > { %v2240_v4 = vpop.f32.mrf.mxu2  ;;  %v2581_v46 = vpop.f32.mrf.mxu0 }
 0x2d0   : > { %v2280_v41 = vadd.f32 %v2240_v4, %v2118_v22 }
 0x2d1   : > { %v2081_v32 = vpop.f32.mrf.mxu1  ;;  %v2412_v53 = vpop.f32.mrf.mxu3 }
 0x2d2   : > { %v2452_v59 = vadd.f32 %v2412_v53, %v2280_v41  ;;  %v2119_v30 = vadd.f32 %v2081_v32, %v4701_v16 }
 0x2d4   : > { %v2621_v7 = vadd.f32 %v2581_v46, %v2452_v59 }
 0x2d6   : > { %2653 = vst [vmem:[%s4730_s9 + $0xe0] sm:$0xff] %v2621_v7 }
 0x2d7   : > { %v2243_v15 = vpop.f32.mrf.mxu2  ;;  %v2584_v38 = vpop.f32.mrf.mxu0 }
 0x2d8   : > { %v2281_v33 = vadd.f32 %v2243_v15, %v2119_v30 }
 0x2d9   : > { %v2084_v11 = vpop.f32.mrf.mxu1  ;;  %v2415_v9 = vpop.f32.mrf.mxu3 }
 0x2da   : > { %v2453_v14 = vadd.f32 %v2415_v9, %v2281_v33  ;;  %v2120_v62 = vadd.f32 %v2084_v11, %v4710_v31 }
 0x2dc   : > { %v2622_v52 = vadd.f32 %v2584_v38, %v2453_v14 }
 0x2de   : > { %2654 = vst [vmem:[%s4730_s9 + $0xe8] sm:$0xff] %v2622_v52 }
 0x2df   : > { %v2246_v5 = vpop.f32.mrf.mxu2  ;;  %v2587_v25 = vpop.f32.mrf.mxu0 }
 0x2e0   : > { %v2282_v28 = vadd.f32 %v2246_v5, %v2120_v62 }
 0x2e1   : > { %v2418_v19 = vpop.f32.mrf.mxu3  ;;  %v2087_v1 = vpop.f32.mrf.mxu1 }
 0x2e2   : > { %v2454_v42 = vadd.f32 %v2418_v19, %v2282_v28  ;;  %v2121_v8 = vadd.f32 %v2087_v1, %v4717_v36 }
 0x2e4   : > { %v2623_v16 = vadd.f32 %v2587_v25, %v2454_v42 }
 0x2e6   : > { %2655 = vst [vmem:[%s4730_s9 + $0xf0] sm:$0xff] %v2623_v16 }
 0x2e7   : > { %v2249_v37 = vpop.f32.mrf.mxu2  ;;  %v2590_v44 = vpop.f32.mrf.mxu0 }
 0x2e8   : > { %v2283_v34 = vadd.f32 %v2249_v37, %v2121_v8 }
 0x2e9   : > { %v2421_v20 = vpop.f32.mrf.mxu3 }
 0x2ea   : > { %v2455_v6 = vadd.f32 %v2421_v20, %v2283_v34 }
 0x2ec   : > { %v2624_v12 = vadd.f32 %v2590_v44, %v2455_v6 }
 0x2ee   : > { %2656 = vst [vmem:[%s4730_s9 + $0xf8] sm:$0xff] %v2624_v12 }
 0x2ef PF: > { %s15_s20 = sadd.s32 1, %s3064_s20   ;;  %s5239_s18 = smov %s3060_s19 }
 0x2f0   : > { %p12_p5 = scmp.ge.s32.totalorder %s15_s20, 4   ;;  %s5240_s19 = smov %s5242_s21 }
 0x2f2   :  { %14 = sbr.rel (!%p12_p5) target bundleno = 2 (0x2), region = 81 }

// kernel: unet_up_forward.11
= control target key start
LH: loop header
LB: loop body
LE: loop exit
PB: predicated region body
PF: predicated region fallthrough
CT: control target
= control target key end

     0   :  { %s5627_s13 = smov 0   ;;  %s5629_s14 = smov 0   ;;  %s8959_s0 = inlined_call_operand.vmem [shape: f32[2,24,18,128], index: 0, kind: input, shape index: {}, may-alias: {0,1}]   ;;  %s8960_s1 = inlined_call_operand.vmem [shape: f32[2,24,18,128], index: 1, kind: input, shape index: {}, may-alias: {0,1}]   ;;  %s8961_s2 = inlined_call_operand.vmem [shape: f32[1,128], index: 2, kind: input, shape index: {}]   ;;  %s8962_s3 = inlined_call_operand.vmem [shape: f32[1,128], index: 3, kind: input, shape index: {}]   ;;  %s8963_s4 = inlined_call_operand.vmem [shape: f32[9,128,128], index: 4, kind: input, shape index: {}]   ;;  %s8964_s5 = inlined_call_operand.vmem [shape: f32[2,24,18,128], index: 5, kind: input, shape index: {}, may-alias: {5,6}]   ;;  %s8965_s6 = inlined_call_operand.vmem [shape: f32[2,24,18,128], index: 6, kind: input, shape index: {}, may-alias: {5,6}]   ;;  %s8966_s7 = inlined_call_operand.vmem [shape: f32[1,128], index: 7, kind: input, shape index: {}]   ;;  %s8967_s8 = inlined_call_operand.vmem [shape: f32[1,128], index: 8, kind: input, shape index: {}]   ;;  %s8968_s9 = inlined_call_operand.vmem [shape: f32[9,128,128], index: 9, kind: input, shape index: {}]   ;;  %s8969_s10 = inlined_call_operand.vmem [shape: f32[2,16,16,128], index: 10, kind: output, shape index: {}]  }
   0x1   :  { %s5631_s15 = smov 0  }
   0x2 LB: > { %s32_s16 = sadd.s32 1, %s5565_s14  ;;  %p5113_p0 = scmp.ge.s32.totalorder %s5569_s15, 1  ;;  %s5569_s15 = sphi %s5631_s15, %s20_s15   ;;  %s5565_s14 = sphi %s5629_s14, %s9578_s14   ;;  %s5561_s13 = sphi %s5627_s13, %s9577_s13  }
   0x3   : > { %p34_p1 = scmp.ge.s32.totalorder %s32_s16, 2  ;;  %p424_p2 = scmp.lt.s32.totalorder %s5569_s15, 3 }
   0x5   : > { %s9580_s16 = smov (%p34_p1, %s32_s16), 0  ;;  %p425_p3 = pnand %p5113_p0, %p424_p2 }
   0x7   : > { %428 = sbr.rel (%p425_p3) target bundleno = 1329 (0x531), region = 60 }
   0xc   : > { %v5135_v0 = vld [vmem:[%s8963_s4 + $0xf8] sm:$0xff]  ;;  %v5134_v2 = vld [vmem:[%s8963_s4 + $0xf0] sm:$0xff]  ;;  %p522_p4 = scmp.lt.s32.totalorder %s5561_s13, 1  ;;  %v5133_v4 = vld [vmem:[%s8963_s4 + $0xe8] sm:$0xff]  ;;  %v618_v16 = vlaneseq  ;;  %vm1240_vm1 = vcmask 1046528   ;;  %vm1596_vm3 = vcmask 1045504  }
   0xd   : > { %v1191_v1 = vld [vmem:[%s8963_s4 + $0x78] sm:$0xff]  ;;  %5475 = vmatpush.msra.mxu2 %v5135_v0  ;;  %v1190_v3 = vld [vmem:[%s8963_s4 + $0x70] sm:$0xff]  ;;  %v1189_v5 = vld [vmem:[%s8963_s4 + $0x68] sm:$0xff]  ;;  %1370 = vmatpush.msra.mxu0 %v5135_v0  ;;  %v8970_v0 = vmov 0.0  }
   0xe   : > { %5491 = vmatpush.msra.mxu3 %v1191_v1  ;;  %1483 = vmatpush.msra.mxu1 %v1191_v1  ;;  %s9582_s13 = smov (!%p522_p4, %s5561_s13), 1  ;;  %v5132_v6 = vld [vmem:[%s8963_s4 + $0xe0] sm:$0xff]  ;;  %v5131_v8 = vld [vmem:[%s8963_s4 + $0xd8] sm:$0xff]  ;;  %v5130_v10 = vld [vmem:[%s8963_s4 + $0xd0] sm:$0xff]  ;;  %v5724_v25 = vshrl.u32 %v618_v16, 7  ;;  %v5811_v1 = vrot.slane %v8970_v0, 1 }
   0xf   : > { %5476 = vmatpush.msra.mxu2 %v5134_v2  ;;  %v1188_v7 = vld [vmem:[%s8963_s4 + $0x60] sm:$0xff]  ;;  %1371 = vmatpush.msra.mxu0 %v5134_v2  ;;  %s5672_s17 = smul.u32 576, %s9582_s13  ;;  %v1187_v9 = vld [vmem:[%s8963_s4 + $0x58] sm:$0xff]  ;;  %v1186_v11 = vld [vmem:[%s8963_s4 + $0x50] sm:$0xff]  ;;  %s5474_s19 = sshll.u32 %s9582_s13, 8 }
  0x10   : > { %5492 = vmatpush.msra.mxu3 %v1190_v3  ;;  %1484 = vmatpush.msra.mxu1 %v1190_v3  ;;  %v5129_v12 = vld [vmem:[%s8963_s4 + $0xc8] sm:$0xff]  ;;  %v5128_v14 = vld [vmem:[%s8963_s4 + $0xc0] sm:$0xff]  ;;  %v5127_v23 = vld [vmem:[%s8963_s4 + $0xb8] sm:$0xff]  ;;  %vm676_vm0 = vcmp.ge.s32.totalorder %v5724_v25, 1  ;;  %v5766_v42 = vadd.s32 16, %v5724_v25  ;;  %9155 = vst [vmem:[#allocation6_spill] sm:$0xff] %v5811_v1 }
  0x11   : > { %5477 = vmatpush.msra.mxu2 %v5133_v4  ;;  %1372 = vmatpush.msra.mxu0 %v5133_v4  ;;  %s5684_s24 = scalar_lea.vmem %s8959_s0, %s5672_s17  ;;  %v1185_v13 = vld [vmem:[%s8963_s4 + $0x48] sm:$0xff]  ;;  %v5706_v18 = vld [vmem:[%s8961_s2] ss:$0 sm:$0xff]  ;;  %v1183_v24 = vld [vmem:[%s8963_s4 + $0x38] sm:$0xff]  ;;  %s5471_s26 = sadd.s32 384, %s5672_s17 }
  0x12   : > { %5493 = vmatpush.msra.mxu3 %v1189_v5  ;;  %1485 = vmatpush.msra.mxu1 %v1189_v5  ;;  %v814_v15 = vld [vmem:[%s5684_s24 + $0xc0] sm:$0xff]  ;;  %v815_v17 = vld [vmem:[%s5684_s24 + $0xc8] sm:$0xff]  ;;  %v816_v27 = vld [vmem:[%s5684_s24 + $0xd0] sm:$0x3]  ;;  %9153 = vst [vmem:[#allocation4_spill] sm:$0xff] %v5766_v42  ;;  %vm735_vm2 = vcmp.le.s32.totalorder %v5766_v42, 16  ;;  %s548_s29 = scalar_lea.vmem %s8960_s1, %s5471_s26  ;;  %s7238_s30 = scalar_lea.vmem %s8964_s5, %s5672_s17 }
  0x13   : > { %5478 = vmatpush.msra.mxu2 %v5132_v6  ;;  %1373 = vmatpush.msra.mxu0 %v5132_v6  ;;  %v1184_v19 = vld [vmem:[%s8963_s4 + $0x40] sm:$0xff]  ;;  %v872_v21 = vmul.f32 %v5706_v18, %v814_v15  ;;  %v873_v22 = vmul.f32 %v5706_v18, %v815_v17  ;;  %v5126_v28 = vld [vmem:[%s8963_s4 + $0xb0] sm:$0xff]  ;;  %v5125_v30 = vld [vmem:[%s8963_s4 + $0xa8] sm:$0xff]  ;;  %v874_v34 = vmul.f32 %v5706_v18, %v816_v27  ;;  %s8565_s11 = scalar_lea.vmem %s8965_s6, %s5471_s26 }
  0x14   : > { %5494 = vmatpush.msra.mxu3 %v1188_v7  ;;  %1486 = vmatpush.msra.mxu1 %v1188_v7  ;;  %v5714_v20 = vld [vmem:[%s8962_s3] ss:$0 sm:$0xff]  ;;  %v1182_v29 = vld [vmem:[%s8963_s4 + $0x30] sm:$0xff]  ;;  %v1181_v32 = vld [vmem:[%s8963_s4 + $0x28] sm:$0xff] }
  0x15   : > { %5479 = vmatpush.msra.mxu2 %v5131_v8  ;;  %1374 = vmatpush.msra.mxu0 %v5131_v8  ;;  %v930_v26 = vadd.f32 %v5714_v20, %v872_v21  ;;  %v931_v31 = vadd.f32 %v5714_v20, %v873_v22  ;;  %v5124_v35 = vld [vmem:[%s8963_s4 + $0xa0] sm:$0xff]  ;;  %v5123_v38 = vld [vmem:[%s8963_s4 + $0x98] sm:$0xff]  ;;  %v932_v41 = vadd.f32 %v5714_v20, %v874_v34  ;;  %v5122_v44 = vld [vmem:[%s8963_s4 + $0x90] sm:$0xff] }
  0x16   : > { %5495 = vmatpush.msra.mxu3 %v1187_v9  ;;  %1487 = vmatpush.msra.mxu1 %v1187_v9  ;;  %v1180_v36 = vld [vmem:[%s8963_s4 + $0x20] sm:$0xff]  ;;  %v1179_v39 = vld [vmem:[%s8963_s4 + $0x18] sm:$0xff]  ;;  %v1178_v45 = vld [vmem:[%s8963_s4 + $0x10] sm:$0xff] }
  0x17   : > { %5480 = vmatpush.msra.mxu2 %v5130_v10  ;;  %1375 = vmatpush.msra.mxu0 %v5130_v10  ;;  %v5741_v33 = vmax.f32 %v930_v26, 0.0  ;;  %v5751_v37 = vmax.f32 %v931_v31, 0.0  ;;  %v817_v43 = vld [vmem:[%s5684_s24 + $0xd8] sm:$0xff]  ;;  %v5121_v46 = vld [vmem:[%s8963_s4 + $0x88] sm:$0xff]  ;;  %v986_v50 = vmax.f32 %v932_v41, 0.0  ;;  %v818_v51 = vld [vmem:[%s5684_s24 + $0xe0] sm:$0xff] }
  0x18   : > { %5496 = vmatpush.msra.mxu3 %v1186_v11  ;;  %1488 = vmatpush.msra.mxu1 %v1186_v11  ;;  %v1177_v49 = vld [vmem:[%s8963_s4 + $0x8] sm:$0xff]  ;;  %v875_v52 = vmul.f32 %v5706_v18, %v817_v43  ;;  %v793_v53 = vld [vmem:[%s5684_s24 + $0x18] sm:$0xff]  ;;  %v5120_v54 = vld [vmem:[%s8963_s4 + $0x80] sm:$0xff]  ;;  %v876_v57 = vmul.f32 %v5706_v18, %v818_v51 }
  0x19   : > { %5481 = vmatpush.msra.mxu2 %v5129_v12  ;;  %1376 = vmatpush.msra.mxu0 %v5129_v12  ;;  %9151 = vst [vmem:[#allocation2_spill] sm:$0xff] %v5741_v33  ;;  %v5762_v40 = vsel %vm676_vm0, %v5741_v33, 0.0  ;;  %v1282_v48 = vrot.slane %v5751_v37, 1  ;;  %v1176_v55 = vld [vmem:[%s8963_s4] sm:$0xff]  ;;  %v851_v59 = vmul.f32 %v5706_v18, %v793_v53  ;;  %v5166_v60 = vld [vmem:[%s8963_s4 + $0x178] sm:$0xff]  ;;  %v5807_v62 = vsel %vm735_vm2, %v986_v50, 0.0 }
  0x1a   : > { %5497 = vmatpush.msra.mxu3 %v1185_v13  ;;  %1489 = vmatpush.msra.mxu1 %v1185_v13  ;;  %9152 = vst [vmem:[#allocation3_spill] sm:$0xff] %v5751_v37  ;;  %v1281_v47 = vrot.slane %v5762_v40, 1  ;;  %v794_v58 = vld [vmem:[%s5684_s24 + $0x20] sm:$0xff]  ;;  %v5182_v61 = vld [vmem:[%s8963_s4 + $0x1f8] sm:$0xff]  ;;  %v933_v63 = vadd.f32 %v5714_v20, %v875_v52  ;;  %v819_v2 = vld [vmem:[%s5684_s24 + $0xe8] sm:$0x3]  ;;  %v934_v7 = vadd.f32 %v5714_v20, %v876_v57 }
  0x1b   : > { %5482 = vmatpush.msra.mxu2 %v5128_v14  ;;  %1377 = vmatpush.msra.mxu0 %v5128_v14  ;;  %v5165_v3 = vld [vmem:[%s8963_s4 + $0x170] sm:$0xff]  ;;  %v852_v4 = vmul.f32 %v5706_v18, %v794_v58  ;;  %v1284_v5 = vrot.slane %v5807_v62, 1  ;;  %v909_v8 = vadd.f32 %v5714_v20, %v851_v59  ;;  %v5214_v9 = vld [vmem:[%s8963_s4 + $0x278] sm:$0xff]  ;;  %v877_v12 = vmul.f32 %v5706_v18, %v819_v2  ;;  %v795_v13 = vld [vmem:[%s5684_s24 + $0x28] sm:$0x3] }
  0x1c   : > { %5498 = vmatpush.msra.mxu3 %v1184_v19  ;;  %1490 = vmatpush.msra.mxu1 %v1184_v19  ;;  %v5794_v56 = vsel %vm1240_vm1, %v1281_v47, %v1282_v48  ;;  %v5181_v6 = vld [vmem:[%s8963_s4 + $0x1f0] sm:$0xff]  ;;  %v5230_v10 = vld [vmem:[%s8963_s4 + $0x2f8] sm:$0xff]  ;;  %v5834_v11 = vmax.f32 %v933_v63, 0.0  ;;  %v5164_v14 = vld [vmem:[%s8963_s4 + $0x168] sm:$0xff]  ;;  %v5856_v22 = vmax.f32 %v934_v7, 0.0 }
  0x1d   : > { %5483 = vmatpush.msra.mxu2 %v5127_v23  ;;  %1378 = vmatpush.msra.mxu0 %v5127_v23  ;;  %9154 = vst [vmem:[#allocation5_spill] sm:$0xff] %v5794_v56  ;;  %v5180_v15 = vld [vmem:[%s8963_s4 + $0x1e8] sm:$0xff]  ;;  %v5213_v16 = vld [vmem:[%s8963_s4 + $0x270] sm:$0xff]  ;;  %v910_v19 = vadd.f32 %v5714_v20, %v852_v4  ;;  %v5854_v21 = vsel %vm1240_vm1, %v1282_v48, %v1284_v5  ;;  %v5858_v23 = vmax.f32 %v909_v8, 0.0  ;;  %v821_v41 = vld [vmem:[%s5684_s24 + $0xf8] sm:$0xff] }
  0x1e   : > { %5499 = vmatpush.msra.mxu3 %v1183_v24  ;;  %1491 = vmatpush.msra.mxu1 %v1183_v24  ;;  %9156 = vst [vmem:[#allocation7_spill] sm:$0xff] %v5834_v11  ;;  %v5229_v17 = vld [vmem:[%s8963_s4 + $0x2f0] sm:$0xff]  ;;  %v853_v24 = vmul.f32 %v5706_v18, %v795_v13  ;;  %v5864_v26 = vsel %vm676_vm0, %v5834_v11, 0.0  ;;  %v935_v27 = vadd.f32 %v5714_v20, %v877_v12  ;;  %v5228_v31 = vld [vmem:[%s8963_s4 + $0x2e8] sm:$0xff]  ;;  %v5211_v47 = vld [vmem:[%s8963_s4 + $0x260] sm:$0xff] }
  0x1f   : > { %5484 = vmatpush.msra.mxu2 %v5126_v28  ;;  %1379 = vmatpush.msra.mxu0 %v5126_v28  ;;  %9157 = vst [vmem:[#allocation8_spill] sm:$0xff] %v5854_v21  ;;  %v5163_v28 = vld [vmem:[%s8963_s4 + $0x160] sm:$0xff]  ;;  %v5882_v34 = vmax.f32 %v910_v19, 0.0  ;;  %v5161_v50 = vld [vmem:[%s8963_s4 + $0x150] sm:$0xff]  ;;  %v879_v58 = vmul.f32 %v5706_v18, %v821_v41  ;;  %v5176_v7 = vld [vmem:[%s8963_s4 + $0x1c8] sm:$0xff] }
  0x20   : > { %5500 = vmatpush.msra.mxu3 %v1182_v29  ;;  %1492 = vmatpush.msra.mxu1 %v1182_v29  ;;  %9158 = vst [vmem:[#allocation9_spill] sm:$0xff] %v5856_v22  ;;  %v5179_v29 = vld [vmem:[%s8963_s4 + $0x1e0] sm:$0xff]  ;;  %v911_v43 = vadd.f32 %v5714_v20, %v853_v24  ;;  %v5177_v51 = vld [vmem:[%s8963_s4 + $0x1d0] sm:$0xff] }
  0x21   : > { %5485 = vmatpush.msra.mxu2 %v5125_v30  ;;  %1380 = vmatpush.msra.mxu0 %v5125_v30  ;;  %9159 = vst [vmem:[#allocation10_spill] sm:$0xff] %v5864_v26  ;;  %v5212_v30 = vld [vmem:[%s8963_s4 + $0x268] sm:$0xff]  ;;  %v5227_v48 = vld [vmem:[%s8963_s4 + $0x2e0] sm:$0xff]  ;;  %v1247_v53 = vrot.slane %v5882_v34, 1  ;;  %v5209_v8 = vld [vmem:[%s8963_s4 + $0x250] sm:$0xff] }
  0x22   : > { %5501 = vmatpush.msra.mxu3 %v1181_v32  ;;  %1493 = vmatpush.msra.mxu1 %v1181_v32  ;;  %v820_v32 = vld [vmem:[%s5684_s24 + $0xf0] sm:$0xff]  ;;  %v965_v59 = vmax.f32 %v911_v43, 0.0  ;;  %v5159_v41 = vld [vmem:[%s8963_s4 + $0x140] sm:$0xff] }
  0x23   : > { %5486 = vmatpush.msra.mxu2 %v5124_v35  ;;  %1381 = vmatpush.msra.mxu0 %v5124_v35  ;;  %v5162_v35 = vld [vmem:[%s8963_s4 + $0x158] sm:$0xff]  ;;  %v5175_v43 = vld [vmem:[%s8963_s4 + $0x1c0] sm:$0xff] }
  0x24   : > { %5502 = vmatpush.msra.mxu3 %v1180_v36  ;;  %1494 = vmatpush.msra.mxu1 %v1180_v36  ;;  %v1286_v36 = vrot.slane %v5864_v26, 1  ;;  %v5956_v12 = vsel %vm735_vm2, %v965_v59, 0.0  ;;  %v813_v26 = vld [vmem:[%s5684_s24 + $0xb8] sm:$0x3] }
  0x25   : > { %5487 = vmatpush.msra.mxu2 %v5123_v38  ;;  %1382 = vmatpush.msra.mxu0 %v5123_v38  ;;  %v1287_v38 = vrot.slane %v5856_v22, 1  ;;  %v1249_v19 = vrot.slane %v5956_v12, 1 }
  0x26   : > { %5503 = vmatpush.msra.mxu3 %v1179_v39  ;;  %1495 = vmatpush.msra.mxu1 %v1179_v39  ;;  %v5892_v39 = vsel %vm676_vm0, %v5858_v23, 0.0 }
  0x27   : > { %5488 = vmatpush.msra.mxu2 %v5122_v44  ;;  %1383 = vmatpush.msra.mxu0 %v5122_v44  ;;  %v5178_v44 = vld [vmem:[%s8963_s4 + $0x1d8] sm:$0xff]  ;;  %v1246_v52 = vrot.slane %v5892_v39, 1  ;;  %v5924_v57 = vsel %vm1240_vm1, %v1286_v36, %v1287_v38  ;;  %v5990_v36 = vsel %vm1240_vm1, %v1247_v53, %v1249_v19 }
  0x28   : > { %5504 = vmatpush.msra.mxu3 %v1178_v45  ;;  %1496 = vmatpush.msra.mxu1 %v1178_v45  ;;  %v989_v45 = vmax.f32 %v935_v27, 0.0  ;;  %9160 = vst [vmem:[#allocation11_spill] sm:$0xff] %v5924_v57 }
  0x29   : > { %5489 = vmatpush.msra.mxu2 %v5121_v46  ;;  %1384 = vmatpush.msra.mxu0 %v5121_v46  ;;  %v878_v46 = vmul.f32 %v5706_v18, %v820_v32  ;;  %v5940_v4 = vsel %vm1240_vm1, %v1246_v52, %v1247_v53  ;;  %v799_v53 = vld [vmem:[%s5684_s24 + $0x48] sm:$0xff] }
  0x2a   : > { %5505 = vmatpush.msra.mxu3 %v1177_v49  ;;  %1497 = vmatpush.msra.mxu1 %v1177_v49  ;;  %v796_v49 = vld [vmem:[%s5684_s24 + $0x30] sm:$0xff]  ;;  %v5931_v63 = vsel %vm735_vm2, %v989_v45, 0.0 }
  0x2b   : > { %5490 = vmatpush.msra.mxu2 %v5120_v54  ;;  %1385 = vmatpush.msra.mxu0 %v5120_v54  ;;  %v5210_v54 = vld [vmem:[%s8963_s4 + $0x258] sm:$0xff]  ;;  %9161 = vst [vmem:[#allocation12_spill] sm:$0xff] %v5931_v63  ;;  %v936_v2 = vadd.f32 %v5714_v20, %v878_v46 }
  0x2c   : > { %5506 = vmatpush.msra.mxu3 %v1176_v55  ;;  %1434 = vmatmul.f32.vlgmr.msra.gmra.mxu2 %v5794_v56 }
  0x2d   : > { %5143 = vmatmul.msk.f32.vlgmr.msra.gmra.mxu3 %vm676_vm0, %v5741_v33  ;;  %1726 = vmatpush.msrb.mxu2 %v5166_v60  ;;  %v797_v60 = vld [vmem:[%s5684_s24 + $0x38] sm:$0xff] }
  0x2e   : > { %1888 = vmatpush.msrb.mxu3 %v5182_v61  ;;  %1498 = vmatpush.msra.mxu1 %v1176_v55  ;;  %v5226_v55 = vld [vmem:[%s8963_s4 + $0x2d8] sm:$0xff]  ;;  %v854_v61 = vmul.f32 %v5706_v18, %v796_v49  ;;  %v855_v5 = vmul.f32 %v5706_v18, %v797_v60  ;;  %v5224_v49 = vld [vmem:[%s8963_s4 + $0x2c8] sm:$0xff] }
  0x2f   : > { %1727 = vmatpush.msrb.mxu2 %v5165_v3  ;;  %1386 = vmatmul.f32.vlgmr.msra.gmra.mxu0 %v5811_v1  ;;  %v822_v3 = vld [vmem:[%s5684_s24 + $0x100] sm:$0x3] }
  0x30   : > { %1499 = vmatmul.f32.vlgmr.msra.gmra.mxu1 %v8970_v0  ;;  %1889 = vmatpush.msrb.mxu3 %v5181_v6  ;;  %v5160_v6 = vld [vmem:[%s8963_s4 + $0x148] sm:$0xff]  ;;  %v912_v13 = vadd.f32 %v5714_v20, %v854_v61  ;;  %v913_v24 = vadd.f32 %v5714_v20, %v855_v5  ;;  %v800_v61 = vld [vmem:[%s5684_s24 + $0x50] sm:$0xff] }
  0x31   : > { %2060 = vmatpush.msrb.mxu0 %v5214_v9  ;;  %2229 = vmatpush.msrb.mxu1 %v5230_v10  ;;  %v1289_v9 = vrot.slane %v5931_v63, 1  ;;  %v937_v10 = vadd.f32 %v5714_v20, %v879_v58 }
  0x32   : > { %1728 = vmatpush.msrb.mxu2 %v5164_v14  ;;  %1890 = vmatpush.msrb.mxu3 %v5180_v15  ;;  %v5225_v14 = vld [vmem:[%s8963_s4 + $0x2d0] sm:$0xff]  ;;  %v5962_v15 = vmax.f32 %v936_v2, 0.0  ;;  %v857_v2 = vmul.f32 %v5706_v18, %v799_v53 }
  0x33   : > { %2061 = vmatpush.msrb.mxu0 %v5213_v16  ;;  %2230 = vmatpush.msrb.mxu1 %v5229_v17  ;;  %v880_v16 = vmul.f32 %v5706_v18, %v822_v3  ;;  %v798_v17 = vld [vmem:[%s5684_s24 + $0x40] sm:$0x3]  ;;  %v5973_v27 = vsel %vm1240_vm1, %v1287_v38, %v1289_v9  ;;  %v5992_v38 = vmax.f32 %v913_v24, 0.0  ;;  %v5158_v9 = vld [vmem:[%s8963_s4 + $0x138] sm:$0xff] }
  0x34   : > { %1437 = vmatmul.f32.gmra.mxu2 %v5854_v21  ;;  %1891 = vmatpush.msrb.mxu3 %v5179_v29  ;;  %9162 = vst [vmem:[#allocation13_spill] sm:$0xff] %v5962_v15  ;;  %v5977_v29 = vmax.f32 %v912_v13, 0.0  ;;  %v5207_v13 = vld [vmem:[%s8963_s4 + $0x240] sm:$0xff]  ;;  %v915_v19 = vadd.f32 %v5714_v20, %v857_v2 }
  0x35   : > { %1550 = vmatmul.f32.gmra.mxu3 %v5751_v37  ;;  %1729 = vmatpush.msrb.mxu2 %v5163_v28  ;;  %9163 = vst [vmem:[#allocation14_spill] sm:$0xff] %v5973_v27  ;;  %v5975_v28 = vmax.f32 %v937_v10, 0.0  ;;  %v938_v32 = vadd.f32 %v5714_v20, %v880_v16  ;;  %v5174_v10 = vld [vmem:[%s8963_s4 + $0x1b8] sm:$0xff]  ;;  %v5223_v24 = vld [vmem:[%s8963_s4 + $0x2c0] sm:$0xff] }
  0x36   : > { %2062 = vmatpush.msrb.mxu0 %v5212_v30  ;;  %2231 = vmatpush.msrb.mxu1 %v5228_v31  ;;  %v856_v30 = vmul.f32 %v5706_v18, %v798_v17  ;;  %v5983_v31 = vsel %vm676_vm0, %v5962_v15, 0.0  ;;  %9166 = vst [vmem:[#allocation17_spill] sm:$0xff] %v5992_v38 }
  0x37   : > { %1389 = vmatmul.f32.gmra.mxu0 %v5811_v1  ;;  %1730 = vmatpush.msrb.mxu2 %v5162_v35  ;;  %9164 = vst [vmem:[#allocation15_spill] sm:$0xff] %v5975_v28  ;;  %v823_v35 = vld [vmem:[%s5684_s24 + $0x108] sm:$0xff]  ;;  %v1291_v45 = vrot.slane %v5983_v31, 1  ;;  %v1292_v46 = vrot.slane %v5975_v28, 1  ;;  %v830_v1 = vld [vmem:[%s5684_s24 + $0x140] sm:$0xff] }
  0x38   : > { %1502 = vmatmul.f32.gmra.mxu1 %v8970_v0  ;;  %1892 = vmatpush.msrb.mxu3 %v5178_v44  ;;  %9165 = vst [vmem:[#allocation16_spill] sm:$0xff] %v5983_v31  ;;  %v5208_v44 = vld [vmem:[%s8963_s4 + $0x248] sm:$0xff]  ;;  %v881_v52 = vmul.f32 %v5706_v18, %v823_v35  ;;  %v801_v35 = vld [vmem:[%s5684_s24 + $0x58] sm:$0x3] }
  0x39   : > { %2063 = vmatpush.msrb.mxu0 %v5211_v47  ;;  %2232 = vmatpush.msrb.mxu1 %v5227_v48  ;;  %v6008_v47 = vsel %vm676_vm0, %v5977_v29, 0.0  ;;  %v914_v48 = vadd.f32 %v5714_v20, %v856_v30  ;;  %v6022_v58 = vsel %vm1240_vm1, %v1291_v45, %v1292_v46 }
  0x3a   : > { %1731 = vmatpush.msrb.mxu2 %v5161_v50  ;;  %1893 = vmatpush.msrb.mxu3 %v5177_v51  ;;  %v992_v50 = vmax.f32 %v938_v32, 0.0  ;;  %v824_v51 = vld [vmem:[%s5684_s24 + $0x110] sm:$0xff]  ;;  %9167 = vst [vmem:[#allocation18_spill] sm:$0xff] %v6022_v58  ;;  %v939_v5 = vadd.f32 %v5714_v20, %v881_v52  ;;  %v826_v52 = vld [vmem:[%s5684_s24 + $0x120] sm:$0xff] }
  0x3b   : > { %2064 = vmatpush.msrb.mxu0 %v5210_v54  ;;  %2233 = vmatpush.msrb.mxu1 %v5226_v55  ;;  %v1251_v54 = vrot.slane %v6008_v47, 1  ;;  %v1252_v55 = vrot.slane %v5992_v38, 1  ;;  %v882_v59 = vmul.f32 %v5706_v18, %v824_v51  ;;  %v968_v60 = vmax.f32 %v914_v48, 0.0 }
  0x3c   : > { %1440 = vmatmul.f32.gmra.mxu2 %v5924_v57  ;;  %1894 = vmatpush.msrb.mxu3 %v5176_v7  ;;  %v6029_v3 = vsel %vm735_vm2, %v992_v50, 0.0  ;;  %v6060_v30 = vmax.f32 %v939_v5, 0.0  ;;  %v6075_v48 = vmax.f32 %v915_v19, 0.0  ;;  %v812_v57 = vld [vmem:[%s5684_s24 + $0xb0] sm:$0xff] }
  0x3d   : > { %5144 = vmatmul.msk.f32.gmra.mxu3 %vm676_vm0, %v5834_v11  ;;  %1732 = vmatpush.msrb.mxu2 %v5160_v6  ;;  %9168 = vst [vmem:[#allocation19_spill] sm:$0xff] %v6029_v3  ;;  %v825_v6 = vld [vmem:[%s5684_s24 + $0x118] sm:$0x3]  ;;  %v6038_v7 = vsel %vm1240_vm1, %v1251_v54, %v1252_v55  ;;  %v940_v16 = vadd.f32 %v5714_v20, %v882_v59  ;;  %v6054_v17 = vsel %vm735_vm2, %v968_v60, 0.0  ;;  %v5157_v54 = vld [vmem:[%s8963_s4 + $0x130] sm:$0xff] }
  0x3e   : > { %2065 = vmatpush.msrb.mxu0 %v5209_v8  ;;  %2234 = vmatpush.msrb.mxu1 %v5225_v14  ;;  %v858_v8 = vmul.f32 %v5706_v18, %v800_v61  ;;  %v1294_v14 = vrot.slane %v6029_v3, 1  ;;  %9169 = vst [vmem:[#allocation20_spill] sm:$0xff] %v6060_v30  ;;  %v883_v32 = vmul.f32 %v5706_v18, %v825_v6  ;;  %v6081_v50 = vsel %vm676_vm0, %v6060_v30, 0.0  ;;  %v5173_v59 = vld [vmem:[%s8963_s4 + $0x1b0] sm:$0xff]  ;;  %v5206_v60 = vld [vmem:[%s8963_s4 + $0x238] sm:$0xff] }
  0x3f   : > { %1392 = vmatmul.f32.gmra.mxu0 %v5940_v4  ;;  %1733 = vmatpush.msrb.mxu2 %v5159_v41  ;;  %v1254_v41 = vrot.slane %v6054_v17, 1  ;;  %v6073_v45 = vmax.f32 %v940_v16, 0.0  ;;  %9172 = vst [vmem:[#allocation23_spill] sm:$0xff] %v6075_v48  ;;  %v1296_v61 = vrot.slane %v6081_v50, 1  ;;  %v5222_v6 = vld [vmem:[%s8963_s4 + $0x2b8] sm:$0xff] }
  0x40   : > { %5136 = vmatmul.msk.f32.gmra.mxu1 %vm676_vm0, %v5858_v23  ;;  %1895 = vmatpush.msrb.mxu3 %v5175_v43  ;;  %v916_v43 = vadd.f32 %v5714_v20, %v858_v8  ;;  %9173 = vst [vmem:[#allocation24_spill] sm:$0xff] %v6081_v50  ;;  %v941_v51 = vadd.f32 %v5714_v20, %v883_v32  ;;  %v837_v11 = vld [vmem:[%s5684_s24 + $0x178] sm:$0x3] }
  0x41   : > { %2066 = vmatpush.msrb.mxu0 %v5208_v44  ;;  %2235 = vmatpush.msrb.mxu1 %v5224_v49  ;;  %v6071_v44 = vsel %vm1240_vm1, %v1292_v46, %v1294_v14  ;;  %9171 = vst [vmem:[#allocation22_spill] sm:$0xff] %v6073_v45  ;;  %v859_v49 = vmul.f32 %v5706_v18, %v801_v35  ;;  %v1297_v2 = vrot.slane %v6073_v45, 1  ;;  %v803_v35 = vld [vmem:[%s5684_s24 + $0x68] sm:$0xff] }
  0x42   : > { %1734 = vmatpush.msrb.mxu2 %v5158_v9  ;;  %1896 = vmatpush.msrb.mxu3 %v5174_v10  ;;  %9170 = vst [vmem:[#allocation21_spill] sm:$0xff] %v6071_v44  ;;  %v6088_v46 = vsel %vm1240_vm1, %v1252_v55, %v1254_v41  ;;  %v6090_v53 = vmax.f32 %v916_v43, 0.0  ;;  %v6106_v55 = vsel %vm676_vm0, %v6075_v48, 0.0  ;;  %v995_v8 = vmax.f32 %v941_v51, 0.0  ;;  %v827_v9 = vld [vmem:[%s5684_s24 + $0x128] sm:$0xff] }
  0x43   : > { %2067 = vmatpush.msrb.mxu0 %v5207_v13  ;;  %2236 = vmatpush.msrb.mxu1 %v5223_v24  ;;  %9174 = vst [vmem:[#allocation25_spill] sm:$0xff] %v6088_v46  ;;  %v917_v5 = vadd.f32 %v5714_v20, %v859_v49  ;;  %v884_v10 = vmul.f32 %v5706_v18, %v826_v52  ;;  %v802_v13 = vld [vmem:[%s5684_s24 + $0x60] sm:$0xff]  ;;  %v1256_v14 = vrot.slane %v6106_v55, 1  ;;  %v828_v51 = vld [vmem:[%s5684_s24 + $0x130] sm:$0x3] }
  0x44   : > { %1443 = vmatmul.f32.gmra.mxu2 %v5973_v27  ;;  %9175 = vst [vmem:[#allocation26_spill] sm:$0xff] %v6090_v53  ;;  %1897 = vmatpush.msrb.mxu3 %v5173_v59  ;;  %v1257_v16 = vrot.slane %v6090_v53, 1  ;;  %v6120_v19 = vsel %vm1240_vm1, %v1296_v61, %v1297_v2  ;;  %v885_v24 = vmul.f32 %v5706_v18, %v827_v9  ;;  %v6127_v43 = vsel %vm735_vm2, %v995_v8, 0.0  ;;  %v5156_v59 = vld [vmem:[%s8963_s4 + $0x128] sm:$0xff]  ;;  %v5205_v61 = vld [vmem:[%s8963_s4 + $0x230] sm:$0xff] }
  0x45   : > { %1556 = vmatmul.f32.gmra.mxu3 %v5856_v22  ;;  %1735 = vmatpush.msrb.mxu2 %v5157_v54  ;;  %9176 = vst [vmem:[#allocation27_spill] sm:$0xff] %v6120_v19  ;;  %v971_v32 = vmax.f32 %v917_v5, 0.0  ;;  %v860_v41 = vmul.f32 %v5706_v18, %v802_v13  ;;  %v942_v49 = vadd.f32 %v5714_v20, %v884_v10  ;;  %v1299_v5 = vrot.slane %v6127_v43, 1  ;;  %v5221_v10 = vld [vmem:[%s8963_s4 + $0x2b0] sm:$0xff]  ;;  %v811_v27 = vld [vmem:[%s5684_s24 + $0xa8] sm:$0xff] }
  0x46   : > { %2068 = vmatpush.msrb.mxu0 %v5206_v60  ;;  %2237 = vmatpush.msrb.mxu1 %v5222_v6  ;;  %9177 = vst [vmem:[#allocation28_spill] sm:$0xff] %v6127_v43  ;;  %v6136_v52 = vsel %vm1240_vm1, %v1256_v14, %v1257_v16  ;;  %v861_v54 = vmul.f32 %v5706_v18, %v803_v35  ;;  %v5172_v60 = vld [vmem:[%s8963_s4 + $0x1a8] sm:$0xff]  ;;  %v804_v35 = vld [vmem:[%s5684_s24 + $0x70] sm:$0x3] }
  0x47   : > { %1395 = vmatmul.f32.gmra.mxu0 %v5990_v36  ;;  %9178 = vst [vmem:[#allocation29_spill] sm:$0xff] %v6136_v52  ;;  %v943_v6 = vadd.f32 %v5714_v20, %v885_v24  ;;  %v6152_v8 = vsel %vm735_vm2, %v971_v32, 0.0  ;;  %v918_v9 = vadd.f32 %v5714_v20, %v860_v41  ;;  %1736 = vmatpush.msrb.mxu2 %v5156_v59  ;;  %v6158_v13 = vmax.f32 %v942_v49, 0.0 }
  0x48   : > { %1508 = vmatmul.f32.gmra.mxu1 %v5882_v34  ;;  %1898 = vmatpush.msrb.mxu3 %v5172_v60  ;;  %v886_v14 = vmul.f32 %v5706_v18, %v828_v51  ;;  %v1259_v24 = vrot.slane %v6152_v8, 1  ;;  %v919_v32 = vadd.f32 %v5714_v20, %v861_v54  ;;  %v6169_v41 = vsel %vm1240_vm1, %v1297_v2, %v1299_v5  ;;  %v5155_v5 = vld [vmem:[%s8963_s4 + $0x120] sm:$0xff] }
  0x49   : > { %9179 = vst [vmem:[#allocation30_spill] sm:$0xff] %v6158_v13  ;;  %2069 = vmatpush.msrb.mxu0 %v5205_v61  ;;  %2238 = vmatpush.msrb.mxu1 %v5221_v10  ;;  %v6171_v49 = vmax.f32 %v943_v6, 0.0  ;;  %v6173_v59 = vmax.f32 %v918_v9, 0.0  ;;  %v862_v51 = vmul.f32 %v5706_v18, %v804_v35  ;;  %v6179_v60 = vsel %vm676_vm0, %v6158_v13, 0.0  ;;  %v829_v10 = vld [vmem:[%s5684_s24 + $0x138] sm:$0xff]  ;;  %v5171_v6 = vld [vmem:[%s8963_s4 + $0x1a0] sm:$0xff] }
  0x4a   : > { %9180 = vst [vmem:[#allocation31_spill] sm:$0xff] %v6169_v41  ;;  %v944_v61 = vadd.f32 %v5714_v20, %v886_v14  ;;  %v6186_v2 = vsel %vm1240_vm1, %v1257_v16, %v1259_v24  ;;  %v6188_v54 = vmax.f32 %v919_v32, 0.0  ;;  %v5204_v9 = vld [vmem:[%s8963_s4 + $0x228] sm:$0xff]  ;;  %v1301_v14 = vrot.slane %v6179_v60, 1  ;;  %1737 = vmatpush.msrb.mxu2 %v5155_v5  ;;  %1899 = vmatpush.msrb.mxu3 %v5171_v6 }
  0x4b   : > { %9181 = vst [vmem:[#allocation32_spill] sm:$0xff] %v6171_v49  ;;  %v1302_v35 = vrot.slane %v6171_v49, 1  ;;  %v6204_v16 = vsel %vm676_vm0, %v6173_v59, 0.0  ;;  %v920_v24 = vadd.f32 %v5714_v20, %v862_v51  ;;  %v5220_v32 = vld [vmem:[%s8963_s4 + $0x2a8] sm:$0xff]  ;;  %2070 = vmatpush.msrb.mxu0 %v5204_v9  ;;  %v895_v22 = vmul.f32 %v5706_v18, %v837_v11 }
  0x4c   : > { %1446 = vmatmul.f32.gmra.mxu2 %v6022_v58  ;;  %9182 = vst [vmem:[#allocation33_spill] sm:$0xff] %v6173_v59  ;;  %v998_v0 = vmax.f32 %v944_v61, 0.0  ;;  %2239 = vmatpush.msrb.mxu1 %v5220_v32  ;;  %v1261_v51 = vrot.slane %v6204_v16, 1  ;;  %v1262_v5 = vrot.slane %v6188_v54, 1  ;;  %v888_v61 = vmul.f32 %v5706_v18, %v830_v1  ;;  %v809_v58 = vld [vmem:[%s5684_s24 + $0x98] sm:$0xff] }
  0x4d   : > { %5145 = vmatmul.msk.f32.gmra.mxu3 %vm676_vm0, %v5962_v15  ;;  %9183 = vst [vmem:[#allocation34_spill] sm:$0xff] %v6179_v60  ;;  %v887_v60 = vmul.f32 %v5706_v18, %v829_v10  ;;  %v6218_v6 = vsel %vm1240_vm1, %v1301_v14, %v1302_v35  ;;  %v974_v43 = vmax.f32 %v920_v24, 0.0  ;;  %v834_v15 = vld [vmem:[%s5684_s24 + $0x160] sm:$0x3] }
  0x4e   : > { %9184 = vst [vmem:[#allocation35_spill] sm:$0xff] %v6186_v2  ;;  %v6225_v9 = vsel %vm735_vm2, %v998_v0, 0.0  ;;  %v6234_v1 = vsel %vm1240_vm1, %v1261_v51, %v1262_v5  ;;  %v5154_v0 = vld [vmem:[%s8963_s4 + $0x118] sm:$0xff]  ;;  %v892_v31 = vmul.f32 %v5706_v18, %v834_v15 }
  0x4f   : > { %1398 = vmatmul.f32.gmra.mxu0 %v6038_v7  ;;  %9185 = vst [vmem:[#allocation36_spill] sm:$0xff] %v6188_v54  ;;  %v945_v32 = vadd.f32 %v5714_v20, %v887_v60  ;;  %v5203_v60 = vld [vmem:[%s8963_s4 + $0x220] sm:$0xff]  ;;  %v1304_v24 = vrot.slane %v6225_v9, 1  ;;  %v6250_v51 = vsel %vm735_vm2, %v974_v43, 0.0  ;;  %1738 = vmatpush.msrb.mxu2 %v5154_v0 }
  0x50   : > { %5137 = vmatmul.msk.f32.gmra.mxu1 %vm676_vm0, %v5977_v29  ;;  %9186 = vst [vmem:[#allocation37_spill] sm:$0xff] %v6218_v6  ;;  %2071 = vmatpush.msrb.mxu0 %v5203_v60  ;;  %v1264_v43 = vrot.slane %v6250_v51, 1  ;;  %v832_v60 = vld [vmem:[%s5684_s24 + $0x150] sm:$0xff] }
  0x51   : > { %9187 = vst [vmem:[#allocation38_spill] sm:$0xff] %v6225_v9  ;;  %v807_v9 = vld [vmem:[%s5684_s24 + $0x88] sm:$0x3] }
  0x52   : > { %9188 = vst [vmem:[#allocation39_spill] sm:$0xff] %v6234_v1 }
  0x54   : > { %1449 = vmatmul.f32.gmra.mxu2 %v6071_v44  ;;  %v808_v44 = vld [vmem:[%s5684_s24 + $0x90] sm:$0xff] }
  0x55   : > { %1562 = vmatmul.f32.gmra.mxu3 %v5975_v28 }
  0x57   : > { %1401 = vmatmul.f32.gmra.mxu0 %v6088_v46 }
  0x58   : > { %1514 = vmatmul.f32.gmra.mxu1 %v5992_v38 }
  0x5c   : > { %1452 = vmatmul.f32.gmra.mxu2 %v6120_v19  ;;  %v806_v19 = vld [vmem:[%s5684_s24 + $0x80] sm:$0xff] }
  0x5d   : > { %5146 = vmatmul.msk.f32.gmra.mxu3 %vm676_vm0, %v6060_v30  ;;  %v831_v30 = vld [vmem:[%s5684_s24 + $0x148] sm:$0x3]  ;;  %v864_v14 = vmul.f32 %v5706_v18, %v806_v19 }
  0x5e   : > { %v889_v50 = vmul.f32 %v5706_v18, %v831_v30  ;;  %v865_v30 = vmul.f32 %v5706_v18, %v807_v9  ;;  %v5153_v9 = vld [vmem:[%s8963_s4 + $0x110] sm:$0xff] }
  0x5f   : > { %1404 = vmatmul.f32.gmra.mxu0 %v6136_v52  ;;  %1739 = vmatpush.msrb.mxu2 %v5153_v9 }
  0x60   : > { %5138 = vmatmul.msk.f32.gmra.mxu1 %vm676_vm0, %v6075_v48 }
  0x64   : > { %1455 = vmatmul.f32.gmra.mxu2 %v6169_v41  ;;  %v805_v41 = vld [vmem:[%s5684_s24 + $0x78] sm:$0xff] }
  0x65   : > { %1568 = vmatmul.f32.gmra.mxu3 %v6073_v45  ;;  %v863_v10 = vmul.f32 %v5706_v18, %v805_v41  ;;  %v5170_v41 = vld [vmem:[%s8963_s4 + $0x198] sm:$0xff]  ;;  %v6256_v45 = vmax.f32 %v945_v32, 0.0 }
  0x66   : > { %1900 = vmatpush.msrb.mxu3 %v5170_v41  ;;  %v947_v41 = vadd.f32 %v5714_v20, %v889_v50  ;;  %v5169_v50 = vld [vmem:[%s8963_s4 + $0x190] sm:$0xff] }
  0x67   : > { %1407 = vmatmul.f32.gmra.mxu0 %v6186_v2  ;;  %v921_v19 = vadd.f32 %v5714_v20, %v863_v10  ;;  %9189 = vst [vmem:[#allocation40_spill] sm:$0xff] %v6256_v45  ;;  %v6267_v10 = vsel %vm1240_vm1, %v1302_v35, %v1304_v24  ;;  %v6284_v35 = vsel %vm1240_vm1, %v1262_v5, %v1264_v43 }
  0x68   : > { %1520 = vmatmul.f32.gmra.mxu1 %v6090_v53  ;;  %9190 = vst [vmem:[#allocation41_spill] sm:$0xff] %v6267_v10  ;;  %v923_v43 = vadd.f32 %v5714_v20, %v865_v30  ;;  %1901 = vmatpush.msrb.mxu3 %v5169_v50 }
  0x69   : > { %v6271_v0 = vmax.f32 %v921_v19, 0.0  ;;  %9194 = vst [vmem:[#allocation45_spill] sm:$0xff] %v6284_v35 }
  0x6a   : > { %v977_v3 = vmax.f32 %v923_v43, 0.0 }
  0x6b   : > { %9192 = vst [vmem:[#allocation43_spill] sm:$0xff] %v6271_v0  ;;  %v6302_v5 = vsel %vm676_vm0, %v6271_v0, 0.0 }
  0x6c   : > { %1458 = vmatmul.f32.gmra.mxu2 %v6218_v6  ;;  %v946_v6 = vadd.f32 %v5714_v20, %v888_v61  ;;  %v922_v61 = vadd.f32 %v5714_v20, %v864_v14  ;;  %v5202_v14 = vld [vmem:[%s8963_s4 + $0x218] sm:$0xff]  ;;  %v1266_v30 = vrot.slane %v6302_v5, 1 }
  0x6d   : > { %5147 = vmatmul.msk.f32.gmra.mxu3 %vm676_vm0, %v6158_v13  ;;  %v5219_v13 = vld [vmem:[%s8963_s4 + $0x2a0] sm:$0xff]  ;;  %2072 = vmatpush.msrb.mxu0 %v5202_v14 }
  0x6e   : > { %2240 = vmatpush.msrb.mxu1 %v5219_v13  ;;  %v6269_v32 = vmax.f32 %v946_v6, 0.0  ;;  %v6277_v13 = vsel %vm676_vm0, %v6256_v45, 0.0  ;;  %v6286_v6 = vmax.f32 %v922_v61, 0.0  ;;  %v5218_v61 = vld [vmem:[%s8963_s4 + $0x298] sm:$0xff] }
  0x6f   : > { %1410 = vmatmul.f32.gmra.mxu0 %v6234_v1  ;;  %9193 = vst [vmem:[#allocation44_spill] sm:$0xff] %v6277_v13  ;;  %v1306_v24 = vrot.slane %v6277_v13, 1  ;;  %v890_v13 = vmul.f32 %v5706_v18, %v832_v60  ;;  %v866_v60 = vmul.f32 %v5706_v18, %v808_v44  ;;  %v5152_v44 = vld [vmem:[%s8963_s4 + $0x108] sm:$0xff] }
  0x70   : > { %5139 = vmatmul.msk.f32.gmra.mxu1 %vm676_vm0, %v6173_v59  ;;  %9191 = vst [vmem:[#allocation42_spill] sm:$0xff] %v6269_v32  ;;  %v1307_v19 = vrot.slane %v6269_v32, 1  ;;  %v1267_v9 = vrot.slane %v6286_v6, 1  ;;  %1740 = vmatpush.msrb.mxu2 %v5152_v44 }
  0x71   : > { %9195 = vst [vmem:[#allocation46_spill] sm:$0xff] %v6286_v6  ;;  %2241 = vmatpush.msrb.mxu1 %v5218_v61  ;;  %v948_v61 = vadd.f32 %v5714_v20, %v890_v13  ;;  %v5201_v13 = vld [vmem:[%s8963_s4 + $0x210] sm:$0xff] }
  0x72   : > { %v6316_v50 = vsel %vm1240_vm1, %v1306_v24, %v1307_v19  ;;  %v867_v24 = vmul.f32 %v5706_v18, %v809_v58  ;;  %v924_v58 = vadd.f32 %v5714_v20, %v866_v60  ;;  %2073 = vmatpush.msrb.mxu0 %v5201_v13  ;;  %v835_v13 = vld [vmem:[%s5684_s24 + $0x168] sm:$0xff] }
  0x73   : > { %9196 = vst [vmem:[#allocation47_spill] sm:$0xff] %v6316_v50  ;;  %v6354_v28 = vmax.f32 %v948_v61, 0.0 }
  0x74   : > { %1461 = vmatmul.f32.gmra.mxu2 %v6267_v10  ;;  %v1001_v10 = vmax.f32 %v947_v41, 0.0  ;;  %v6369_v44 = vmax.f32 %v924_v58, 0.0 }
  0x75   : > { %1574 = vmatmul.f32.gmra.mxu3 %v6171_v49  ;;  %v833_v49 = vld [vmem:[%s5684_s24 + $0x158] sm:$0xff]  ;;  %9199 = vst [vmem:[#allocation50_spill] sm:$0xff] %v6354_v28 }
  0x76   : > { %v891_v41 = vmul.f32 %v5706_v18, %v833_v49  ;;  %v6323_v14 = vsel %vm735_vm2, %v1001_v10, 0.0  ;;  %v6332_v49 = vsel %vm1240_vm1, %v1266_v30, %v1267_v9  ;;  %v5168_v10 = vld [vmem:[%s8963_s4 + $0x188] sm:$0xff]  ;;  %v6348_v30 = vsel %vm735_vm2, %v977_v3, 0.0  ;;  %9202 = vst [vmem:[#allocation53_spill] sm:$0xff] %v6369_v44 }
  0x77   : > { %1413 = vmatmul.f32.gmra.mxu0 %v6284_v35  ;;  %9197 = vst [vmem:[#allocation48_spill] sm:$0xff] %v6323_v14  ;;  %v1309_v43 = vrot.slane %v6323_v14, 1  ;;  %1902 = vmatpush.msrb.mxu3 %v5168_v10  ;;  %v810_v14 = vld [vmem:[%s5684_s24 + $0xa0] sm:$0x3]  ;;  %v1269_v3 = vrot.slane %v6348_v30, 1  ;;  %v950_v10 = vadd.f32 %v5714_v20, %v892_v31 }
  0x78   : > { %1526 = vmatmul.f32.gmra.mxu1 %v6188_v54  ;;  %9198 = vst [vmem:[#allocation49_spill] sm:$0xff] %v6332_v49  ;;  %v868_v15 = vmul.f32 %v5706_v18, %v810_v14  ;;  %v5151_v14 = vld [vmem:[%s8963_s4 + $0x100] sm:$0xff] }
  0x79   : > { %v6365_v60 = vsel %vm1240_vm1, %v1307_v19, %v1309_v43  ;;  %v6382_v19 = vsel %vm1240_vm1, %v1267_v9, %v1269_v3  ;;  %v5167_v31 = vld [vmem:[%s8963_s4 + $0x180] sm:$0xff]  ;;  %v6400_v9 = vsel %vm676_vm0, %v6369_v44, 0.0  ;;  %1741 = vmatpush.msrb.mxu2 %v5151_v14 }
  0x7a   : > { %9200 = vst [vmem:[#allocation51_spill] sm:$0xff] %v6365_v60  ;;  %v926_v3 = vadd.f32 %v5714_v20, %v868_v15  ;;  %1903 = vmatpush.msrb.mxu3 %v5167_v31  ;;  %v1271_v15 = vrot.slane %v6400_v9, 1 }
  0x7b   : > { %9204 = vst [vmem:[#allocation55_spill] sm:$0xff] %v6382_v19 }
  0x7c   : > { %1464 = vmatmul.f32.gmra.mxu2 %v6316_v50  ;;  %v949_v50 = vadd.f32 %v5714_v20, %v891_v41  ;;  %v925_v41 = vadd.f32 %v5714_v20, %v867_v24  ;;  %v5200_v24 = vld [vmem:[%s8963_s4 + $0x208] sm:$0xff]  ;;  %v980_v63 = vmax.f32 %v926_v3, 0.0 }
  0x7d   : > { %5148 = vmatmul.msk.f32.gmra.mxu3 %vm676_vm0, %v6256_v45  ;;  %v5217_v45 = vld [vmem:[%s8963_s4 + $0x290] sm:$0xff]  ;;  %2074 = vmatpush.msrb.mxu0 %v5200_v24 }
  0x7e   : > { %2242 = vmatpush.msrb.mxu1 %v5217_v45  ;;  %v6367_v61 = vmax.f32 %v949_v50, 0.0  ;;  %v6375_v45 = vsel %vm676_vm0, %v6354_v28, 0.0  ;;  %v6384_v50 = vmax.f32 %v925_v41, 0.0  ;;  %v5216_v41 = vld [vmem:[%s8963_s4 + $0x288] sm:$0xff] }
  0x7f   : > { %1416 = vmatmul.f32.gmra.mxu0 %v6332_v49  ;;  %9203 = vst [vmem:[#allocation54_spill] sm:$0xff] %v6375_v45  ;;  %v1311_v43 = vrot.slane %v6375_v45, 1  ;;  %v893_v45 = vmul.f32 %v5706_v18, %v835_v13  ;;  %v869_v13 = vmul.f32 %v5706_v18, %v811_v27  ;;  %v5246_v27 = vld [vmem:[%s8963_s4 + $0x378] sm:$0xff] }
  0x80   : > { %5140 = vmatmul.msk.f32.gmra.mxu1 %vm676_vm0, %v6271_v0  ;;  %9201 = vst [vmem:[#allocation52_spill] sm:$0xff] %v6367_v61  ;;  %v1312_v58 = vrot.slane %v6367_v61, 1  ;;  %v1272_v14 = vrot.slane %v6384_v50, 1  ;;  %2391 = vmatpush.msra.mxu2 %v5246_v27  ;;  %v5539_v27 = vld [vmem:[%s8961_s2] ss:$0 sm:$0xff] }
  0x81   : > { %9205 = vst [vmem:[#allocation56_spill] sm:$0xff] %v6384_v50  ;;  %2243 = vmatpush.msrb.mxu1 %v5216_v41  ;;  %v951_v41 = vadd.f32 %v5714_v20, %v893_v45  ;;  %v5277_v45 = vld [vmem:[%s8963_s4 + $0x3f8] sm:$0xff] }
  0x82   : > { %v6414_v31 = vsel %vm1240_vm1, %v1311_v43, %v1312_v58  ;;  %v870_v43 = vmul.f32 %v5706_v18, %v812_v57  ;;  %v927_v57 = vadd.f32 %v5714_v20, %v869_v13  ;;  %2563 = vmatpush.msra.mxu3 %v5277_v45  ;;  %v5215_v13 = vld [vmem:[%s8963_s4 + $0x280] sm:$0xff] }
  0x83   : > { %9206 = vst [vmem:[#allocation57_spill] sm:$0xff] %v6414_v31  ;;  %2244 = vmatpush.msrb.mxu1 %v5215_v13 }
  0x84   : > { %1467 = vmatmul.f32.gmra.mxu2 %v6365_v60  ;;  %v1004_v60 = vmax.f32 %v950_v10, 0.0  ;;  %v6467_v11 = vmax.f32 %v927_v57, 0.0 }
  0x85   : > { %1580 = vmatmul.f32.gmra.mxu3 %v6269_v32  ;;  %v836_v32 = vld [vmem:[%s5684_s24 + $0x170] sm:$0xff]  ;;  %s8814_s24 = scalar_lea.vmem %s8969_s10, %s5474_s19 }
  0x86   : > { %v894_v10 = vmul.f32 %v5706_v18, %v836_v32  ;;  %v6421_v24 = vsel %vm735_vm2, %v1004_v60, 0.0  ;;  %v6430_v32 = vsel %vm1240_vm1, %v1271_v15, %v1272_v14  ;;  %v5199_v60 = vld [vmem:[%s8963_s4 + $0x200] sm:$0xff]  ;;  %v6446_v15 = vsel %vm735_vm2, %v980_v63, 0.0  ;;  %9210 = vst [vmem:[#allocation61_spill] sm:$0xff] %v6467_v11 }
  0x87   : > { %1419 = vmatmul.f32.gmra.mxu0 %v6382_v19  ;;  %9207 = vst [vmem:[#allocation58_spill] sm:$0xff] %v6430_v32  ;;  %v1314_v3 = vrot.slane %v6421_v24, 1  ;;  %v928_v63 = vadd.f32 %v5714_v20, %v870_v43 }
  0x88   : > { %1532 = vmatmul.f32.gmra.mxu1 %v6286_v6  ;;  %2075 = vmatpush.msrb.mxu0 %v5199_v60  ;;  %v871_v60 = vmul.f32 %v5539_v27, %v813_v26  ;;  %v5293_v26 = vld [vmem:[%s8963_s4 + $0x478] sm:$0xff] }
  0x89   : > { %v6485_v45 = vmax.f32 %v928_v63, 0.0  ;;  %v3170_v63 = vld [vmem:[%s8968_s9 + $0x78] sm:$0xff] }
  0x8a   : > { %2732 = vmatpush.msra.mxu0 %v5293_v26  ;;  %3171 = vmatpush.msra.mxu1 %v3170_v63  ;;  %v5276_v26 = vld [vmem:[%s8963_s4 + $0x3f0] sm:$0xff] }
  0x8b   : > { %9213 = vst [vmem:[#allocation64_spill] sm:$0xff] %v6485_v45  ;;  %2564 = vmatpush.msra.mxu3 %v5276_v26  ;;  %v5292_v63 = vld [vmem:[%s8963_s4 + $0x470] sm:$0xff] }
  0x8c   : > { %1470 = vmatmul.f32.gmra.mxu2 %v6414_v31  ;;  %v952_v31 = vadd.f32 %v5714_v20, %v894_v10  ;;  %v1274_v10 = vrot.slane %v6446_v15, 1  ;;  %2733 = vmatpush.msra.mxu0 %v5292_v63  ;;  %v5244_v63 = vld [vmem:[%s8963_s4 + $0x368] sm:$0xff] }
  0x8d   : > { %5149 = vmatmul.msk.f32.gmra.mxu3 %vm676_vm0, %v6354_v28  ;;  %v6449_v28 = vmax.f32 %v951_v41, 0.0  ;;  %v6463_v41 = vsel %vm1240_vm1, %v1312_v58, %v1314_v3  ;;  %v5540_v58 = vld [vmem:[%s8962_s3] ss:$0 sm:$0xff] }
  0x8e   : > { %9209 = vst [vmem:[#allocation60_spill] sm:$0xff] %v6463_v41  ;;  %v6465_v18 = vmax.f32 %v952_v31, 0.0  ;;  %v953_v43 = vadd.f32 %v5540_v58, %v895_v22  ;;  %v6483_v31 = vsel %vm1240_vm1, %v1272_v14, %v1274_v10  ;;  %v6495_v22 = vsel %vm676_vm0, %v6467_v11, 0.0 }
  0x8f   : > { %9208 = vst [vmem:[#allocation59_spill] sm:$0xff] %v6449_v28  ;;  %1422 = vmatmul.f32.gmra.mxu0 %v6430_v32  ;;  %v6475_v20 = vsel %vm676_vm0, %v6449_v28, 0.0  ;;  %v929_v13 = vadd.f32 %v5540_v58, %v871_v60  ;;  %v1276_v14 = vrot.slane %v6495_v22, 1  ;;  %v1277_v10 = vrot.slane %v6485_v45, 1 }
  0x90   : > { %5141 = vmatmul.msk.f32.gmra.mxu1 %vm676_vm0, %v6369_v44  ;;  %9211 = vst [vmem:[#allocation62_spill] sm:$0xff] %v6475_v20  ;;  %v1316_v3 = vrot.slane %v6475_v20, 1  ;;  %v1317_v57 = vrot.slane %v6465_v18, 1  ;;  %v1007_v27 = vmax.f32 %v953_v43, 0.0  ;;  %v5245_v43 = vld [vmem:[%s8963_s4 + $0x370] sm:$0xff] }
  0x91   : > { %9212 = vst [vmem:[#allocation63_spill] sm:$0xff] %v6483_v31  ;;  %v6516_v58 = vsel %vm1240_vm1, %v1276_v14, %v1277_v10  ;;  %2392 = vmatpush.msra.mxu2 %v5245_v43  ;;  %v9219_v43 = vmov 0.0  }
  0x92   : > { %v6505_v20 = vsel %vm1240_vm1, %v1316_v3, %v1317_v57  ;;  %v6509_v60 = vsel %vm735_vm2, %v1007_v27, 0.0  ;;  %9216 = vst [vmem:[#allocation67_spill] sm:$0xff] %v6516_v58  ;;  %v6547_v26 = vrot.slane %v9219_v43, 2 }
  0x93   : > { %9214 = vst [vmem:[#allocation65_spill] sm:$0xff] %v6505_v20  ;;  %v1319_v3 = vrot.slane %v6509_v60, 1  ;;  %2393 = vmatpush.msra.mxu2 %v5244_v63 }
  0x94   : > { %1473 = vmatmul.f32.gmra.mxu2 %v6463_v41  ;;  %v983_v41 = vmax.f32 %v929_v13, 0.0  ;;  %9215 = vst [vmem:[#allocation66_spill] sm:$0xff] %v6509_v60  ;;  %v1605_v60 = vrot.slane %v5956_v12, 2 }
  0x95   : > { %1586 = vmatmul.f32.gmra.mxu3 %v6367_v61  ;;  %v6535_v14 = vsel %vm1240_vm1, %v1317_v57, %v1319_v3  ;;  %9220 = vst [vmem:[#allocation70_spill] sm:$0xff] %v6547_v26  ;;  %v3169_v57 = vld [vmem:[%s8968_s9 + $0x70] sm:$0xff]  ;;  %v1602_v3 = vrot.slane %v5892_v39, 2  ;;  %v5275_v39 = vld [vmem:[%s8963_s4 + $0x3e8] sm:$0xff] }
  0x96   : > { %v6527_v13 = vsel %vm735_vm2, %v983_v41, 0.0  ;;  %9217 = vst [vmem:[#allocation68_spill] sm:$0xff] %v6535_v14  ;;  %3172 = vmatpush.msra.mxu1 %v3169_v57  ;;  %2565 = vmatpush.msra.mxu3 %v5275_v39 }
  0x97   : > { %1425 = vmatmul.f32.gmra.mxu0 %v6483_v31  ;;  %v1279_v27 = vrot.slane %v6527_v13, 1 }
  0x98   : > { %1538 = vmatmul.f32.gmra.mxu1 %v6384_v50 }
  0x99   : > { %v6540_v41 = vsel %vm1240_vm1, %v1277_v10, %v1279_v27  ;;  %v1603_v10 = vrot.slane %v5882_v34, 2 }
  0x9a   : > { %9218 = vst [vmem:[#allocation69_spill] sm:$0xff] %v6540_v41 }
  0x9b   : > { %v1604_v57 = vsel %vm1596_vm3, %v1602_v3, %v1603_v10  ;;  %v5291_v3 = vld [vmem:[%s8963_s4 + $0x468] sm:$0xff]  ;;  %v1606_v39 = vsel %vm1596_vm3, %v1603_v10, %v1605_v60  ;;  %v5274_v10 = vld [vmem:[%s8963_s4 + $0x3e0] sm:$0xff] }
  0x9c   : > { %1476 = vmatmul.f32.gmra.mxu2 %v6505_v20  ;;  %2734 = vmatpush.msra.mxu0 %v5291_v3 }
  0x9d   : > { %5150 = vmatmul.msk.f32.gmra.mxu3 %vm676_vm0, %v6449_v28 }
  0x9e   : > { %2566 = vmatpush.msra.mxu3 %v5274_v10 }
  0x9f   : > { %1428 = vmatmul.f32.gmra.mxu0 %v6516_v58 }
  0xa0   : > { %5142 = vmatmul.msk.f32.gmra.mxu1 %vm676_vm0, %v6467_v11 }
  0xa4   : > { %1479 = vmatmul.f32.gmra.mxu2 %v6535_v14 }
  0xa5   : > { %1592 = vmatmul.f32.gmra.mxu3 %v6465_v18 }
  0xa7   : > { %1431 = vmatmul.f32.gmra.mxu0 %v6540_v41 }
  0xa8   : > { %1544 = vmatmul.f32.gmra.mxu1 %v6485_v45 }
  0xac   : > { %1742 = vmatmul.f32.vlgmr.msrb.gmra.mxu2 %v6547_v26  ;;  %v6559_v27 = vpop.f32.mrf.mxu0 }
  0xad   : > { %5183 = vmatmul.msk.f32.vlgmr.msrb.gmra.mxu3 %vm676_vm0, %v5858_v23  ;;  %v6567_v43 = vpop.f32.mrf.mxu1 }
  0xaf   : > { %v1435_v42 = vpop.f32.mrf.mxu2  ;;  %2076 = vmatmul.f32.vlgmr.msrb.gmra.mxu0 %v5940_v4 }
  0xb0   : > { %v1548_v14 = vpop.f32.mrf.mxu3  ;;  %2245 = vmatmul.f32.vlgmr.msrb.gmra.mxu1 %v1604_v57 }
  0xb1   : > { %v6571_v23 = vadd.f32 %v1548_v14, %v1435_v42  ;;  %v1607_v14 = vrot.slane %v6008_v47, 2 }
  0xb4   : > { %1745 = vmatmul.f32.gmra.mxu2 %v6547_v26  ;;  %v6576_v20 = vpop.f32.mrf.mxu0  ;;  %v1608_v26 = vrot.slane %v5992_v38, 2 }
  0xb5   : > { %1907 = vmatmul.f32.gmra.mxu3 %v5882_v34  ;;  %v6581_v63 = vpop.f32.mrf.mxu1  ;;  %v3168_v34 = vld [vmem:[%s8968_s9 + $0x68] sm:$0xff] }
  0xb6   : > { %3173 = vmatpush.msra.mxu1 %v3168_v34  ;;  %v6606_v47 = vsel %vm1596_vm3, %v1607_v14, %v1608_v26  ;;  %v1610_v34 = vrot.slane %v6054_v17, 2  ;;  %v5290_v14 = vld [vmem:[%s8963_s4 + $0x460] sm:$0xff] }
  0xb7   : > { %v1438_v42 = vpop.f32.mrf.mxu2  ;;  %2079 = vmatmul.f32.gmra.mxu0 %v5990_v36  ;;  %v5243_v36 = vld [vmem:[%s8963_s4 + $0x360] sm:$0xff] }
  0xb8   : > { %v1551_v4 = vpop.f32.mrf.mxu3  ;;  %2248 = vmatmul.f32.gmra.mxu1 %v1606_v39  ;;  %2394 = vmatpush.msra.mxu2 %v5243_v36  ;;  %v6622_v10 = vsel %vm1596_vm3, %v1608_v26, %v1610_v34  ;;  %v5242_v34 = vld [vmem:[%s8963_s4 + $0x358] sm:$0xff] }
  0xb9   : > { %v6585_v12 = vadd.f32 %v1551_v4, %v1438_v42  ;;  %2735 = vmatpush.msra.mxu0 %v5290_v14  ;;  %v5273_v14 = vld [vmem:[%s8963_s4 + $0x3d8] sm:$0xff] }
  0xba   : > { %2395 = vmatpush.msra.mxu2 %v5242_v34  ;;  %2567 = vmatpush.msra.mxu3 %v5273_v14 }
  0xbb   : > { %9221 = vst [vmem:[#allocation71_spill] sm:$0xff] %v6585_v12 }
  0xbc   : > { %1748 = vmatmul.f32.gmra.mxu2 %v1604_v57  ;;  %v6595_v60 = vpop.f32.mrf.mxu0 }
  0xbd   : > { %5184 = vmatmul.msk.f32.gmra.mxu3 %vm676_vm0, %v5977_v29  ;;  %v6603_v3 = vpop.f32.mrf.mxu1 }
  0xbf   : > { %v1441_v57 = vpop.f32.mrf.mxu2  ;;  %2082 = vmatmul.f32.gmra.mxu0 %v6038_v7 }
  0xc0   : > { %v1554_v42 = vpop.f32.mrf.mxu3  ;;  %2251 = vmatmul.f32.gmra.mxu1 %v6606_v47 }
  0xc1   : > { %v6609_v4 = vadd.f32 %v1554_v42, %v1441_v57 }
  0xc3   : > { %9222 = vst [vmem:[#allocation72_spill] sm:$0xff] %v6609_v4  ;;  %v1612_v4 = vrot.slane %v6106_v55, 2 }
  0xc4   : > { %1751 = vmatmul.f32.gmra.mxu2 %v1606_v39  ;;  %v6614_v12 = vpop.f32.mrf.mxu0  ;;  %v3167_v39 = vld [vmem:[%s8968_s9 + $0x60] sm:$0xff] }
  0xc5   : > { %1913 = vmatmul.f32.gmra.mxu3 %v5992_v38  ;;  %v6619_v36 = vpop.f32.mrf.mxu1  ;;  %v1613_v38 = vrot.slane %v6090_v53, 2  ;;  %3174 = vmatpush.msra.mxu1 %v3167_v39 }
  0xc7   : > { %v1444_v57 = vpop.f32.mrf.mxu2  ;;  %2085 = vmatmul.f32.gmra.mxu0 %v6088_v46 }
  0xc8   : > { %v1557_v42 = vpop.f32.mrf.mxu3  ;;  %2254 = vmatmul.f32.gmra.mxu1 %v6622_v10 }
  0xc9   : > { %v6625_v17 = vadd.f32 %v1557_v42, %v1444_v57  ;;  %v6648_v57 = vsel %vm1596_vm3, %v1612_v4, %v1613_v38  ;;  %v5289_v4 = vld [vmem:[%s8963_s4 + $0x458] sm:$0xff] }
  0xca   : > { %2736 = vmatpush.msra.mxu0 %v5289_v4  ;;  %v5272_v4 = vld [vmem:[%s8963_s4 + $0x3d0] sm:$0xff] }
  0xcb   : > { %9223 = vst [vmem:[#allocation73_spill] sm:$0xff] %v6625_v17  ;;  %2568 = vmatpush.msra.mxu3 %v5272_v4 }
  0xcc   : > { %1754 = vmatmul.f32.gmra.mxu2 %v6606_v47  ;;  %v6637_v26 = vpop.f32.mrf.mxu0 }
  0xcd   : > { %5185 = vmatmul.msk.f32.gmra.mxu3 %vm676_vm0, %v6075_v48  ;;  %v6645_v55 = vpop.f32.mrf.mxu1  ;;  %v1615_v48 = vrot.slane %v6152_v8, 2 }
  0xcf   : > { %v1447_v42 = vpop.f32.mrf.mxu2  ;;  %2088 = vmatmul.f32.gmra.mxu0 %v6136_v52  ;;  %v6665_v14 = vsel %vm1596_vm3, %v1613_v38, %v1615_v48  ;;  %v1618_v52 = vrot.slane %v6188_v54, 2  ;;  %v5241_v48 = vld [vmem:[%s8963_s4 + $0x350] sm:$0xff] }
  0xd0   : > { %v1560_v39 = vpop.f32.mrf.mxu3  ;;  %2257 = vmatmul.f32.gmra.mxu1 %v6648_v57  ;;  %2396 = vmatpush.msra.mxu2 %v5241_v48 }
  0xd1   : > { %v6651_v17 = vadd.f32 %v1560_v39, %v1447_v42 }
  0xd3   : > { %9224 = vst [vmem:[#allocation74_spill] sm:$0xff] %v6651_v17  ;;  %v3166_v17 = vld [vmem:[%s8968_s9 + $0x58] sm:$0xff] }
  0xd4   : > { %1757 = vmatmul.f32.gmra.mxu2 %v6622_v10  ;;  %v6657_v46 = vpop.f32.mrf.mxu0  ;;  %3175 = vmatpush.msra.mxu1 %v3166_v17 }
  0xd5   : > { %1919 = vmatmul.f32.gmra.mxu3 %v6090_v53  ;;  %v6662_v34 = vpop.f32.mrf.mxu1  ;;  %v1617_v53 = vrot.slane %v6204_v16, 2 }
  0xd7   : > { %v1450_v42 = vpop.f32.mrf.mxu2  ;;  %2091 = vmatmul.f32.gmra.mxu0 %v6186_v2  ;;  %v6691_v17 = vsel %vm1596_vm3, %v1617_v53, %v1618_v52  ;;  %v5288_v53 = vld [vmem:[%s8963_s4 + $0x450] sm:$0xff] }
  0xd8   : > { %v1563_v39 = vpop.f32.mrf.mxu3  ;;  %2260 = vmatmul.f32.gmra.mxu1 %v6665_v14  ;;  %2737 = vmatpush.msra.mxu0 %v5288_v53  ;;  %v5271_v53 = vld [vmem:[%s8963_s4 + $0x3c8] sm:$0xff] }
  0xd9   : > { %v6668_v8 = vadd.f32 %v1563_v39, %v1450_v42  ;;  %2569 = vmatpush.msra.mxu3 %v5271_v53 }
  0xdb   : > { %9225 = vst [vmem:[#allocation75_spill] sm:$0xff] %v6668_v8 }
  0xdc   : > { %1760 = vmatmul.f32.gmra.mxu2 %v6648_v57  ;;  %v6680_v38 = vpop.f32.mrf.mxu0 }
  0xdd   : > { %5186 = vmatmul.msk.f32.gmra.mxu3 %vm676_vm0, %v6173_v59  ;;  %v6688_v16 = vpop.f32.mrf.mxu1  ;;  %v1620_v59 = vrot.slane %v6250_v51, 2 }
  0xdf   : > { %v1453_v42 = vpop.f32.mrf.mxu2  ;;  %2094 = vmatmul.f32.gmra.mxu0 %v6234_v1  ;;  %v6708_v4 = vsel %vm1596_vm3, %v1618_v52, %v1620_v59  ;;  %v1623_v1 = vrot.slane %v6286_v6, 2  ;;  %v5240_v59 = vld [vmem:[%s8963_s4 + $0x348] sm:$0xff] }
  0xe0   : > { %v1566_v39 = vpop.f32.mrf.mxu3  ;;  %2263 = vmatmul.f32.gmra.mxu1 %v6691_v17  ;;  %2397 = vmatpush.msra.mxu2 %v5240_v59 }
  0xe1   : > { %v6694_v8 = vadd.f32 %v1566_v39, %v1453_v42 }
  0xe3   : > { %9226 = vst [vmem:[#allocation76_spill] sm:$0xff] %v6694_v8  ;;  %v3165_v8 = vld [vmem:[%s8968_s9 + $0x50] sm:$0xff] }
  0xe4   : > { %1763 = vmatmul.f32.gmra.mxu2 %v6665_v14  ;;  %v6700_v2 = vpop.f32.mrf.mxu0  ;;  %3176 = vmatpush.msra.mxu1 %v3165_v8 }
  0xe5   : > { %1925 = vmatmul.f32.gmra.mxu3 %v6188_v54  ;;  %v6705_v48 = vpop.f32.mrf.mxu1  ;;  %v1622_v54 = vrot.slane %v6302_v5, 2 }
  0xe7   : > { %v1456_v42 = vpop.f32.mrf.mxu2  ;;  %2097 = vmatmul.f32.gmra.mxu0 %v6284_v35  ;;  %v6734_v8 = vsel %vm1596_vm3, %v1622_v54, %v1623_v1  ;;  %v5287_v54 = vld [vmem:[%s8963_s4 + $0x448] sm:$0xff] }
  0xe8   : > { %v1569_v39 = vpop.f32.mrf.mxu3  ;;  %2266 = vmatmul.f32.gmra.mxu1 %v6708_v4  ;;  %2738 = vmatpush.msra.mxu0 %v5287_v54  ;;  %v5270_v54 = vld [vmem:[%s8963_s4 + $0x3c0] sm:$0xff] }
  0xe9   : > { %v6711_v51 = vadd.f32 %v1569_v39, %v1456_v42  ;;  %2570 = vmatpush.msra.mxu3 %v5270_v54 }
  0xeb   : > { %9227 = vst [vmem:[#allocation77_spill] sm:$0xff] %v6711_v51 }
  0xec   : > { %1766 = vmatmul.f32.gmra.mxu2 %v6691_v17  ;;  %v6723_v52 = vpop.f32.mrf.mxu0 }
  0xed   : > { %5187 = vmatmul.msk.f32.gmra.mxu3 %vm676_vm0, %v6271_v0  ;;  %v6731_v5 = vpop.f32.mrf.mxu1  ;;  %v1625_v0 = vrot.slane %v6348_v30, 2 }
  0xef   : > { %v1459_v42 = vpop.f32.mrf.mxu2  ;;  %2100 = vmatmul.f32.gmra.mxu0 %v6332_v49  ;;  %v6751_v53 = vsel %vm1596_vm3, %v1623_v1, %v1625_v0  ;;  %v1628_v49 = vrot.slane %v6384_v50, 2  ;;  %v5239_v0 = vld [vmem:[%s8963_s4 + $0x340] sm:$0xff] }
  0xf0   : > { %v1572_v39 = vpop.f32.mrf.mxu3  ;;  %2269 = vmatmul.f32.gmra.mxu1 %v6734_v8  ;;  %9229 = vst [vmem:[#allocation79_spill] sm:$0xff] %v6751_v53  ;;  %2398 = vmatpush.msra.mxu2 %v5239_v0 }
  0xf1   : > { %v6737_v51 = vadd.f32 %v1572_v39, %v1459_v42 }
  0xf3   : > { %9228 = vst [vmem:[#allocation78_spill] sm:$0xff] %v6737_v51  ;;  %v3164_v51 = vld [vmem:[%s8968_s9 + $0x48] sm:$0xff] }
  0xf4   : > { %1769 = vmatmul.f32.gmra.mxu2 %v6708_v4  ;;  %v6743_v35 = vpop.f32.mrf.mxu0  ;;  %3177 = vmatpush.msra.mxu1 %v3164_v51 }
  0xf5   : > { %1931 = vmatmul.f32.gmra.mxu3 %v6286_v6  ;;  %v6748_v59 = vpop.f32.mrf.mxu1  ;;  %v1627_v6 = vrot.slane %v6400_v9, 2 }
  0xf7   : > { %v1462_v42 = vpop.f32.mrf.mxu2  ;;  %2103 = vmatmul.f32.gmra.mxu0 %v6382_v19  ;;  %v6777_v51 = vsel %vm1596_vm3, %v1627_v6, %v1628_v49  ;;  %v5286_v6 = vld [vmem:[%s8963_s4 + $0x440] sm:$0xff] }
  0xf8   : > { %v1575_v39 = vpop.f32.mrf.mxu3  ;;  %2272 = vmatmul.f32.gmra.mxu1 %v6751_v53  ;;  %9231 = vst [vmem:[#allocation81_spill] sm:$0xff] %v6777_v51  ;;  %2739 = vmatpush.msra.mxu0 %v5286_v6  ;;  %v5269_v6 = vld [vmem:[%s8963_s4 + $0x3b8] sm:$0xff] }
  0xf9   : > { %v6754_v30 = vadd.f32 %v1575_v39, %v1462_v42  ;;  %2571 = vmatpush.msra.mxu3 %v5269_v6  ;;  %v5285_v6 = vld [vmem:[%s8963_s4 + $0x438] sm:$0xff] }
  0xfa   : > { %2740 = vmatpush.msra.mxu0 %v5285_v6  ;;  %v5237_v6 = vld [vmem:[%s8963_s4 + $0x330] sm:$0xff] }
  0xfb   : > { %9230 = vst [vmem:[#allocation80_spill] sm:$0xff] %v6754_v30 }
  0xfc   : > { %1772 = vmatmul.f32.gmra.mxu2 %v6734_v8  ;;  %v6766_v1 = vpop.f32.mrf.mxu0 }
  0xfd   : > { %5188 = vmatmul.msk.f32.gmra.mxu3 %vm676_vm0, %v6369_v44  ;;  %v6774_v9 = vpop.f32.mrf.mxu1  ;;  %v1630_v44 = vrot.slane %v6446_v15, 2 }
  0xff   : > { %v1465_v42 = vpop.f32.mrf.mxu2  ;;  %2106 = vmatmul.f32.gmra.mxu0 %v6430_v32  ;;  %v6794_v54 = vsel %vm1596_vm3, %v1628_v49, %v1630_v44  ;;  %v1633_v32 = vrot.slane %v6485_v45, 2  ;;  %v5238_v44 = vld [vmem:[%s8963_s4 + $0x338] sm:$0xff] }
 0x100   : > { %v1578_v39 = vpop.f32.mrf.mxu3  ;;  %2275 = vmatmul.f32.gmra.mxu1 %v6777_v51  ;;  %9233 = vst [vmem:[#allocation83_spill] sm:$0xff] %v6794_v54  ;;  %2399 = vmatpush.msra.mxu2 %v5238_v44 }
 0x101   : > { %v6780_v30 = vadd.f32 %v1578_v39, %v1465_v42 }
 0x102   : > { %2400 = vmatpush.msra.mxu2 %v5237_v6 }
 0x103   : > { %9232 = vst [vmem:[#allocation82_spill] sm:$0xff] %v6780_v30  ;;  %v3163_v30 = vld [vmem:[%s8968_s9 + $0x40] sm:$0xff] }
 0x104   : > { %1775 = vmatmul.f32.gmra.mxu2 %v6751_v53  ;;  %v6786_v19 = vpop.f32.mrf.mxu0  ;;  %3178 = vmatpush.msra.mxu1 %v3163_v30 }
 0x105   : > { %1937 = vmatmul.f32.gmra.mxu3 %v6384_v50  ;;  %v6791_v0 = vpop.f32.mrf.mxu1  ;;  %v1632_v50 = vrot.slane %v6495_v22, 2 }
 0x107   : > { %v1468_v42 = vpop.f32.mrf.mxu2  ;;  %2109 = vmatmul.f32.gmra.mxu0 %v6483_v31  ;;  %v6820_v30 = vsel %vm1596_vm3, %v1632_v50, %v1633_v32 }
 0x108   : > { %v1581_v39 = vpop.f32.mrf.mxu3  ;;  %2278 = vmatmul.f32.gmra.mxu1 %v6794_v54  ;;  %9235 = vst [vmem:[#allocation85_spill] sm:$0xff] %v6820_v30 }
 0x109   : > { %v6797_v15 = vadd.f32 %v1581_v39, %v1468_v42 }
 0x10b   : > { %9234 = vst [vmem:[#allocation84_spill] sm:$0xff] %v6797_v15 }
 0x10c   : > { %1778 = vmatmul.f32.gmra.mxu2 %v6777_v51  ;;  %v6809_v49 = vpop.f32.mrf.mxu0 }
 0x10d   : > { %5189 = vmatmul.msk.f32.gmra.mxu3 %vm676_vm0, %v6467_v11  ;;  %v6817_v22 = vpop.f32.mrf.mxu1  ;;  %v1635_v11 = vrot.slane %v6527_v13, 2 }
 0x10f   : > { %v1471_v42 = vpop.f32.mrf.mxu2  ;;  %2112 = vmatmul.f32.gmra.mxu0 %v6516_v58  ;;  %v6834_v44 = vsel %vm1596_vm3, %v1633_v32, %v1635_v11  ;;  %v1637_v32 = vrot.slane %v5762_v40, 2  ;;  %v1638_v11 = vrot.slane %v5751_v37, 2  ;;  %v5268_v40 = vld [vmem:[%s8963_s4 + $0x3b0] sm:$0xff] }
 0x110   : > { %v1584_v39 = vpop.f32.mrf.mxu3  ;;  %2281 = vmatmul.f32.gmra.mxu1 %v6820_v30  ;;  %9237 = vst [vmem:[#allocation87_spill] sm:$0xff] %v6834_v44  ;;  %2572 = vmatpush.msra.mxu3 %v5268_v40 }
 0x111   : > { %v6823_v15 = vadd.f32 %v1584_v39, %v1471_v42 }
 0x113   : > { %9236 = vst [vmem:[#allocation86_spill] sm:$0xff] %v6823_v15  ;;  %v3162_v15 = vld [vmem:[%s8968_s9 + $0x38] sm:$0xff] }
 0x114   : > { %1781 = vmatmul.f32.gmra.mxu2 %v6794_v54  ;;  %v6829_v31 = vpop.f32.mrf.mxu0  ;;  %3179 = vmatpush.msra.mxu1 %v3162_v15  ;;  %v9246_v54 = vld [vmem:[#allocation12_spill] sm:$0xff] }
 0x115   : > { %1943 = vmatmul.f32.gmra.mxu3 %v6485_v45  ;;  %v6831_v50 = vpop.f32.mrf.mxu1  ;;  %v1640_v45 = vrot.slane %v5807_v62, 2  ;;  %v1645_v51 = vrot.slane %v9246_v54, 2 }
 0x117   : > { %v1474_v42 = vpop.f32.mrf.mxu2  ;;  %2115 = vmatmul.f32.gmra.mxu0 %v6540_v41 }
 0x118   : > { %v1587_v39 = vpop.f32.mrf.mxu3  ;;  %2284 = vmatmul.f32.gmra.mxu1 %v6834_v44 }
 0x119   : > { %v6840_v13 = vadd.f32 %v1587_v39, %v1474_v42 }
 0x11b   : > { %9238 = vst [vmem:[#allocation88_spill] sm:$0xff] %v6840_v13  ;;  %v6860_v13 = vsel %vm1596_vm3, %v1637_v32, %v1638_v11 }
 0x11c   : > { %1784 = vmatmul.f32.gmra.mxu2 %v6820_v30  ;;  %v6852_v42 = vpop.f32.mrf.mxu0  ;;  %9239 = vst [vmem:[#allocation89_spill] sm:$0xff] %v6860_v13  ;;  %v6877_v30 = vsel %vm1596_vm3, %v1638_v11, %v1640_v45  ;;  %v9243_v11 = vld [vmem:[#allocation9_spill] sm:$0xff] }
 0x11d   : > { %5190 = vmatmul.msk.f32.gmra.mxu3 %vm676_vm0, %v5741_v33  ;;  %v6857_v39 = vpop.f32.mrf.mxu1 }
 0x11f   : > { %v1477_v15 = vpop.f32.mrf.mxu2  ;;  %2118 = vmatmul.f32.gmra.mxu0 %v5794_v56  ;;  %v1643_v56 = vrot.slane %v9243_v11, 2 }
 0x120   : > { %v1590_v41 = vpop.f32.mrf.mxu3  ;;  %2287 = vmatmul.f32.gmra.mxu1 %v6860_v13 }
 0x121   : > { %v6866_v33 = vadd.f32 %v1590_v41, %v1477_v15  ;;  %v5284_v41 = vld [vmem:[%s8963_s4 + $0x430] sm:$0xff] }
 0x122   : > { %2741 = vmatpush.msra.mxu0 %v5284_v41  ;;  %v5236_v41 = vld [vmem:[%s8963_s4 + $0x328] sm:$0xff] }
 0x123   : > { %9240 = vst [vmem:[#allocation90_spill] sm:$0xff] %v6866_v33  ;;  %v3161_v33 = vld [vmem:[%s8968_s9 + $0x30] sm:$0xff]  ;;  %2401 = vmatpush.msra.mxu2 %v5236_v41  ;;  %v6912_v41 = vsel %vm1596_vm3, %v1643_v56, %v1645_v51 }
 0x124   : > { %1787 = vmatmul.f32.gmra.mxu2 %v6834_v44  ;;  %v6872_v32 = vpop.f32.mrf.mxu0  ;;  %3180 = vmatpush.msra.mxu1 %v3161_v33  ;;  %v9244_v44 = vld [vmem:[#allocation7_spill] sm:$0xff]  ;;  %v9249_v51 = vld [vmem:[#allocation16_spill] sm:$0xff] }
 0x125   : > { %1949 = vmatmul.f32.gmra.mxu3 %v5751_v37  ;;  %v6874_v6 = vpop.f32.mrf.mxu1  ;;  %v9242_v37 = vld [vmem:[#allocation10_spill] sm:$0xff]  ;;  %v5267_v33 = vld [vmem:[%s8963_s4 + $0x3a8] sm:$0xff] }
 0x126   : > { %v1642_v45 = vrot.slane %v9242_v37, 2  ;;  %v1501_v37 = vadd.f32 %v6567_v43, %v6559_v27  ;;  %2573 = vmatpush.msra.mxu3 %v5267_v33 }
 0x127   : > { %v1480_v40 = vpop.f32.mrf.mxu2  ;;  %2121 = vmatmul.f32.gmra.mxu0 %v5854_v21 }
 0x128   : > { %v1593_v15 = vpop.f32.mrf.mxu3  ;;  %2290 = vmatmul.f32.gmra.mxu1 %v6877_v30 }
 0x129   : > { %v6883_v62 = vadd.f32 %v1593_v15, %v1480_v40 }
 0x12b   : > { %9241 = vst [vmem:[#allocation91_spill] sm:$0xff] %v6883_v62  ;;  %v6899_v62 = vsel %vm1596_vm3, %v1642_v45, %v1643_v56  ;;  %v3160_v56 = vld [vmem:[%s8968_s9 + $0x28] sm:$0xff] }
 0x12c   : > { %1790 = vmatmul.f32.gmra.mxu2 %v6860_v13  ;;  %v2077_v40 = vpop.f32.mrf.mxu0  ;;  %3181 = vmatpush.msra.mxu1 %v3160_v56 }
 0x12d   : > { %5191 = vmatmul.msk.f32.gmra.mxu3 %vm676_vm0, %v9244_v44  ;;  %v2246_v15 = vpop.f32.mrf.mxu1  ;;  %v9245_v44 = vld [vmem:[#allocation11_spill] sm:$0xff] }
 0x12f   : > { %v1743_v21 = vpop.f32.mrf.mxu2  ;;  %2124 = vmatmul.f32.gmra.mxu0 %v9245_v44  ;;  %v1504_v44 = vadd.f32 %v6581_v63, %v6576_v20  ;;  %v1647_v20 = vrot.slane %v9249_v51, 2  ;;  %v9250_v63 = vld [vmem:[#allocation15_spill] sm:$0xff] }
 0x130   : > { %v1905_v13 = vpop.f32.mrf.mxu3  ;;  %v1839_v58 = vadd.f32 %v1743_v21, %v1501_v37  ;;  %2293 = vmatmul.f32.gmra.mxu1 %v6899_v62  ;;  %v5283_v21 = vld [vmem:[%s8963_s4 + $0x428] sm:$0xff] }
 0x131   : > { %2742 = vmatpush.msra.mxu0 %v5283_v21  ;;  %v5235_v21 = vld [vmem:[%s8963_s4 + $0x320] sm:$0xff] }
 0x132   : > { %v2001_v45 = vadd.f32 %v1905_v13, %v1839_v58  ;;  %v9248_v13 = vld [vmem:[#allocation14_spill] sm:$0xff]  ;;  %2402 = vmatpush.msra.mxu2 %v5235_v21 }
 0x134   : > { %v2173_v53 = vadd.f32 %v2077_v40, %v2001_v45  ;;  %1793 = vmatmul.f32.gmra.mxu2 %v6877_v30  ;;  %v2080_v43 = vpop.f32.mrf.mxu0  ;;  %v9251_v45 = vld [vmem:[#allocation13_spill] sm:$0xff] }
 0x135   : > { %1955 = vmatmul.f32.gmra.mxu3 %v9243_v11  ;;  %v2249_v27 = vpop.f32.mrf.mxu1 }
 0x136   : > { %v6916_v33 = vadd.f32 %v2246_v15, %v2173_v53  ;;  %v1648_v53 = vrot.slane %v9250_v63, 2 }
 0x137   : > { %v1746_v58 = vpop.f32.mrf.mxu2  ;;  %2127 = vmatmul.f32.gmra.mxu0 %v9248_v13 }
 0x138   : > { %9247 = vst [vmem:[#allocation10_spill] sm:$0xff] %v6916_v33  ;;  %v1908_v54 = vpop.f32.mrf.mxu3  ;;  %v1840_v40 = vadd.f32 %v1746_v58, %v1504_v44  ;;  %2296 = vmatmul.f32.gmra.mxu1 %v6912_v41  ;;  %v6936_v33 = vsel %vm1596_vm3, %v1647_v20, %v1648_v53  ;;  %v9254_v20 = vld [vmem:[#allocation19_spill] sm:$0xff] }
 0x139   : > { %v1650_v13 = vrot.slane %v9254_v20, 2 }
 0x13a   : > { %v2002_v15 = vadd.f32 %v1908_v54, %v1840_v40  ;;  %v1507_v54 = vadd.f32 %v6603_v3, %v6595_v60  ;;  %v5266_v40 = vld [vmem:[%s8963_s4 + $0x3a0] sm:$0xff] }
 0x13b   : > { %2574 = vmatpush.msra.mxu3 %v5266_v40 }
 0x13c   : > { %v2174_v37 = vadd.f32 %v2080_v43, %v2002_v15  ;;  %1796 = vmatmul.f32.gmra.mxu2 %v6899_v62  ;;  %v2083_v44 = vpop.f32.mrf.mxu0  ;;  %v9253_v15 = vld [vmem:[#allocation18_spill] sm:$0xff] }
 0x13d   : > { %5192 = vmatmul.msk.f32.gmra.mxu3 %vm676_vm0, %v9251_v45  ;;  %v2252_v58 = vpop.f32.mrf.mxu1 }
 0x13e   : > { %v6940_v43 = vadd.f32 %v2249_v27, %v2174_v37  ;;  %v6951_v27 = vsel %vm1596_vm3, %v1648_v53, %v1650_v13  ;;  %v1510_v37 = vadd.f32 %v6619_v36, %v6614_v12  ;;  %v3159_v13 = vld [vmem:[%s8968_s9 + $0x20] sm:$0xff]  ;;  %v9257_v53 = vld [vmem:[#allocation24_spill] sm:$0xff] }
 0x13f   : > { %v1749_v56 = vpop.f32.mrf.mxu2  ;;  %2130 = vmatmul.f32.gmra.mxu0 %v9253_v15  ;;  %v1652_v12 = vrot.slane %v9257_v53, 2  ;;  %v9258_v36 = vld [vmem:[#allocation22_spill] sm:$0xff]  ;;  %3182 = vmatpush.msra.mxu1 %v3159_v13 }
 0x140   : > { %9252 = vst [vmem:[#allocation12_spill] sm:$0xff] %v6940_v43  ;;  %v1911_v51 = vpop.f32.mrf.mxu3  ;;  %v1841_v45 = vadd.f32 %v1749_v56, %v1507_v54  ;;  %2299 = vmatmul.f32.gmra.mxu1 %v6936_v33  ;;  %v5282_v54 = vld [vmem:[%s8963_s4 + $0x420] sm:$0xff]  ;;  %v9256_v56 = vld [vmem:[#allocation21_spill] sm:$0xff] }
 0x141   : > { %2743 = vmatpush.msra.mxu0 %v5282_v54  ;;  %v5234_v54 = vld [vmem:[%s8963_s4 + $0x318] sm:$0xff] }
 0x142   : > { %v2003_v21 = vadd.f32 %v1911_v51, %v1841_v45  ;;  %2403 = vmatpush.msra.mxu2 %v5234_v54 }
 0x144   : > { %v2175_v11 = vadd.f32 %v2083_v44, %v2003_v21  ;;  %1799 = vmatmul.f32.gmra.mxu2 %v6912_v41  ;;  %v2086_v60 = vpop.f32.mrf.mxu0  ;;  %v9259_v21 = vld [vmem:[#allocation20_spill] sm:$0xff] }
 0x145   : > { %1961 = vmatmul.f32.gmra.mxu3 %v9250_v63  ;;  %v2255_v3 = vpop.f32.mrf.mxu1 }
 0x146   : > { %v6955_v40 = vadd.f32 %v2252_v58, %v2175_v11  ;;  %v1653_v11 = vrot.slane %v9258_v36, 2 }
 0x147   : > { %v1752_v45 = vpop.f32.mrf.mxu2  ;;  %2133 = vmatmul.f32.gmra.mxu0 %v9256_v56 }
 0x148   : > { %9255 = vst [vmem:[#allocation16_spill] sm:$0xff] %v6955_v40  ;;  %v1914_v44 = vpop.f32.mrf.mxu3  ;;  %v1842_v51 = vadd.f32 %v1752_v45, %v1510_v37  ;;  %2302 = vmatmul.f32.gmra.mxu1 %v6951_v27  ;;  %v6975_v40 = vsel %vm1596_vm3, %v1652_v12, %v1653_v11  ;;  %v9262_v12 = vld [vmem:[#allocation28_spill] sm:$0xff] }
 0x149   : > { %v1655_v43 = vrot.slane %v9262_v12, 2 }
 0x14a   : > { %v2004_v58 = vadd.f32 %v1914_v44, %v1842_v51  ;;  %v1513_v44 = vadd.f32 %v6645_v55, %v6637_v26  ;;  %v5265_v51 = vld [vmem:[%s8963_s4 + $0x398] sm:$0xff] }
 0x14b   : > { %2575 = vmatpush.msra.mxu3 %v5265_v51 }
 0x14c   : > { %v2176_v20 = vadd.f32 %v2086_v60, %v2004_v58  ;;  %1802 = vmatmul.f32.gmra.mxu2 %v6936_v33  ;;  %v2089_v37 = vpop.f32.mrf.mxu0  ;;  %v9261_v58 = vld [vmem:[#allocation27_spill] sm:$0xff] }
 0x14d   : > { %5193 = vmatmul.msk.f32.gmra.mxu3 %vm676_vm0, %v9259_v21  ;;  %v2258_v45 = vpop.f32.mrf.mxu1 }
 0x14e   : > { %v6979_v60 = vadd.f32 %v2255_v3, %v2176_v20  ;;  %v6990_v3 = vsel %vm1596_vm3, %v1653_v11, %v1655_v43  ;;  %v1516_v20 = vadd.f32 %v6662_v34, %v6657_v46  ;;  %v3158_v43 = vld [vmem:[%s8968_s9 + $0x18] sm:$0xff]  ;;  %v9265_v11 = vld [vmem:[#allocation34_spill] sm:$0xff]  ;;  %v9266_v34 = vld [vmem:[#allocation32_spill] sm:$0xff] }
 0x14f   : > { %v1755_v13 = vpop.f32.mrf.mxu2  ;;  %2136 = vmatmul.f32.gmra.mxu0 %v9261_v58  ;;  %v1657_v46 = vrot.slane %v9265_v11, 2  ;;  %3183 = vmatpush.msra.mxu1 %v3158_v43 }
 0x150   : > { %9260 = vst [vmem:[#allocation15_spill] sm:$0xff] %v6979_v60  ;;  %v1917_v53 = vpop.f32.mrf.mxu3  ;;  %v1843_v21 = vadd.f32 %v1755_v13, %v1513_v44  ;;  %2305 = vmatmul.f32.gmra.mxu1 %v6975_v40  ;;  %v5281_v44 = vld [vmem:[%s8963_s4 + $0x418] sm:$0xff]  ;;  %v9264_v13 = vld [vmem:[#allocation31_spill] sm:$0xff] }
 0x151   : > { %2744 = vmatpush.msra.mxu0 %v5281_v44  ;;  %v5233_v44 = vld [vmem:[%s8963_s4 + $0x310] sm:$0xff] }
 0x152   : > { %v2005_v54 = vadd.f32 %v1917_v53, %v1843_v21  ;;  %2404 = vmatpush.msra.mxu2 %v5233_v44 }
 0x154   : > { %v2177_v56 = vadd.f32 %v2089_v37, %v2005_v54  ;;  %1805 = vmatmul.f32.gmra.mxu2 %v6951_v27  ;;  %v2092_v26 = vpop.f32.mrf.mxu0  ;;  %v9267_v54 = vld [vmem:[#allocation30_spill] sm:$0xff] }
 0x155   : > { %1967 = vmatmul.f32.gmra.mxu3 %v9258_v36  ;;  %v2261_v55 = vpop.f32.mrf.mxu1 }
 0x156   : > { %v6994_v51 = vadd.f32 %v2258_v45, %v2177_v56  ;;  %v1658_v56 = vrot.slane %v9266_v34, 2 }
 0x157   : > { %v1758_v21 = vpop.f32.mrf.mxu2  ;;  %2139 = vmatmul.f32.gmra.mxu0 %v9264_v13 }
 0x158   : > { %9263 = vst [vmem:[#allocation18_spill] sm:$0xff] %v6994_v51  ;;  %v1920_v37 = vpop.f32.mrf.mxu3  ;;  %v1844_v53 = vadd.f32 %v1758_v21, %v1516_v20  ;;  %2308 = vmatmul.f32.gmra.mxu1 %v6990_v3  ;;  %v7014_v51 = vsel %vm1596_vm3, %v1657_v46, %v1658_v56  ;;  %v9270_v46 = vld [vmem:[#allocation38_spill] sm:$0xff] }
 0x159   : > { %v1660_v60 = vrot.slane %v9270_v46, 2 }
 0x15a   : > { %v2006_v45 = vadd.f32 %v1920_v37, %v1844_v53  ;;  %v1519_v37 = vadd.f32 %v6688_v16, %v6680_v38  ;;  %v5264_v53 = vld [vmem:[%s8963_s4 + $0x390] sm:$0xff] }
 0x15b   : > { %2576 = vmatpush.msra.mxu3 %v5264_v53 }
 0x15c   : > { %v2178_v12 = vadd.f32 %v2092_v26, %v2006_v45  ;;  %1808 = vmatmul.f32.gmra.mxu2 %v6975_v40  ;;  %v2095_v20 = vpop.f32.mrf.mxu0  ;;  %v9269_v45 = vld [vmem:[#allocation37_spill] sm:$0xff] }
 0x15d   : > { %5194 = vmatmul.msk.f32.gmra.mxu3 %vm676_vm0, %v9267_v54  ;;  %v2264_v21 = vpop.f32.mrf.mxu1 }
 0x15e   : > { %v7018_v26 = vadd.f32 %v2261_v55, %v2178_v12  ;;  %v7029_v55 = vsel %vm1596_vm3, %v1658_v56, %v1660_v60  ;;  %v1522_v12 = vadd.f32 %v6705_v48, %v6700_v2  ;;  %v3157_v60 = vld [vmem:[%s8968_s9 + $0x10] sm:$0xff]  ;;  %v9274_v48 = vld [vmem:[#allocation42_spill] sm:$0xff] }
 0x15f   : > { %v1761_v43 = vpop.f32.mrf.mxu2  ;;  %2142 = vmatmul.f32.gmra.mxu0 %v9269_v45  ;;  %v9273_v56 = vld [vmem:[#allocation44_spill] sm:$0xff]  ;;  %3184 = vmatpush.msra.mxu1 %v3157_v60 }
 0x160   : > { %9268 = vst [vmem:[#allocation19_spill] sm:$0xff] %v7018_v26  ;;  %v1923_v11 = vpop.f32.mrf.mxu3  ;;  %v1845_v54 = vadd.f32 %v1761_v43, %v1519_v37  ;;  %2311 = vmatmul.f32.gmra.mxu1 %v7014_v51  ;;  %v5280_v37 = vld [vmem:[%s8963_s4 + $0x410] sm:$0xff]  ;;  %v9272_v43 = vld [vmem:[#allocation41_spill] sm:$0xff]  ;;  %v1662_v2 = vrot.slane %v9273_v56, 2 }
 0x161   : > { %2745 = vmatpush.msra.mxu0 %v5280_v37  ;;  %v5232_v37 = vld [vmem:[%s8963_s4 + $0x308] sm:$0xff] }
 0x162   : > { %v2007_v44 = vadd.f32 %v1923_v11, %v1845_v54  ;;  %2405 = vmatpush.msra.mxu2 %v5232_v37 }
 0x164   : > { %v2179_v13 = vadd.f32 %v2095_v20, %v2007_v44  ;;  %1811 = vmatmul.f32.gmra.mxu2 %v6990_v3  ;;  %v2098_v38 = vpop.f32.mrf.mxu0  ;;  %v9275_v44 = vld [vmem:[#allocation40_spill] sm:$0xff] }
 0x165   : > { %1973 = vmatmul.f32.gmra.mxu3 %v9266_v34  ;;  %v2267_v16 = vpop.f32.mrf.mxu1 }
 0x166   : > { %v7033_v53 = vadd.f32 %v2264_v21, %v2179_v13  ;;  %v1663_v13 = vrot.slane %v9274_v48, 2 }
 0x167   : > { %v1764_v54 = vpop.f32.mrf.mxu2  ;;  %2145 = vmatmul.f32.gmra.mxu0 %v9272_v43 }
 0x168   : > { %9271 = vst [vmem:[#allocation24_spill] sm:$0xff] %v7033_v53  ;;  %v1926_v20 = vpop.f32.mrf.mxu3  ;;  %v1846_v11 = vadd.f32 %v1764_v54, %v1522_v12  ;;  %2314 = vmatmul.f32.gmra.mxu1 %v7029_v55  ;;  %v7053_v53 = vsel %vm1596_vm3, %v1662_v2, %v1663_v13  ;;  %v9277_v2 = vld [vmem:[#allocation48_spill] sm:$0xff] }
 0x169   : > { %v1665_v26 = vrot.slane %v9277_v2, 2  ;;  %v9281_v2 = vld [vmem:[#allocation50_spill] sm:$0xff] }
 0x16a   : > { %v2008_v21 = vadd.f32 %v1926_v20, %v1846_v11  ;;  %v1525_v20 = vadd.f32 %v6731_v5, %v6723_v52  ;;  %v5263_v11 = vld [vmem:[%s8963_s4 + $0x388] sm:$0xff] }
 0x16b   : > { %2577 = vmatpush.msra.mxu3 %v5263_v11 }
 0x16c   : > { %v2180_v46 = vadd.f32 %v2098_v38, %v2008_v21  ;;  %1814 = vmatmul.f32.gmra.mxu2 %v7014_v51  ;;  %v2101_v12 = vpop.f32.mrf.mxu0  ;;  %v9276_v21 = vld [vmem:[#allocation47_spill] sm:$0xff] }
 0x16d   : > { %5195 = vmatmul.msk.f32.gmra.mxu3 %vm676_vm0, %v9275_v44  ;;  %v2270_v54 = vpop.f32.mrf.mxu1 }
 0x16e   : > { %v7057_v38 = vadd.f32 %v2267_v16, %v2180_v46  ;;  %v7068_v16 = vsel %vm1596_vm3, %v1663_v13, %v1665_v26  ;;  %v1528_v46 = vadd.f32 %v6748_v59, %v6743_v35  ;;  %v3156_v26 = vld [vmem:[%s8968_s9 + $0x8] sm:$0xff]  ;;  %v9280_v13 = vld [vmem:[#allocation54_spill] sm:$0xff]  ;;  %v1668_v59 = vrot.slane %v6367_v61, 2 }
 0x16f   : > { %v1767_v60 = vpop.f32.mrf.mxu2  ;;  %2148 = vmatmul.f32.gmra.mxu0 %v9276_v21  ;;  %v1667_v35 = vrot.slane %v9280_v13, 2  ;;  %3185 = vmatpush.msra.mxu1 %v3156_v26 }
 0x170   : > { %v1929_v56 = vpop.f32.mrf.mxu3  ;;  %v1847_v44 = vadd.f32 %v1767_v60, %v1525_v20  ;;  %2317 = vmatmul.f32.gmra.mxu1 %v7053_v53  ;;  %v5279_v20 = vld [vmem:[%s8963_s4 + $0x408] sm:$0xff] }
 0x171   : > { %v9279_v60 = vld [vmem:[#allocation51_spill] sm:$0xff]  ;;  %2746 = vmatpush.msra.mxu0 %v5279_v20 }
 0x172   : > { %v2009_v37 = vadd.f32 %v1929_v56, %v1847_v44 }
 0x174   : > { %v2181_v43 = vadd.f32 %v2101_v12, %v2009_v37  ;;  %1817 = vmatmul.f32.gmra.mxu2 %v7029_v55  ;;  %v2104_v52 = vpop.f32.mrf.mxu0 }
 0x175   : > { %1979 = vmatmul.f32.gmra.mxu3 %v9274_v48  ;;  %v2273_v5 = vpop.f32.mrf.mxu1 }
 0x176   : > { %v7072_v11 = vadd.f32 %v2270_v54, %v2181_v43 }
 0x177   : > { %v1770_v44 = vpop.f32.mrf.mxu2  ;;  %2151 = vmatmul.f32.gmra.mxu0 %v9279_v60 }
 0x178   : > { %9278 = vst [vmem:[#allocation22_spill] sm:$0xff] %v7072_v11  ;;  %v1932_v12 = vpop.f32.mrf.mxu3  ;;  %v1848_v56 = vadd.f32 %v1770_v44, %v1528_v46  ;;  %2320 = vmatmul.f32.gmra.mxu1 %v7068_v16  ;;  %v5231_v46 = vld [vmem:[%s8963_s4 + $0x300] sm:$0xff]  ;;  %v7092_v44 = vsel %vm1596_vm3, %v1667_v35, %v1668_v59  ;;  %v1670_v35 = vrot.slane %v6421_v24, 2  ;;  %v1534_v24 = vadd.f32 %v6791_v0, %v6786_v19 }
 0x179   : > { %9282 = vst [vmem:[#allocation27_spill] sm:$0xff] %v7092_v44  ;;  %2406 = vmatpush.msra.mxu2 %v5231_v46  ;;  %v9287_v19 = vld [vmem:[#allocation62_spill] sm:$0xff] }
 0x17a   : > { %v2010_v43 = vadd.f32 %v1932_v12, %v1848_v56  ;;  %v5262_v56 = vld [vmem:[%s8963_s4 + $0x380] sm:$0xff]  ;;  %v1672_v0 = vrot.slane %v9287_v19, 2  ;;  %v5324_v19 = vld [vmem:[%s8968_s9 + $0xf8] sm:$0xff] }
 0x17b   : > { %2578 = vmatpush.msra.mxu3 %v5262_v56  ;;  %3493 = vmatpush.msrb.mxu2 %v5324_v19 }
 0x17c   : > { %v2182_v54 = vadd.f32 %v2104_v52, %v2010_v43  ;;  %1820 = vmatmul.f32.gmra.mxu2 %v7053_v53  ;;  %v2107_v37 = vpop.f32.mrf.mxu0  ;;  %v1531_v52 = vadd.f32 %v6774_v9, %v6766_v1  ;;  %v9284_v43 = vld [vmem:[#allocation57_spill] sm:$0xff] }
 0x17d   : > { %5196 = vmatmul.msk.f32.gmra.mxu3 %vm676_vm0, %v9281_v2  ;;  %v2276_v20 = vpop.f32.mrf.mxu1 }
 0x17e   : > { %v7096_v12 = vadd.f32 %v2273_v5, %v2182_v54  ;;  %v7108_v54 = vsel %vm1596_vm3, %v1668_v59, %v1670_v35  ;;  %v3155_v35 = vld [vmem:[%s8968_s9] sm:$0xff] }
 0x17f   : > { %v1773_v26 = vpop.f32.mrf.mxu2  ;;  %2154 = vmatmul.f32.gmra.mxu0 %v9284_v43  ;;  %3186 = vmatpush.msra.mxu1 %v3155_v35 }
 0x180   : > { %9283 = vst [vmem:[#allocation28_spill] sm:$0xff] %v7096_v12  ;;  %v1935_v13 = vpop.f32.mrf.mxu3  ;;  %v1849_v11 = vadd.f32 %v1773_v26, %v1531_v52  ;;  %2323 = vmatmul.f32.gmra.mxu1 %v7092_v44  ;;  %v9286_v26 = vld [vmem:[#allocation60_spill] sm:$0xff] }
 0x182   : > { %v2011_v46 = vadd.f32 %v1935_v13, %v1849_v11  ;;  %v838_v13 = vld [vmem:[%s548_s29] sm:$0xff] }
 0x184   : > { %v2183_v1 = vadd.f32 %v2107_v37, %v2011_v46  ;;  %1823 = vmatmul.f32.gmra.mxu2 %v7068_v16  ;;  %v2110_v9 = vpop.f32.mrf.mxu0  ;;  %v5278_v37 = vld [vmem:[%s8963_s4 + $0x400] sm:$0xff]  ;;  %v839_v46 = vld [vmem:[%s548_s29 + $0x8] sm:$0xff] }
 0x185   : > { %1985 = vmatmul.f32.gmra.mxu3 %v6367_v61  ;;  %v2279_v5 = vpop.f32.mrf.mxu1  ;;  %2747 = vmatpush.msra.mxu0 %v5278_v37 }
 0x186   : > { %v7117_v11 = vadd.f32 %v2276_v20, %v2183_v1  ;;  %v1673_v20 = vrot.slane %v6465_v18, 2 }
 0x187   : > { %v1776_v52 = vpop.f32.mrf.mxu2  ;;  %2157 = vmatmul.f32.gmra.mxu0 %v9286_v26  ;;  %v9289_v26 = vld [vmem:[#allocation65_spill] sm:$0xff] }
 0x188   : > { %9285 = vst [vmem:[#allocation34_spill] sm:$0xff] %v7117_v11  ;;  %v1938_v56 = vpop.f32.mrf.mxu3  ;;  %v1850_v59 = vadd.f32 %v1776_v52, %v1534_v24  ;;  %2326 = vmatmul.f32.gmra.mxu1 %v7108_v54  ;;  %v5541_v11 = vld [vmem:[%s8961_s2] ss:$0 sm:$0xff] }
 0x189   : > { %v896_v24 = vmul.f32 %v5541_v11, %v838_v13  ;;  %v897_v12 = vmul.f32 %v5541_v11, %v839_v46  ;;  %v840_v13 = vld [vmem:[%s548_s29 + $0x10] sm:$0x3] }
 0x18a   : > { %v2012_v1 = vadd.f32 %v1938_v56, %v1850_v59  ;;  %v7140_v56 = vsel %vm1596_vm3, %v1672_v0, %v1673_v20  ;;  %v5542_v0 = vld [vmem:[%s8962_s3] ss:$0 sm:$0xff] }
 0x18b   : > { %v954_v61 = vadd.f32 %v5542_v0, %v896_v24 }
 0x18c   : > { %v2184_v52 = vadd.f32 %v2110_v9, %v2012_v1  ;;  %1826 = vmatmul.f32.gmra.mxu2 %v7092_v44  ;;  %v2113_v37 = vpop.f32.mrf.mxu0  ;;  %v1537_v9 = vadd.f32 %v6817_v22, %v6809_v49  ;;  %v5340_v1 = vld [vmem:[%s8968_s9 + $0x178] sm:$0xff]  ;;  %v955_v49 = vadd.f32 %v5542_v0, %v897_v12  ;;  %v9290_v22 = vld [vmem:[#allocation66_spill] sm:$0xff] }
 0x18d   : > { %5197 = vmatmul.msk.f32.gmra.mxu3 %vm676_vm0, %v6449_v28  ;;  %v2282_v35 = vpop.f32.mrf.mxu1  ;;  %v7155_v44 = vmax.f32 %v954_v61, 0.0 }
 0x18e   : > { %v7144_v59 = vadd.f32 %v2279_v5, %v2184_v52  ;;  %3767 = vmatpush.msrb.mxu3 %v5340_v1  ;;  %v1675_v5 = vrot.slane %v9290_v22, 2  ;;  %v898_v52 = vmul.f32 %v5541_v11, %v840_v13  ;;  %v7159_v2 = vmax.f32 %v955_v49, 0.0  ;;  %v9291_v1 = vld [vmem:[#allocation68_spill] sm:$0xff] }
 0x18f   : > { %v1779_v46 = vpop.f32.mrf.mxu2  ;;  %2160 = vmatmul.f32.gmra.mxu0 %v9289_v26  ;;  %v1170_v12 = vsel %vm676_vm0, %v7155_v44, 0.0 }
 0x190   : > { %9288 = vst [vmem:[#allocation32_spill] sm:$0xff] %v7144_v59  ;;  %v1941_v28 = vpop.f32.mrf.mxu3  ;;  %v1851_v19 = vadd.f32 %v1779_v46, %v1537_v9  ;;  %2329 = vmatmul.f32.gmra.mxu1 %v7140_v56  ;;  %v7162_v9 = vsel %vm1596_vm3, %v1673_v20, %v1675_v5  ;;  %v956_v11 = vadd.f32 %v5542_v0, %v898_v52  ;;  %v2036_v46 = vrot.slane %v1170_v12, 1  ;;  %v5323_v52 = vld [vmem:[%s8968_s9 + $0xf0] sm:$0xff] }
 0x191   : > { %3494 = vmatpush.msrb.mxu2 %v5323_v52 }
 0x192   : > { %v2013_v59 = vadd.f32 %v1941_v28, %v1851_v19  ;;  %v1540_v28 = vadd.f32 %v6831_v50, %v6829_v31  ;;  %v2037_v19 = vrot.slane %v7159_v2, 1  ;;  %v5388_v31 = vld [vmem:[%s8968_s9 + $0x278] sm:$0xff]  ;;  %v2205_v50 = vrot.slane %v1170_v12, 2 }
 0x193   : > { %4101 = vmatpush.msrb.mxu1 %v5388_v31 }
 0x194   : > { %v2185_v43 = vadd.f32 %v2113_v37, %v2013_v59  ;;  %1829 = vmatmul.f32.gmra.mxu2 %v7108_v54  ;;  %v2116_v26 = vpop.f32.mrf.mxu0  ;;  %v5356_v37 = vld [vmem:[%s8968_s9 + $0x1f8] sm:$0xff]  ;;  %v7186_v5 = vsel %vm1240_vm1, %v2036_v46, %v2037_v19 }
 0x195   : > { %1991 = vmatmul.f32.gmra.mxu3 %v6465_v18  ;;  %v2285_v24 = vpop.f32.mrf.mxu1  ;;  %3929 = vmatpush.msrb.mxu0 %v5356_v37  ;;  %v1543_v37 = vadd.f32 %v6857_v39, %v6852_v42 }
 0x196   : > { %v7169_v61 = vadd.f32 %v2282_v35, %v2185_v43  ;;  %v2206_v43 = vrot.slane %v7159_v2, 2  ;;  %v1010_v35 = vmax.f32 %v956_v11, 0.0 }
 0x197   : > { %v1782_v59 = vpop.f32.mrf.mxu2  ;;  %2163 = vmatmul.f32.gmra.mxu0 %v9291_v1 }
 0x198   : > { %v1944_v13 = vpop.f32.mrf.mxu3  ;;  %v1852_v20 = vadd.f32 %v1782_v59, %v1540_v28  ;;  %2332 = vmatmul.f32.gmra.mxu1 %v7162_v9  ;;  %v7192_v11 = vsel %vm1596_vm3, %v2205_v50, %v2206_v43 }
 0x19a   : > { %v2014_v0 = vadd.f32 %v1944_v13, %v1852_v20  ;;  %v5339_v13 = vld [vmem:[%s8968_s9 + $0x170] sm:$0xff] }
 0x19b   : > { %3768 = vmatpush.msrb.mxu3 %v5339_v13 }
 0x19c   : > { %v2186_v49 = vadd.f32 %v2116_v26, %v2014_v0  ;;  %1832 = vmatmul.f32.gmra.mxu2 %v7140_v56  ;;  %v2119_v22 = vpop.f32.mrf.mxu0  ;;  %v1172_v26 = vsel %vm735_vm2, %v1010_v35, 0.0 }
 0x19d   : > { %5198 = vmatmul.msk.f32.gmra.mxu3 %vm676_vm0, %v7155_v44  ;;  %v2288_v12 = vpop.f32.mrf.mxu1  ;;  %v2039_v50 = vrot.slane %v1172_v26, 1  ;;  %v2208_v35 = vrot.slane %v1172_v26, 2 }
 0x19e   : > { %v7198_v59 = vadd.f32 %v2285_v24, %v2186_v49 }
 0x19f   : > { %v1785_v20 = vpop.f32.mrf.mxu2  ;;  %2166 = vmatmul.f32.gmra.mxu0 %v7186_v5  ;;  %v7208_v39 = vsel %vm1240_vm1, %v2037_v19, %v2039_v50  ;;  %v7211_v49 = vsel %vm1596_vm3, %v2206_v43, %v2208_v35  ;;  %v5387_v43 = vld [vmem:[%s8968_s9 + $0x270] sm:$0xff] }
 0x1a0   : > { %v1947_v46 = vpop.f32.mrf.mxu3  ;;  %v1853_v31 = vadd.f32 %v1785_v20, %v1543_v37  ;;  %2335 = vmatmul.f32.gmra.mxu1 %v7192_v11  ;;  %v1546_v37 = vadd.f32 %v6874_v6, %v6872_v32 }
 0x1a1   : > { %4102 = vmatpush.msrb.mxu1 %v5387_v43 }
 0x1a2   : > { %v2015_v0 = vadd.f32 %v1947_v46, %v1853_v31  ;;  %v5322_v46 = vld [vmem:[%s8968_s9 + $0xe8] sm:$0xff] }
 0x1a3   : > { %3495 = vmatpush.msrb.mxu2 %v5322_v46 }
 0x1a4   : > { %v2187_v52 = vadd.f32 %v2119_v22, %v2015_v0  ;;  %1835 = vmatmul.f32.gmra.mxu2 %v7162_v9  ;;  %v2122_v42 = vpop.f32.mrf.mxu0  ;;  %v5355_v22 = vld [vmem:[%s8968_s9 + $0x1f0] sm:$0xff] }
 0x1a5   : > { %1997 = vmatmul.f32.gmra.mxu3 %v7159_v2  ;;  %v2291_v24 = vpop.f32.mrf.mxu1  ;;  %3930 = vmatpush.msrb.mxu0 %v5355_v22 }
 0x1a6   : > { %v7215_v13 = vadd.f32 %v2288_v12, %v2187_v52  ;;  %v9293_v52 = vmov 0.0  }
 0x1a7   : > { %v1788_v26 = vpop.f32.mrf.mxu2  ;;  %2169 = vmatmul.f32.gmra.mxu0 %v7208_v39 }
 0x1a8   : > { %v1950_v20 = vpop.f32.mrf.mxu3  ;;  %v1854_v19 = vadd.f32 %v1788_v26, %v1546_v37  ;;  %2338 = vmatmul.f32.gmra.mxu1 %v7211_v49  ;;  %v9294_v26 = vld [vmem:[#allocation17_spill] sm:$0xff] }
 0x1aa   : > { %v2016_v32 = vadd.f32 %v1950_v20, %v1854_v19  ;;  %v9295_v20 = vld [vmem:[#allocation25_spill] sm:$0xff] }
 0x1ac   : > { %v2188_v6 = vadd.f32 %v2122_v42, %v2016_v32  ;;  %5247 = vmatmul.msk.f32.vlgmr.msra.gmra.mxu2 %vm676_vm0, %v5977_v29  ;;  %v2125_v12 = vpop.f32.mrf.mxu0  ;;  %v5338_v29 = vld [vmem:[%s8968_s9 + $0x168] sm:$0xff]  ;;  %v7249_v42 = vld [vmem:[%s8966_s7] ss:$0 sm:$0xff] }
 0x1ad   : > { %2579 = vmatmul.f32.vlgmr.msra.gmra.mxu3 %v6038_v7  ;;  %v2294_v31 = vpop.f32.mrf.mxu1 }
 0x1ae   : > { %v7232_v50 = vadd.f32 %v2291_v24, %v2188_v6  ;;  %3769 = vmatpush.msrb.mxu3 %v5338_v29  ;;  %v2880_v24 = vld [vmem:[%s7238_s30 + $0x18] sm:$0xff]  ;;  %v5354_v6 = vld [vmem:[%s8968_s9 + $0x1e8] sm:$0xff] }
 0x1af   : > { %v1791_v7 = vpop.f32.mrf.mxu2  ;;  %2748 = vmatmul.f32.vlgmr.msra.gmra.mxu0 %v6606_v47  ;;  %v2938_v47 = vmul.f32 %v7249_v42, %v2880_v24  ;;  %v9296_v29 = vld [vmem:[#allocation71_spill] sm:$0xff] }
 0x1b0   : > { %v1953_v35 = vpop.f32.mrf.mxu3  ;;  %v1855_v0 = vadd.f32 %v1791_v7, %v6571_v23  ;;  %3187 = vmatmul.f32.vlgmr.msra.gmra.mxu1 %v9293_v52  ;;  %v7258_v23 = vld [vmem:[%s8967_s8] ss:$0 sm:$0xff]  ;;  %3931 = vmatpush.msrb.mxu0 %v5354_v6 }
 0x1b1   : > { %v5321_v6 = vld [vmem:[%s8968_s9 + $0xe0] sm:$0xff] }
 0x1b2   : > { %v2017_v37 = vadd.f32 %v1953_v35, %v1855_v0  ;;  %v2996_v35 = vadd.f32 %v7258_v23, %v2938_v47  ;;  %v2881_v0 = vld [vmem:[%s7238_s30 + $0x20] sm:$0xff]  ;;  %3496 = vmatpush.msrb.mxu2 %v5321_v6 }
 0x1b3   : > { %v2939_v47 = vmul.f32 %v7249_v42, %v2881_v0 }
 0x1b4   : > { %v2189_v22 = vadd.f32 %v2125_v12, %v2017_v37  ;;  %2410 = vmatmul.f32.gmra.mxu2 %v9294_v26  ;;  %v2128_v19 = vpop.f32.mrf.mxu0 }
 0x1b5   : > { %2582 = vmatmul.f32.gmra.mxu3 %v9295_v20  ;;  %v2297_v43 = vpop.f32.mrf.mxu1  ;;  %v7277_v20 = vmax.f32 %v2996_v35, 0.0  ;;  %v9300_v35 = vld [vmem:[#allocation72_spill] sm:$0xff]  ;;  %v2997_v0 = vadd.f32 %v7258_v23, %v2939_v47  ;;  %v5353_v47 = vld [vmem:[%s8968_s9 + $0x1e0] sm:$0xff] }
 0x1b6   : > { %v7260_v32 = vadd.f32 %v2294_v31, %v2189_v22  ;;  %v5386_v31 = vld [vmem:[%s8968_s9 + $0x268] sm:$0xff]  ;;  %3932 = vmatpush.msrb.mxu0 %v5353_v47  ;;  %v5320_v47 = vld [vmem:[%s8968_s9 + $0xd8] sm:$0xff] }
 0x1b7   : > { %v1794_v12 = vpop.f32.mrf.mxu2  ;;  %2751 = vmatmul.f32.gmra.mxu0 %v6622_v10  ;;  %4103 = vmatpush.msrb.mxu1 %v5386_v31  ;;  %v9297_v22 = vld [vmem:[#allocation23_spill] sm:$0xff]  ;;  %v9298_v10 = vld [vmem:[#allocation29_spill] sm:$0xff] }
 0x1b8   : > { %v1956_v46 = vpop.f32.mrf.mxu3  ;;  %v1856_v7 = vadd.f32 %v1794_v12, %v9296_v29  ;;  %3190 = vmatmul.f32.gmra.mxu1 %v9293_v52  ;;  %3497 = vmatpush.msrb.mxu2 %v5320_v47  ;;  %v9310_v47 = vld [vmem:[#allocation45_spill] sm:$0xff] }
 0x1ba   : > { %v2018_v24 = vadd.f32 %v1956_v46, %v1856_v7 }
 0x1bc   : > { %v2190_v37 = vadd.f32 %v2128_v19, %v2018_v24  ;;  %5248 = vmatmul.msk.f32.gmra.mxu2 %vm676_vm0, %v9297_v22  ;;  %v2131_v26 = vpop.f32.mrf.mxu0  ;;  %v5337_v19 = vld [vmem:[%s8968_s9 + $0x160] sm:$0xff]  ;;  %v2883_v24 = vld [vmem:[%s7238_s30 + $0x30] sm:$0xff] }
 0x1bd   : > { %2585 = vmatmul.f32.gmra.mxu3 %v9298_v10  ;;  %v2300_v12 = vpop.f32.mrf.mxu1  ;;  %v9301_v22 = vld [vmem:[#allocation26_spill] sm:$0xff]  ;;  %v9302_v10 = vld [vmem:[#allocation35_spill] sm:$0xff] }
 0x1be   : > { %v7283_v46 = vadd.f32 %v2297_v43, %v2190_v37  ;;  %3770 = vmatpush.msrb.mxu3 %v5337_v19 }
 0x1bf   : > { %v1797_v29 = vpop.f32.mrf.mxu2  ;;  %2754 = vmatmul.f32.gmra.mxu0 %v6648_v57  ;;  %v2941_v57 = vmul.f32 %v7249_v42, %v2883_v24  ;;  %v2884_v24 = vld [vmem:[%s7238_s30 + $0x38] sm:$0xff] }
 0x1c0   : > { %9299 = vst [vmem:[#allocation37_spill] sm:$0xff] %v7283_v46  ;;  %v1959_v7 = vpop.f32.mrf.mxu3  ;;  %v1857_v31 = vadd.f32 %v1797_v29, %v9300_v35  ;;  %5294 = vmatmul.msk.f32.gmra.mxu1 %vm676_vm0, %v7277_v20  ;;  %v7297_v46 = vmax.f32 %v2997_v0, 0.0 }
 0x1c1   : > { %v2999_v0 = vadd.f32 %v7258_v23, %v2941_v57  ;;  %v2942_v57 = vmul.f32 %v7249_v42, %v2884_v24 }
 0x1c2   : > { %v2019_v43 = vadd.f32 %v1959_v7, %v1857_v31 }
 0x1c3   : > { %v3000_v24 = vadd.f32 %v7258_v23, %v2942_v57  ;;  %v5352_v57 = vld [vmem:[%s8968_s9 + $0x1d8] sm:$0xff] }
 0x1c4   : > { %v2191_v37 = vadd.f32 %v2131_v26, %v2019_v43  ;;  %2416 = vmatmul.f32.gmra.mxu2 %v9301_v22  ;;  %v2134_v6 = vpop.f32.mrf.mxu0  ;;  %v9304_v26 = vld [vmem:[#allocation73_spill] sm:$0xff]  ;;  %3933 = vmatpush.msrb.mxu0 %v5352_v57  ;;  %v5319_v57 = vld [vmem:[%s8968_s9 + $0xd0] sm:$0xff] }
 0x1c5   : > { %2588 = vmatmul.f32.gmra.mxu3 %v9302_v10  ;;  %v2303_v19 = vpop.f32.mrf.mxu1  ;;  %v9305_v22 = vld [vmem:[#allocation33_spill] sm:$0xff]  ;;  %3498 = vmatpush.msrb.mxu2 %v5319_v57  ;;  %v9320_v57 = vld [vmem:[#allocation55_spill] sm:$0xff] }
 0x1c6   : > { %v7300_v29 = vadd.f32 %v2300_v12, %v2191_v37  ;;  %v5385_v12 = vld [vmem:[%s8968_s9 + $0x260] sm:$0xff] }
 0x1c7   : > { %v1800_v35 = vpop.f32.mrf.mxu2  ;;  %2757 = vmatmul.f32.gmra.mxu0 %v6665_v14  ;;  %4104 = vmatpush.msrb.mxu1 %v5385_v12  ;;  %v9306_v14 = vld [vmem:[#allocation39_spill] sm:$0xff] }
 0x1c8   : > { %9303 = vst [vmem:[#allocation38_spill] sm:$0xff] %v7300_v29  ;;  %v1962_v7 = vpop.f32.mrf.mxu3  ;;  %v1858_v31 = vadd.f32 %v1800_v35, %v9304_v26  ;;  %3196 = vmatmul.f32.gmra.mxu1 %v7297_v46  ;;  %v7317_v35 = vmax.f32 %v2999_v0, 0.0  ;;  %v9308_v0 = vld [vmem:[#allocation74_spill] sm:$0xff]  ;;  %v7337_v29 = vmax.f32 %v3000_v24, 0.0 }
 0x1ca   : > { %v2020_v43 = vadd.f32 %v1962_v7, %v1858_v31  ;;  %9311 = vst [vmem:[#allocation42_spill] sm:$0xff] %v7337_v29 }
 0x1cc   : > { %v2192_v37 = vadd.f32 %v2134_v6, %v2020_v43  ;;  %5249 = vmatmul.msk.f32.gmra.mxu2 %vm676_vm0, %v9305_v22  ;;  %v2137_v10 = vpop.f32.mrf.mxu0  ;;  %v5336_v6 = vld [vmem:[%s8968_s9 + $0x158] sm:$0xff]  ;;  %v2886_v22 = vld [vmem:[%s7238_s30 + $0x48] sm:$0xff] }
 0x1cd   : > { %2591 = vmatmul.f32.gmra.mxu3 %v9306_v14  ;;  %v2306_v26 = vpop.f32.mrf.mxu1  ;;  %v9309_v14 = vld [vmem:[#allocation36_spill] sm:$0xff] }
 0x1ce   : > { %v7323_v7 = vadd.f32 %v2303_v19, %v2192_v37  ;;  %3771 = vmatpush.msrb.mxu3 %v5336_v6 }
 0x1cf   : > { %v1803_v31 = vpop.f32.mrf.mxu2  ;;  %2760 = vmatmul.f32.gmra.mxu0 %v6691_v17  ;;  %v2944_v17 = vmul.f32 %v7249_v42, %v2886_v22  ;;  %v2887_v22 = vld [vmem:[%s7238_s30 + $0x50] sm:$0xff] }
 0x1d0   : > { %9307 = vst [vmem:[#allocation44_spill] sm:$0xff] %v7323_v7  ;;  %v1965_v12 = vpop.f32.mrf.mxu3  ;;  %v1859_v43 = vadd.f32 %v1803_v31, %v9308_v0  ;;  %5295 = vmatmul.msk.f32.gmra.mxu1 %vm676_vm0, %v7317_v35 }
 0x1d1   : > { %v3002_v24 = vadd.f32 %v7258_v23, %v2944_v17  ;;  %v2945_v17 = vmul.f32 %v7249_v42, %v2887_v22 }
 0x1d2   : > { %v2021_v19 = vadd.f32 %v1965_v12, %v1859_v43 }
 0x1d3   : > { %v3003_v22 = vadd.f32 %v7258_v23, %v2945_v17  ;;  %v5351_v17 = vld [vmem:[%s8968_s9 + $0x1d0] sm:$0xff] }
 0x1d4   : > { %v2193_v37 = vadd.f32 %v2137_v10, %v2021_v19  ;;  %2422 = vmatmul.f32.gmra.mxu2 %v9309_v14  ;;  %v2140_v7 = vpop.f32.mrf.mxu0  ;;  %v9313_v10 = vld [vmem:[#allocation75_spill] sm:$0xff]  ;;  %3934 = vmatpush.msrb.mxu0 %v5351_v17 }
 0x1d5   : > { %2594 = vmatmul.f32.gmra.mxu3 %v9310_v47  ;;  %v2309_v6 = vpop.f32.mrf.mxu1  ;;  %v9314_v14 = vld [vmem:[#allocation43_spill] sm:$0xff] }
 0x1d6   : > { %v7340_v31 = vadd.f32 %v2306_v26, %v2193_v37  ;;  %v5384_v26 = vld [vmem:[%s8968_s9 + $0x258] sm:$0xff]  ;;  %v5318_v17 = vld [vmem:[%s8968_s9 + $0xc8] sm:$0xff] }
 0x1d7   : > { %v1806_v0 = vpop.f32.mrf.mxu2  ;;  %2763 = vmatmul.f32.gmra.mxu0 %v6708_v4  ;;  %4105 = vmatpush.msrb.mxu1 %v5384_v26  ;;  %v9315_v4 = vld [vmem:[#allocation49_spill] sm:$0xff] }
 0x1d8   : > { %9312 = vst [vmem:[#allocation47_spill] sm:$0xff] %v7340_v31  ;;  %v1968_v12 = vpop.f32.mrf.mxu3  ;;  %v1860_v43 = vadd.f32 %v1806_v0, %v9313_v10  ;;  %3202 = vmatmul.f32.gmra.mxu1 %v7337_v29  ;;  %v7357_v0 = vmax.f32 %v3002_v24, 0.0  ;;  %v9318_v24 = vld [vmem:[#allocation76_spill] sm:$0xff]  ;;  %v7377_v31 = vmax.f32 %v3003_v22, 0.0  ;;  %3499 = vmatpush.msrb.mxu2 %v5318_v17 }
 0x1d9   : > { %v9331_v17 = vld [vmem:[#allocation56_spill] sm:$0xff] }
 0x1da   : > { %v2022_v19 = vadd.f32 %v1968_v12, %v1860_v43  ;;  %9316 = vst [vmem:[#allocation48_spill] sm:$0xff] %v7357_v0 }
 0x1db   : > { %9321 = vst [vmem:[#allocation54_spill] sm:$0xff] %v7377_v31 }
 0x1dc   : > { %v2194_v37 = vadd.f32 %v2140_v7, %v2022_v19  ;;  %5250 = vmatmul.msk.f32.gmra.mxu2 %vm676_vm0, %v9314_v14  ;;  %v2143_v47 = vpop.f32.mrf.mxu0  ;;  %v5335_v7 = vld [vmem:[%s8968_s9 + $0x150] sm:$0xff]  ;;  %v2889_v14 = vld [vmem:[%s7238_s30 + $0x60] sm:$0xff] }
 0x1dd   : > { %2597 = vmatmul.f32.gmra.mxu3 %v9315_v4  ;;  %v2312_v10 = vpop.f32.mrf.mxu1  ;;  %v9319_v4 = vld [vmem:[#allocation46_spill] sm:$0xff] }
 0x1de   : > { %v7363_v12 = vadd.f32 %v2309_v6, %v2194_v37  ;;  %3772 = vmatpush.msrb.mxu3 %v5335_v7 }
 0x1df   : > { %v1809_v43 = vpop.f32.mrf.mxu2  ;;  %2766 = vmatmul.f32.gmra.mxu0 %v6734_v8  ;;  %v2947_v8 = vmul.f32 %v7249_v42, %v2889_v14  ;;  %v2890_v14 = vld [vmem:[%s7238_s30 + $0x68] sm:$0xff] }
 0x1e0   : > { %9317 = vst [vmem:[#allocation51_spill] sm:$0xff] %v7363_v12  ;;  %v1971_v26 = vpop.f32.mrf.mxu3  ;;  %v1861_v19 = vadd.f32 %v1809_v43, %v9318_v24  ;;  %5296 = vmatmul.msk.f32.gmra.mxu1 %vm676_vm0, %v7357_v0 }
 0x1e1   : > { %v3005_v22 = vadd.f32 %v7258_v23, %v2947_v8  ;;  %v2948_v8 = vmul.f32 %v7249_v42, %v2890_v14 }
 0x1e2   : > { %v2023_v6 = vadd.f32 %v1971_v26, %v1861_v19  ;;  %v9324_v19 = vld [vmem:[#allocation77_spill] sm:$0xff] }
 0x1e3   : > { %v3006_v14 = vadd.f32 %v7258_v23, %v2948_v8  ;;  %v5350_v8 = vld [vmem:[%s8968_s9 + $0x1c8] sm:$0xff] }
 0x1e4   : > { %v2195_v37 = vadd.f32 %v2143_v47, %v2023_v6  ;;  %2428 = vmatmul.f32.gmra.mxu2 %v9319_v4  ;;  %v2146_v12 = vpop.f32.mrf.mxu0  ;;  %v9323_v47 = vld [vmem:[#allocation79_spill] sm:$0xff]  ;;  %3935 = vmatpush.msrb.mxu0 %v5350_v8  ;;  %v5317_v8 = vld [vmem:[%s8968_s9 + $0xc0] sm:$0xff] }
 0x1e5   : > { %2600 = vmatmul.f32.gmra.mxu3 %v9320_v57  ;;  %v2315_v7 = vpop.f32.mrf.mxu1  ;;  %v9325_v57 = vld [vmem:[#allocation53_spill] sm:$0xff]  ;;  %v7417_v0 = vmax.f32 %v3006_v14, 0.0  ;;  %v2893_v14 = vld [vmem:[%s7238_s30 + $0x80] sm:$0xff]  ;;  %3500 = vmatpush.msrb.mxu2 %v5317_v8  ;;  %v9343_v8 = vld [vmem:[#allocation64_spill] sm:$0xff] }
 0x1e6   : > { %v7380_v43 = vadd.f32 %v2312_v10, %v2195_v37  ;;  %v5383_v10 = vld [vmem:[%s8968_s9 + $0x250] sm:$0xff] }
 0x1e7   : > { %v1812_v24 = vpop.f32.mrf.mxu2  ;;  %2769 = vmatmul.f32.gmra.mxu0 %v9323_v47  ;;  %4106 = vmatpush.msrb.mxu1 %v5383_v10  ;;  %v9326_v47 = vld [vmem:[#allocation58_spill] sm:$0xff]  ;;  %9333 = vst [vmem:[#allocation4_spill] sm:$0xff] %v7417_v0 }
 0x1e8   : > { %9322 = vst [vmem:[#allocation62_spill] sm:$0xff] %v7380_v43  ;;  %v1974_v26 = vpop.f32.mrf.mxu3  ;;  %v1862_v6 = vadd.f32 %v1812_v24, %v9324_v19  ;;  %3208 = vmatmul.f32.gmra.mxu1 %v7377_v31  ;;  %v7397_v19 = vmax.f32 %v3005_v22, 0.0  ;;  %v9330_v22 = vld [vmem:[#allocation78_spill] sm:$0xff] }
 0x1ea   : > { %v2024_v37 = vadd.f32 %v1974_v26, %v1862_v6  ;;  %9327 = vst [vmem:[#allocation66_spill] sm:$0xff] %v7397_v19 }
 0x1ec   : > { %v2196_v4 = vadd.f32 %v2146_v12, %v2024_v37  ;;  %5251 = vmatmul.msk.f32.gmra.mxu2 %vm676_vm0, %v9325_v57  ;;  %v2149_v24 = vpop.f32.mrf.mxu0  ;;  %v5334_v12 = vld [vmem:[%s8968_s9 + $0x148] sm:$0xff]  ;;  %v9329_v37 = vld [vmem:[#allocation81_spill] sm:$0xff] }
 0x1ed   : > { %2603 = vmatmul.f32.gmra.mxu3 %v9326_v47  ;;  %v2318_v43 = vpop.f32.mrf.mxu1  ;;  %v2892_v47 = vld [vmem:[%s7238_s30 + $0x78] sm:$0xff] }
 0x1ee   : > { %v7403_v26 = vadd.f32 %v2315_v7, %v2196_v4  ;;  %3773 = vmatpush.msrb.mxu3 %v5334_v12  ;;  %v2950_v12 = vmul.f32 %v7249_v42, %v2892_v47 }
 0x1ef   : > { %v1815_v6 = vpop.f32.mrf.mxu2  ;;  %2772 = vmatmul.f32.gmra.mxu0 %v9329_v37 }
 0x1f0   : > { %9328 = vst [vmem:[#allocation68_spill] sm:$0xff] %v7403_v26  ;;  %v1977_v10 = vpop.f32.mrf.mxu3  ;;  %v1863_v57 = vadd.f32 %v1815_v6, %v9330_v22  ;;  %5297 = vmatmul.msk.f32.gmra.mxu1 %vm676_vm0, %v7397_v19  ;;  %v9332_v26 = vld [vmem:[#allocation63_spill] sm:$0xff] }
 0x1f2   : > { %v2025_v7 = vadd.f32 %v1977_v10, %v1863_v57  ;;  %v9336_v57 = vld [vmem:[#allocation80_spill] sm:$0xff] }
 0x1f4   : > { %v2197_v4 = vadd.f32 %v2149_v24, %v2025_v7  ;;  %2434 = vmatmul.f32.gmra.mxu2 %v9331_v17  ;;  %v2152_v31 = vpop.f32.mrf.mxu0  ;;  %v9335_v24 = vld [vmem:[#allocation83_spill] sm:$0xff]  ;;  %v9337_v17 = vld [vmem:[#allocation61_spill] sm:$0xff] }
 0x1f5   : > { %2606 = vmatmul.f32.gmra.mxu3 %v9332_v26  ;;  %v2321_v6 = vpop.f32.mrf.mxu1  ;;  %v3008_v26 = vadd.f32 %v7258_v23, %v2950_v12  ;;  %v2951_v12 = vmul.f32 %v7249_v42, %v2893_v14 }
 0x1f6   : > { %v7420_v37 = vadd.f32 %v2318_v43, %v2197_v4  ;;  %v5382_v43 = vld [vmem:[%s8968_s9 + $0x248] sm:$0xff] }
 0x1f7   : > { %v1818_v22 = vpop.f32.mrf.mxu2  ;;  %2775 = vmatmul.f32.gmra.mxu0 %v9335_v24  ;;  %4107 = vmatpush.msrb.mxu1 %v5382_v43  ;;  %v9338_v24 = vld [vmem:[#allocation67_spill] sm:$0xff]  ;;  %v3009_v14 = vadd.f32 %v7258_v23, %v2951_v12  ;;  %v5349_v12 = vld [vmem:[%s8968_s9 + $0x1c0] sm:$0xff] }
 0x1f8   : > { %9334 = vst [vmem:[#allocation17_spill] sm:$0xff] %v7420_v37  ;;  %v1980_v10 = vpop.f32.mrf.mxu3  ;;  %v1864_v7 = vadd.f32 %v1818_v22, %v9336_v57  ;;  %3214 = vmatmul.f32.gmra.mxu1 %v7417_v0  ;;  %v7437_v57 = vmax.f32 %v3008_v26, 0.0  ;;  %v9342_v26 = vld [vmem:[#allocation82_spill] sm:$0xff]  ;;  %3936 = vmatpush.msrb.mxu0 %v5349_v12  ;;  %v5316_v12 = vld [vmem:[%s8968_s9 + $0xb8] sm:$0xff] }
 0x1f9   : > { %v7457_v19 = vmax.f32 %v3009_v14, 0.0  ;;  %v2896_v14 = vld [vmem:[%s7238_s30 + $0x98] sm:$0xff]  ;;  %3501 = vmatpush.msrb.mxu2 %v5316_v12  ;;  %v9355_v12 = vld [vmem:[#allocation3_spill] sm:$0xff] }
 0x1fa   : > { %v2026_v47 = vadd.f32 %v1980_v10, %v1864_v7  ;;  %9339 = vst [vmem:[#allocation25_spill] sm:$0xff] %v7437_v57 }
 0x1fb   : > { %9345 = vst [vmem:[#allocation23_spill] sm:$0xff] %v7457_v19 }
 0x1fc   : > { %v2198_v4 = vadd.f32 %v2152_v31, %v2026_v47  ;;  %5252 = vmatmul.msk.f32.gmra.mxu2 %vm676_vm0, %v9337_v17  ;;  %v2155_v22 = vpop.f32.mrf.mxu0  ;;  %v5333_v31 = vld [vmem:[%s8968_s9 + $0x140] sm:$0xff]  ;;  %v9341_v47 = vld [vmem:[#allocation85_spill] sm:$0xff] }
 0x1fd   : > { %2609 = vmatmul.f32.gmra.mxu3 %v9338_v24  ;;  %v2324_v37 = vpop.f32.mrf.mxu1  ;;  %v2895_v24 = vld [vmem:[%s7238_s30 + $0x90] sm:$0xff] }
 0x1fe   : > { %v7443_v10 = vadd.f32 %v2321_v6, %v2198_v4  ;;  %3774 = vmatpush.msrb.mxu3 %v5333_v31  ;;  %v2953_v31 = vmul.f32 %v7249_v42, %v2895_v24 }
 0x1ff   : > { %v1821_v7 = vpop.f32.mrf.mxu2  ;;  %2778 = vmatmul.f32.gmra.mxu0 %v9341_v47 }
 0x200   : > { %9340 = vst [vmem:[#allocation71_spill] sm:$0xff] %v7443_v10  ;;  %v1983_v43 = vpop.f32.mrf.mxu3  ;;  %v1865_v17 = vadd.f32 %v1821_v7, %v9342_v26  ;;  %5298 = vmatmul.msk.f32.gmra.mxu1 %vm676_vm0, %v7437_v57  ;;  %v9344_v10 = vld [vmem:[#allocation69_spill] sm:$0xff] }
 0x202   : > { %v2027_v6 = vadd.f32 %v1983_v43, %v1865_v17  ;;  %v9348_v17 = vld [vmem:[#allocation84_spill] sm:$0xff] }
 0x204   : > { %v2199_v4 = vadd.f32 %v2155_v22, %v2027_v6  ;;  %2440 = vmatmul.f32.gmra.mxu2 %v9343_v8  ;;  %v2158_v0 = vpop.f32.mrf.mxu0  ;;  %v9347_v22 = vld [vmem:[#allocation87_spill] sm:$0xff]  ;;  %v9349_v8 = vld [vmem:[#allocation2_spill] sm:$0xff] }
 0x205   : > { %2612 = vmatmul.f32.gmra.mxu3 %v9344_v10  ;;  %v2327_v7 = vpop.f32.mrf.mxu1  ;;  %v3011_v10 = vadd.f32 %v7258_v23, %v2953_v31  ;;  %v2954_v31 = vmul.f32 %v7249_v42, %v2896_v14 }
 0x206   : > { %v7460_v47 = vadd.f32 %v2324_v37, %v2199_v4  ;;  %v5381_v37 = vld [vmem:[%s8968_s9 + $0x240] sm:$0xff] }
 0x207   : > { %v1824_v26 = vpop.f32.mrf.mxu2  ;;  %2781 = vmatmul.f32.gmra.mxu0 %v9347_v22  ;;  %4108 = vmatpush.msrb.mxu1 %v5381_v37  ;;  %v9350_v22 = vld [vmem:[#allocation5_spill] sm:$0xff]  ;;  %v3012_v14 = vadd.f32 %v7258_v23, %v2954_v31 }
 0x208   : > { %9346 = vst [vmem:[#allocation29_spill] sm:$0xff] %v7460_v47  ;;  %v1986_v43 = vpop.f32.mrf.mxu3  ;;  %v1866_v6 = vadd.f32 %v1824_v26, %v9348_v17  ;;  %3220 = vmatmul.f32.gmra.mxu1 %v7457_v19  ;;  %v7477_v17 = vmax.f32 %v3011_v10, 0.0  ;;  %v9354_v10 = vld [vmem:[#allocation86_spill] sm:$0xff]  ;;  %v5348_v31 = vld [vmem:[%s8968_s9 + $0x1b8] sm:$0xff] }
 0x209   : > { %v7497_v57 = vmax.f32 %v3012_v14, 0.0  ;;  %3937 = vmatpush.msrb.mxu0 %v5348_v31  ;;  %v2899_v14 = vld [vmem:[%s7238_s30 + $0xb0] sm:$0xff] }
 0x20a   : > { %v2028_v24 = vadd.f32 %v1986_v43, %v1866_v6  ;;  %9351 = vst [vmem:[#allocation72_spill] sm:$0xff] %v7477_v17  ;;  %v5315_v31 = vld [vmem:[%s8968_s9 + $0xb0] sm:$0xff] }
 0x20b   : > { %9357 = vst [vmem:[#allocation35_spill] sm:$0xff] %v7497_v57  ;;  %3502 = vmatpush.msrb.mxu2 %v5315_v31  ;;  %v9366_v31 = vld [vmem:[#allocation14_spill] sm:$0xff] }
 0x20c   : > { %v2200_v4 = vadd.f32 %v2158_v0, %v2028_v24  ;;  %5253 = vmatmul.msk.f32.gmra.mxu2 %vm676_vm0, %v9349_v8  ;;  %v2161_v26 = vpop.f32.mrf.mxu0  ;;  %v5332_v0 = vld [vmem:[%s8968_s9 + $0x138] sm:$0xff] }
 0x20d   : > { %2615 = vmatmul.f32.gmra.mxu3 %v9350_v22  ;;  %v2330_v47 = vpop.f32.mrf.mxu1  ;;  %v9353_v24 = vld [vmem:[#allocation89_spill] sm:$0xff]  ;;  %v2898_v22 = vld [vmem:[%s7238_s30 + $0xa8] sm:$0xff] }
 0x20e   : > { %v7483_v43 = vadd.f32 %v2327_v7, %v2200_v4  ;;  %3775 = vmatpush.msrb.mxu3 %v5332_v0  ;;  %v2956_v0 = vmul.f32 %v7249_v42, %v2898_v22 }
 0x20f   : > { %v1827_v6 = vpop.f32.mrf.mxu2  ;;  %2784 = vmatmul.f32.gmra.mxu0 %v9353_v24 }
 0x210   : > { %9352 = vst [vmem:[#allocation26_spill] sm:$0xff] %v7483_v43  ;;  %v1989_v37 = vpop.f32.mrf.mxu3  ;;  %v1867_v8 = vadd.f32 %v1827_v6, %v9354_v10  ;;  %5299 = vmatmul.msk.f32.gmra.mxu1 %vm676_vm0, %v7477_v17  ;;  %v9356_v43 = vld [vmem:[#allocation8_spill] sm:$0xff] }
 0x212   : > { %v2029_v7 = vadd.f32 %v1989_v37, %v1867_v8 }
 0x214   : > { %v2201_v4 = vadd.f32 %v2161_v26, %v2029_v7  ;;  %2446 = vmatmul.f32.gmra.mxu2 %v9355_v12  ;;  %v2164_v19 = vpop.f32.mrf.mxu0  ;;  %v9359_v26 = vld [vmem:[#allocation88_spill] sm:$0xff] }
 0x215   : > { %2618 = vmatmul.f32.gmra.mxu3 %v9356_v43  ;;  %v2333_v6 = vpop.f32.mrf.mxu1  ;;  %v3014_v43 = vadd.f32 %v7258_v23, %v2956_v0  ;;  %v2957_v0 = vmul.f32 %v7249_v42, %v2899_v14 }
 0x216   : > { %v7500_v24 = vadd.f32 %v2330_v47, %v2201_v4  ;;  %v5380_v47 = vld [vmem:[%s8968_s9 + $0x238] sm:$0xff]  ;;  %v9360_v4 = vld [vmem:[#allocation7_spill] sm:$0xff] }
 0x217   : > { %v1830_v10 = vpop.f32.mrf.mxu2  ;;  %2787 = vmatmul.f32.gmra.mxu0 %v6877_v30  ;;  %4109 = vmatpush.msrb.mxu1 %v5380_v47  ;;  %v9361_v30 = vld [vmem:[#allocation11_spill] sm:$0xff]  ;;  %v3015_v14 = vadd.f32 %v7258_v23, %v2957_v0  ;;  %v5347_v0 = vld [vmem:[%s8968_s9 + $0x1b0] sm:$0xff] }
 0x218   : > { %9358 = vst [vmem:[#allocation73_spill] sm:$0xff] %v7500_v24  ;;  %v1992_v37 = vpop.f32.mrf.mxu3  ;;  %v1868_v8 = vadd.f32 %v1830_v10, %v9359_v26  ;;  %3226 = vmatmul.f32.gmra.mxu1 %v7497_v57  ;;  %v7517_v10 = vmax.f32 %v3014_v43, 0.0  ;;  %v9364_v43 = vld [vmem:[#allocation90_spill] sm:$0xff]  ;;  %3938 = vmatpush.msrb.mxu0 %v5347_v0  ;;  %v5314_v0 = vld [vmem:[%s8968_s9 + $0xa8] sm:$0xff] }
 0x219   : > { %v7537_v24 = vmax.f32 %v3015_v14, 0.0  ;;  %3503 = vmatpush.msrb.mxu2 %v5314_v0 }
 0x21a   : > { %v2030_v22 = vadd.f32 %v1992_v37, %v1868_v8  ;;  %9362 = vst [vmem:[#allocation33_spill] sm:$0xff] %v7517_v10 }
 0x21b   : > { %9367 = vst [vmem:[#allocation74_spill] sm:$0xff] %v7537_v24 }
 0x21c   : > { %v2202_v7 = vadd.f32 %v2164_v19, %v2030_v22  ;;  %5254 = vmatmul.msk.f32.gmra.mxu2 %vm676_vm0, %v9360_v4  ;;  %v2167_v12 = vpop.f32.mrf.mxu0  ;;  %v5331_v19 = vld [vmem:[%s8968_s9 + $0x130] sm:$0xff]  ;;  %v2901_v4 = vld [vmem:[%s7238_s30 + $0xc0] sm:$0xff] }
 0x21d   : > { %2621 = vmatmul.f32.gmra.mxu3 %v9361_v30  ;;  %v2336_v26 = vpop.f32.mrf.mxu1  ;;  %v9365_v30 = vld [vmem:[#allocation9_spill] sm:$0xff] }
 0x21e   : > { %v7523_v37 = vadd.f32 %v2333_v6, %v2202_v7  ;;  %3776 = vmatpush.msrb.mxu3 %v5331_v19 }
 0x21f   : > { %v1833_v8 = vpop.f32.mrf.mxu2  ;;  %2790 = vmatmul.f32.gmra.mxu0 %v6899_v62  ;;  %v2959_v62 = vmul.f32 %v7249_v42, %v2901_v4  ;;  %v2902_v4 = vld [vmem:[%s7238_s30 + $0xc8] sm:$0xff] }
 0x220   : > { %9363 = vst [vmem:[#allocation39_spill] sm:$0xff] %v7523_v37  ;;  %v1995_v47 = vpop.f32.mrf.mxu3  ;;  %v1869_v22 = vadd.f32 %v1833_v8, %v9364_v43  ;;  %5300 = vmatmul.msk.f32.gmra.mxu1 %vm676_vm0, %v7517_v10 }
 0x221   : > { %v3017_v14 = vadd.f32 %v7258_v23, %v2959_v62  ;;  %v2960_v62 = vmul.f32 %v7249_v42, %v2902_v4  ;;  %v2904_v4 = vld [vmem:[%s7238_s30 + $0xd8] sm:$0xff] }
 0x222   : > { %v2031_v6 = vadd.f32 %v1995_v47, %v1869_v22 }
 0x224   : > { %v2203_v7 = vadd.f32 %v2167_v12, %v2031_v6  ;;  %2452 = vmatmul.f32.gmra.mxu2 %v9365_v30  ;;  %v2170_v37 = vpop.f32.mrf.mxu0  ;;  %v9368_v12 = vld [vmem:[#allocation91_spill] sm:$0xff]  ;;  %v9369_v30 = vld [vmem:[#allocation13_spill] sm:$0xff] }
 0x225   : > { %2624 = vmatmul.f32.gmra.mxu3 %v9366_v31  ;;  %v2339_v19 = vpop.f32.mrf.mxu1  ;;  %v7557_v31 = vmax.f32 %v3017_v14, 0.0 }
 0x226   : > { %v7540_v8 = vadd.f32 %v2336_v26, %v2203_v7  ;;  %v5379_v26 = vld [vmem:[%s8968_s9 + $0x230] sm:$0xff] }
 0x227   : > { %v1836_v43 = vpop.f32.mrf.mxu2  ;;  %2793 = vmatmul.f32.gmra.mxu0 %v6912_v41  ;;  %4110 = vmatpush.msrb.mxu1 %v5379_v26  ;;  %9370 = vst [vmem:[#allocation36_spill] sm:$0xff] %v7557_v31  ;;  %v3018_v26 = vadd.f32 %v7258_v23, %v2960_v62  ;;  %v5346_v62 = vld [vmem:[%s8968_s9 + $0x1a8] sm:$0xff] }
 0x228   : > { %v1998_v47 = vpop.f32.mrf.mxu3  ;;  %v1870_v22 = vadd.f32 %v1836_v43, %v9368_v12  ;;  %3232 = vmatmul.f32.gmra.mxu1 %v7537_v24  ;;  %3939 = vmatpush.msrb.mxu0 %v5346_v62  ;;  %v5313_v62 = vld [vmem:[%s8968_s9 + $0xa0] sm:$0xff] }
 0x229   : > { %v7577_v0 = vmax.f32 %v3018_v26, 0.0  ;;  %v2905_v26 = vld [vmem:[%s7238_s30 + $0xe0] sm:$0xff]  ;;  %3504 = vmatpush.msrb.mxu2 %v5313_v62 }
 0x22a   : > { %v2032_v6 = vadd.f32 %v1998_v47, %v1870_v22  ;;  %v9371_v22 = vld [vmem:[#allocation10_spill] sm:$0xff] }
 0x22c   : > { %v2204_v7 = vadd.f32 %v2170_v37, %v2032_v6  ;;  %5255 = vmatmul.msk.f32.gmra.mxu2 %vm676_vm0, %v9369_v30  ;;  %v2749_v41 = vpop.f32.mrf.mxu0  ;;  %v5330_v37 = vld [vmem:[%s8968_s9 + $0x128] sm:$0xff] }
 0x22d   : > { %2627 = vmatmul.f32.gmra.mxu3 %v9253_v15  ;;  %v3188_v43 = vpop.f32.mrf.mxu1 }
 0x22e   : > { %v7563_v47 = vadd.f32 %v2339_v19, %v2204_v7  ;;  %3777 = vmatpush.msrb.mxu3 %v5330_v37  ;;  %v9372_v7 = vld [vmem:[#allocation21_spill] sm:$0xff] }
 0x22f   : > { %v2408_v12 = vpop.f32.mrf.mxu2  ;;  %2796 = vmatmul.f32.gmra.mxu0 %v6936_v33  ;;  %v2962_v33 = vmul.f32 %v7249_v42, %v2904_v4 }
 0x230   : > { %v2580_v15 = vpop.f32.mrf.mxu3  ;;  %v2504_v14 = vadd.f32 %v2408_v12, %v9371_v22  ;;  %5301 = vmatmul.msk.f32.gmra.mxu1 %vm676_vm0, %v7557_v31 }
 0x232   : > { %v2676_v19 = vadd.f32 %v2580_v15, %v2504_v14  ;;  %v3020_v14 = vadd.f32 %v7258_v23, %v2962_v33  ;;  %v2963_v33 = vmul.f32 %v7249_v42, %v2905_v26  ;;  %v2907_v26 = vld [vmem:[%s7238_s30 + $0xf0] sm:$0xff] }
 0x234   : > { %v2845_v6 = vadd.f32 %v2749_v41, %v2676_v19  ;;  %2458 = vmatmul.f32.gmra.mxu2 %v9250_v63  ;;  %v2752_v30 = vpop.f32.mrf.mxu0  ;;  %v9373_v63 = vld [vmem:[#allocation12_spill] sm:$0xff] }
 0x235   : > { %2630 = vmatmul.f32.gmra.mxu3 %v9372_v7  ;;  %v3191_v37 = vpop.f32.mrf.mxu1  ;;  %v7597_v7 = vmax.f32 %v3020_v14, 0.0 }
 0x236   : > { %v7580_v12 = vadd.f32 %v3188_v43, %v2845_v6  ;;  %v5378_v43 = vld [vmem:[%s8968_s9 + $0x228] sm:$0xff]  ;;  %v9374_v6 = vld [vmem:[#allocation20_spill] sm:$0xff] }
 0x237   : > { %v2411_v22 = vpop.f32.mrf.mxu2  ;;  %2799 = vmatmul.f32.gmra.mxu0 %v6951_v27  ;;  %4111 = vmatpush.msrb.mxu1 %v5378_v43  ;;  %9375 = vst [vmem:[#allocation45_spill] sm:$0xff] %v7597_v7  ;;  %v3021_v43 = vadd.f32 %v7258_v23, %v2963_v33  ;;  %v5345_v33 = vld [vmem:[%s8968_s9 + $0x1a0] sm:$0xff] }
 0x238   : > { %v2583_v15 = vpop.f32.mrf.mxu3  ;;  %v2505_v41 = vadd.f32 %v2411_v22, %v9373_v63  ;;  %3238 = vmatmul.f32.gmra.mxu1 %v7577_v0  ;;  %3940 = vmatpush.msrb.mxu0 %v5345_v33  ;;  %v5312_v33 = vld [vmem:[%s8968_s9 + $0x98] sm:$0xff] }
 0x239   : > { %v7617_v62 = vmax.f32 %v3021_v43, 0.0  ;;  %v2908_v43 = vld [vmem:[%s7238_s30 + $0xf8] sm:$0xff]  ;;  %3505 = vmatpush.msrb.mxu2 %v5312_v33 }
 0x23a   : > { %v2677_v4 = vadd.f32 %v2583_v15, %v2505_v41  ;;  %v9376_v41 = vld [vmem:[#allocation16_spill] sm:$0xff] }
 0x23c   : > { %v2846_v19 = vadd.f32 %v2752_v30, %v2677_v4  ;;  %5256 = vmatmul.msk.f32.gmra.mxu2 %vm676_vm0, %v9374_v6  ;;  %v2755_v27 = vpop.f32.mrf.mxu0  ;;  %v5329_v30 = vld [vmem:[%s8968_s9 + $0x120] sm:$0xff] }
 0x23d   : > { %2633 = vmatmul.f32.gmra.mxu3 %v9261_v58  ;;  %v3194_v22 = vpop.f32.mrf.mxu1 }
 0x23e   : > { %v7603_v15 = vadd.f32 %v3191_v37, %v2846_v19  ;;  %3778 = vmatpush.msrb.mxu3 %v5329_v30  ;;  %v9377_v19 = vld [vmem:[#allocation31_spill] sm:$0xff] }
 0x23f   : > { %v2414_v63 = vpop.f32.mrf.mxu2  ;;  %2802 = vmatmul.f32.gmra.mxu0 %v6975_v40  ;;  %v2965_v40 = vmul.f32 %v7249_v42, %v2907_v26 }
 0x240   : > { %v2586_v58 = vpop.f32.mrf.mxu3  ;;  %v2506_v14 = vadd.f32 %v2414_v63, %v9376_v41  ;;  %5302 = vmatmul.msk.f32.gmra.mxu1 %vm676_vm0, %v7597_v7 }
 0x242   : > { %v2678_v37 = vadd.f32 %v2586_v58, %v2506_v14  ;;  %v3023_v14 = vadd.f32 %v7258_v23, %v2965_v40  ;;  %v2966_v40 = vmul.f32 %v7249_v42, %v2908_v43  ;;  %v2910_v43 = vld [vmem:[%s7238_s30 + $0x108] sm:$0xff] }
 0x244   : > { %v2847_v4 = vadd.f32 %v2755_v27, %v2678_v37  ;;  %2464 = vmatmul.f32.gmra.mxu2 %v9258_v36  ;;  %v2758_v6 = vpop.f32.mrf.mxu0  ;;  %v9378_v36 = vld [vmem:[#allocation15_spill] sm:$0xff] }
 0x245   : > { %2636 = vmatmul.f32.gmra.mxu3 %v9377_v19  ;;  %v3197_v30 = vpop.f32.mrf.mxu1  ;;  %v7637_v19 = vmax.f32 %v3023_v14, 0.0 }
 0x246   : > { %v7620_v63 = vadd.f32 %v3194_v22, %v2847_v4  ;;  %v5377_v22 = vld [vmem:[%s8968_s9 + $0x220] sm:$0xff] }
 0x247   : > { %v2417_v41 = vpop.f32.mrf.mxu2  ;;  %2805 = vmatmul.f32.gmra.mxu0 %v6990_v3  ;;  %4112 = vmatpush.msrb.mxu1 %v5377_v22  ;;  %v9379_v4 = vld [vmem:[#allocation30_spill] sm:$0xff]  ;;  %9380 = vst [vmem:[#allocation75_spill] sm:$0xff] %v7637_v19  ;;  %v3024_v22 = vadd.f32 %v7258_v23, %v2966_v40  ;;  %v5344_v40 = vld [vmem:[%s8968_s9 + $0x198] sm:$0xff] }
 0x248   : > { %v2589_v58 = vpop.f32.mrf.mxu3  ;;  %v2507_v27 = vadd.f32 %v2417_v41, %v9378_v36  ;;  %3244 = vmatmul.f32.gmra.mxu1 %v7617_v62  ;;  %3941 = vmatpush.msrb.mxu0 %v5344_v40  ;;  %v5311_v40 = vld [vmem:[%s8968_s9 + $0x90] sm:$0xff] }
 0x249   : > { %v7657_v33 = vmax.f32 %v3024_v22, 0.0  ;;  %v2911_v22 = vld [vmem:[%s7238_s30 + $0x110] sm:$0xff]  ;;  %3506 = vmatpush.msrb.mxu2 %v5311_v40 }
 0x24a   : > { %v2679_v26 = vadd.f32 %v2589_v58, %v2507_v27  ;;  %v9381_v27 = vld [vmem:[#allocation18_spill] sm:$0xff] }
 0x24b   : > { %9383 = vst [vmem:[#allocation43_spill] sm:$0xff] %v7657_v33 }
 0x24c   : > { %v2848_v37 = vadd.f32 %v2758_v6, %v2679_v26  ;;  %5257 = vmatmul.msk.f32.gmra.mxu2 %vm676_vm0, %v9379_v4  ;;  %v2761_v3 = vpop.f32.mrf.mxu0  ;;  %v5328_v6 = vld [vmem:[%s8968_s9 + $0x118] sm:$0xff] }
 0x24d   : > { %2639 = vmatmul.f32.gmra.mxu3 %v9269_v45  ;;  %v3200_v41 = vpop.f32.mrf.mxu1 }
 0x24e   : > { %v7643_v58 = vadd.f32 %v3197_v30, %v2848_v37  ;;  %3779 = vmatpush.msrb.mxu3 %v5328_v6  ;;  %v9382_v37 = vld [vmem:[#allocation41_spill] sm:$0xff] }
 0x24f   : > { %v2420_v36 = vpop.f32.mrf.mxu2  ;;  %2808 = vmatmul.f32.gmra.mxu0 %v7014_v51  ;;  %v2968_v51 = vmul.f32 %v7249_v42, %v2910_v43 }
 0x250   : > { %v2592_v45 = vpop.f32.mrf.mxu3  ;;  %v2508_v14 = vadd.f32 %v2420_v36, %v9381_v27  ;;  %5303 = vmatmul.msk.f32.gmra.mxu1 %vm676_vm0, %v7637_v19 }
 0x252   : > { %v2680_v30 = vadd.f32 %v2592_v45, %v2508_v14  ;;  %v3026_v14 = vadd.f32 %v7258_v23, %v2968_v51  ;;  %v2969_v51 = vmul.f32 %v7249_v42, %v2911_v22  ;;  %v2913_v22 = vld [vmem:[%s7238_s30 + $0x120] sm:$0xff] }
 0x254   : > { %v2849_v26 = vadd.f32 %v2761_v3, %v2680_v30  ;;  %2470 = vmatmul.f32.gmra.mxu2 %v9266_v34  ;;  %v2764_v4 = vpop.f32.mrf.mxu0  ;;  %v9384_v34 = vld [vmem:[#allocation19_spill] sm:$0xff] }
 0x255   : > { %2642 = vmatmul.f32.gmra.mxu3 %v9382_v37  ;;  %v3203_v6 = vpop.f32.mrf.mxu1  ;;  %v7677_v37 = vmax.f32 %v3026_v14, 0.0 }
 0x256   : > { %v7660_v36 = vadd.f32 %v3200_v41, %v2849_v26  ;;  %v5376_v41 = vld [vmem:[%s8968_s9 + $0x218] sm:$0xff]  ;;  %v9385_v26 = vld [vmem:[#allocation40_spill] sm:$0xff] }
 0x257   : > { %v2423_v27 = vpop.f32.mrf.mxu2  ;;  %2811 = vmatmul.f32.gmra.mxu0 %v7029_v55  ;;  %4113 = vmatpush.msrb.mxu1 %v5376_v41  ;;  %9386 = vst [vmem:[#allocation49_spill] sm:$0xff] %v7677_v37  ;;  %v3027_v41 = vadd.f32 %v7258_v23, %v2969_v51  ;;  %v5343_v51 = vld [vmem:[%s8968_s9 + $0x190] sm:$0xff] }
 0x258   : > { %v2595_v45 = vpop.f32.mrf.mxu3  ;;  %v2509_v3 = vadd.f32 %v2423_v27, %v9384_v34  ;;  %3250 = vmatmul.f32.gmra.mxu1 %v7657_v33  ;;  %3942 = vmatpush.msrb.mxu0 %v5343_v51 }
 0x25a   : > { %v2681_v43 = vadd.f32 %v2595_v45, %v2509_v3  ;;  %v9387_v3 = vld [vmem:[#allocation24_spill] sm:$0xff] }
 0x25c   : > { %v2850_v30 = vadd.f32 %v2764_v4, %v2681_v43  ;;  %5258 = vmatmul.msk.f32.gmra.mxu2 %vm676_vm0, %v9385_v26  ;;  %v2767_v55 = vpop.f32.mrf.mxu0  ;;  %v5327_v4 = vld [vmem:[%s8968_s9 + $0x110] sm:$0xff]  ;;  %v7697_v26 = vmax.f32 %v3027_v41, 0.0  ;;  %v9389_v41 = vld [vmem:[#allocation50_spill] sm:$0xff] }
 0x25d   : > { %2645 = vmatmul.f32.gmra.mxu3 %v9276_v21  ;;  %v3206_v27 = vpop.f32.mrf.mxu1 }
 0x25e   : > { %v7683_v45 = vadd.f32 %v3203_v6, %v2850_v30  ;;  %3780 = vmatpush.msrb.mxu3 %v5327_v4  ;;  %9388 = vst [vmem:[#allocation76_spill] sm:$0xff] %v7697_v26 }
 0x25f   : > { %v2426_v34 = vpop.f32.mrf.mxu2  ;;  %2814 = vmatmul.f32.gmra.mxu0 %v7053_v53  ;;  %v2971_v53 = vmul.f32 %v7249_v42, %v2913_v22 }
 0x260   : > { %v2598_v21 = vpop.f32.mrf.mxu3  ;;  %v2510_v14 = vadd.f32 %v2426_v34, %v9387_v3  ;;  %5304 = vmatmul.msk.f32.gmra.mxu1 %vm676_vm0, %v7677_v37 }
 0x262   : > { %v2682_v6 = vadd.f32 %v2598_v21, %v2510_v14 }
 0x264   : > { %v2851_v43 = vadd.f32 %v2767_v55, %v2682_v6  ;;  %2476 = vmatmul.f32.gmra.mxu2 %v9274_v48  ;;  %v2770_v30 = vpop.f32.mrf.mxu0  ;;  %v5375_v55 = vld [vmem:[%s8968_s9 + $0x210] sm:$0xff] }
 0x265   : > { %2648 = vmatmul.f32.gmra.mxu3 %v9279_v60  ;;  %v3209_v40 = vpop.f32.mrf.mxu1  ;;  %v3029_v60 = vadd.f32 %v7258_v23, %v2971_v53  ;;  %4114 = vmatpush.msrb.mxu1 %v5375_v55 }
 0x266   : > { %v7700_v4 = vadd.f32 %v3206_v27, %v2851_v43  ;;  %v2914_v27 = vld [vmem:[%s7238_s30 + $0x128] sm:$0xff] }
 0x267   : > { %v2429_v34 = vpop.f32.mrf.mxu2  ;;  %2817 = vmatmul.f32.gmra.mxu0 %v7068_v16  ;;  %v9390_v16 = vld [vmem:[#allocation57_spill] sm:$0xff]  ;;  %v7717_v22 = vmax.f32 %v3029_v60, 0.0  ;;  %v2972_v6 = vmul.f32 %v7249_v42, %v2914_v27  ;;  %v5310_v43 = vld [vmem:[%s8968_s9 + $0x88] sm:$0xff]  ;;  %v9394_v60 = vld [vmem:[#allocation22_spill] sm:$0xff] }
 0x268   : > { %v2601_v21 = vpop.f32.mrf.mxu3  ;;  %v2511_v48 = vadd.f32 %v2429_v34, %v7057_v38  ;;  %3256 = vmatmul.f32.gmra.mxu1 %v7697_v26  ;;  %3507 = vmatpush.msrb.mxu2 %v5310_v43 }
 0x269   : > { %9391 = vst [vmem:[#allocation46_spill] sm:$0xff] %v7717_v22  ;;  %v3030_v27 = vadd.f32 %v7258_v23, %v2972_v6  ;;  %v5342_v6 = vld [vmem:[%s8968_s9 + $0x188] sm:$0xff] }
 0x26a   : > { %v2683_v3 = vadd.f32 %v2601_v21, %v2511_v48  ;;  %v9393_v48 = vld [vmem:[#allocation27_spill] sm:$0xff]  ;;  %3943 = vmatpush.msrb.mxu0 %v5342_v6 }
 0x26c   : > { %v2852_v14 = vadd.f32 %v2770_v30, %v2683_v3  ;;  %5259 = vmatmul.msk.f32.gmra.mxu2 %vm676_vm0, %v9389_v41  ;;  %v2773_v38 = vpop.f32.mrf.mxu0  ;;  %v5326_v30 = vld [vmem:[%s8968_s9 + $0x108] sm:$0xff]  ;;  %v2916_v3 = vld [vmem:[%s7238_s30 + $0x138] sm:$0xff]  ;;  %v9395_v41 = vld [vmem:[#allocation52_spill] sm:$0xff] }
 0x26d   : > { %2651 = vmatmul.f32.gmra.mxu3 %v9390_v16  ;;  %v3212_v53 = vpop.f32.mrf.mxu1  ;;  %v9396_v16 = vld [vmem:[#allocation60_spill] sm:$0xff] }
 0x26e   : > { %v7723_v51 = vadd.f32 %v3209_v40, %v2852_v14  ;;  %3781 = vmatpush.msrb.mxu3 %v5326_v30  ;;  %v2974_v30 = vmul.f32 %v7249_v42, %v2916_v3  ;;  %v2917_v3 = vld [vmem:[%s7238_s30 + $0x140] sm:$0xff] }
 0x26f   : > { %v2432_v34 = vpop.f32.mrf.mxu2  ;;  %2820 = vmatmul.f32.gmra.mxu0 %v9393_v48 }
 0x270   : > { %9392 = vst [vmem:[#allocation55_spill] sm:$0xff] %v7723_v51  ;;  %v2604_v21 = vpop.f32.mrf.mxu3  ;;  %v2512_v55 = vadd.f32 %v2432_v34, %v9394_v60  ;;  %5305 = vmatmul.msk.f32.gmra.mxu1 %vm676_vm0, %v7717_v22  ;;  %v7737_v51 = vmax.f32 %v3030_v27, 0.0  ;;  %v3032_v27 = vadd.f32 %v7258_v23, %v2974_v30  ;;  %v2975_v23 = vmul.f32 %v7249_v42, %v2917_v3  ;;  %v5309_v30 = vld [vmem:[%s8968_s9 + $0x80] sm:$0xff]  ;;  %v2919_v3 = vld [vmem:[%s7238_s30 + $0x150] sm:$0xff] }
 0x271   : > { %3508 = vmatpush.msrb.mxu2 %v5309_v30  ;;  %v7776_v42 = vld [vmem:[%s8967_s8] ss:$0 sm:$0xff] }
 0x272   : > { %v2684_v40 = vadd.f32 %v2604_v21, %v2512_v55  ;;  %9397 = vst [vmem:[#allocation79_spill] sm:$0xff] %v7737_v51 }
 0x274   : > { %v2853_v14 = vadd.f32 %v2773_v38, %v2684_v40  ;;  %2482 = vmatmul.f32.gmra.mxu2 %v9395_v41  ;;  %v2776_v43 = vpop.f32.mrf.mxu0  ;;  %v9398_v38 = vld [vmem:[#allocation28_spill] sm:$0xff]  ;;  %v9399_v41 = vld [vmem:[#allocation59_spill] sm:$0xff] }
 0x275   : > { %2654 = vmatmul.f32.gmra.mxu3 %v9396_v16  ;;  %v3215_v34 = vpop.f32.mrf.mxu1 }
 0x276   : > { %v7740_v48 = vadd.f32 %v3212_v53, %v2853_v14  ;;  %v5374_v53 = vld [vmem:[%s8968_s9 + $0x208] sm:$0xff] }
 0x277   : > { %v2435_v60 = vpop.f32.mrf.mxu2  ;;  %2823 = vmatmul.f32.gmra.mxu0 %v7108_v54  ;;  %4115 = vmatpush.msrb.mxu1 %v5374_v53  ;;  %v9400_v54 = vld [vmem:[#allocation65_spill] sm:$0xff] }
 0x278   : > { %v2607_v21 = vpop.f32.mrf.mxu3  ;;  %v2513_v55 = vadd.f32 %v2435_v60, %v9398_v38  ;;  %3262 = vmatmul.f32.gmra.mxu1 %v7737_v51  ;;  %v7757_v60 = vmax.f32 %v3032_v27, 0.0  ;;  %v9402_v27 = vld [vmem:[#allocation34_spill] sm:$0xff] }
 0x27a   : > { %v2685_v40 = vadd.f32 %v2607_v21, %v2513_v55  ;;  %9401 = vst [vmem:[#allocation77_spill] sm:$0xff] %v7757_v60 }
 0x27c   : > { %v2854_v14 = vadd.f32 %v2776_v43, %v2685_v40  ;;  %5260 = vmatmul.msk.f32.gmra.mxu2 %vm676_vm0, %v9399_v41  ;;  %v2779_v16 = vpop.f32.mrf.mxu0  ;;  %v5325_v43 = vld [vmem:[%s8968_s9 + $0x100] sm:$0xff] }
 0x27d   : > { %2657 = vmatmul.f32.gmra.mxu3 %v9400_v54  ;;  %v3218_v6 = vpop.f32.mrf.mxu1  ;;  %v7787_v54 = vld [vmem:[%s8966_s7] ss:$0 sm:$0xff] }
 0x27e   : > { %v7763_v21 = vadd.f32 %v3215_v34, %v2854_v14  ;;  %3782 = vmatpush.msrb.mxu3 %v5325_v43  ;;  %v3033_v34 = vadd.f32 %v7776_v42, %v2975_v23  ;;  %v2977_v30 = vmul.f32 %v7787_v54, %v2919_v3 }
 0x27f   : > { %v2438_v38 = vpop.f32.mrf.mxu2  ;;  %2826 = vmatmul.f32.gmra.mxu0 %v7140_v56 }
 0x280   : > { %v2610_v55 = vpop.f32.mrf.mxu3  ;;  %v2514_v53 = vadd.f32 %v2438_v38, %v9402_v27  ;;  %5306 = vmatmul.msk.f32.gmra.mxu1 %vm676_vm0, %v7757_v60  ;;  %v7782_v41 = vmax.f32 %v3033_v34, 0.0  ;;  %v9404_v38 = vld [vmem:[#allocation32_spill] sm:$0xff]  ;;  %v3035_v27 = vadd.f32 %v7776_v42, %v2977_v30  ;;  %v5404_v30 = vld [vmem:[%s8968_s9 + $0x2f8] sm:$0xff] }
 0x281   : > { %4270 = vmatpush.msra.mxu2 %v5404_v30 }
 0x282   : > { %v2686_v40 = vadd.f32 %v2610_v55, %v2514_v53  ;;  %9403 = vst [vmem:[#allocation53_spill] sm:$0xff] %v7782_v41  ;;  %v2920_v53 = vld [vmem:[%s7238_s30 + $0x158] sm:$0xff] }
 0x284   : > { %v2855_v14 = vadd.f32 %v2779_v16, %v2686_v40  ;;  %2488 = vmatmul.f32.gmra.mxu2 %v6465_v18  ;;  %v2782_v56 = vpop.f32.mrf.mxu0  ;;  %v5341_v18 = vld [vmem:[%s8968_s9 + $0x180] sm:$0xff]  ;;  %v7807_v40 = vmax.f32 %v3035_v27, 0.0 }
 0x285   : > { %2660 = vmatmul.f32.gmra.mxu3 %v9291_v1  ;;  %v3221_v43 = vpop.f32.mrf.mxu1  ;;  %3944 = vmatpush.msrb.mxu0 %v5341_v18 }
 0x286   : > { %v7790_v23 = vadd.f32 %v3218_v6, %v2855_v14  ;;  %v5373_v6 = vld [vmem:[%s8968_s9 + $0x200] sm:$0xff]  ;;  %9405 = vst [vmem:[#allocation58_spill] sm:$0xff] %v7807_v40  ;;  %v2978_v14 = vmul.f32 %v7787_v54, %v2920_v53 }
 0x287   : > { %v2441_v16 = vpop.f32.mrf.mxu2  ;;  %2829 = vmatmul.f32.gmra.mxu0 %v7162_v9  ;;  %4116 = vmatpush.msrb.mxu1 %v5373_v6 }
 0x288   : > { %v2613_v1 = vpop.f32.mrf.mxu3  ;;  %v2515_v55 = vadd.f32 %v2441_v16, %v9404_v38  ;;  %3268 = vmatmul.f32.gmra.mxu1 %v7782_v41  ;;  %v3036_v38 = vadd.f32 %v7776_v42, %v2978_v14 }
 0x28a   : > { %v2687_v34 = vadd.f32 %v2613_v1, %v2515_v55  ;;  %v2922_v55 = vld [vmem:[%s7238_s30 + $0x168] sm:$0xff]  ;;  %v7827_v53 = vmax.f32 %v3036_v38, 0.0  ;;  %v5403_v38 = vld [vmem:[%s8968_s9 + $0x2f0] sm:$0xff] }
 0x28b   : > { %4271 = vmatpush.msra.mxu2 %v5403_v38 }
 0x28c   : > { %v2856_v3 = vadd.f32 %v2782_v56, %v2687_v34  ;;  %5261 = vmatmul.msk.f32.gmra.mxu2 %vm676_vm0, %v7155_v44  ;;  %v2785_v9 = vpop.f32.mrf.mxu0  ;;  %v5420_v44 = vld [vmem:[%s8968_s9 + $0x378] sm:$0xff]  ;;  %9406 = vst [vmem:[#allocation81_spill] sm:$0xff] %v7827_v53 }
 0x28d   : > { %2663 = vmatmul.f32.gmra.mxu3 %v7186_v5  ;;  %v3224_v18 = vpop.f32.mrf.mxu1 }
 0x28e   : > { %v7813_v16 = vadd.f32 %v3221_v43, %v2856_v3  ;;  %4432 = vmatpush.msra.mxu3 %v5420_v44  ;;  %v5451_v3 = vld [vmem:[%s8968_s9 + $0x3f8] sm:$0xff] }
 0x28f   : > { %v2444_v56 = vpop.f32.mrf.mxu2  ;;  %2832 = vmatmul.f32.gmra.mxu0 %v7192_v11  ;;  %v2980_v11 = vmul.f32 %v7787_v54, %v2922_v55 }
 0x290   : > { %v2616_v5 = vpop.f32.mrf.mxu3  ;;  %v2516_v1 = vadd.f32 %v2444_v56, %v7169_v61  ;;  %5307 = vmatmul.msk.f32.gmra.mxu1 %vm676_vm0, %v7807_v40  ;;  %4604 = vmatpush.msra.mxu0 %v5451_v3  ;;  %v9410_v3 = vld [vmem:[#allocation70_spill] sm:$0xff] }
 0x292   : > { %v2688_v43 = vadd.f32 %v2616_v5, %v2516_v1  ;;  %v9407_v5 = vld [vmem:[#allocation6_spill] sm:$0xff] }
 0x294   : > { %v2857_v27 = vadd.f32 %v2785_v9, %v2688_v43  ;;  %2494 = vmatmul.f32.gmra.mxu2 %v7159_v2  ;;  %v2788_v6 = vpop.f32.mrf.mxu0  ;;  %v5467_v9 = vld [vmem:[%s8968_s9 + $0x478] sm:$0xff] }
 0x295   : > { %2666 = vmatmul.f32.gmra.mxu3 %v7208_v39  ;;  %v3227_v61 = vpop.f32.mrf.mxu1  ;;  %v3038_v39 = vadd.f32 %v7776_v42, %v2980_v11  ;;  %4773 = vmatpush.msra.mxu1 %v5467_v9 }
 0x296   : > { %v7830_v34 = vadd.f32 %v3224_v18, %v2857_v27  ;;  %v2923_v18 = vld [vmem:[%s7238_s30 + $0x170] sm:$0xff] }
 0x297   : > { %v2447_v14 = vpop.f32.mrf.mxu2  ;;  %2835 = vmatmul.f32.gmra.mxu0 %v7211_v49  ;;  %v2981_v1 = vmul.f32 %v7787_v54, %v2923_v18  ;;  %v5419_v27 = vld [vmem:[%s8968_s9 + $0x370] sm:$0xff] }
 0x298   : > { %v2619_v30 = vpop.f32.mrf.mxu3  ;;  %v2517_v2 = vadd.f32 %v2447_v14, %v7198_v59  ;;  %3274 = vmatmul.f32.gmra.mxu1 %v7827_v53  ;;  %v7845_v59 = vmax.f32 %v3038_v39, 0.0  ;;  %4433 = vmatpush.msra.mxu3 %v5419_v27  ;;  %v2882_v14 = vld [vmem:[%s7238_s30 + $0x28] sm:$0x3] }
 0x299   : > { %v2940_v39 = vmul.f32 %v7787_v54, %v2882_v14 }
 0x29a   : > { %v2689_v44 = vadd.f32 %v2619_v30, %v2517_v2  ;;  %9408 = vst [vmem:[#allocation78_spill] sm:$0xff] %v7845_v59  ;;  %v3039_v2 = vadd.f32 %v7776_v42, %v2981_v1 }
 0x29b   : > { %v2998_v1 = vadd.f32 %v7776_v42, %v2940_v39 }
 0x29c   : > { %v2858_v56 = vadd.f32 %v2788_v6, %v2689_v44  ;;  %2497 = vmatmul.f32.gmra.mxu2 %v9293_v52  ;;  %v2791_v49 = vpop.f32.mrf.mxu0  ;;  %v7866_v44 = vmax.f32 %v3039_v2, 0.0 }
 0x29d   : > { %2669 = vmatmul.f32.gmra.mxu3 %v9407_v5  ;;  %v3230_v55 = vpop.f32.mrf.mxu1 }
 0x29e   : > { %v7851_v43 = vadd.f32 %v3227_v61, %v2858_v56 }
 0x29f   : > { %v2450_v6 = vpop.f32.mrf.mxu2  ;;  %2838 = vmatmul.f32.gmra.mxu0 %v9410_v3 }
 0x2a0   : > { %9409 = vst [vmem:[#allocation56_spill] sm:$0xff] %v7851_v43  ;;  %v2622_v11 = vpop.f32.mrf.mxu3  ;;  %v2518_v30 = vadd.f32 %v2450_v6, %v7215_v13  ;;  %5308 = vmatmul.msk.f32.gmra.mxu1 %vm676_vm0, %v7845_v59  ;;  %v3104_v13 = vsel %vm676_vm0, %v7277_v20, 0.0  ;;  %v3644_v43 = vrot.slane %v7297_v46, 2 }
 0x2a1   : > { %v3369_v14 = vrot.slane %v3104_v13, 1 }
 0x2a2   : > { %v2690_v61 = vadd.f32 %v2622_v11, %v2518_v30  ;;  %v3370_v30 = vrot.slane %v7297_v46, 1 }
 0x2a4   : > { %v2859_v9 = vadd.f32 %v2791_v49, %v2690_v61  ;;  %2500 = vmatmul.f32.gmra.mxu2 %v9293_v52  ;;  %v2794_v18 = vpop.f32.mrf.mxu0  ;;  %v5450_v49 = vld [vmem:[%s8968_s9 + $0x3f0] sm:$0xff]  ;;  %v3052_v61 = vmax.f32 %v2998_v1, 0.0 }
 0x2a5   : > { %2672 = vmatmul.f32.gmra.mxu3 %v9407_v5  ;;  %v3233_v56 = vpop.f32.mrf.mxu1  ;;  %4605 = vmatpush.msra.mxu0 %v5450_v49 }
 0x2a6   : > { %v7868_v38 = vadd.f32 %v3230_v55, %v2859_v9  ;;  %v5466_v55 = vld [vmem:[%s8968_s9 + $0x470] sm:$0xff]  ;;  %v5402_v9 = vld [vmem:[%s8968_s9 + $0x2e8] sm:$0xff]  ;;  %v3106_v1 = vsel %vm735_vm2, %v3052_v61, 0.0 }
 0x2a7   : > { %v2453_v27 = vpop.f32.mrf.mxu2  ;;  %2841 = vmatmul.f32.gmra.mxu0 %v9410_v3  ;;  %4774 = vmatpush.msra.mxu1 %v5466_v55  ;;  %v2885_v55 = vld [vmem:[%s7238_s30 + $0x40] sm:$0x3] }
 0x2a8   : > { %9411 = vst [vmem:[#allocation63_spill] sm:$0xff] %v7868_v38  ;;  %v2625_v6 = vpop.f32.mrf.mxu3  ;;  %v2519_v11 = vadd.f32 %v2453_v27, %v7232_v50  ;;  %3280 = vmatmul.f32.gmra.mxu1 %v7866_v44  ;;  %v3371_v27 = vsel %vm1240_vm1, %v3369_v14, %v3370_v30  ;;  %4272 = vmatpush.msra.mxu2 %v5402_v9  ;;  %v3643_v38 = vrot.slane %v3104_v13, 2  ;;  %v9414_v13 = vld [vmem:[#allocation37_spill] sm:$0xff] }
 0x2aa   : > { %v2691_v2 = vadd.f32 %v2625_v6, %v2519_v11 }
 0x2ac   : > { %v2860_v39 = vadd.f32 %v2794_v18, %v2691_v2  ;;  %3509 = vmatmul.f32.vlgmr.msrb.gmra.mxu2 %v9407_v5  ;;  %v2797_v50 = vpop.f32.mrf.mxu0  ;;  %v5418_v18 = vld [vmem:[%s8968_s9 + $0x368] sm:$0xff] }
 0x2ad   : > { %3783 = vmatmul.f32.vlgmr.msrb.gmra.mxu3 %v9410_v3  ;;  %v3236_v49 = vpop.f32.mrf.mxu1 }
 0x2ae   : > { %v7890_v52 = vadd.f32 %v3233_v56, %v2860_v39  ;;  %4434 = vmatpush.msra.mxu3 %v5418_v18  ;;  %v3372_v56 = vrot.slane %v3106_v1, 1  ;;  %v2943_v39 = vmul.f32 %v7787_v54, %v2885_v55 }
 0x2af   : > { %v2456_v6 = vpop.f32.mrf.mxu2  ;;  %5357 = vmatmul.msk.f32.vlgmr.msrb.gmra.mxu0 %vm676_vm0, %v7277_v20 }
 0x2b0   : > { %9412 = vst [vmem:[#allocation83_spill] sm:$0xff] %v7890_v52  ;;  %v2628_v11 = vpop.f32.mrf.mxu3  ;;  %v2520_v14 = vadd.f32 %v2456_v6, %v7260_v32  ;;  %4117 = vmatmul.f32.vlgmr.msrb.gmra.mxu1 %v3371_v27  ;;  %v3373_v20 = vsel %vm1240_vm1, %v3370_v30, %v3372_v56  ;;  %v3107_v32 = vsel %vm676_vm0, %v7317_v35, 0.0  ;;  %v3001_v6 = vadd.f32 %v7776_v42, %v2943_v39  ;;  %v5465_v30 = vld [vmem:[%s8968_s9 + $0x468] sm:$0xff] }
 0x2b1   : > { %v3374_v56 = vrot.slane %v3107_v32, 1  ;;  %4775 = vmatpush.msra.mxu1 %v5465_v30 }
 0x2b2   : > { %v2692_v2 = vadd.f32 %v2628_v11, %v2520_v14 }
 0x2b4   : > { %v2861_v61 = vadd.f32 %v2797_v50, %v2692_v2  ;;  %3512 = vmatmul.f32.gmra.mxu2 %v9407_v5  ;;  %v2800_v9 = vpop.f32.mrf.mxu0  ;;  %v5449_v50 = vld [vmem:[%s8968_s9 + $0x3e8] sm:$0xff]  ;;  %v3375_v2 = vrot.slane %v7337_v29, 1 }
 0x2b5   : > { %3786 = vmatmul.f32.gmra.mxu3 %v9410_v3  ;;  %v3239_v52 = vpop.f32.mrf.mxu1  ;;  %4606 = vmatpush.msra.mxu0 %v5449_v50  ;;  %v5401_v50 = vld [vmem:[%s8968_s9 + $0x2e0] sm:$0xff] }
 0x2b6   : > { %v7907_v18 = vadd.f32 %v3236_v49, %v2861_v61  ;;  %v7922_v49 = vsel %vm1596_vm3, %v3643_v38, %v3644_v43  ;;  %v3055_v61 = vmax.f32 %v3001_v6, 0.0  ;;  %v7930_v38 = vsel %vm1240_vm1, %v3374_v56, %v3375_v2  ;;  %4273 = vmatpush.msra.mxu2 %v5401_v50 }
 0x2b7   : > { %v2459_v11 = vpop.f32.mrf.mxu2  ;;  %3948 = vmatmul.f32.gmra.mxu0 %v7297_v46  ;;  %9415 = vst [vmem:[#allocation61_spill] sm:$0xff] %v7930_v38 }
 0x2b8   : > { %9413 = vst [vmem:[#allocation80_spill] sm:$0xff] %v7907_v18  ;;  %v2631_v55 = vpop.f32.mrf.mxu3  ;;  %v2521_v14 = vadd.f32 %v2459_v11, %v9414_v13  ;;  %4120 = vmatmul.f32.gmra.mxu1 %v3373_v20  ;;  %v3646_v13 = vrot.slane %v3106_v1, 2  ;;  %v2888_v1 = vld [vmem:[%s7238_s30 + $0x58] sm:$0x3]  ;;  %v3648_v18 = vrot.slane %v3107_v32, 2  ;;  %v9422_v32 = vld [vmem:[#allocation44_spill] sm:$0xff] }
 0x2ba   : > { %v2693_v39 = vadd.f32 %v2631_v55, %v2521_v14  ;;  %v9417_v14 = vld [vmem:[#allocation38_spill] sm:$0xff] }
 0x2bc   : > { %v2862_v3 = vadd.f32 %v2800_v9, %v2693_v39  ;;  %3515 = vmatmul.f32.gmra.mxu2 %v3371_v27  ;;  %v2803_v46 = vpop.f32.mrf.mxu0  ;;  %v3109_v9 = vsel %vm735_vm2, %v3055_v61, 0.0  ;;  %v5417_v27 = vld [vmem:[%s8968_s9 + $0x360] sm:$0xff]  ;;  %v2946_v39 = vmul.f32 %v7787_v54, %v2888_v1 }
 0x2bd   : > { %3789 = vmatmul.f32.gmra.mxu3 %v7922_v49  ;;  %v3242_v11 = vpop.f32.mrf.mxu1 }
 0x2be   : > { %v7932_v5 = vadd.f32 %v3239_v52, %v2862_v3  ;;  %4435 = vmatpush.msra.mxu3 %v5417_v27  ;;  %v7946_v52 = vsel %vm1596_vm3, %v3644_v43, %v3646_v13  ;;  %v3377_v3 = vrot.slane %v3109_v9, 1  ;;  %v3649_v27 = vrot.slane %v7337_v29, 2  ;;  %v9421_v43 = vld [vmem:[#allocation48_spill] sm:$0xff] }
 0x2bf   : > { %v2462_v6 = vpop.f32.mrf.mxu2  ;;  %5358 = vmatmul.msk.f32.gmra.mxu0 %vm676_vm0, %v7317_v35  ;;  %9418 = vst [vmem:[#allocation85_spill] sm:$0xff] %v7946_v52  ;;  %v3110_v13 = vsel %vm676_vm0, %v9421_v43, 0.0 }
 0x2c0   : > { %9416 = vst [vmem:[#allocation67_spill] sm:$0xff] %v7932_v5  ;;  %v2634_v55 = vpop.f32.mrf.mxu3  ;;  %v2522_v30 = vadd.f32 %v2462_v6, %v9417_v14  ;;  %4123 = vmatmul.f32.gmra.mxu1 %v7930_v38  ;;  %v7952_v6 = vsel %vm1240_vm1, %v3375_v2, %v3377_v3  ;;  %v5464_v2 = vld [vmem:[%s8968_s9 + $0x460] sm:$0xff]  ;;  %v3379_v3 = vrot.slane %v3110_v13, 1 }
 0x2c1   : > { %9419 = vst [vmem:[#allocation82_spill] sm:$0xff] %v7952_v6  ;;  %4776 = vmatpush.msra.mxu1 %v5464_v2 }
 0x2c2   : > { %v2694_v56 = vadd.f32 %v2634_v55, %v2522_v30  ;;  %v3004_v55 = vadd.f32 %v7776_v42, %v2946_v39 }
 0x2c4   : > { %v2863_v61 = vadd.f32 %v2803_v46, %v2694_v56  ;;  %3518 = vmatmul.f32.gmra.mxu2 %v3373_v20  ;;  %v2806_v50 = vpop.f32.mrf.mxu0  ;;  %v5448_v20 = vld [vmem:[%s8968_s9 + $0x3e0] sm:$0xff] }
 0x2c5   : > { %3792 = vmatmul.f32.gmra.mxu3 %v7946_v52  ;;  %v3245_v5 = vpop.f32.mrf.mxu1  ;;  %4607 = vmatpush.msra.mxu0 %v5448_v20  ;;  %v9424_v56 = vld [vmem:[#allocation54_spill] sm:$0xff] }
 0x2c6   : > { %v7954_v14 = vadd.f32 %v3242_v11, %v2863_v61  ;;  %v7970_v11 = vsel %vm1596_vm3, %v3648_v18, %v3649_v27  ;;  %v3380_v39 = vrot.slane %v9424_v56, 1  ;;  %v3651_v18 = vrot.slane %v3109_v9, 2  ;;  %v2891_v9 = vld [vmem:[%s7238_s30 + $0x70] sm:$0x3] }
 0x2c7   : > { %v2465_v46 = vpop.f32.mrf.mxu2  ;;  %3954 = vmatmul.f32.gmra.mxu0 %v7337_v29  ;;  %9423 = vst [vmem:[#allocation69_spill] sm:$0xff] %v7970_v11 }
 0x2c8   : > { %9420 = vst [vmem:[#allocation64_spill] sm:$0xff] %v7954_v14  ;;  %v2637_v1 = vpop.f32.mrf.mxu3  ;;  %v2523_v30 = vadd.f32 %v2465_v46, %v9422_v32  ;;  %4126 = vmatmul.f32.gmra.mxu1 %v7952_v6  ;;  %v3058_v14 = vmax.f32 %v3004_v55, 0.0  ;;  %v5400_v46 = vld [vmem:[%s8968_s9 + $0x2d8] sm:$0xff]  ;;  %v7979_v29 = vsel %vm1240_vm1, %v3379_v3, %v3380_v39  ;;  %v9427_v3 = vld [vmem:[#allocation47_spill] sm:$0xff] }
 0x2c9   : > { %9425 = vst [vmem:[#allocation87_spill] sm:$0xff] %v7979_v29  ;;  %4274 = vmatpush.msra.mxu2 %v5400_v46  ;;  %v5416_v55 = vld [vmem:[%s8968_s9 + $0x358] sm:$0xff]  ;;  %v2949_v46 = vmul.f32 %v7787_v54, %v2891_v9 }
 0x2ca   : > { %v2695_v61 = vadd.f32 %v2637_v1, %v2523_v30  ;;  %4436 = vmatpush.msra.mxu3 %v5416_v55  ;;  %v3653_v55 = vrot.slane %v3110_v13, 2  ;;  %v9432_v13 = vld [vmem:[#allocation51_spill] sm:$0xff] }
 0x2cc   : > { %v2864_v52 = vadd.f32 %v2806_v50, %v2695_v61  ;;  %3521 = vmatmul.f32.gmra.mxu2 %v7930_v38  ;;  %v2809_v20 = vpop.f32.mrf.mxu0  ;;  %v3112_v50 = vsel %vm735_vm2, %v3058_v14, 0.0  ;;  %v3654_v38 = vrot.slane %v9424_v56, 2 }
 0x2cd   : > { %3795 = vmatmul.f32.gmra.mxu3 %v7970_v11  ;;  %v3248_v32 = vpop.f32.mrf.mxu1 }
 0x2ce   : > { %v7981_v2 = vadd.f32 %v3245_v5, %v2864_v52  ;;  %v7995_v5 = vsel %vm1596_vm3, %v3649_v27, %v3651_v18  ;;  %v3382_v52 = vrot.slane %v3112_v50, 1  ;;  %v9431_v27 = vld [vmem:[#allocation66_spill] sm:$0xff] }
 0x2cf   : > { %v2468_v1 = vpop.f32.mrf.mxu2  ;;  %5359 = vmatmul.msk.f32.gmra.mxu0 %vm676_vm0, %v9421_v43  ;;  %9428 = vst [vmem:[#allocation2_spill] sm:$0xff] %v7995_v5  ;;  %v3113_v18 = vsel %vm676_vm0, %v9431_v27, 0.0 }
 0x2d0   : > { %9426 = vst [vmem:[#allocation84_spill] sm:$0xff] %v7981_v2  ;;  %v2640_v30 = vpop.f32.mrf.mxu3  ;;  %v2524_v61 = vadd.f32 %v2468_v1, %v9427_v3  ;;  %4129 = vmatmul.f32.gmra.mxu1 %v7979_v29  ;;  %v8002_v1 = vsel %vm1240_vm1, %v3380_v39, %v3382_v52  ;;  %v5463_v39 = vld [vmem:[%s8968_s9 + $0x458] sm:$0xff]  ;;  %v9434_v52 = vld [vmem:[#allocation4_spill] sm:$0xff] }
 0x2d1   : > { %9429 = vst [vmem:[#allocation5_spill] sm:$0xff] %v8002_v1  ;;  %4777 = vmatpush.msra.mxu1 %v5463_v39 }
 0x2d2   : > { %v2696_v14 = vadd.f32 %v2640_v30, %v2524_v61  ;;  %v5447_v30 = vld [vmem:[%s8968_s9 + $0x3d8] sm:$0xff] }
 0x2d3   : > { %4608 = vmatpush.msra.mxu0 %v5447_v30 }
 0x2d4   : > { %v2865_v2 = vadd.f32 %v2809_v20, %v2696_v14  ;;  %3524 = vmatmul.f32.gmra.mxu2 %v7952_v6  ;;  %v2812_v11 = vpop.f32.mrf.mxu0  ;;  %v3007_v20 = vadd.f32 %v7776_v42, %v2949_v46  ;;  %v3385_v46 = vrot.slane %v9434_v52, 1 }
 0x2d5   : > { %3798 = vmatmul.f32.gmra.mxu3 %v7995_v5  ;;  %v3251_v43 = vpop.f32.mrf.mxu1 }
 0x2d6   : > { %v8004_v3 = vadd.f32 %v3248_v32, %v2865_v2  ;;  %v8020_v32 = vsel %vm1596_vm3, %v3653_v55, %v3654_v38  ;;  %v3384_v2 = vrot.slane %v3113_v18, 1  ;;  %v3061_v5 = vmax.f32 %v3007_v20, 0.0 }
 0x2d7   : > { %v2471_v9 = vpop.f32.mrf.mxu2  ;;  %3960 = vmatmul.f32.gmra.mxu0 %v9424_v56  ;;  %9433 = vst [vmem:[#allocation86_spill] sm:$0xff] %v8020_v32  ;;  %v3656_v55 = vrot.slane %v3112_v50, 2  ;;  %v2894_v50 = vld [vmem:[%s7238_s30 + $0x88] sm:$0x3] }
 0x2d8   : > { %9430 = vst [vmem:[#allocation89_spill] sm:$0xff] %v8004_v3  ;;  %v2643_v61 = vpop.f32.mrf.mxu3  ;;  %v2525_v14 = vadd.f32 %v2471_v9, %v9432_v13  ;;  %4132 = vmatmul.f32.gmra.mxu1 %v8002_v1  ;;  %v5399_v9 = vld [vmem:[%s8968_s9 + $0x2d0] sm:$0xff]  ;;  %v8029_v56 = vsel %vm1240_vm1, %v3384_v2, %v3385_v46 }
 0x2d9   : > { %9435 = vst [vmem:[#allocation3_spill] sm:$0xff] %v8029_v56  ;;  %4275 = vmatpush.msra.mxu2 %v5399_v9  ;;  %v2952_v9 = vmul.f32 %v7787_v54, %v2894_v50 }
 0x2da   : > { %v2697_v3 = vadd.f32 %v2643_v61, %v2525_v14  ;;  %v9437_v14 = vld [vmem:[#allocation62_spill] sm:$0xff] }
 0x2dc   : > { %v2866_v6 = vadd.f32 %v2812_v11, %v2697_v3  ;;  %3527 = vmatmul.f32.gmra.mxu2 %v7979_v29  ;;  %v2815_v30 = vpop.f32.mrf.mxu0  ;;  %v3115_v11 = vsel %vm735_vm2, %v3061_v5, 0.0  ;;  %v5415_v3 = vld [vmem:[%s8968_s9 + $0x350] sm:$0xff]  ;;  %v3659_v29 = vrot.slane %v9434_v52, 2 }
 0x2dd   : > { %3801 = vmatmul.f32.gmra.mxu3 %v8020_v32  ;;  %v3254_v13 = vpop.f32.mrf.mxu1 }
 0x2de   : > { %v8031_v39 = vadd.f32 %v3251_v43, %v2866_v6  ;;  %4437 = vmatpush.msra.mxu3 %v5415_v3  ;;  %v8045_v6 = vsel %vm1596_vm3, %v3654_v38, %v3656_v55  ;;  %v3387_v43 = vrot.slane %v3115_v11, 1  ;;  %v3658_v3 = vrot.slane %v3113_v18, 2  ;;  %v9440_v38 = vld [vmem:[#allocation25_spill] sm:$0xff]  ;;  %v9441_v18 = vld [vmem:[#allocation68_spill] sm:$0xff] }
 0x2df   : > { %v2474_v20 = vpop.f32.mrf.mxu2  ;;  %5360 = vmatmul.msk.f32.gmra.mxu0 %vm676_vm0, %v9431_v27  ;;  %9438 = vst [vmem:[#allocation88_spill] sm:$0xff] %v8045_v6  ;;  %v3116_v55 = vsel %vm676_vm0, %v9440_v38, 0.0 }
 0x2e0   : > { %9436 = vst [vmem:[#allocation8_spill] sm:$0xff] %v8031_v39  ;;  %v2646_v61 = vpop.f32.mrf.mxu3  ;;  %v2526_v2 = vadd.f32 %v2474_v20, %v9437_v14  ;;  %4135 = vmatmul.f32.gmra.mxu1 %v8029_v56  ;;  %v8052_v20 = vsel %vm1240_vm1, %v3385_v46, %v3387_v43  ;;  %v5462_v46 = vld [vmem:[%s8968_s9 + $0x450] sm:$0xff]  ;;  %v9443_v43 = vld [vmem:[#allocation23_spill] sm:$0xff] }
 0x2e1   : > { %4778 = vmatpush.msra.mxu1 %v5462_v46 }
 0x2e2   : > { %v2698_v5 = vadd.f32 %v2646_v61, %v2526_v2  ;;  %v5446_v61 = vld [vmem:[%s8968_s9 + $0x3d0] sm:$0xff] }
 0x2e3   : > { %4609 = vmatpush.msra.mxu0 %v5446_v61 }
 0x2e4   : > { %v2867_v39 = vadd.f32 %v2815_v30, %v2698_v5  ;;  %3530 = vmatmul.f32.gmra.mxu2 %v8002_v1  ;;  %v2818_v32 = vpop.f32.mrf.mxu0  ;;  %v3010_v30 = vadd.f32 %v7776_v42, %v2952_v9  ;;  %v3390_v9 = vrot.slane %v9443_v43, 1 }
 0x2e5   : > { %3804 = vmatmul.f32.gmra.mxu3 %v8045_v6  ;;  %v3257_v27 = vpop.f32.mrf.mxu1 }
 0x2e6   : > { %v8054_v14 = vadd.f32 %v3254_v13, %v2867_v39  ;;  %v8070_v13 = vsel %vm1596_vm3, %v3658_v3, %v3659_v29  ;;  %v3389_v39 = vrot.slane %v3116_v55, 1  ;;  %v3064_v6 = vmax.f32 %v3010_v30, 0.0 }
 0x2e7   : > { %v2477_v50 = vpop.f32.mrf.mxu2  ;;  %3966 = vmatmul.f32.gmra.mxu0 %v9434_v52  ;;  %9442 = vst [vmem:[#allocation11_spill] sm:$0xff] %v8070_v13  ;;  %v3661_v3 = vrot.slane %v3115_v11, 2  ;;  %v2897_v11 = vld [vmem:[%s7238_s30 + $0xa0] sm:$0x3] }
 0x2e8   : > { %9439 = vst [vmem:[#allocation7_spill] sm:$0xff] %v8054_v14  ;;  %v2649_v2 = vpop.f32.mrf.mxu3  ;;  %v2527_v5 = vadd.f32 %v2477_v50, %v9441_v18  ;;  %4138 = vmatmul.f32.gmra.mxu1 %v8052_v20  ;;  %v5398_v50 = vld [vmem:[%s8968_s9 + $0x2c8] sm:$0xff]  ;;  %v8079_v52 = vsel %vm1240_vm1, %v3389_v39, %v3390_v9 }
 0x2e9   : > { %9444 = vst [vmem:[#allocation90_spill] sm:$0xff] %v8079_v52  ;;  %4276 = vmatpush.msra.mxu2 %v5398_v50  ;;  %v2955_v50 = vmul.f32 %v7787_v54, %v2897_v11 }
 0x2ea   : > { %v2699_v14 = vadd.f32 %v2649_v2, %v2527_v5  ;;  %v9446_v5 = vld [vmem:[#allocation17_spill] sm:$0xff] }
 0x2ec   : > { %v2868_v1 = vadd.f32 %v2818_v32, %v2699_v14  ;;  %3533 = vmatmul.f32.gmra.mxu2 %v8029_v56  ;;  %v2821_v61 = vpop.f32.mrf.mxu0  ;;  %v3118_v32 = vsel %vm735_vm2, %v3064_v6, 0.0  ;;  %v5414_v14 = vld [vmem:[%s8968_s9 + $0x348] sm:$0xff]  ;;  %v3664_v56 = vrot.slane %v9443_v43, 2 }
 0x2ed   : > { %3807 = vmatmul.f32.gmra.mxu3 %v8070_v13  ;;  %v3260_v18 = vpop.f32.mrf.mxu1 }
 0x2ee   : > { %v8081_v46 = vadd.f32 %v3257_v27, %v2868_v1  ;;  %4438 = vmatpush.msra.mxu3 %v5414_v14  ;;  %v8095_v1 = vsel %vm1596_vm3, %v3659_v29, %v3661_v3  ;;  %v3392_v27 = vrot.slane %v3118_v32, 1  ;;  %v3663_v14 = vrot.slane %v3116_v55, 2  ;;  %v5445_v3 = vld [vmem:[%s8968_s9 + $0x3c8] sm:$0xff] }
 0x2ef   : > { %v2480_v30 = vpop.f32.mrf.mxu2  ;;  %5361 = vmatmul.msk.f32.gmra.mxu0 %vm676_vm0, %v9440_v38  ;;  %v3119_v29 = vsel %vm676_vm0, %v7477_v17, 0.0  ;;  %v9448_v55 = vld [vmem:[#allocation71_spill] sm:$0xff] }
 0x2f0   : > { %9445 = vst [vmem:[#allocation9_spill] sm:$0xff] %v8081_v46  ;;  %v2652_v2 = vpop.f32.mrf.mxu3  ;;  %v2528_v39 = vadd.f32 %v2480_v30, %v9446_v5  ;;  %4141 = vmatmul.f32.gmra.mxu1 %v8079_v52  ;;  %v8102_v30 = vsel %vm1240_vm1, %v3390_v9, %v3392_v27  ;;  %4610 = vmatpush.msra.mxu0 %v5445_v3  ;;  %v5461_v9 = vld [vmem:[%s8968_s9 + $0x448] sm:$0xff]  ;;  %v3395_v27 = vrot.slane %v7497_v57, 1 }
 0x2f1   : > { %4779 = vmatpush.msra.mxu1 %v5461_v9 }
 0x2f2   : > { %v2700_v6 = vadd.f32 %v2652_v2, %v2528_v39 }
 0x2f4   : > { %v2869_v46 = vadd.f32 %v2821_v61, %v2700_v6  ;;  %3536 = vmatmul.f32.gmra.mxu2 %v8052_v20  ;;  %v2824_v13 = vpop.f32.mrf.mxu0  ;;  %v3013_v61 = vadd.f32 %v7776_v42, %v2955_v50 }
 0x2f5   : > { %3810 = vmatmul.f32.gmra.mxu3 %v8095_v1  ;;  %v3263_v38 = vpop.f32.mrf.mxu1 }
 0x2f6   : > { %v8104_v5 = vadd.f32 %v3260_v18, %v2869_v46  ;;  %v8120_v18 = vsel %vm1596_vm3, %v3663_v14, %v3664_v56  ;;  %v3394_v46 = vrot.slane %v3119_v29, 1  ;;  %v3067_v50 = vmax.f32 %v3013_v61, 0.0  ;;  %v5413_v61 = vld [vmem:[%s8968_s9 + $0x340] sm:$0xff] }
 0x2f7   : > { %v2483_v2 = vpop.f32.mrf.mxu2  ;;  %3972 = vmatmul.f32.gmra.mxu0 %v9443_v43  ;;  %9449 = vst [vmem:[#allocation91_spill] sm:$0xff] %v8120_v18  ;;  %v3666_v14 = vrot.slane %v3118_v32, 2  ;;  %4439 = vmatpush.msra.mxu3 %v5413_v61  ;;  %v2900_v32 = vld [vmem:[%s7238_s30 + $0xb8] sm:$0x3]  ;;  %v3668_v61 = vrot.slane %v3119_v29, 2  ;;  %v9454_v29 = vld [vmem:[#allocation26_spill] sm:$0xff] }
 0x2f8   : > { %9447 = vst [vmem:[#allocation14_spill] sm:$0xff] %v8104_v5  ;;  %v2655_v11 = vpop.f32.mrf.mxu3  ;;  %v2529_v39 = vadd.f32 %v2483_v2, %v9448_v55  ;;  %4144 = vmatmul.f32.gmra.mxu1 %v8102_v30  ;;  %v5397_v2 = vld [vmem:[%s8968_s9 + $0x2c0] sm:$0xff]  ;;  %v8129_v43 = vsel %vm1240_vm1, %v3394_v46, %v3395_v27  ;;  %v9452_v46 = vld [vmem:[#allocation29_spill] sm:$0xff] }
 0x2f9   : > { %9450 = vst [vmem:[#allocation13_spill] sm:$0xff] %v8129_v43  ;;  %4277 = vmatpush.msra.mxu2 %v5397_v2  ;;  %v2958_v2 = vmul.f32 %v7787_v54, %v2900_v32 }
 0x2fa   : > { %v2701_v6 = vadd.f32 %v2655_v11, %v2529_v39 }
 0x2fc   : > { %v2870_v5 = vadd.f32 %v2824_v13, %v2701_v6  ;;  %3539 = vmatmul.f32.gmra.mxu2 %v8079_v52  ;;  %v2827_v3 = vpop.f32.mrf.mxu0  ;;  %v3121_v13 = vsel %vm735_vm2, %v3067_v50, 0.0  ;;  %v3669_v52 = vrot.slane %v7497_v57, 2 }
 0x2fd   : > { %3813 = vmatmul.f32.gmra.mxu3 %v8120_v18  ;;  %v3266_v55 = vpop.f32.mrf.mxu1 }
 0x2fe   : > { %v8131_v9 = vadd.f32 %v3263_v38, %v2870_v5  ;;  %v8145_v38 = vsel %vm1596_vm3, %v3664_v56, %v3666_v14  ;;  %v3397_v5 = vrot.slane %v3121_v13, 1  ;;  %v3122_v56 = vsel %vm676_vm0, %v7517_v10, 0.0  ;;  %v5444_v14 = vld [vmem:[%s8968_s9 + $0x3c0] sm:$0xff] }
 0x2ff   : > { %v2486_v11 = vpop.f32.mrf.mxu2  ;;  %5362 = vmatmul.msk.f32.gmra.mxu0 %vm676_vm0, %v7477_v17 }
 0x300   : > { %9451 = vst [vmem:[#allocation10_spill] sm:$0xff] %v8131_v9  ;;  %v2658_v39 = vpop.f32.mrf.mxu3  ;;  %v2530_v6 = vadd.f32 %v2486_v11, %v9452_v46  ;;  %4147 = vmatmul.f32.gmra.mxu1 %v8129_v43  ;;  %v8152_v11 = vsel %vm1240_vm1, %v3395_v27, %v3397_v5  ;;  %4611 = vmatpush.msra.mxu0 %v5444_v14  ;;  %v5460_v27 = vld [vmem:[%s8968_s9 + $0x440] sm:$0xff]  ;;  %v3400_v5 = vrot.slane %v7537_v24, 1 }
 0x301   : > { %4780 = vmatpush.msra.mxu1 %v5460_v27 }
 0x302   : > { %v2702_v50 = vadd.f32 %v2658_v39, %v2530_v6 }
 0x304   : > { %v2871_v9 = vadd.f32 %v2827_v3, %v2702_v50  ;;  %3542 = vmatmul.f32.gmra.mxu2 %v8102_v30  ;;  %v2830_v18 = vpop.f32.mrf.mxu0  ;;  %v3016_v3 = vadd.f32 %v7776_v42, %v2958_v2 }
 0x305   : > { %3816 = vmatmul.f32.gmra.mxu3 %v8145_v38  ;;  %v3269_v17 = vpop.f32.mrf.mxu1 }
 0x306   : > { %v8154_v46 = vadd.f32 %v3266_v55, %v2871_v9  ;;  %v8170_v55 = vsel %vm1596_vm3, %v3668_v61, %v3669_v52  ;;  %v3399_v9 = vrot.slane %v3122_v56, 1  ;;  %v3070_v2 = vmax.f32 %v3016_v3, 0.0  ;;  %v5412_v3 = vld [vmem:[%s8968_s9 + $0x338] sm:$0xff] }
 0x307   : > { %v2489_v39 = vpop.f32.mrf.mxu2  ;;  %3978 = vmatmul.f32.gmra.mxu0 %v7497_v57  ;;  %9455 = vst [vmem:[#allocation12_spill] sm:$0xff] %v8170_v55  ;;  %v3671_v61 = vrot.slane %v3121_v13, 2  ;;  %4440 = vmatpush.msra.mxu3 %v5412_v3  ;;  %v2903_v13 = vld [vmem:[%s7238_s30 + $0xd0] sm:$0x3]  ;;  %v3673_v3 = vrot.slane %v3122_v56, 2  ;;  %v9459_v56 = vld [vmem:[#allocation39_spill] sm:$0xff] }
 0x308   : > { %9453 = vst [vmem:[#allocation21_spill] sm:$0xff] %v8154_v46  ;;  %v2661_v32 = vpop.f32.mrf.mxu3  ;;  %v2531_v6 = vadd.f32 %v2489_v39, %v9454_v29  ;;  %4150 = vmatmul.f32.gmra.mxu1 %v8152_v11  ;;  %v5396_v39 = vld [vmem:[%s8968_s9 + $0x2b8] sm:$0xff]  ;;  %v8179_v57 = vsel %vm1240_vm1, %v3399_v9, %v3400_v5 }
 0x309   : > { %4278 = vmatpush.msra.mxu2 %v5396_v39  ;;  %v9457_v9 = vld [vmem:[#allocation73_spill] sm:$0xff]  ;;  %v2961_v39 = vmul.f32 %v7787_v54, %v2903_v13 }
 0x30a   : > { %v2703_v50 = vadd.f32 %v2661_v32, %v2531_v6 }
 0x30c   : > { %v2872_v46 = vadd.f32 %v2830_v18, %v2703_v50  ;;  %3545 = vmatmul.f32.gmra.mxu2 %v8129_v43  ;;  %v2833_v14 = vpop.f32.mrf.mxu0  ;;  %v3124_v18 = vsel %vm735_vm2, %v3070_v2, 0.0  ;;  %v3674_v43 = vrot.slane %v7537_v24, 2 }
 0x30d   : > { %3819 = vmatmul.f32.gmra.mxu3 %v8170_v55  ;;  %v3272_v29 = vpop.f32.mrf.mxu1 }
 0x30e   : > { %v8181_v27 = vadd.f32 %v3269_v17, %v2872_v46  ;;  %v8195_v17 = vsel %vm1596_vm3, %v3669_v52, %v3671_v61  ;;  %v3402_v46 = vrot.slane %v3124_v18, 1  ;;  %v3125_v52 = vsel %vm676_vm0, %v7557_v31, 0.0  ;;  %v5443_v61 = vld [vmem:[%s8968_s9 + $0x3b8] sm:$0xff] }
 0x30f   : > { %v2492_v32 = vpop.f32.mrf.mxu2  ;;  %5363 = vmatmul.msk.f32.gmra.mxu0 %vm676_vm0, %v7517_v10 }
 0x310   : > { %9456 = vst [vmem:[#allocation20_spill] sm:$0xff] %v8181_v27  ;;  %v2664_v6 = vpop.f32.mrf.mxu3  ;;  %v2532_v50 = vadd.f32 %v2492_v32, %v9457_v9  ;;  %4153 = vmatmul.f32.gmra.mxu1 %v8179_v57  ;;  %v8202_v32 = vsel %vm1240_vm1, %v3400_v5, %v3402_v46  ;;  %4612 = vmatpush.msra.mxu0 %v5443_v61  ;;  %v5459_v5 = vld [vmem:[%s8968_s9 + $0x438] sm:$0xff]  ;;  %v3405_v46 = vrot.slane %v7577_v0, 1 }
 0x311   : > { %4781 = vmatpush.msra.mxu1 %v5459_v5 }
 0x312   : > { %v2704_v2 = vadd.f32 %v2664_v6, %v2532_v50 }
 0x314   : > { %v2873_v27 = vadd.f32 %v2833_v14, %v2704_v2  ;;  %3548 = vmatmul.f32.gmra.mxu2 %v8152_v11  ;;  %v2836_v55 = vpop.f32.mrf.mxu0  ;;  %v3019_v14 = vadd.f32 %v7776_v42, %v2961_v39 }
 0x315   : > { %3822 = vmatmul.f32.gmra.mxu3 %v8195_v17  ;;  %v3275_v10 = vpop.f32.mrf.mxu1 }
 0x316   : > { %v8204_v9 = vadd.f32 %v3272_v29, %v2873_v27  ;;  %v8220_v29 = vsel %vm1596_vm3, %v3673_v3, %v3674_v43  ;;  %v3404_v27 = vrot.slane %v3125_v52, 1  ;;  %v3073_v39 = vmax.f32 %v3019_v14, 0.0  ;;  %v5411_v14 = vld [vmem:[%s8968_s9 + $0x330] sm:$0xff] }
 0x317   : > { %v2495_v6 = vpop.f32.mrf.mxu2  ;;  %3984 = vmatmul.f32.gmra.mxu0 %v7537_v24  ;;  %9460 = vst [vmem:[#allocation31_spill] sm:$0xff] %v8220_v29  ;;  %v3676_v3 = vrot.slane %v3124_v18, 2  ;;  %4441 = vmatpush.msra.mxu3 %v5411_v14  ;;  %v2906_v18 = vld [vmem:[%s7238_s30 + $0xe8] sm:$0x3]  ;;  %v3678_v14 = vrot.slane %v3125_v52, 2 }
 0x318   : > { %9458 = vst [vmem:[#allocation16_spill] sm:$0xff] %v8204_v9  ;;  %v2667_v13 = vpop.f32.mrf.mxu3  ;;  %v2533_v50 = vadd.f32 %v2495_v6, %v9459_v56  ;;  %4156 = vmatmul.f32.gmra.mxu1 %v8202_v32  ;;  %v5395_v6 = vld [vmem:[%s8968_s9 + $0x2b0] sm:$0xff]  ;;  %v8229_v24 = vsel %vm1240_vm1, %v3404_v27, %v3405_v46 }
 0x319   : > { %4279 = vmatpush.msra.mxu2 %v5395_v6 }
 0x31a   : > { %v2705_v2 = vadd.f32 %v2667_v13, %v2533_v50 }
 0x31c   : > { %v2874_v9 = vadd.f32 %v2836_v55, %v2705_v2  ;;  %3551 = vmatmul.f32.gmra.mxu2 %v8179_v57  ;;  %v2839_v61 = vpop.f32.mrf.mxu0  ;;  %v3127_v55 = vsel %vm735_vm2, %v3073_v39, 0.0  ;;  %v2964_v39 = vmul.f32 %v7787_v54, %v2906_v18 }
 0x31d   : > { %3825 = vmatmul.f32.gmra.mxu3 %v8220_v29  ;;  %v3278_v56 = vpop.f32.mrf.mxu1  ;;  %v3679_v29 = vrot.slane %v7577_v0, 2 }
 0x31e   : > { %v8231_v5 = vadd.f32 %v3275_v10, %v2874_v9  ;;  %v8245_v10 = vsel %vm1596_vm3, %v3674_v43, %v3676_v3  ;;  %v3407_v9 = vrot.slane %v3127_v55, 1  ;;  %v3128_v43 = vsel %vm676_vm0, %v7597_v7, 0.0  ;;  %v5442_v3 = vld [vmem:[%s8968_s9 + $0x3b0] sm:$0xff] }
 0x31f   : > { %v2498_v13 = vpop.f32.mrf.mxu2  ;;  %5364 = vmatmul.msk.f32.gmra.mxu0 %vm676_vm0, %v7557_v31 }
 0x320   : > { %9461 = vst [vmem:[#allocation15_spill] sm:$0xff] %v8231_v5  ;;  %v2670_v50 = vpop.f32.mrf.mxu3  ;;  %v2534_v27 = vadd.f32 %v2498_v13, %v7540_v8  ;;  %4159 = vmatmul.f32.gmra.mxu1 %v8229_v24  ;;  %v8252_v8 = vsel %vm1240_vm1, %v3405_v46, %v3407_v9  ;;  %4613 = vmatpush.msra.mxu0 %v5442_v3  ;;  %v5458_v46 = vld [vmem:[%s8968_s9 + $0x430] sm:$0xff] }
 0x321   : > { %4782 = vmatpush.msra.mxu1 %v5458_v46 }
 0x322   : > { %v2706_v2 = vadd.f32 %v2670_v50, %v2534_v27  ;;  %v3410_v27 = vrot.slane %v7617_v62, 1 }
 0x324   : > { %v2875_v6 = vadd.f32 %v2839_v61, %v2706_v2  ;;  %3554 = vmatmul.f32.gmra.mxu2 %v8202_v32  ;;  %v2842_v5 = vpop.f32.mrf.mxu0  ;;  %v3022_v61 = vadd.f32 %v7776_v42, %v2964_v39  ;;  %v3409_v42 = vrot.slane %v3128_v43, 1 }
 0x325   : > { %3828 = vmatmul.f32.gmra.mxu3 %v8245_v10  ;;  %v3281_v31 = vpop.f32.mrf.mxu1 }
 0x326   : > { %v8254_v13 = vadd.f32 %v3278_v56, %v2875_v6  ;;  %v8270_v56 = vsel %vm1596_vm3, %v3678_v14, %v3679_v29  ;;  %v3076_v2 = vmax.f32 %v3022_v61, 0.0  ;;  %v5394_v6 = vld [vmem:[%s8968_s9 + $0x2a8] sm:$0xff]  ;;  %v3681_v14 = vrot.slane %v3127_v55, 2  ;;  %v2909_v55 = vld [vmem:[%s7238_s30 + $0x100] sm:$0x3] }
 0x327   : > { %v2501_v50 = vpop.f32.mrf.mxu2  ;;  %3990 = vmatmul.f32.gmra.mxu0 %v7577_v0  ;;  %4280 = vmatpush.msra.mxu2 %v5394_v6  ;;  %v5410_v61 = vld [vmem:[%s8968_s9 + $0x328] sm:$0xff] }
 0x328   : > { %9462 = vst [vmem:[#allocation30_spill] sm:$0xff] %v8254_v13  ;;  %v2673_v18 = vpop.f32.mrf.mxu3  ;;  %v2535_v52 = vadd.f32 %v2501_v50, %v7563_v47  ;;  %4162 = vmatmul.f32.gmra.mxu1 %v8252_v8  ;;  %v8279_v50 = vsel %vm1240_vm1, %v3409_v42, %v3410_v27  ;;  %4442 = vmatpush.msra.mxu3 %v5410_v61  ;;  %v3683_v61 = vrot.slane %v3128_v43, 2  ;;  %v5441_v43 = vld [vmem:[%s8968_s9 + $0x3a8] sm:$0xff] }
 0x329   : > { %4614 = vmatpush.msra.mxu0 %v5441_v43  ;;  %v5393_v43 = vld [vmem:[%s8968_s9 + $0x2a0] sm:$0xff] }
 0x32a   : > { %v2707_v9 = vadd.f32 %v2673_v18, %v2535_v52  ;;  %4281 = vmatpush.msra.mxu2 %v5393_v43 }
 0x32c   : > { %v2876_v39 = vadd.f32 %v2842_v5, %v2707_v9  ;;  %3557 = vmatmul.f32.gmra.mxu2 %v8229_v24  ;;  %v3946_v47 = vpop.f32.mrf.mxu0  ;;  %v3130_v5 = vsel %vm735_vm2, %v3076_v2, 0.0 }
 0x32d   : > { %3831 = vmatmul.f32.gmra.mxu3 %v8270_v56  ;;  %v4118_v3 = vpop.f32.mrf.mxu1  ;;  %v3412_v9 = vrot.slane %v3130_v5, 1 }
 0x32e   : > { %v8281_v46 = vadd.f32 %v3281_v31, %v2876_v39  ;;  %v8295_v31 = vsel %vm1596_vm3, %v3679_v29, %v3681_v14  ;;  %v2967_v39 = vmul.f32 %v7787_v54, %v2909_v55  ;;  %v3131_v29 = vsel %vm676_vm0, %v7637_v19, 0.0  ;;  %v8312_v54 = vld [vmem:[%s8967_s8] ss:$0 sm:$0xff] }
 0x32f   : > { %v3510_v18 = vpop.f32.mrf.mxu2  ;;  %5365 = vmatmul.msk.f32.gmra.mxu0 %vm676_vm0, %v7597_v7  ;;  %v3684_v7 = vrot.slane %v7617_v62, 2 }
 0x330   : > { %9463 = vst [vmem:[#allocation18_spill] sm:$0xff] %v8281_v46  ;;  %v3784_v52 = vpop.f32.mrf.mxu3  ;;  %v3606_v42 = vadd.f32 %v3510_v18, %v7580_v12  ;;  %4165 = vmatmul.f32.gmra.mxu1 %v8279_v50  ;;  %v8302_v12 = vsel %vm1240_vm1, %v3410_v27, %v3412_v9  ;;  %v3415_v9 = vrot.slane %v7657_v33, 1 }
 0x331   : > { %v8325_v55 = vsel %vm1596_vm3, %v3683_v61, %v3684_v7  ;;  %v3686_v61 = vrot.slane %v3130_v5, 2  ;;  %v2912_v5 = vld [vmem:[%s7238_s30 + $0x118] sm:$0x3] }
 0x332   : > { %v3880_v2 = vadd.f32 %v3784_v52, %v3606_v42  ;;  %v5457_v52 = vld [vmem:[%s8968_s9 + $0x428] sm:$0xff]  ;;  %v3414_v42 = vrot.slane %v3131_v29, 1 }
 0x333   : > { %4783 = vmatpush.msra.mxu1 %v5457_v52 }
 0x334   : > { %v4042_v6 = vadd.f32 %v3946_v47, %v3880_v2  ;;  %3560 = vmatmul.f32.gmra.mxu2 %v8252_v8  ;;  %v3949_v46 = vpop.f32.mrf.mxu0  ;;  %v3025_v47 = vadd.f32 %v8312_v54, %v2967_v39 }
 0x335   : > { %3834 = vmatmul.f32.gmra.mxu3 %v8295_v31  ;;  %v4121_v13 = vpop.f32.mrf.mxu1 }
 0x336   : > { %v8304_v18 = vadd.f32 %v4118_v3, %v4042_v6  ;;  %v3079_v39 = vmax.f32 %v3025_v47, 0.0  ;;  %v5409_v47 = vld [vmem:[%s8968_s9 + $0x320] sm:$0xff] }
 0x337   : > { %v3513_v14 = vpop.f32.mrf.mxu2  ;;  %3996 = vmatmul.f32.gmra.mxu0 %v7617_v62  ;;  %4443 = vmatpush.msra.mxu3 %v5409_v47 }
 0x338   : > { %9464 = vst [vmem:[#allocation41_spill] sm:$0xff] %v8304_v18  ;;  %v3787_v27 = vpop.f32.mrf.mxu3  ;;  %v3607_v3 = vadd.f32 %v3513_v14, %v7603_v15  ;;  %4168 = vmatmul.f32.gmra.mxu1 %v8302_v12  ;;  %v8334_v18 = vsel %vm1240_vm1, %v3414_v42, %v3415_v9 }
 0x33a   : > { %v3881_v2 = vadd.f32 %v3787_v27, %v3607_v3 }
 0x33c   : > { %v4043_v6 = vadd.f32 %v3949_v46, %v3881_v2  ;;  %3563 = vmatmul.f32.gmra.mxu2 %v8279_v50  ;;  %v3952_v15 = vpop.f32.mrf.mxu0  ;;  %v3133_v46 = vsel %vm735_vm2, %v3079_v39, 0.0 }
 0x33d   : > { %3837 = vmatmul.f32.gmra.mxu3 %v8325_v55  ;;  %v4124_v14 = vpop.f32.mrf.mxu1  ;;  %v3417_v2 = vrot.slane %v3133_v46, 1 }
 0x33e   : > { %v8336_v52 = vadd.f32 %v4121_v13, %v4043_v6  ;;  %v8350_v13 = vsel %vm1596_vm3, %v3684_v7, %v3686_v61  ;;  %v8355_v6 = vld [vmem:[%s8966_s7] ss:$0 sm:$0xff]  ;;  %v3689_v7 = vrot.slane %v7657_v33, 2 }
 0x33f   : > { %v3516_v27 = vpop.f32.mrf.mxu2  ;;  %5366 = vmatmul.msk.f32.gmra.mxu0 %vm676_vm0, %v7637_v19  ;;  %9466 = vst [vmem:[#allocation40_spill] sm:$0xff] %v8350_v13  ;;  %v2970_v43 = vmul.f32 %v8355_v6, %v2912_v5  ;;  %v8362_v61 = vsel %vm1240_vm1, %v3415_v9, %v3417_v2  ;;  %v5440_v5 = vld [vmem:[%s8968_s9 + $0x3a0] sm:$0xff]  ;;  %v3420_v2 = vrot.slane %v7697_v26, 1 }
 0x340   : > { %9465 = vst [vmem:[#allocation19_spill] sm:$0xff] %v8336_v52  ;;  %v3790_v3 = vpop.f32.mrf.mxu3  ;;  %v3608_v42 = vadd.f32 %v3516_v27, %v7620_v63  ;;  %4171 = vmatmul.f32.gmra.mxu1 %v8334_v18  ;;  %v3688_v27 = vrot.slane %v3131_v29, 2  ;;  %4615 = vmatpush.msra.mxu0 %v5440_v5  ;;  %v5456_v9 = vld [vmem:[%s8968_s9 + $0x420] sm:$0xff]  ;;  %v5392_v5 = vld [vmem:[%s8968_s9 + $0x298] sm:$0xff] }
 0x341   : > { %4784 = vmatpush.msra.mxu1 %v5456_v9  ;;  %4282 = vmatpush.msra.mxu2 %v5392_v5 }
 0x342   : > { %v3882_v39 = vadd.f32 %v3790_v3, %v3608_v42  ;;  %v3134_v42 = vsel %vm676_vm0, %v7677_v37, 0.0 }
 0x344   : > { %v4044_v52 = vadd.f32 %v3952_v15, %v3882_v39  ;;  %3566 = vmatmul.f32.gmra.mxu2 %v8302_v12  ;;  %v3955_v63 = vpop.f32.mrf.mxu0  ;;  %v3028_v15 = vadd.f32 %v8312_v54, %v2970_v43 }
 0x345   : > { %3840 = vmatmul.f32.gmra.mxu3 %v8350_v13  ;;  %v4127_v47 = vpop.f32.mrf.mxu1 }
 0x346   : > { %v8364_v3 = vadd.f32 %v4124_v14, %v4044_v52  ;;  %v8380_v14 = vsel %vm1596_vm3, %v3688_v27, %v3689_v7  ;;  %v3419_v52 = vrot.slane %v3134_v42, 1  ;;  %v3691_v27 = vrot.slane %v3133_v46, 2  ;;  %v2915_v46 = vld [vmem:[%s7238_s30 + $0x130] sm:$0x3] }
 0x347   : > { %v3519_v39 = vpop.f32.mrf.mxu2  ;;  %4002 = vmatmul.f32.gmra.mxu0 %v7657_v33  ;;  %9468 = vst [vmem:[#allocation50_spill] sm:$0xff] %v8380_v14 }
 0x348   : > { %9467 = vst [vmem:[#allocation24_spill] sm:$0xff] %v8364_v3  ;;  %v3793_v19 = vpop.f32.mrf.mxu3  ;;  %v3609_v29 = vadd.f32 %v3519_v39, %v7643_v58  ;;  %4174 = vmatmul.f32.gmra.mxu1 %v8362_v61  ;;  %v3082_v3 = vmax.f32 %v3028_v15, 0.0  ;;  %v8389_v33 = vsel %vm1240_vm1, %v3419_v52, %v3420_v2 }
 0x34a   : > { %v3883_v43 = vadd.f32 %v3793_v19, %v3609_v29  ;;  %v3136_v19 = vsel %vm735_vm2, %v3082_v3, 0.0 }
 0x34c   : > { %v4045_v13 = vadd.f32 %v3955_v63, %v3883_v43  ;;  %3569 = vmatmul.f32.gmra.mxu2 %v8334_v18  ;;  %v3958_v58 = vpop.f32.mrf.mxu0  ;;  %v5408_v63 = vld [vmem:[%s8968_s9 + $0x318] sm:$0xff]  ;;  %v2973_v43 = vmul.f32 %v8355_v6, %v2915_v46 }
 0x34d   : > { %3843 = vmatmul.f32.gmra.mxu3 %v8380_v14  ;;  %v4130_v39 = vpop.f32.mrf.mxu1  ;;  %v3694_v14 = vrot.slane %v7697_v26, 2 }
 0x34e   : > { %v8391_v9 = vadd.f32 %v4127_v47, %v4045_v13  ;;  %4444 = vmatpush.msra.mxu3 %v5408_v63  ;;  %v8405_v13 = vsel %vm1596_vm3, %v3689_v7, %v3691_v27  ;;  %v3422_v47 = vrot.slane %v3136_v19, 1  ;;  %v3693_v63 = vrot.slane %v3134_v42, 2  ;;  %v5439_v27 = vld [vmem:[%s8968_s9 + $0x398] sm:$0xff] }
 0x34f   : > { %v3522_v15 = vpop.f32.mrf.mxu2  ;;  %5367 = vmatmul.msk.f32.gmra.mxu0 %vm676_vm0, %v7677_v37  ;;  %v3137_v7 = vsel %vm676_vm0, %v7717_v22, 0.0 }
 0x350   : > { %9469 = vst [vmem:[#allocation57_spill] sm:$0xff] %v8391_v9  ;;  %v3796_v29 = vpop.f32.mrf.mxu3  ;;  %v3610_v52 = vadd.f32 %v3522_v15, %v7660_v36  ;;  %4177 = vmatmul.f32.gmra.mxu1 %v8389_v33  ;;  %v8412_v36 = vsel %vm1240_vm1, %v3420_v2, %v3422_v47  ;;  %4616 = vmatpush.msra.mxu0 %v5439_v27  ;;  %v5455_v2 = vld [vmem:[%s8968_s9 + $0x418] sm:$0xff]  ;;  %v3425_v47 = vrot.slane %v7737_v51, 1  ;;  %v5391_v27 = vld [vmem:[%s8968_s9 + $0x290] sm:$0xff] }
 0x351   : > { %4785 = vmatpush.msra.mxu1 %v5455_v2  ;;  %4283 = vmatpush.msra.mxu2 %v5391_v27 }
 0x352   : > { %v3884_v3 = vadd.f32 %v3796_v29, %v3610_v52  ;;  %v3424_v52 = vrot.slane %v3137_v7, 1 }
 0x354   : > { %v4046_v5 = vadd.f32 %v3958_v58, %v3884_v3  ;;  %3572 = vmatmul.f32.gmra.mxu2 %v8362_v61  ;;  %v3961_v9 = vpop.f32.mrf.mxu0  ;;  %v3031_v58 = vadd.f32 %v8312_v54, %v2973_v43 }
 0x355   : > { %3846 = vmatmul.f32.gmra.mxu3 %v8405_v13  ;;  %v4133_v37 = vpop.f32.mrf.mxu1 }
 0x356   : > { %v8414_v15 = vadd.f32 %v4130_v39, %v4046_v5  ;;  %v8430_v39 = vsel %vm1596_vm3, %v3693_v63, %v3694_v14  ;;  %v3085_v43 = vmax.f32 %v3031_v58, 0.0  ;;  %v3696_v63 = vrot.slane %v3136_v19, 2  ;;  %v5407_v58 = vld [vmem:[%s8968_s9 + $0x310] sm:$0xff]  ;;  %v2918_v19 = vld [vmem:[%s7238_s30 + $0x148] sm:$0x3] }
 0x357   : > { %v3525_v29 = vpop.f32.mrf.mxu2  ;;  %4008 = vmatmul.f32.gmra.mxu0 %v7697_v26  ;;  %4445 = vmatpush.msra.mxu3 %v5407_v58  ;;  %v3698_v58 = vrot.slane %v3137_v7, 2  ;;  %v3699_v26 = vrot.slane %v7737_v51, 2  ;;  %v9473_v7 = vld [vmem:[#allocation55_spill] sm:$0xff] }
 0x358   : > { %9470 = vst [vmem:[#allocation27_spill] sm:$0xff] %v8414_v15  ;;  %v3799_v46 = vpop.f32.mrf.mxu3  ;;  %v3611_v42 = vadd.f32 %v3525_v29, %v7683_v45  ;;  %4180 = vmatmul.f32.gmra.mxu1 %v8412_v36  ;;  %v8439_v15 = vsel %vm1240_vm1, %v3424_v52, %v3425_v47 }
 0x35a   : > { %v3885_v3 = vadd.f32 %v3799_v46, %v3611_v42 }
 0x35c   : > { %v4047_v5 = vadd.f32 %v3961_v9, %v3885_v3  ;;  %3575 = vmatmul.f32.gmra.mxu2 %v8389_v33  ;;  %v3964_v45 = vpop.f32.mrf.mxu0  ;;  %v3139_v9 = vsel %vm735_vm2, %v3085_v43, 0.0 }
 0x35d   : > { %3849 = vmatmul.f32.gmra.mxu3 %v8430_v39  ;;  %v4136_v29 = vpop.f32.mrf.mxu1  ;;  %v3427_v3 = vrot.slane %v3139_v9, 1 }
 0x35e   : > { %v8441_v2 = vadd.f32 %v4133_v37, %v4047_v5  ;;  %v8455_v37 = vsel %vm1596_vm3, %v3694_v14, %v3696_v63  ;;  %v2976_v5 = vmul.f32 %v8355_v6, %v2918_v19  ;;  %v3140_v14 = vsel %vm676_vm0, %v7757_v60, 0.0  ;;  %v5438_v63 = vld [vmem:[%s8968_s9 + $0x390] sm:$0xff] }
 0x35f   : > { %v3528_v46 = vpop.f32.mrf.mxu2  ;;  %5368 = vmatmul.msk.f32.gmra.mxu0 %vm676_vm0, %v7717_v22 }
 0x360   : > { %9471 = vst [vmem:[#allocation22_spill] sm:$0xff] %v8441_v2  ;;  %v3802_v42 = vpop.f32.mrf.mxu3  ;;  %v3612_v52 = vadd.f32 %v3528_v46, %v7700_v4  ;;  %4183 = vmatmul.f32.gmra.mxu1 %v8439_v15  ;;  %v8462_v4 = vsel %vm1240_vm1, %v3425_v47, %v3427_v3  ;;  %4617 = vmatpush.msra.mxu0 %v5438_v63  ;;  %v5454_v47 = vld [vmem:[%s8968_s9 + $0x410] sm:$0xff]  ;;  %v3429_v3 = vrot.slane %v3140_v14, 1 }
 0x361   : > { %4786 = vmatpush.msra.mxu1 %v5454_v47 }
 0x362   : > { %v3886_v43 = vadd.f32 %v3802_v42, %v3612_v52 }
 0x364   : > { %v4048_v27 = vadd.f32 %v3964_v45, %v3886_v43  ;;  %3578 = vmatmul.f32.gmra.mxu2 %v8412_v36  ;;  %v3967_v2 = vpop.f32.mrf.mxu0  ;;  %v3034_v45 = vadd.f32 %v8312_v54, %v2976_v5  ;;  %v3430_v43 = vrot.slane %v7782_v41, 1 }
 0x365   : > { %3852 = vmatmul.f32.gmra.mxu3 %v8455_v37  ;;  %v4139_v22 = vpop.f32.mrf.mxu1 }
 0x366   : > { %v8464_v46 = vadd.f32 %v4136_v29, %v4048_v27  ;;  %v8480_v29 = vsel %vm1596_vm3, %v3698_v58, %v3699_v26  ;;  %v3088_v27 = vmax.f32 %v3034_v45, 0.0  ;;  %v3701_v58 = vrot.slane %v3139_v9, 2  ;;  %v5406_v45 = vld [vmem:[%s8968_s9 + $0x308] sm:$0xff]  ;;  %v2921_v9 = vld [vmem:[%s7238_s30 + $0x160] sm:$0x3] }
 0x367   : > { %v3531_v42 = vpop.f32.mrf.mxu2  ;;  %4014 = vmatmul.f32.gmra.mxu0 %v7737_v51  ;;  %9474 = vst [vmem:[#allocation60_spill] sm:$0xff] %v8480_v29  ;;  %v8489_v51 = vsel %vm1240_vm1, %v3429_v3, %v3430_v43  ;;  %4446 = vmatpush.msra.mxu3 %v5406_v45  ;;  %v3703_v45 = vrot.slane %v3140_v14, 2 }
 0x368   : > { %9472 = vst [vmem:[#allocation52_spill] sm:$0xff] %v8464_v46  ;;  %v3805_v19 = vpop.f32.mrf.mxu3  ;;  %v3613_v52 = vadd.f32 %v3531_v42, %v9473_v7  ;;  %4186 = vmatmul.f32.gmra.mxu1 %v8462_v4  ;;  %v5390_v42 = vld [vmem:[%s8968_s9 + $0x288] sm:$0xff] }
 0x369   : > { %4284 = vmatpush.msra.mxu2 %v5390_v42 }
 0x36a   : > { %v3887_v5 = vadd.f32 %v3805_v19, %v3613_v52 }
 0x36c   : > { %v4049_v46 = vadd.f32 %v3967_v2, %v3887_v5  ;;  %3581 = vmatmul.f32.gmra.mxu2 %v8439_v15  ;;  %v3970_v63 = vpop.f32.mrf.mxu0  ;;  %v3142_v2 = vsel %vm735_vm2, %v3088_v27, 0.0  ;;  %v2979_v27 = vmul.f32 %v8355_v6, %v2921_v9 }
 0x36d   : > { %3855 = vmatmul.f32.gmra.mxu3 %v8480_v29  ;;  %v4142_v7 = vpop.f32.mrf.mxu1  ;;  %v3704_v29 = vrot.slane %v7782_v41, 2 }
 0x36e   : > { %v8491_v47 = vadd.f32 %v4139_v22, %v4049_v46  ;;  %v8505_v22 = vsel %vm1596_vm3, %v3699_v26, %v3701_v58  ;;  %v3432_v46 = vrot.slane %v3142_v2, 1  ;;  %v3143_v26 = vsel %vm676_vm0, %v7807_v40, 0.0  ;;  %v5437_v58 = vld [vmem:[%s8968_s9 + $0x388] sm:$0xff] }
 0x36f   : > { %v3534_v19 = vpop.f32.mrf.mxu2  ;;  %5369 = vmatmul.msk.f32.gmra.mxu0 %vm676_vm0, %v7757_v60 }
 0x370   : > { %9475 = vst [vmem:[#allocation28_spill] sm:$0xff] %v8491_v47  ;;  %v3808_v52 = vpop.f32.mrf.mxu3  ;;  %v3614_v3 = vadd.f32 %v3534_v19, %v7740_v48  ;;  %4189 = vmatmul.f32.gmra.mxu1 %v8489_v51  ;;  %v8512_v48 = vsel %vm1240_vm1, %v3430_v43, %v3432_v46  ;;  %4618 = vmatpush.msra.mxu0 %v5437_v58  ;;  %v5453_v43 = vld [vmem:[%s8968_s9 + $0x408] sm:$0xff]  ;;  %v3435_v46 = vrot.slane %v7827_v53, 1  ;;  %v5389_v58 = vld [vmem:[%s8968_s9 + $0x280] sm:$0xff] }
 0x371   : > { %9476 = vst [vmem:[#allocation59_spill] sm:$0xff] %v8512_v48  ;;  %4787 = vmatpush.msra.mxu1 %v5453_v43  ;;  %4285 = vmatpush.msra.mxu2 %v5389_v58 }
 0x372   : > { %v3888_v5 = vadd.f32 %v3808_v52, %v3614_v3  ;;  %v3434_v3 = vrot.slane %v3143_v26, 1 }
 0x374   : > { %v4050_v42 = vadd.f32 %v3970_v63, %v3888_v5  ;;  %3584 = vmatmul.f32.gmra.mxu2 %v8462_v4  ;;  %v3973_v47 = vpop.f32.mrf.mxu0  ;;  %v3037_v63 = vadd.f32 %v8312_v54, %v2979_v27 }
 0x375   : > { %3858 = vmatmul.f32.gmra.mxu3 %v8505_v22  ;;  %v4145_v60 = vpop.f32.mrf.mxu1 }
 0x376   : > { %v8514_v19 = vadd.f32 %v4142_v7, %v4050_v42  ;;  %v8530_v7 = vsel %vm1596_vm3, %v3703_v45, %v3704_v29  ;;  %v3091_v27 = vmax.f32 %v3037_v63, 0.0  ;;  %v3706_v45 = vrot.slane %v3142_v2, 2  ;;  %v5405_v63 = vld [vmem:[%s8968_s9 + $0x300] sm:$0xff]  ;;  %v2924_v2 = vld [vmem:[%s7238_s30 + $0x178] sm:$0x3] }
 0x377   : > { %v3537_v52 = vpop.f32.mrf.mxu2  ;;  %4020 = vmatmul.f32.gmra.mxu0 %v7782_v41  ;;  %4447 = vmatpush.msra.mxu3 %v5405_v63 }
 0x378   : > { %9477 = vst [vmem:[#allocation65_spill] sm:$0xff] %v8514_v19  ;;  %v3811_v9 = vpop.f32.mrf.mxu3  ;;  %v3615_v14 = vadd.f32 %v3537_v52, %v7763_v21  ;;  %4192 = vmatmul.f32.gmra.mxu1 %v8512_v48  ;;  %v8539_v19 = vsel %vm1240_vm1, %v3434_v3, %v3435_v46 }
 0x37a   : > { %v3889_v5 = vadd.f32 %v3811_v9, %v3615_v14 }
 0x37c   : > { %v4051_v42 = vadd.f32 %v3973_v47, %v3889_v5  ;;  %3587 = vmatmul.f32.gmra.mxu2 %v8489_v51  ;;  %v3976_v21 = vpop.f32.mrf.mxu0  ;;  %v3145_v47 = vsel %vm735_vm2, %v3091_v27, 0.0 }
 0x37d   : > { %3861 = vmatmul.f32.gmra.mxu3 %v8530_v7  ;;  %v4148_v52 = vpop.f32.mrf.mxu1  ;;  %v3437_v5 = vrot.slane %v3145_v47, 1 }
 0x37e   : > { %v8541_v43 = vadd.f32 %v4145_v60, %v4051_v42  ;;  %v8555_v60 = vsel %vm1596_vm3, %v3704_v29, %v3706_v45  ;;  %v2982_v42 = vmul.f32 %v8355_v6, %v2924_v2  ;;  %v3708_v29 = vrot.slane %v3143_v26, 2  ;;  %v5436_v2 = vld [vmem:[%s8968_s9 + $0x380] sm:$0xff] }
 0x37f   : > { %v3540_v9 = vpop.f32.mrf.mxu2  ;;  %5370 = vmatmul.msk.f32.gmra.mxu0 %vm676_vm0, %v7807_v40  ;;  %9479 = vst [vmem:[#allocation32_spill] sm:$0xff] %v8555_v60  ;;  %v3709_v45 = vrot.slane %v7827_v53, 2  ;;  %v8569_v63 = vsel %vm1240_vm1, %v3435_v46, %v3437_v5 }
 0x380   : > { %9478 = vst [vmem:[#allocation34_spill] sm:$0xff] %v8541_v43  ;;  %v3814_v14 = vpop.f32.mrf.mxu3  ;;  %v3616_v3 = vadd.f32 %v3540_v9, %v7790_v23  ;;  %4195 = vmatmul.f32.gmra.mxu1 %v8539_v19  ;;  %v3146_v9 = vsel %vm676_vm0, %v7845_v59, 0.0  ;;  %4619 = vmatpush.msra.mxu0 %v5436_v2 }
 0x381   : > { %v8588_v5 = vsel %vm1596_vm3, %v3708_v29, %v3709_v45 }
 0x382   : > { %v3890_v27 = vadd.f32 %v3814_v14, %v3616_v3  ;;  %v3040_v14 = vadd.f32 %v8312_v54, %v2982_v42  ;;  %v3439_v42 = vrot.slane %v3146_v9, 1 }
 0x384   : > { %v4052_v58 = vadd.f32 %v3976_v21, %v3890_v27  ;;  %3590 = vmatmul.f32.gmra.mxu2 %v8512_v48  ;;  %v3979_v43 = vpop.f32.mrf.mxu0  ;;  %v2925_v27 = vld [vmem:[%s8565_s11] sm:$0xff]  ;;  %v3094_v40 = vmax.f32 %v3040_v14, 0.0  ;;  %v3711_v48 = vrot.slane %v3145_v47, 2 }
 0x385   : > { %3864 = vmatmul.f32.gmra.mxu3 %v8555_v60  ;;  %v4151_v23 = vpop.f32.mrf.mxu1 }
 0x386   : > { %v8571_v21 = vadd.f32 %v4148_v52, %v4052_v58  ;;  %v5452_v52 = vld [vmem:[%s8968_s9 + $0x400] sm:$0xff]  ;;  %v3440_v58 = vrot.slane %v7866_v44, 1  ;;  %v3148_v14 = vsel %vm735_vm2, %v3094_v40, 0.0 }
 0x387   : > { %v3543_v3 = vpop.f32.mrf.mxu2  ;;  %4026 = vmatmul.f32.gmra.mxu0 %v7827_v53  ;;  %4788 = vmatpush.msra.mxu1 %v5452_v52  ;;  %v2926_v53 = vld [vmem:[%s8565_s11 + $0x8] sm:$0xff] }
 0x388   : > { %9480 = vst [vmem:[#allocation37_spill] sm:$0xff] %v8571_v21  ;;  %v3817_v26 = vpop.f32.mrf.mxu3  ;;  %v3617_v46 = vadd.f32 %v3543_v3, %v7813_v16  ;;  %4198 = vmatmul.f32.gmra.mxu1 %v8569_v63  ;;  %v2983_v16 = vmul.f32 %v8355_v6, %v2925_v27  ;;  %v8596_v29 = vsel %vm1240_vm1, %v3439_v42, %v3440_v58  ;;  %v2927_v27 = vld [vmem:[%s8565_s11 + $0x10] sm:$0x3] }
 0x389   : > { %v2984_v41 = vmul.f32 %v8355_v6, %v2926_v53  ;;  %v8611_v53 = vsel %vm1596_vm3, %v3709_v45, %v3711_v48 }
 0x38a   : > { %v3891_v21 = vadd.f32 %v3817_v26, %v3617_v46  ;;  %v3041_v26 = vadd.f32 %v8312_v54, %v2983_v16  ;;  %v2985_v16 = vmul.f32 %v8355_v6, %v2927_v27 }
 0x38b   : > { %v3042_v46 = vadd.f32 %v8312_v54, %v2984_v41 }
 0x38c   : > { %v4053_v3 = vadd.f32 %v3979_v43, %v3891_v21  ;;  %3593 = vmatmul.f32.gmra.mxu2 %v8539_v19  ;;  %v3982_v2 = vpop.f32.mrf.mxu0  ;;  %v8614_v42 = vmax.f32 %v3041_v26, 0.0 }
 0x38d   : > { %3867 = vmatmul.f32.gmra.mxu3 %v8588_v5  ;;  %v4154_v60 = vpop.f32.mrf.mxu1  ;;  %v8623_v45 = vmax.f32 %v3042_v46, 0.0 }
 0x38e   : > { %v8599_v52 = vadd.f32 %v4151_v23, %v4053_v3  ;;  %v3442_v23 = vrot.slane %v3148_v14, 1  ;;  %v8630_v6 = vsel %vm676_vm0, %v8614_v42, 0.0 }
 0x38f   : > { %v3546_v43 = vpop.f32.mrf.mxu2  ;;  %5371 = vmatmul.msk.f32.gmra.mxu0 %vm676_vm0, %v7845_v59  ;;  %v3714_v59 = vrot.slane %v7866_v44, 2 }
 0x390   : > { %9481 = vst [vmem:[#allocation38_spill] sm:$0xff] %v8599_v52  ;;  %v3820_v21 = vpop.f32.mrf.mxu3  ;;  %v3618_v47 = vadd.f32 %v3546_v43, %v7830_v34  ;;  %4201 = vmatmul.f32.gmra.mxu1 %v8596_v29  ;;  %v3713_v43 = vrot.slane %v3146_v9, 2  ;;  %v8621_v48 = vsel %vm1240_vm1, %v3440_v58, %v3442_v23  ;;  %v9483_v9 = vld [vmem:[#allocation56_spill] sm:$0xff] }
 0x392   : > { %v3892_v40 = vadd.f32 %v3820_v21, %v3618_v47  ;;  %v8637_v58 = vsel %vm1596_vm3, %v3713_v43, %v3714_v59  ;;  %v4078_v47 = vrot.slane %v8623_v45, 1 }
 0x394   : > { %v4054_v3 = vadd.f32 %v3982_v2, %v3892_v40  ;;  %3596 = vmatmul.f32.gmra.mxu2 %v8569_v63  ;;  %v3985_v52 = vpop.f32.mrf.mxu0  ;;  %v3043_v2 = vadd.f32 %v8312_v54, %v2985_v16 }
 0x395   : > { %3870 = vmatmul.f32.gmra.mxu3 %v8611_v53  ;;  %v4157_v34 = vpop.f32.mrf.mxu1 }
 0x396   : > { %v8625_v41 = vadd.f32 %v4154_v60, %v4054_v3  ;;  %v4077_v60 = vrot.slane %v8630_v6, 1  ;;  %v3097_v46 = vmax.f32 %v3043_v2, 0.0  ;;  %v3716_v3 = vrot.slane %v3148_v14, 2 }
 0x397   : > { %v3549_v26 = vpop.f32.mrf.mxu2  ;;  %4032 = vmatmul.f32.gmra.mxu0 %v7866_v44 }
 0x398   : > { %9482 = vst [vmem:[#allocation44_spill] sm:$0xff] %v8625_v41  ;;  %v3823_v21 = vpop.f32.mrf.mxu3  ;;  %v3619_v27 = vadd.f32 %v3549_v26, %v9483_v9  ;;  %4204 = vmatmul.f32.gmra.mxu1 %v8621_v48  ;;  %v8644_v26 = vsel %vm1240_vm1, %v4077_v60, %v4078_v47  ;;  %v8650_v43 = vsel %vm735_vm2, %v3097_v46, 0.0  ;;  %v8658_v14 = vsel %vm1596_vm3, %v3714_v59, %v3716_v3  ;;  %v9489_v59 = vld [vmem:[#allocation83_spill] sm:$0xff] }
 0x399   : > { %9485 = vst [vmem:[#allocation51_spill] sm:$0xff] %v8650_v43 }
 0x39a   : > { %v3893_v23 = vadd.f32 %v3823_v21, %v3619_v27 }
 0x39c   : > { %v4055_v40 = vadd.f32 %v3985_v52, %v3893_v23  ;;  %3599 = vmatmul.f32.gmra.mxu2 %v8596_v29  ;;  %v3988_v54 = vpop.f32.mrf.mxu0  ;;  %v9486_v52 = vld [vmem:[#allocation63_spill] sm:$0xff] }
 0x39d   : > { %3873 = vmatmul.f32.gmra.mxu3 %v8637_v58  ;;  %v4160_v16 = vpop.f32.mrf.mxu1 }
 0x39e   : > { %v8646_v9 = vadd.f32 %v4157_v34, %v4055_v40  ;;  %v4080_v34 = vrot.slane %v8650_v43, 1  ;;  %v9499_v43 = vld [vmem:[#allocation2_spill] sm:$0xff] }
 0x39f   : > { %v3552_v41 = vpop.f32.mrf.mxu2  ;;  %5372 = vmatmul.msk.f32.gmra.mxu0 %vm676_vm0, %v8614_v42 }
 0x3a0   : > { %9484 = vst [vmem:[#allocation47_spill] sm:$0xff] %v8646_v9  ;;  %v3826_v21 = vpop.f32.mrf.mxu3  ;;  %v3620_v2 = vadd.f32 %v3552_v41, %v9486_v52  ;;  %4207 = vmatmul.f32.gmra.mxu1 %v8644_v26  ;;  %v8664_v46 = vsel %vm1240_vm1, %v4078_v47, %v4080_v34 }
 0x3a1   : > { %9487 = vst [vmem:[#allocation62_spill] sm:$0xff] %v8664_v46 }
 0x3a2   : > { %v3894_v27 = vadd.f32 %v3826_v21, %v3620_v2 }
 0x3a4   : > { %v4056_v60 = vadd.f32 %v3988_v54, %v3894_v27  ;;  %3602 = vmatmul.f32.gmra.mxu2 %v8621_v48  ;;  %v3991_v28 = vpop.f32.mrf.mxu0 }
 0x3a5   : > { %3876 = vmatmul.f32.gmra.mxu3 %v8658_v14  ;;  %v4163_v23 = vpop.f32.mrf.mxu1 }
 0x3a6   : > { %v8666_v40 = vadd.f32 %v4160_v16, %v4056_v60  ;;  %v9491_v60 = vld [vmem:[#allocation61_spill] sm:$0xff] }
 0x3a7   : > { %v3555_v41 = vpop.f32.mrf.mxu2  ;;  %4038 = vmatmul.f32.gmra.mxu0 %v8623_v45 }
 0x3a8   : > { %9488 = vst [vmem:[#allocation68_spill] sm:$0xff] %v8666_v40  ;;  %v3829_v52 = vpop.f32.mrf.mxu3  ;;  %v3621_v3 = vadd.f32 %v3555_v41, %v9489_v59  ;;  %4210 = vmatmul.f32.gmra.mxu1 %v8664_v46  ;;  %v9492_v40 = vld [vmem:[#allocation80_spill] sm:$0xff]  ;;  %v9493_v59 = vld [vmem:[#allocation69_spill] sm:$0xff]  ;;  %v9498_v46 = vld [vmem:[#allocation67_spill] sm:$0xff] }
 0x3aa   : > { %v3895_v54 = vadd.f32 %v3829_v52, %v3621_v3  ;;  %v9494_v3 = vld [vmem:[#allocation85_spill] sm:$0xff] }
 0x3ac   : > { %v4057_v21 = vadd.f32 %v3991_v28, %v3895_v54  ;;  %4286 = vmatmul.f32.vlgmr.msra.gmra.mxu2 %v7922_v49  ;;  %v3994_v47 = vpop.f32.mrf.mxu0  ;;  %v9495_v49 = vld [vmem:[#allocation42_spill] sm:$0xff] }
 0x3ad   : > { %5421 = vmatmul.msk.f32.vlgmr.msra.gmra.mxu3 %vm676_vm0, %v7317_v35  ;;  %v4166_v2 = vpop.f32.mrf.mxu1 }
 0x3ae   : > { %v8675_v16 = vadd.f32 %v4163_v23, %v4057_v21 }
 0x3af   : > { %v3558_v34 = vpop.f32.mrf.mxu2  ;;  %4620 = vmatmul.f32.vlgmr.msra.gmra.mxu0 %v9491_v60 }
 0x3b0   : > { %9490 = vst [vmem:[#allocation17_spill] sm:$0xff] %v8675_v16  ;;  %v3832_v27 = vpop.f32.mrf.mxu3  ;;  %v3622_v41 = vadd.f32 %v3558_v34, %v9492_v40  ;;  %4789 = vmatmul.f32.vlgmr.msra.gmra.mxu1 %v9493_v59  ;;  %v9497_v16 = vld [vmem:[#allocation82_spill] sm:$0xff] }
 0x3b2   : > { %v3896_v52 = vadd.f32 %v3832_v27, %v3622_v41 }
 0x3b4   : > { %v4058_v28 = vadd.f32 %v3994_v47, %v3896_v52  ;;  %4289 = vmatmul.f32.gmra.mxu2 %v9494_v3  ;;  %v3997_v54 = vpop.f32.mrf.mxu0  ;;  %v9500_v47 = vld [vmem:[#allocation48_spill] sm:$0xff]  ;;  %v9502_v3 = vld [vmem:[#allocation87_spill] sm:$0xff] }
 0x3b5   : > { %4451 = vmatmul.f32.gmra.mxu3 %v9495_v49  ;;  %v4169_v35 = vpop.f32.mrf.mxu1  ;;  %v9504_v49 = vld [vmem:[#allocation86_spill] sm:$0xff] }
 0x3b6   : > { %v8682_v9 = vadd.f32 %v4166_v2, %v4058_v28 }
 0x3b7   : > { %v3561_v23 = vpop.f32.mrf.mxu2  ;;  %4623 = vmatmul.f32.gmra.mxu0 %v9497_v16  ;;  %v9503_v16 = vld [vmem:[#allocation64_spill] sm:$0xff] }
 0x3b8   : > { %9496 = vst [vmem:[#allocation71_spill] sm:$0xff] %v8682_v9  ;;  %v3835_v21 = vpop.f32.mrf.mxu3  ;;  %v3623_v60 = vadd.f32 %v3561_v23, %v9498_v46  ;;  %4792 = vmatmul.f32.gmra.mxu1 %v9499_v43  ;;  %v9508_v9 = vld [vmem:[#allocation88_spill] sm:$0xff] }
 0x3ba   : > { %v3897_v40 = vadd.f32 %v3835_v21, %v3623_v60 }
 0x3bc   : > { %v4059_v34 = vadd.f32 %v3997_v54, %v3897_v40  ;;  %4292 = vmatmul.f32.gmra.mxu2 %v9493_v59  ;;  %v4000_v27 = vpop.f32.mrf.mxu0  ;;  %v9505_v59 = vld [vmem:[#allocation54_spill] sm:$0xff] }
 0x3bd   : > { %5422 = vmatmul.msk.f32.gmra.mxu3 %vm676_vm0, %v9500_v47  ;;  %v4172_v41 = vpop.f32.mrf.mxu1  ;;  %v9506_v47 = vld [vmem:[#allocation5_spill] sm:$0xff] }
 0x3be   : > { %v8691_v2 = vadd.f32 %v4169_v35, %v4059_v34 }
 0x3bf   : > { %v3564_v52 = vpop.f32.mrf.mxu2  ;;  %4626 = vmatmul.f32.gmra.mxu0 %v9502_v3 }
 0x3c0   : > { %9501 = vst [vmem:[#allocation29_spill] sm:$0xff] %v8691_v2  ;;  %v3838_v28 = vpop.f32.mrf.mxu3  ;;  %v3624_v46 = vadd.f32 %v3564_v52, %v9503_v16  ;;  %4795 = vmatmul.f32.gmra.mxu1 %v9504_v49  ;;  %v9507_v2 = vld [vmem:[#allocation84_spill] sm:$0xff] }
 0x3c2   : > { %v3898_v23 = vadd.f32 %v3838_v28, %v3624_v46 }
 0x3c4   : > { %v4060_v54 = vadd.f32 %v4000_v27, %v3898_v23  ;;  %4295 = vmatmul.f32.gmra.mxu2 %v9499_v43  ;;  %v4003_v21 = vpop.f32.mrf.mxu0  ;;  %v9509_v27 = vld [vmem:[#allocation66_spill] sm:$0xff] }
 0x3c5   : > { %4457 = vmatmul.f32.gmra.mxu3 %v9505_v59  ;;  %v4175_v60 = vpop.f32.mrf.mxu1  ;;  %v9511_v59 = vld [vmem:[#allocation89_spill] sm:$0xff] }
 0x3c6   : > { %v8698_v40 = vadd.f32 %v4172_v41, %v4060_v54  ;;  %v9510_v54 = vld [vmem:[#allocation3_spill] sm:$0xff] }
 0x3c7   : > { %v3567_v35 = vpop.f32.mrf.mxu2  ;;  %4629 = vmatmul.f32.gmra.mxu0 %v9506_v47 }
 0x3c8   : > { %v3841_v34 = vpop.f32.mrf.mxu3  ;;  %v3625_v3 = vadd.f32 %v3567_v35, %v9507_v2  ;;  %4798 = vmatmul.f32.gmra.mxu1 %v9508_v9  ;;  %v9512_v35 = vld [vmem:[#allocation11_spill] sm:$0xff] }
 0x3ca   : > { %v3899_v52 = vadd.f32 %v3841_v34, %v3625_v3 }
 0x3cc   : > { %v4061_v16 = vadd.f32 %v4003_v21, %v3899_v52  ;;  %4298 = vmatmul.f32.gmra.mxu2 %v9504_v49  ;;  %v4006_v43 = vpop.f32.mrf.mxu0  ;;  %v9513_v49 = vld [vmem:[#allocation4_spill] sm:$0xff] }
 0x3cd   : > { %5423 = vmatmul.msk.f32.gmra.mxu3 %vm676_vm0, %v9509_v27  ;;  %v4178_v28 = vpop.f32.mrf.mxu1  ;;  %v9514_v27 = vld [vmem:[#allocation8_spill] sm:$0xff] }
 0x3ce   : > { %v8707_v41 = vadd.f32 %v4175_v60, %v4061_v16 }
 0x3cf   : > { %v3570_v46 = vpop.f32.mrf.mxu2  ;;  %4632 = vmatmul.f32.gmra.mxu0 %v9510_v54 }
 0x3d0   : > { %v3844_v23 = vpop.f32.mrf.mxu3  ;;  %v3626_v2 = vadd.f32 %v3570_v46, %v9511_v59  ;;  %4801 = vmatmul.f32.gmra.mxu1 %v9512_v35 }
 0x3d2   : > { %v3900_v34 = vadd.f32 %v3844_v23, %v3626_v2 }
 0x3d4   : > { %v4062_v21 = vadd.f32 %v4006_v43, %v3900_v34  ;;  %4301 = vmatmul.f32.gmra.mxu2 %v9508_v9  ;;  %v4009_v47 = vpop.f32.mrf.mxu0  ;;  %v9515_v43 = vld [vmem:[#allocation25_spill] sm:$0xff] }
 0x3d5   : > { %4463 = vmatmul.f32.gmra.mxu3 %v9513_v49  ;;  %v4181_v3 = vpop.f32.mrf.mxu1 }
 0x3d6   : > { %v8714_v52 = vadd.f32 %v4178_v28, %v4062_v21  ;;  %v9516_v21 = vld [vmem:[#allocation90_spill] sm:$0xff] }
 0x3d7   : > { %v3573_v60 = vpop.f32.mrf.mxu2  ;;  %4635 = vmatmul.f32.gmra.mxu0 %v8052_v20  ;;  %v9517_v20 = vld [vmem:[#allocation7_spill] sm:$0xff] }
 0x3d8   : > { %v3847_v16 = vpop.f32.mrf.mxu3  ;;  %v3627_v54 = vadd.f32 %v3573_v60, %v9514_v27  ;;  %4804 = vmatmul.f32.gmra.mxu1 %v8095_v1  ;;  %v9518_v60 = vld [vmem:[#allocation91_spill] sm:$0xff] }
 0x3da   : > { %v3901_v46 = vadd.f32 %v3847_v16, %v3627_v54 }
 0x3dc   : > { %v4063_v59 = vadd.f32 %v4009_v47, %v3901_v46  ;;  %4304 = vmatmul.f32.gmra.mxu2 %v9512_v35  ;;  %v4012_v9 = vpop.f32.mrf.mxu0  ;;  %v9519_v35 = vld [vmem:[#allocation23_spill] sm:$0xff] }
 0x3dd   : > { %5424 = vmatmul.msk.f32.gmra.mxu3 %vm676_vm0, %v9515_v43  ;;  %v4184_v23 = vpop.f32.mrf.mxu1  ;;  %v9520_v43 = vld [vmem:[#allocation9_spill] sm:$0xff] }
 0x3de   : > { %v8723_v28 = vadd.f32 %v4181_v3, %v4063_v59 }
 0x3df   : > { %v3576_v2 = vpop.f32.mrf.mxu2  ;;  %4638 = vmatmul.f32.gmra.mxu0 %v9516_v21 }
 0x3e0   : > { %v3850_v34 = vpop.f32.mrf.mxu3  ;;  %v3628_v49 = vadd.f32 %v3576_v2, %v9517_v20  ;;  %4807 = vmatmul.f32.gmra.mxu1 %v9518_v60 }
 0x3e2   : > { %v3902_v16 = vadd.f32 %v3850_v34, %v3628_v49 }
 0x3e4   : > { %v4064_v47 = vadd.f32 %v4012_v9, %v3902_v16  ;;  %4307 = vmatmul.f32.gmra.mxu2 %v8095_v1  ;;  %v4015_v27 = vpop.f32.mrf.mxu0  ;;  %v9521_v9 = vld [vmem:[#allocation72_spill] sm:$0xff] }
 0x3e5   : > { %4469 = vmatmul.f32.gmra.mxu3 %v9519_v35  ;;  %v4187_v54 = vpop.f32.mrf.mxu1 }
 0x3e6   : > { %v8730_v46 = vadd.f32 %v4184_v23, %v4064_v47  ;;  %v9522_v47 = vld [vmem:[#allocation13_spill] sm:$0xff] }
 0x3e7   : > { %v3579_v3 = vpop.f32.mrf.mxu2  ;;  %4641 = vmatmul.f32.gmra.mxu0 %v8102_v30  ;;  %v9523_v30 = vld [vmem:[#allocation14_spill] sm:$0xff] }
 0x3e8   : > { %v3853_v59 = vpop.f32.mrf.mxu3  ;;  %v3629_v21 = vadd.f32 %v3579_v3, %v9520_v43  ;;  %4810 = vmatmul.f32.gmra.mxu1 %v8145_v38  ;;  %v9524_v3 = vld [vmem:[#allocation12_spill] sm:$0xff] }
 0x3ea   : > { %v3903_v2 = vadd.f32 %v3853_v59, %v3629_v21 }
 0x3ec   : > { %v4065_v20 = vadd.f32 %v4015_v27, %v3903_v2  ;;  %4310 = vmatmul.f32.gmra.mxu2 %v9518_v60  ;;  %v4018_v1 = vpop.f32.mrf.mxu0  ;;  %v9525_v60 = vld [vmem:[#allocation35_spill] sm:$0xff] }
 0x3ed   : > { %5425 = vmatmul.msk.f32.gmra.mxu3 %vm676_vm0, %v9521_v9  ;;  %v4190_v34 = vpop.f32.mrf.mxu1  ;;  %v9526_v9 = vld [vmem:[#allocation10_spill] sm:$0xff] }
 0x3ee   : > { %v8739_v23 = vadd.f32 %v4187_v54, %v4065_v20 }
 0x3ef   : > { %v3582_v49 = vpop.f32.mrf.mxu2  ;;  %4644 = vmatmul.f32.gmra.mxu0 %v9522_v47 }
 0x3f0   : > { %v3856_v16 = vpop.f32.mrf.mxu3  ;;  %v3630_v35 = vadd.f32 %v3582_v49, %v9523_v30  ;;  %4813 = vmatmul.f32.gmra.mxu1 %v9524_v3 }
 0x3f2   : > { %v3904_v59 = vadd.f32 %v3856_v16, %v3630_v35 }
 0x3f4   : > { %v4066_v27 = vadd.f32 %v4018_v1, %v3904_v59  ;;  %4313 = vmatmul.f32.gmra.mxu2 %v8145_v38  ;;  %v4021_v43 = vpop.f32.mrf.mxu0  ;;  %v9527_v1 = vld [vmem:[#allocation33_spill] sm:$0xff] }
 0x3f5   : > { %4475 = vmatmul.f32.gmra.mxu3 %v9525_v60  ;;  %v4193_v21 = vpop.f32.mrf.mxu1  ;;  %v9529_v60 = vld [vmem:[#allocation31_spill] sm:$0xff] }
 0x3f6   : > { %v8746_v2 = vadd.f32 %v4190_v34, %v4066_v27 }
 0x3f7   : > { %v3585_v54 = vpop.f32.mrf.mxu2  ;;  %4647 = vmatmul.f32.gmra.mxu0 %v8152_v11  ;;  %v9528_v11 = vld [vmem:[#allocation21_spill] sm:$0xff] }
 0x3f8   : > { %v3859_v20 = vpop.f32.mrf.mxu3  ;;  %v3631_v47 = vadd.f32 %v3585_v54, %v9526_v9  ;;  %4816 = vmatmul.f32.gmra.mxu1 %v8195_v17 }
 0x3fa   : > { %v3905_v49 = vadd.f32 %v3859_v20, %v3631_v47 }
 0x3fc   : > { %v4067_v30 = vadd.f32 %v4021_v43, %v3905_v49  ;;  %4316 = vmatmul.f32.gmra.mxu2 %v9524_v3  ;;  %v4024_v38 = vpop.f32.mrf.mxu0  ;;  %v9530_v3 = vld [vmem:[#allocation74_spill] sm:$0xff] }
 0x3fd   : > { %5426 = vmatmul.msk.f32.gmra.mxu3 %vm676_vm0, %v9527_v1  ;;  %v4196_v16 = vpop.f32.mrf.mxu1 }
 0x3fe   : > { %v8755_v34 = vadd.f32 %v4193_v21, %v4067_v30  ;;  %v9531_v30 = vld [vmem:[#allocation20_spill] sm:$0xff] }
 0x3ff   : > { %v3588_v35 = vpop.f32.mrf.mxu2  ;;  %4650 = vmatmul.f32.gmra.mxu0 %v8179_v57 }
 0x400   : > { %v3862_v59 = vpop.f32.mrf.mxu3  ;;  %v3632_v27 = vadd.f32 %v3588_v35, %v9528_v11  ;;  %4819 = vmatmul.f32.gmra.mxu1 %v9529_v60 }
 0x402   : > { %v3906_v54 = vadd.f32 %v3862_v59, %v3632_v27 }
 0x404   : > { %v4068_v43 = vadd.f32 %v4024_v38, %v3906_v54  ;;  %4319 = vmatmul.f32.gmra.mxu2 %v8195_v17  ;;  %v4027_v20 = vpop.f32.mrf.mxu0  ;;  %v9532_v38 = vld [vmem:[#allocation36_spill] sm:$0xff] }
 0x405   : > { %4481 = vmatmul.f32.gmra.mxu3 %v9530_v3  ;;  %v4199_v9 = vpop.f32.mrf.mxu1 }
 0x406   : > { %v8762_v47 = vadd.f32 %v4196_v16, %v4068_v43 }
 0x407   : > { %v3591_v21 = vpop.f32.mrf.mxu2  ;;  %4653 = vmatmul.f32.gmra.mxu0 %v8202_v32  ;;  %v9533_v32 = vld [vmem:[#allocation16_spill] sm:$0xff] }
 0x408   : > { %v3865_v49 = vpop.f32.mrf.mxu3  ;;  %v3633_v57 = vadd.f32 %v3591_v21, %v9531_v30  ;;  %4822 = vmatmul.f32.gmra.mxu1 %v8245_v10  ;;  %v9534_v30 = vld [vmem:[#allocation15_spill] sm:$0xff] }
 0x40a   : > { %v3907_v1 = vadd.f32 %v3865_v49, %v3633_v57 }
 0x40c   : > { %v4069_v35 = vadd.f32 %v4027_v20, %v3907_v1  ;;  %4322 = vmatmul.f32.gmra.mxu2 %v9529_v60  ;;  %v4030_v17 = vpop.f32.mrf.mxu0 }
 0x40d   : > { %5427 = vmatmul.msk.f32.gmra.mxu3 %vm676_vm0, %v9532_v38  ;;  %v4202_v59 = vpop.f32.mrf.mxu1 }
 0x40e   : > { %v8771_v16 = vadd.f32 %v4199_v9, %v4069_v35  ;;  %v9535_v35 = vld [vmem:[#allocation45_spill] sm:$0xff] }
 0x40f   : > { %v3594_v11 = vpop.f32.mrf.mxu2  ;;  %4656 = vmatmul.f32.gmra.mxu0 %v8229_v24 }
 0x410   : > { %v3868_v27 = vpop.f32.mrf.mxu3  ;;  %v3634_v54 = vadd.f32 %v3594_v11, %v9533_v32  ;;  %4825 = vmatmul.f32.gmra.mxu1 %v8270_v56 }
 0x412   : > { %v3908_v43 = vadd.f32 %v3868_v27, %v3634_v54 }
 0x414   : > { %v4070_v3 = vadd.f32 %v4030_v17, %v3908_v43  ;;  %4325 = vmatmul.f32.gmra.mxu2 %v8245_v10  ;;  %v4033_v60 = vpop.f32.mrf.mxu0 }
 0x415   : > { %4487 = vmatmul.f32.gmra.mxu3 %v7577_v0  ;;  %v4205_v20 = vpop.f32.mrf.mxu1 }
 0x416   : > { %v8778_v21 = vadd.f32 %v4202_v59, %v4070_v3 }
 0x417   : > { %v3597_v9 = vpop.f32.mrf.mxu2  ;;  %4659 = vmatmul.f32.gmra.mxu0 %v8252_v8  ;;  %v9536_v8 = vld [vmem:[#allocation30_spill] sm:$0xff] }
 0x418   : > { %v3871_v49 = vpop.f32.mrf.mxu3  ;;  %v3635_v24 = vadd.f32 %v3597_v9, %v9534_v30  ;;  %4828 = vmatmul.f32.gmra.mxu1 %v8295_v31  ;;  %v9538_v9 = vld [vmem:[#allocation40_spill] sm:$0xff] }
 0x41a   : > { %v3909_v57 = vadd.f32 %v3871_v49, %v3635_v24 }
 0x41c   : > { %v4071_v1 = vadd.f32 %v4033_v60, %v3909_v57  ;;  %4328 = vmatmul.f32.gmra.mxu2 %v8270_v56  ;;  %v4036_v0 = vpop.f32.mrf.mxu0 }
 0x41d   : > { %5428 = vmatmul.msk.f32.gmra.mxu3 %vm676_vm0, %v9535_v35  ;;  %v4208_v10 = vpop.f32.mrf.mxu1 }
 0x41e   : > { %v8787_v38 = vadd.f32 %v4205_v20, %v4071_v1  ;;  %v9537_v20 = vld [vmem:[#allocation18_spill] sm:$0xff] }
 0x41f   : > { %v3600_v17 = vpop.f32.mrf.mxu2  ;;  %4662 = vmatmul.f32.gmra.mxu0 %v8279_v50 }
 0x420   : > { %v3874_v59 = vpop.f32.mrf.mxu3  ;;  %v3636_v11 = vadd.f32 %v3600_v17, %v9536_v8  ;;  %4831 = vmatmul.f32.gmra.mxu1 %v8325_v55 }
 0x422   : > { %v3910_v27 = vadd.f32 %v3874_v59, %v3636_v11 }
 0x424   : > { %v4072_v32 = vadd.f32 %v4036_v0, %v3910_v27  ;;  %4331 = vmatmul.f32.gmra.mxu2 %v8295_v31  ;;  %v4039_v56 = vpop.f32.mrf.mxu0  ;;  %v9539_v31 = vld [vmem:[#allocation75_spill] sm:$0xff] }
 0x425   : > { %4493 = vmatmul.f32.gmra.mxu3 %v7617_v62  ;;  %v4211_v54 = vpop.f32.mrf.mxu1 }
 0x426   : > { %v8794_v43 = vadd.f32 %v4208_v10, %v4072_v32  ;;  %v9541_v10 = vld [vmem:[#allocation50_spill] sm:$0xff] }
 0x427   : > { %v3603_v3 = vpop.f32.mrf.mxu2  ;;  %4665 = vmatmul.f32.gmra.mxu0 %v8302_v12  ;;  %v9540_v12 = vld [vmem:[#allocation41_spill] sm:$0xff] }
 0x428   : > { %v3877_v60 = vpop.f32.mrf.mxu3  ;;  %v3637_v50 = vadd.f32 %v3603_v3, %v9537_v20  ;;  %4834 = vmatmul.f32.gmra.mxu1 %v9538_v9  ;;  %v9544_v20 = vld [vmem:[#allocation49_spill] sm:$0xff] }
 0x42a   : > { %v3911_v49 = vadd.f32 %v3877_v60, %v3637_v50 }
 0x42c   : > { %v4073_v30 = vadd.f32 %v4039_v56, %v3911_v49  ;;  %4334 = vmatmul.f32.gmra.mxu2 %v8325_v55  ;;  %v4621_v62 = vpop.f32.mrf.mxu0  ;;  %v9542_v55 = vld [vmem:[#allocation43_spill] sm:$0xff] }
 0x42d   : > { %5429 = vmatmul.msk.f32.gmra.mxu3 %vm676_vm0, %v9539_v31  ;;  %v4790_v24 = vpop.f32.mrf.mxu1  ;;  %v9543_v56 = vld [vmem:[#allocation19_spill] sm:$0xff] }
 0x42e   : > { %v8803_v57 = vadd.f32 %v4211_v54, %v4073_v30 }
 0x42f   : > { %v4287_v1 = vpop.f32.mrf.mxu2  ;;  %4668 = vmatmul.f32.gmra.mxu0 %v8334_v18 }
 0x430   : > { %v4449_v35 = vpop.f32.mrf.mxu3  ;;  %v4383_v0 = vadd.f32 %v4287_v1, %v9540_v12  ;;  %4837 = vmatmul.f32.gmra.mxu1 %v9541_v10 }
 0x432   : > { %v4545_v17 = vadd.f32 %v4449_v35, %v4383_v0  ;;  %v9546_v35 = vld [vmem:[#allocation76_spill] sm:$0xff] }
 0x434   : > { %v4717_v59 = vadd.f32 %v4621_v62, %v4545_v17  ;;  %4337 = vmatmul.f32.gmra.mxu2 %v9538_v9  ;;  %v4624_v8 = vpop.f32.mrf.mxu0 }
 0x435   : > { %4499 = vmatmul.f32.gmra.mxu3 %v9542_v55  ;;  %v4793_v11 = vpop.f32.mrf.mxu1 }
 0x436   : > { %v4886_v18 = vadd.f32 %v4790_v24, %v4717_v59 }
 0x437   : > { %v4290_v27 = vpop.f32.mrf.mxu2  ;;  %4671 = vmatmul.f32.gmra.mxu0 %v8362_v61  ;;  %v9545_v61 = vld [vmem:[#allocation24_spill] sm:$0xff] }
 0x438   : > { %v4452_v32 = vpop.f32.mrf.mxu3  ;;  %4918 = vst [vmem:[%s8814_s24] sm:$0xff] %v4886_v18  ;;  %v4384_v54 = vadd.f32 %v4290_v27, %v9543_v56  ;;  %4840 = vmatmul.f32.gmra.mxu1 %v8405_v13 }
 0x43a   : > { %v4546_v3 = vadd.f32 %v4452_v32, %v4384_v54 }
 0x43c   : > { %v4718_v60 = vadd.f32 %v4624_v8, %v4546_v3  ;;  %4340 = vmatmul.f32.gmra.mxu2 %v9541_v10  ;;  %v4627_v50 = vpop.f32.mrf.mxu0 }
 0x43d   : > { %5430 = vmatmul.msk.f32.gmra.mxu3 %vm676_vm0, %v9544_v20  ;;  %v4796_v9 = vpop.f32.mrf.mxu1 }
 0x43e   : > { %v4887_v49 = vadd.f32 %v4793_v11, %v4718_v60  ;;  %v9550_v60 = vld [vmem:[#allocation60_spill] sm:$0xff] }
 0x43f   : > { %v4293_v30 = vpop.f32.mrf.mxu2  ;;  %4674 = vmatmul.f32.gmra.mxu0 %v8389_v33  ;;  %v9547_v33 = vld [vmem:[#allocation57_spill] sm:$0xff] }
 0x440   : > { %v4455_v31 = vpop.f32.mrf.mxu3  ;;  %4919 = vst [vmem:[%s8814_s24 + $0x8] sm:$0xff] %v4887_v49  ;;  %v4385_v62 = vadd.f32 %v4293_v30, %v9545_v61  ;;  %4843 = vmatmul.f32.gmra.mxu1 %v8430_v39 }
 0x442   : > { %v4547_v24 = vadd.f32 %v4455_v31, %v4385_v62 }
 0x444   : > { %v4719_v1 = vadd.f32 %v4627_v50, %v4547_v24  ;;  %4343 = vmatmul.f32.gmra.mxu2 %v8405_v13  ;;  %v4630_v12 = vpop.f32.mrf.mxu0  ;;  %v9548_v13 = vld [vmem:[#allocation46_spill] sm:$0xff] }
 0x445   : > { %4505 = vmatmul.f32.gmra.mxu3 %v9546_v35  ;;  %v4799_v0 = vpop.f32.mrf.mxu1 }
 0x446   : > { %v4888_v10 = vadd.f32 %v4796_v9, %v4719_v1 }
 0x447   : > { %v4296_v17 = vpop.f32.mrf.mxu2  ;;  %4677 = vmatmul.f32.gmra.mxu0 %v8412_v36  ;;  %v9549_v36 = vld [vmem:[#allocation27_spill] sm:$0xff] }
 0x448   : > { %v4458_v59 = vpop.f32.mrf.mxu3  ;;  %4920 = vst [vmem:[%s8814_s24 + $0x10] sm:$0xff] %v4888_v10  ;;  %v4386_v55 = vadd.f32 %v4296_v17, %v9547_v33  ;;  %4846 = vmatmul.f32.gmra.mxu1 %v8455_v37 }
 0x44a   : > { %v4548_v8 = vadd.f32 %v4458_v59, %v4386_v55 }
 0x44c   : > { %v4720_v11 = vadd.f32 %v4630_v12, %v4548_v8  ;;  %4346 = vmatmul.f32.gmra.mxu2 %v8430_v39  ;;  %v4633_v18 = vpop.f32.mrf.mxu0  ;;  %v9551_v39 = vld [vmem:[#allocation79_spill] sm:$0xff]  ;;  %v9555_v8 = vld [vmem:[#allocation53_spill] sm:$0xff] }
 0x44d   : > { %5431 = vmatmul.msk.f32.gmra.mxu3 %vm676_vm0, %v9548_v13  ;;  %v4802_v27 = vpop.f32.mrf.mxu1 }
 0x44e   : > { %v4889_v32 = vadd.f32 %v4799_v0, %v4720_v11 }
 0x44f   : > { %v4299_v56 = vpop.f32.mrf.mxu2  ;;  %4680 = vmatmul.f32.gmra.mxu0 %v8439_v15  ;;  %v9552_v15 = vld [vmem:[#allocation22_spill] sm:$0xff] }
 0x450   : > { %v4461_v54 = vpop.f32.mrf.mxu3  ;;  %4921 = vst [vmem:[%s8814_s24 + $0x18] sm:$0xff] %v4889_v32  ;;  %v4387_v3 = vadd.f32 %v4299_v56, %v9549_v36  ;;  %4849 = vmatmul.f32.gmra.mxu1 %v9550_v60  ;;  %v9556_v56 = vld [vmem:[#allocation59_spill] sm:$0xff]  ;;  %v9558_v36 = vld [vmem:[#allocation32_spill] sm:$0xff] }
 0x452   : > { %v4549_v20 = vadd.f32 %v4461_v54, %v4387_v3 }
 0x454   : > { %v4721_v50 = vadd.f32 %v4633_v18, %v4549_v20  ;;  %4349 = vmatmul.f32.gmra.mxu2 %v8455_v37  ;;  %v4636_v9 = vpop.f32.mrf.mxu0  ;;  %v9553_v37 = vld [vmem:[#allocation77_spill] sm:$0xff] }
 0x455   : > { %4511 = vmatmul.f32.gmra.mxu3 %v9551_v39  ;;  %v4805_v49 = vpop.f32.mrf.mxu1 }
 0x456   : > { %v4890_v30 = vadd.f32 %v4802_v27, %v4721_v50 }
 0x457   : > { %v4302_v31 = vpop.f32.mrf.mxu2  ;;  %4683 = vmatmul.f32.gmra.mxu0 %v8462_v4  ;;  %v9554_v4 = vld [vmem:[#allocation52_spill] sm:$0xff] }
 0x458   : > { %v4464_v61 = vpop.f32.mrf.mxu3  ;;  %4922 = vst [vmem:[%s8814_s24 + $0x20] sm:$0xff] %v4890_v30  ;;  %v4388_v62 = vadd.f32 %v4302_v31, %v9552_v15  ;;  %4852 = vmatmul.f32.gmra.mxu1 %v8505_v22  ;;  %v9560_v30 = vld [vmem:[#allocation65_spill] sm:$0xff] }
 0x45a   : > { %v4550_v24 = vadd.f32 %v4464_v61, %v4388_v62 }
 0x45c   : > { %v4722_v1 = vadd.f32 %v4636_v9, %v4550_v24  ;;  %4352 = vmatmul.f32.gmra.mxu2 %v9550_v60  ;;  %v4639_v35 = vpop.f32.mrf.mxu0 }
 0x45d   : > { %5432 = vmatmul.msk.f32.gmra.mxu3 %vm676_vm0, %v9553_v37  ;;  %v4808_v12 = vpop.f32.mrf.mxu1 }
 0x45e   : > { %v4891_v0 = vadd.f32 %v4805_v49, %v4722_v1 }
 0x45f   : > { %v4305_v10 = vpop.f32.mrf.mxu2  ;;  %4686 = vmatmul.f32.gmra.mxu0 %v8489_v51  ;;  %v9557_v51 = vld [vmem:[#allocation28_spill] sm:$0xff] }
 0x460   : > { %v4467_v17 = vpop.f32.mrf.mxu3  ;;  %4923 = vst [vmem:[%s8814_s24 + $0x28] sm:$0xff] %v4891_v0  ;;  %v4389_v59 = vadd.f32 %v4305_v10, %v9554_v4  ;;  %4855 = vmatmul.f32.gmra.mxu1 %v8530_v7 }
 0x462   : > { %v4551_v33 = vadd.f32 %v4467_v17, %v4389_v59  ;;  %v9563_v17 = vld [vmem:[#allocation78_spill] sm:$0xff] }
 0x464   : > { %v4723_v55 = vadd.f32 %v4639_v35, %v4551_v33  ;;  %4355 = vmatmul.f32.gmra.mxu2 %v8505_v22  ;;  %v4642_v11 = vpop.f32.mrf.mxu0  ;;  %v9559_v22 = vld [vmem:[#allocation58_spill] sm:$0xff] }
 0x465   : > { %4517 = vmatmul.f32.gmra.mxu3 %v9555_v8  ;;  %v4811_v13 = vpop.f32.mrf.mxu1 }
 0x466   : > { %v4892_v18 = vadd.f32 %v4808_v12, %v4723_v55 }
 0x467   : > { %v4308_v27 = vpop.f32.mrf.mxu2  ;;  %4689 = vmatmul.f32.gmra.mxu0 %v9556_v56 }
 0x468   : > { %v4470_v32 = vpop.f32.mrf.mxu3  ;;  %4924 = vst [vmem:[%s8814_s24 + $0x30] sm:$0xff] %v4892_v18  ;;  %v4390_v54 = vadd.f32 %v4308_v27, %v9557_v51  ;;  %4858 = vmatmul.f32.gmra.mxu1 %v9558_v36 }
 0x46a   : > { %v4552_v3 = vadd.f32 %v4470_v32, %v4390_v54 }
 0x46c   : > { %v4724_v60 = vadd.f32 %v4642_v11, %v4552_v3  ;;  %4358 = vmatmul.f32.gmra.mxu2 %v8530_v7  ;;  %v4645_v20 = vpop.f32.mrf.mxu0  ;;  %v9561_v7 = vld [vmem:[#allocation81_spill] sm:$0xff]  ;;  %v4247_v3 = vrot.slane %v8623_v45, 2 }
 0x46d   : > { %5433 = vmatmul.msk.f32.gmra.mxu3 %vm676_vm0, %v9559_v22  ;;  %v4814_v50 = vpop.f32.mrf.mxu1 }
 0x46e   : > { %v4893_v39 = vadd.f32 %v4811_v13, %v4724_v60 }
 0x46f   : > { %v4311_v9 = vpop.f32.mrf.mxu2  ;;  %4692 = vmatmul.f32.gmra.mxu0 %v8539_v19  ;;  %v9562_v19 = vld [vmem:[#allocation34_spill] sm:$0xff] }
 0x470   : > { %v4473_v49 = vpop.f32.mrf.mxu3  ;;  %4925 = vst [vmem:[%s8814_s24 + $0x38] sm:$0xff] %v4893_v39  ;;  %v4391_v31 = vadd.f32 %v4311_v9, %v9560_v30  ;;  %4861 = vmatmul.f32.gmra.mxu1 %v8588_v5 }
 0x472   : > { %v4553_v61 = vadd.f32 %v4473_v49, %v4391_v31  ;;  %v9567_v49 = vld [vmem:[#allocation51_spill] sm:$0xff] }
 0x474   : > { %v4725_v15 = vadd.f32 %v4645_v20, %v4553_v61  ;;  %4361 = vmatmul.f32.gmra.mxu2 %v9558_v36  ;;  %v4648_v62 = vpop.f32.mrf.mxu0  ;;  %v4246_v36 = vrot.slane %v8630_v6, 2  ;;  %v9566_v6 = vld [vmem:[#allocation44_spill] sm:$0xff] }
 0x475   : > { %4523 = vmatmul.f32.gmra.mxu3 %v9561_v7  ;;  %v4817_v24 = vpop.f32.mrf.mxu1 }
 0x476   : > { %v4894_v1 = vadd.f32 %v4814_v50, %v4725_v15  ;;  %v4248_v22 = vsel %vm1596_vm3, %v4246_v36, %v4247_v3 }
 0x477   : > { %v4314_v37 = vpop.f32.mrf.mxu2  ;;  %4695 = vmatmul.f32.gmra.mxu0 %v8569_v63  ;;  %v9564_v63 = vld [vmem:[#allocation37_spill] sm:$0xff] }
 0x478   : > { %v4476_v35 = vpop.f32.mrf.mxu3  ;;  %4926 = vst [vmem:[%s8814_s24 + $0x40] sm:$0xff] %v4894_v1  ;;  %v4392_v12 = vadd.f32 %v4314_v37, %v9562_v19  ;;  %4864 = vmatmul.f32.gmra.mxu1 %v8611_v53 }
 0x47a   : > { %v4554_v0 = vadd.f32 %v4476_v35, %v4392_v12 }
 0x47c   : > { %v4726_v10 = vadd.f32 %v4648_v62, %v4554_v0  ;;  %4364 = vmatmul.f32.gmra.mxu2 %v8588_v5  ;;  %v4651_v4 = vpop.f32.mrf.mxu0  ;;  %v9568_v62 = vld [vmem:[#allocation62_spill] sm:$0xff] }
 0x47d   : > { %5434 = vmatmul.msk.f32.gmra.mxu3 %vm676_vm0, %v9563_v17  ;;  %v4820_v59 = vpop.f32.mrf.mxu1  ;;  %v9571_v17 = vld [vmem:[#allocation6_spill] sm:$0xff] }
 0x47e   : > { %v4895_v33 = vadd.f32 %v4817_v24, %v4726_v10  ;;  %v9569_v24 = vld [vmem:[#allocation47_spill] sm:$0xff] }
 0x47f   : > { %v4317_v55 = vpop.f32.mrf.mxu2  ;;  %4698 = vmatmul.f32.gmra.mxu0 %v8596_v29  ;;  %v9565_v29 = vld [vmem:[#allocation38_spill] sm:$0xff] }
 0x480   : > { %v4479_v8 = vpop.f32.mrf.mxu3  ;;  %4927 = vst [vmem:[%s8814_s24 + $0x48] sm:$0xff] %v4895_v33  ;;  %v4393_v11 = vadd.f32 %v4317_v55, %v9564_v63  ;;  %4867 = vmatmul.f32.gmra.mxu1 %v8637_v58  ;;  %v9573_v33 = vld [vmem:[#allocation70_spill] sm:$0xff] }
 0x482   : > { %v4555_v13 = vadd.f32 %v4479_v8, %v4393_v11 }
 0x484   : > { %v4727_v18 = vadd.f32 %v4651_v4, %v4555_v13  ;;  %4367 = vmatmul.f32.gmra.mxu2 %v8611_v53  ;;  %v4654_v5 = vpop.f32.mrf.mxu0  ;;  %v9572_v4 = vld [vmem:[#allocation68_spill] sm:$0xff] }
 0x485   : > { %4529 = vmatmul.f32.gmra.mxu3 %v7866_v44  ;;  %v4823_v27 = vpop.f32.mrf.mxu1 }
 0x486   : > { %v4896_v32 = vadd.f32 %v4820_v59, %v4727_v18 }
 0x487   : > { %v4320_v56 = vpop.f32.mrf.mxu2  ;;  %4701 = vmatmul.f32.gmra.mxu0 %v8621_v48 }
 0x488   : > { %v4482_v51 = vpop.f32.mrf.mxu3  ;;  %4928 = vst [vmem:[%s8814_s24 + $0x50] sm:$0xff] %v4896_v32  ;;  %v4394_v54 = vadd.f32 %v4320_v56, %v9565_v29  ;;  %4870 = vmatmul.f32.gmra.mxu1 %v8658_v14 }
 0x48a   : > { %v4556_v53 = vadd.f32 %v4482_v51, %v4394_v54 }
 0x48c   : > { %v4728_v60 = vadd.f32 %v4654_v5, %v4556_v53  ;;  %4370 = vmatmul.f32.gmra.mxu2 %v8637_v58  ;;  %v4657_v44 = vpop.f32.mrf.mxu0  ;;  %v4249_v58 = vrot.slane %v9567_v49, 2  ;;  %v9576_v49 = vld [vmem:[#allocation29_spill] sm:$0xff] }
 0x48d   : > { %5435 = vmatmul.msk.f32.gmra.mxu3 %vm676_vm0, %v8614_v42  ;;  %v4826_v48 = vpop.f32.mrf.mxu1 }
 0x48e   : > { %v4897_v20 = vadd.f32 %v4823_v27, %v4728_v60  ;;  %v4250_v61 = vsel %vm1596_vm3, %v4247_v3, %v4249_v58  ;;  %v9574_v27 = vld [vmem:[#allocation17_spill] sm:$0xff]  ;;  %v9575_v60 = vld [vmem:[#allocation71_spill] sm:$0xff] }
 0x48f   : > { %v4323_v50 = vpop.f32.mrf.mxu2  ;;  %4704 = vmatmul.f32.gmra.mxu0 %v8644_v26 }
 0x490   : > { %v4485_v39 = vpop.f32.mrf.mxu3  ;;  %4929 = vst [vmem:[%s8814_s24 + $0x58] sm:$0xff] %v4897_v20  ;;  %v4395_v9 = vadd.f32 %v4323_v50, %v9566_v6  ;;  %4873 = vmatmul.f32.gmra.mxu1 %v4248_v22 }
 0x492   : > { %v4557_v30 = vadd.f32 %v4485_v39, %v4395_v9 }
 0x494   : > { %v4729_v31 = vadd.f32 %v4657_v44, %v4557_v30  ;;  %4373 = vmatmul.f32.gmra.mxu2 %v8658_v14  ;;  %v4660_v25 = vpop.f32.mrf.mxu0  ;;  %v9570_v14 = vmov 0.0  }
 0x495   : > { %4535 = vmatmul.f32.gmra.mxu3 %v8623_v45  ;;  %v4829_v42 = vpop.f32.mrf.mxu1 }
 0x496   : > { %v4898_v15 = vadd.f32 %v4826_v48, %v4729_v31 }
 0x497   : > { %v4326_v7 = vpop.f32.mrf.mxu2  ;;  %4707 = vmatmul.f32.gmra.mxu0 %v9568_v62 }
 0x498   : > { %v4488_v26 = vpop.f32.mrf.mxu3  ;;  %4930 = vst [vmem:[%s8814_s24 + $0x60] sm:$0xff] %v4898_v15  ;;  %v4396_v1 = vadd.f32 %v4326_v7, %v9569_v24  ;;  %4876 = vmatmul.f32.gmra.mxu1 %v4250_v61 }
 0x49a   : > { %v4558_v37 = vadd.f32 %v4488_v26, %v4396_v1 }
 0x49c   : > { %v4730_v35 = vadd.f32 %v4660_v25, %v4558_v37  ;;  %4376 = vmatmul.f32.gmra.mxu2 %v4248_v22  ;;  %v4663_v45 = vpop.f32.mrf.mxu0 }
 0x49d   : > { %4538 = vmatmul.f32.gmra.mxu3 %v9570_v14  ;;  %v4832_v19 = vpop.f32.mrf.mxu1 }
 0x49e   : > { %v4899_v12 = vadd.f32 %v4829_v42, %v4730_v35 }
 0x49f   : > { %v4329_v0 = vpop.f32.mrf.mxu2  ;;  %4710 = vmatmul.f32.gmra.mxu0 %v9571_v17 }
 0x4a0   : > { %v4491_v10 = vpop.f32.mrf.mxu3  ;;  %4931 = vst [vmem:[%s8814_s24 + $0x68] sm:$0xff] %v4899_v12  ;;  %v4397_v59 = vadd.f32 %v4329_v0, %v9572_v4  ;;  %4879 = vmatmul.f32.gmra.mxu1 %v9573_v33 }
 0x4a2   : > { %v4559_v55 = vadd.f32 %v4491_v10, %v4397_v59 }
 0x4a4   : > { %v4731_v8 = vadd.f32 %v4663_v45, %v4559_v55  ;;  %4379 = vmatmul.f32.gmra.mxu2 %v4250_v61  ;;  %v4666_v63 = vpop.f32.mrf.mxu0 }
 0x4a5   : > { %4541 = vmatmul.f32.gmra.mxu3 %v9570_v14  ;;  %v4835_v11 = vpop.f32.mrf.mxu1 }
 0x4a6   : > { %v4900_v13 = vadd.f32 %v4832_v19, %v4731_v8 }
 0x4a7   : > { %v4332_v18 = vpop.f32.mrf.mxu2  ;;  %4713 = vmatmul.f32.gmra.mxu0 %v9571_v17 }
 0x4a8   : > { %v4494_v5 = vpop.f32.mrf.mxu3  ;;  %4932 = vst [vmem:[%s8814_s24 + $0x70] sm:$0xff] %v4900_v13  ;;  %v4398_v32 = vadd.f32 %v4332_v18, %v9574_v27  ;;  %4882 = vmatmul.f32.gmra.mxu1 %v9573_v33 }
 0x4aa   : > { %v4560_v56 = vadd.f32 %v4494_v5, %v4398_v32 }
 0x4ac   : > { %v4732_v51 = vadd.f32 %v4666_v63, %v4560_v56  ;;  %v4669_v29 = vpop.f32.mrf.mxu0 }
 0x4ad   : > { %v4838_v54 = vpop.f32.mrf.mxu1 }
 0x4ae   : > { %v4901_v36 = vadd.f32 %v4835_v11, %v4732_v51 }
 0x4af   : > { %v4335_v3 = vpop.f32.mrf.mxu2 }
 0x4b0   : > { %v4497_v53 = vpop.f32.mrf.mxu3  ;;  %4933 = vst [vmem:[%s8814_s24 + $0x78] sm:$0xff] %v4901_v36  ;;  %v4399_v44 = vadd.f32 %v4335_v3, %v9575_v60 }
 0x4b2   : > { %v4561_v48 = vadd.f32 %v4497_v53, %v4399_v44 }
 0x4b4   : > { %v4733_v22 = vadd.f32 %v4669_v29, %v4561_v48  ;;  %v4672_v20 = vpop.f32.mrf.mxu0 }
 0x4b5   : > { %v4841_v50 = vpop.f32.mrf.mxu1 }
 0x4b6   : > { %v4902_v39 = vadd.f32 %v4838_v54, %v4733_v22 }
 0x4b7   : > { %v4338_v6 = vpop.f32.mrf.mxu2 }
 0x4b8   : > { %v4500_v9 = vpop.f32.mrf.mxu3  ;;  %4934 = vst [vmem:[%s8814_s24 + $0x80] sm:$0xff] %v4902_v39  ;;  %v4400_v58 = vadd.f32 %v4338_v6, %v9576_v49 }
 0x4ba   : > { %v4562_v30 = vadd.f32 %v4500_v9, %v4400_v58 }
 0x4bc   : > { %v4734_v31 = vadd.f32 %v4672_v20, %v4562_v30  ;;  %v4675_v25 = vpop.f32.mrf.mxu0 }
 0x4bd   : > { %v4844_v42 = vpop.f32.mrf.mxu1 }
 0x4be   : > { %v4903_v61 = vadd.f32 %v4841_v50, %v4734_v31 }
 0x4bf   : > { %v4341_v15 = vpop.f32.mrf.mxu2 }
 0x4c0   : > { %v4503_v7 = vpop.f32.mrf.mxu3  ;;  %4935 = vst [vmem:[%s8814_s24 + $0x88] sm:$0xff] %v4903_v61  ;;  %v4401_v26 = vadd.f32 %v4341_v15, %v8698_v40 }
 0x4c2   : > { %v4563_v62 = vadd.f32 %v4503_v7, %v4401_v26 }
 0x4c4   : > { %v4735_v24 = vadd.f32 %v4675_v25, %v4563_v62  ;;  %v4678_v1 = vpop.f32.mrf.mxu0 }
 0x4c5   : > { %v4847_v37 = vpop.f32.mrf.mxu1 }
 0x4c6   : > { %v4904_v35 = vadd.f32 %v4844_v42, %v4735_v24 }
 0x4c7   : > { %v4344_v14 = vpop.f32.mrf.mxu2 }
 0x4c8   : > { %v4506_v45 = vpop.f32.mrf.mxu3  ;;  %4936 = vst [vmem:[%s8814_s24 + $0x90] sm:$0xff] %v4904_v35  ;;  %v4402_v19 = vadd.f32 %v4344_v14, %v8707_v41 }
 0x4ca   : > { %v4564_v12 = vadd.f32 %v4506_v45, %v4402_v19 }
 0x4cc   : > { %v4736_v0 = vadd.f32 %v4678_v1, %v4564_v12  ;;  %v4681_v10 = vpop.f32.mrf.mxu0 }
 0x4cd   : > { %v4850_v17 = vpop.f32.mrf.mxu1 }
 0x4ce   : > { %v4905_v4 = vadd.f32 %v4847_v37, %v4736_v0 }
 0x4cf   : > { %v4347_v59 = vpop.f32.mrf.mxu2 }
 0x4d0   : > { %v4509_v33 = vpop.f32.mrf.mxu3  ;;  %4937 = vst [vmem:[%s8814_s24 + $0x98] sm:$0xff] %v4905_v4  ;;  %v4403_v40 = vadd.f32 %v4347_v59, %v8714_v52 }
 0x4d2   : > { %v4565_v55 = vadd.f32 %v4509_v33, %v4403_v40 }
 0x4d4   : > { %v4737_v8 = vadd.f32 %v4681_v10, %v4565_v55  ;;  %v4684_v63 = vpop.f32.mrf.mxu0 }
 0x4d5   : > { %v4853_v11 = vpop.f32.mrf.mxu1 }
 0x4d6   : > { %v4906_v13 = vadd.f32 %v4850_v17, %v4737_v8 }
 0x4d7   : > { %v4350_v18 = vpop.f32.mrf.mxu2 }
 0x4d8   : > { %v4512_v5 = vpop.f32.mrf.mxu3  ;;  %4938 = vst [vmem:[%s8814_s24 + $0xa0] sm:$0xff] %v4906_v13  ;;  %v4404_v41 = vadd.f32 %v4350_v18, %v8723_v28 }
 0x4da   : > { %v4566_v27 = vadd.f32 %v4512_v5, %v4404_v41 }
 0x4dc   : > { %v4738_v32 = vadd.f32 %v4684_v63, %v4566_v27  ;;  %v4687_v56 = vpop.f32.mrf.mxu0 }
 0x4dd   : > { %v4856_v51 = vpop.f32.mrf.mxu1 }
 0x4de   : > { %v4907_v29 = vadd.f32 %v4853_v11, %v4738_v32 }
 0x4df   : > { %v4353_v54 = vpop.f32.mrf.mxu2 }
 0x4e0   : > { %v4515_v36 = vpop.f32.mrf.mxu3  ;;  %4939 = vst [vmem:[%s8814_s24 + $0xa8] sm:$0xff] %v4907_v29  ;;  %v4405_v52 = vadd.f32 %v4353_v54, %v8730_v46 }
 0x4e2   : > { %v4567_v3 = vadd.f32 %v4515_v36, %v4405_v52 }
 0x4e4   : > { %v4739_v53 = vadd.f32 %v4687_v56, %v4567_v3  ;;  %v4690_v60 = vpop.f32.mrf.mxu0 }
 0x4e5   : > { %v4859_v44 = vpop.f32.mrf.mxu1 }
 0x4e6   : > { %v4908_v48 = vadd.f32 %v4856_v51, %v4739_v53 }
 0x4e7   : > { %v4356_v22 = vpop.f32.mrf.mxu2 }
 0x4e8   : > { %v4518_v20 = vpop.f32.mrf.mxu3  ;;  %4940 = vst [vmem:[%s8814_s24 + $0xb0] sm:$0xff] %v4908_v48  ;;  %v4406_v28 = vadd.f32 %v4356_v22, %v8739_v23 }
 0x4ea   : > { %v4568_v50 = vadd.f32 %v4518_v20, %v4406_v28 }
 0x4ec   : > { %v4740_v39 = vadd.f32 %v4690_v60, %v4568_v50  ;;  %v4693_v6 = vpop.f32.mrf.mxu0 }
 0x4ed   : > { %v4862_v9 = vpop.f32.mrf.mxu1 }
 0x4ee   : > { %v4909_v49 = vadd.f32 %v4859_v44, %v4740_v39 }
 0x4ef   : > { %v4359_v58 = vpop.f32.mrf.mxu2 }
 0x4f0   : > { %v4521_v30 = vpop.f32.mrf.mxu3  ;;  %4941 = vst [vmem:[%s8814_s24 + $0xb8] sm:$0xff] %v4909_v49  ;;  %v4407_v46 = vadd.f32 %v4359_v58, %v8746_v2 }
 0x4f2   : > { %v4569_v31 = vadd.f32 %v4521_v30, %v4407_v46 }
 0x4f4   : > { %v4741_v25 = vadd.f32 %v4693_v6, %v4569_v31  ;;  %v4696_v42 = vpop.f32.mrf.mxu0 }
 0x4f5   : > { %v4865_v61 = vpop.f32.mrf.mxu1 }
 0x4f6   : > { %v4910_v15 = vadd.f32 %v4862_v9, %v4741_v25 }
 0x4f7   : > { %v4362_v7 = vpop.f32.mrf.mxu2 }
 0x4f8   : > { %v4524_v26 = vpop.f32.mrf.mxu3  ;;  %4942 = vst [vmem:[%s8814_s24 + $0xc0] sm:$0xff] %v4910_v15  ;;  %v4408_v23 = vadd.f32 %v4362_v7, %v8755_v34 }
 0x4fa   : > { %v4570_v62 = vadd.f32 %v4524_v26, %v4408_v23 }
 0x4fc   : > { %v4742_v24 = vadd.f32 %v4696_v42, %v4570_v62  ;;  %v4699_v1 = vpop.f32.mrf.mxu0 }
 0x4fd   : > { %v4868_v37 = vpop.f32.mrf.mxu1 }
 0x4fe   : > { %v4911_v35 = vadd.f32 %v4865_v61, %v4742_v24 }
 0x4ff   : > { %v4365_v14 = vpop.f32.mrf.mxu2 }
 0x500   : > { %v4527_v45 = vpop.f32.mrf.mxu3  ;;  %4943 = vst [vmem:[%s8814_s24 + $0xc8] sm:$0xff] %v4911_v35  ;;  %v4409_v2 = vadd.f32 %v4365_v14, %v8762_v47 }
 0x502   : > { %v4571_v19 = vadd.f32 %v4527_v45, %v4409_v2 }
 0x504   : > { %v4743_v12 = vadd.f32 %v4699_v1, %v4571_v19  ;;  %v4702_v0 = vpop.f32.mrf.mxu0 }
 0x505   : > { %v4871_v10 = vpop.f32.mrf.mxu1 }
 0x506   : > { %v4912_v17 = vadd.f32 %v4868_v37, %v4743_v12 }
 0x507   : > { %v4368_v4 = vpop.f32.mrf.mxu2 }
 0x508   : > { %v4530_v59 = vpop.f32.mrf.mxu3  ;;  %4944 = vst [vmem:[%s8814_s24 + $0xd0] sm:$0xff] %v4912_v17  ;;  %v4410_v34 = vadd.f32 %v4368_v4, %v8771_v16 }
 0x50a   : > { %v4572_v33 = vadd.f32 %v4530_v59, %v4410_v34 }
 0x50c   : > { %v4744_v40 = vadd.f32 %v4702_v0, %v4572_v33  ;;  %v4705_v55 = vpop.f32.mrf.mxu0 }
 0x50d   : > { %v4874_v8 = vpop.f32.mrf.mxu1 }
 0x50e   : > { %v4913_v63 = vadd.f32 %v4871_v10, %v4744_v40 }
 0x50f   : > { %v4371_v11 = vpop.f32.mrf.mxu2 }
 0x510   : > { %v4533_v13 = vpop.f32.mrf.mxu3  ;;  %4945 = vst [vmem:[%s8814_s24 + $0xd8] sm:$0xff] %v4913_v63  ;;  %v4411_v47 = vadd.f32 %v4371_v11, %v8778_v21 }
 0x512   : > { %v4573_v18 = vadd.f32 %v4533_v13, %v4411_v47 }
 0x514   : > { %v4745_v5 = vadd.f32 %v4705_v55, %v4573_v18  ;;  %v4708_v41 = vpop.f32.mrf.mxu0 }
 0x515   : > { %v4877_v32 = vpop.f32.mrf.mxu1 }
 0x516   : > { %v4914_v27 = vadd.f32 %v4874_v8, %v4745_v5 }
 0x517   : > { %v4374_v56 = vpop.f32.mrf.mxu2 }
 0x518   : > { %v4536_v51 = vpop.f32.mrf.mxu3  ;;  %4946 = vst [vmem:[%s8814_s24 + $0xe0] sm:$0xff] %v4914_v27  ;;  %v4412_v16 = vadd.f32 %v4374_v56, %v8787_v38 }
 0x51a   : > { %v4574_v29 = vadd.f32 %v4536_v51, %v4412_v16 }
 0x51c   : > { %v4746_v54 = vadd.f32 %v4708_v41, %v4574_v29  ;;  %v4711_v52 = vpop.f32.mrf.mxu0 }
 0x51d   : > { %v4880_v60 = vpop.f32.mrf.mxu1 }
 0x51e   : > { %v4915_v36 = vadd.f32 %v4877_v32, %v4746_v54 }
 0x51f   : > { %v4377_v3 = vpop.f32.mrf.mxu2 }
 0x520   : > { %v4539_v53 = vpop.f32.mrf.mxu3  ;;  %4947 = vst [vmem:[%s8814_s24 + $0xe8] sm:$0xff] %v4915_v36  ;;  %v4413_v21 = vadd.f32 %v4377_v3, %v8794_v43 }
 0x522   : > { %v4575_v44 = vadd.f32 %v4539_v53, %v4413_v21 }
 0x524   : > { %v4747_v48 = vadd.f32 %v4711_v52, %v4575_v44  ;;  %v4714_v38 = vpop.f32.mrf.mxu0 }
 0x525   : > { %v4883_v6 = vpop.f32.mrf.mxu1 }
 0x526   : > { %v4916_v22 = vadd.f32 %v4880_v60, %v4747_v48 }
 0x527   : > { %v4380_v20 = vpop.f32.mrf.mxu2 }
 0x528   : > { %v4542_v28 = vpop.f32.mrf.mxu3  ;;  %4948 = vst [vmem:[%s8814_s24 + $0xf0] sm:$0xff] %v4916_v22  ;;  %v4414_v50 = vadd.f32 %v4380_v20, %v8803_v57 }
 0x52a   : > { %v4576_v39 = vadd.f32 %v4542_v28, %v4414_v50 }
 0x52c   : > { %v4748_v9 = vadd.f32 %v4714_v38, %v4576_v39 }
 0x52e   : > { %v4917_v49 = vadd.f32 %v4883_v6, %v4748_v9 }
 0x530   : > { %4949 = vst [vmem:[%s8814_s24 + $0xf8] sm:$0xff] %v4917_v49 }
 0x531 PF: > { %s20_s15 = sadd.s32 1, %s5569_s15   ;;  %s9577_s13 = smov %s5565_s14 }
 0x532   : > { %p17_p5 = scmp.ge.s32.totalorder %s20_s15, 4   ;;  %s9578_s14 = smov %s9580_s16 }
 0x534   :  { %19 = sbr.rel (!%p17_p5) target bundleno = 2 (0x2), region = 115 }

</bundles_post_ra>
